<compile_context>
chip_gen: v5e
topology: v5e:2x2
jax: 0.10.0
libtpu: 0.0.40
codegen_flags: <defaults>
</compile_context>

<pallas_src>
import functools

import jax
import jax.numpy as jnp
import numpy as np
from jax import lax
from jax.experimental import pallas as pl
from jax.experimental.pallas import tpu as pltpu


def _layernorm(x, gamma, beta, eps=1e-5):
    mean = jnp.mean(x, axis=-1, keepdims=True)
    cen = x - mean
    var = jnp.mean(cen * cen, axis=-1, keepdims=True)
    return cen * lax.rsqrt(var + eps) * gamma + beta


def _bridge_kernel(src_ref, tgt_ref, gamma_ref, beta_ref,
                   wq_ref, bq_ref, wk_ref, bk_ref, wv_ref, bv_ref,
                   wo_ref, bo_ref, o_ref,
                   k_scratch, v_scratch,
                   *, num_heads, head_dim, compute_dtype):
    # src_ref: (1, C, TQ) channel-major query tile of the source.
    # tgt_ref: (1, C, S)  full channel-major target (resident across qi).
    # k_scratch: (nh, hd, S)  K^T per head; v_scratch: (nh, S, hd)  V per head.
    qi = pl.program_id(1)

    # ---- K/V of the normed target: compute ONCE per batch element ----------
    @pl.when(qi == 0)
    def _():
        t = tgt_ref[0].astype(jnp.float32).T                           # (S, C)
        tn = _layernorm(t, gamma_ref[...], beta_ref[...]).astype(compute_dtype)
        kf = (jnp.dot(tn, wk_ref[...], preferred_element_type=jnp.float32)
              + bk_ref[...])                                           # (S, C) f32
        vf = (jnp.dot(tn, wv_ref[...], preferred_element_type=jnp.float32)
              + bv_ref[...])                                           # (S, C) f32
        kT = kf.T                                                      # (C, S): one transpose / batch
        for h in range(num_heads):                                     # static unroll
            lo, hi = h * head_dim, (h + 1) * head_dim
            k_scratch[h] = kT[lo:hi, :].astype(compute_dtype)          # (hd, S) sublane slice
            v_scratch[h] = vf[:, lo:hi].astype(compute_dtype)          # (S, hd)

    # ---- Per query tile -----------------------------------------------------
    s = src_ref[0].astype(jnp.float32).T                               # (TQ, C)
    sn = _layernorm(s, gamma_ref[...], beta_ref[...]).astype(compute_dtype)
    # attention scale is pre-folded into Wq / bq on the host
    q = (jnp.dot(sn, wq_ref[...], preferred_element_type=jnp.float32)
         + bq_ref[...]).astype(compute_dtype)                          # (TQ, C)

    tq = q.shape[0]
    y = jnp.zeros((tq, num_heads * head_dim), jnp.float32)
    for h in range(num_heads):                                         # static unroll
        lo, hi = h * head_dim, (h + 1) * head_dim
        qh = q[:, lo:hi]                                               # (TQ, hd)
        scores = jnp.dot(qh, k_scratch[h],
                         preferred_element_type=jnp.float32)           # (TQ, S) lane-dense
        scores = scores - jnp.max(scores, axis=-1, keepdims=True)
        p = jnp.exp(scores)
        inv = pl.reciprocal(jnp.sum(p, axis=-1, keepdims=True), approx=True)
        p = (p * inv).astype(compute_dtype)
        oh = jnp.dot(p, v_scratch[h],
                     preferred_element_type=jnp.float32)               # (TQ, hd)
        # Fused concat + out_proj: sum_h oh @ Wo[h]  (head-major Wo)
        y = y + jnp.dot(oh.astype(compute_dtype), wo_ref[h],
                        preferred_element_type=jnp.float32)            # (TQ, C)
    y = y + bo_ref[...]
    o_ref[0] = y.T.astype(o_ref.dtype)                                 # (C, TQ) lane-dense store


def _pick_query_tile(S, max_tq=512):
    if S <= max_tq:
        return S
    for tq in (512, 256, 128):      # multiples of 128 (lane-dense stores)
        if tq <= max_tq and S % tq == 0:
            return tq
    return S


def lbm_bridge_attention(src_cs, tgt_cs, params, num_heads,
                         compute_dtype=jnp.bfloat16):
    """Fused bridge attention over channel-major (B, C, S) sequences."""
    B, C, S = src_cs.shape
    assert C % num_heads == 0
    head_dim = C // num_heads
    scale = float(head_dim) ** (-0.5)

    TQ = _pick_query_tile(S)
    assert S % TQ == 0
    grid = (B, S // TQ)

    f32 = jnp.float32
    gamma = params["gamma"].reshape(1, C).astype(f32)
    beta = params["beta"].reshape(1, C).astype(f32)
    # Fold the attention scale into the Q projection (free on the host).
    wq = (params["wq"] * scale).astype(compute_dtype)
    bq = (params["bq"] * scale).reshape(1, C).astype(f32)
    wk = params["wk"].astype(compute_dtype)
    bk = params["bk"].reshape(1, C).astype(f32)
    wv = params["wv"].astype(compute_dtype)
    bv = params["bv"].reshape(1, C).astype(f32)
    # Head-major out-projection weights: (C_in, C_out) -> (nh, hd, C_out).
    wo = params["wo"].reshape(num_heads, head_dim, C).astype(compute_dtype)
    bo = params["bo"].reshape(1, C).astype(f32)

    kernel = functools.partial(_bridge_kernel, num_heads=num_heads,
                               head_dim=head_dim, compute_dtype=compute_dtype)
    rep2 = lambda b, qi: (0, 0)
    rep3 = lambda b, qi: (0, 0, 0)

    # Rough resident-VMEM estimate (double-buffered ins/outs + scratch) with
    # headroom; explicit so v7x's smaller default scoped limit is not a trap.
    cbytes = jnp.dtype(compute_dtype).itemsize
    ibytes = src_cs.dtype.itemsize
    rup = lambda x, m: ((x + m - 1) // m) * m
    vmem_est = (
        2 * C * TQ * ibytes                      # source tile
        + 2 * C * S * ibytes                     # resident target
        + 2 * C * TQ * ibytes                    # output tile
        + 2 * 4 * C * C * cbytes                 # Wq/Wk/Wv/Wo
        + num_heads * rup(head_dim, 16) * rup(S, 128) * cbytes   # K^T scratch
        + num_heads * rup(S, 16) * rup(head_dim, 128) * cbytes   # V scratch
    )
    vmem_limit = int(min(100 << 20, max(32 << 20, 2 * vmem_est)))

    return pl.pallas_call(
        kernel,
        out_shape=jax.ShapeDtypeStruct((B, C, S), src_cs.dtype),
        grid_spec=pltpu.PrefetchScalarGridSpec(
            num_scalar_prefetch=0,
            grid=grid,
            in_specs=[
                pl.BlockSpec((1, C, TQ), lambda b, qi: (b, 0, qi)),   # source tile
                pl.BlockSpec((1, C, S), lambda b, qi: (b, 0, 0)),     # full target
                pl.BlockSpec((1, C), rep2),     # gamma
                pl.BlockSpec((1, C), rep2),     # beta
                pl.BlockSpec((C, C), rep2),     # Wq (scale folded)
                pl.BlockSpec((1, C), rep2),     # bq (scale folded)
                pl.BlockSpec((C, C), rep2),     # Wk
                pl.BlockSpec((1, C), rep2),     # bk
                pl.BlockSpec((C, C), rep2),     # Wv
                pl.BlockSpec((1, C), rep2),     # bv
                pl.BlockSpec((num_heads, head_dim, C), rep3),         # Wo head-major
                pl.BlockSpec((1, C), rep2),     # bo
            ],
            out_specs=pl.BlockSpec((1, C, TQ), lambda b, qi: (b, 0, qi)),
            scratch_shapes=[
                pltpu.VMEM((num_heads, head_dim, S), compute_dtype),  # K^T per head
                pltpu.VMEM((num_heads, S, head_dim), compute_dtype),  # V per head
            ],
        ),
        compiler_params=pltpu.CompilerParams(
            dimension_semantics=("parallel", "arbitrary"),
            vmem_limit_bytes=vmem_limit),
    )(src_cs, tgt_cs, gamma, beta, wq, bq, wk, bk, wv, bv, wo, bo)


class LBMBridgePallas:
    """Pallas equivalent of the PyTorch LBMBridge forward pass."""

    def __init__(self, channels, num_heads, key, compute_dtype=jnp.bfloat16):
        assert channels % num_heads == 0
        self.channels = channels
        self.num_heads = num_heads
        self.head_dim = channels // num_heads
        self.compute_dtype = compute_dtype
        C = channels
        ks = jax.random.split(key, 10)
        init = lambda k, shape: jax.random.normal(k, shape, jnp.float32) * 0.1
        # Linear weights stored as (in, out): kernel computes x @ W + b.
        self.params = dict(
            gamma=1.0 + init(ks[0], (C,)),
            beta=init(ks[1], (C,)),
            wq=init(ks[2], (C, C)), bq=init(ks[3], (C,)),
            wk=init(ks[4], (C, C)), bk=init(ks[5], (C,)),
            wv=init(ks[6], (C, C)), bv=init(ks[7], (C,)),
            wo=init(ks[8], (C, C)), bo=init(ks[9], (C,)),
        )

    def __call__(self, source_nchw, target_nchw, compute_dtype=None):
        B, C, H, W = source_nchw.shape
        S = H * W
        # Channel-major (B, C, S): pure reshapes (no host-side transposes);
        # the kernel does the minor-dim swaps on the XLU.
        src = source_nchw.reshape(B, C, S)
        tgt = target_nchw.reshape(B, C, S)
        cd = self.compute_dtype if compute_dtype is None else compute_dtype
        out = lbm_bridge_attention(src, tgt, self.params, self.num_heads, cd)
        return out.reshape(B, C, H, W)                                # (B, C, S) -> NCHW

    def reference(self, source_nchw, target_nchw):
        """Pure-JAX reference mirroring the PyTorch forward."""
        p = self.params
        B, C, H, W = source_nchw.shape
        S = H * W
        s = jnp.transpose(source_nchw, (0, 2, 3, 1)).reshape(B, S, C)
        t = jnp.transpose(target_nchw, (0, 2, 3, 1)).reshape(B, S, C)

        def ln(x):
            m = x.mean(-1, keepdims=True)
            v = ((x - m) ** 2).mean(-1, keepdims=True)
            return (x - m) / jnp.sqrt(v + 1e-5) * p["gamma"] + p["beta"]

        sn, tn = ln(s), ln(t)
        q = sn @ p["wq"] + p["bq"]
        k = tn @ p["wk"] + p["bk"]
        v = tn @ p["wv"] + p["bv"]
        nh, hd = self.num_heads, self.head_dim
        q = jnp.transpose(q.reshape(B, S, nh, hd), (0, 2, 1, 3))
        k = jnp.transpose(k.reshape(B, S, nh, hd), (0, 2, 1, 3))
        v = jnp.transpose(v.reshape(B, S, nh, hd), (0, 2, 1, 3))
        attn = jnp.einsum("bhqd,bhkd->bhqk", q, k) * (hd ** -0.5)
        attn = jax.nn.softmax(attn, axis=-1)
        out = jnp.einsum("bhqk,bhkd->bhqd", attn, v)
        out = jnp.transpose(out, (0, 2, 1, 3)).reshape(B, S, C)
        out = out @ p["wo"] + p["bo"]
        return jnp.transpose(out.reshape(B, H, W, C), (0, 3, 1, 2))


if __name__ == "__main__":
    key = jax.random.PRNGKey(0)
    k_param, k_src, k_tgt = jax.random.split(key, 3)

    B, C, H, W = 2, 32, 16, 16        # channels=32, num_heads=4 -> head_dim=8
    num_heads = 4

    model = LBMBridgePallas(C, num_heads, k_param)
    source = jax.random.normal(k_src, (B, C, H, W), jnp.float32)
    target = jax.random.normal(k_tgt, (B, C, H, W), jnp.float32)

    ref = jax.block_until_ready(model.reference(source, target))

    # f32 matmul path: tight check against the pure-JAX reference.
    out_f32 = jax.block_until_ready(model(source, target, compute_dtype=jnp.float32))
    assert out_f32.shape == (B, C, H, W)
    np.testing.assert_allclose(np.asarray(out_f32), np.asarray(ref),
                               atol=5e-3, rtol=5e-3)

    # bf16 matmul operands (default; MXU-friendly on v6e/v7x), f32 accumulation.
    out_bf16 = jax.block_until_ready(model(source, target))
    assert out_bf16.shape == (B, C, H, W)
    np.testing.assert_allclose(np.asarray(out_bf16), np.asarray(ref),
                               atol=3e-2, rtol=3e-2)

    print("KERNEL_OK")
</pallas_src>

<mosaic_0001>
module attributes {stable_mosaic.version = 11 : i64} {
  func.func @_bridge_kernel(%arg0: i32, %arg1: i32, %arg2: memref<1x32x256xf32, #tpu.memory_space<vmem>>, %arg3: memref<1x32x256xf32, #tpu.memory_space<vmem>>, %arg4: memref<1x32xf32, #tpu.memory_space<vmem>>, %arg5: memref<1x32xf32, #tpu.memory_space<vmem>>, %arg6: memref<32x32xf32, #tpu.memory_space<vmem>>, %arg7: memref<1x32xf32, #tpu.memory_space<vmem>>, %arg8: memref<32x32xf32, #tpu.memory_space<vmem>>, %arg9: memref<1x32xf32, #tpu.memory_space<vmem>>, %arg10: memref<32x32xf32, #tpu.memory_space<vmem>>, %arg11: memref<1x32xf32, #tpu.memory_space<vmem>>, %arg12: memref<4x8x32xf32, #tpu.memory_space<vmem>>, %arg13: memref<1x32xf32, #tpu.memory_space<vmem>>, %arg14: memref<1x32x256xf32, #tpu.memory_space<vmem>>, %arg15: memref<4x8x256xf32, #tpu.memory_space<vmem>>, %arg16: memref<4x256x8xf32, #tpu.memory_space<vmem>>) attributes {dimension_semantics = [#tpu.dimension_semantics<parallel>, #tpu.dimension_semantics<arbitrary>], iteration_bounds = array<i64: 2, 1>, scalar_prefetch = 0 : i64, scratch_operands = 2 : i64, tpu.core_type = #tpu.core_type<tc>, window_params = [{transform_indices = @transform_0, window_bounds = array<i64: 1, 32, 256>}, {transform_indices = @transform_1, window_bounds = array<i64: 1, 32, 256>}, {pipeline_mode = #tpu.pipeline_mode<synchronous>, transform_indices = @transform_2, window_bounds = array<i64: 1, 32>}, {pipeline_mode = #tpu.pipeline_mode<synchronous>, transform_indices = @transform_3, window_bounds = array<i64: 1, 32>}, {pipeline_mode = #tpu.pipeline_mode<synchronous>, transform_indices = @transform_4, window_bounds = array<i64: 32, 32>}, {pipeline_mode = #tpu.pipeline_mode<synchronous>, transform_indices = @transform_5, window_bounds = array<i64: 1, 32>}, {pipeline_mode = #tpu.pipeline_mode<synchronous>, transform_indices = @transform_6, window_bounds = array<i64: 32, 32>}, {pipeline_mode = #tpu.pipeline_mode<synchronous>, transform_indices = @transform_7, window_bounds = array<i64: 1, 32>}, {pipeline_mode = #tpu.pipeline_mode<synchronous>, transform_indices = @transform_8, window_bounds = array<i64: 32, 32>}, {pipeline_mode = #tpu.pipeline_mode<synchronous>, transform_indices = @transform_9, window_bounds = array<i64: 1, 32>}, {pipeline_mode = #tpu.pipeline_mode<synchronous>, transform_indices = @transform_10, window_bounds = array<i64: 4, 8, 32>}, {pipeline_mode = #tpu.pipeline_mode<synchronous>, transform_indices = @transform_11, window_bounds = array<i64: 1, 32>}, {transform_indices = @transform_12, window_bounds = array<i64: 1, 32, 256>}]} {
    %c0_i32 = arith.constant 0 : i32
    %0 = arith.cmpi eq, %arg1, %c0_i32 : i32
    %1 = arith.extui %0 : i1 to i32
    %c0_i32_0 = arith.constant 0 : i32
    %2 = arith.cmpi ne, %1, %c0_i32_0 : i32
    scf.if %2 {
      %c0_75 = arith.constant 0 : index
      %c0_76 = arith.constant 0 : index
      %c0_77 = arith.constant 0 : index
      %125 = vector.load %arg3[%c0_75, %c0_76, %c0_77] : memref<1x32x256xf32, #tpu.memory_space<vmem>>, vector<1x32x256xf32>
      %126 = vector.shape_cast %125 : vector<1x32x256xf32> to vector<32x256xf32>
      %127 = tpu.transpose %126, [1, 0] : vector<32x256xf32> -> vector<256x32xf32>
      %c0_78 = arith.constant 0 : index
      %c0_79 = arith.constant 0 : index
      %128 = vector.load %arg4[%c0_78, %c0_79] : memref<1x32xf32, #tpu.memory_space<vmem>>, vector<1x32xf32>
      %c0_80 = arith.constant 0 : index
      %c0_81 = arith.constant 0 : index
      %129 = vector.load %arg5[%c0_80, %c0_81] : memref<1x32xf32, #tpu.memory_space<vmem>>, vector<1x32xf32>
      %cst_82 = arith.constant dense<0.000000e+00> : vector<256xf32>
      %130 = vector.multi_reduction <add>, %127, %cst_82 [1] : vector<256x32xf32> to vector<256xf32>
      %131 = vector.shape_cast %130 : vector<256xf32> to vector<256x1xf32>
      %cst_83 = arith.constant 3.200000e+01 : f32
      %132 = vector.broadcast %cst_83 : f32 to vector<256x1xf32>
      %133 = arith.divf %131, %132 : vector<256x1xf32>
      %134 = vector.broadcast %133 : vector<256x1xf32> to vector<256x32xf32>
      %135 = arith.subf %127, %134 : vector<256x32xf32>
      %136 = arith.mulf %135, %135 : vector<256x32xf32>
      %cst_84 = arith.constant dense<0.000000e+00> : vector<256xf32>
      %137 = vector.multi_reduction <add>, %136, %cst_84 [1] : vector<256x32xf32> to vector<256xf32>
      %138 = vector.shape_cast %137 : vector<256xf32> to vector<256x1xf32>
      %cst_85 = arith.constant 3.200000e+01 : f32
      %139 = vector.broadcast %cst_85 : f32 to vector<256x1xf32>
      %140 = arith.divf %138, %139 : vector<256x1xf32>
      %cst_86 = arith.constant 9.99999974E-6 : f32
      %141 = vector.broadcast %cst_86 : f32 to vector<256x1xf32>
      %142 = arith.addf %140, %141 : vector<256x1xf32>
      %143 = math.rsqrt %142 : vector<256x1xf32>
      %144 = vector.broadcast %143 : vector<256x1xf32> to vector<256x32xf32>
      %145 = arith.mulf %135, %144 : vector<256x32xf32>
      %146 = vector.broadcast %128 : vector<1x32xf32> to vector<256x32xf32>
      %147 = arith.mulf %145, %146 : vector<256x32xf32>
      %148 = vector.broadcast %129 : vector<1x32xf32> to vector<256x32xf32>
      %149 = arith.addf %147, %148 : vector<256x32xf32>
      %c0_87 = arith.constant 0 : index
      %c0_88 = arith.constant 0 : index
      %150 = vector.load %arg8[%c0_87, %c0_88] : memref<32x32xf32, #tpu.memory_space<vmem>>, vector<32x32xf32>
      %cst_89 = arith.constant dense<0.000000e+00> : vector<256x32xf32>
      %151 = tpu.matmul %149, %150, %cst_89 {dimension_numbers = #tpu.dot_dimension_numbers<[1], [0], [0], [1], [0, 0, 1, 1], [], []>} : vector<256x32xf32>, vector<32x32xf32>, vector<256x32xf32> -> vector<256x32xf32>
      %c0_90 = arith.constant 0 : index
      %c0_91 = arith.constant 0 : index
      %152 = vector.load %arg9[%c0_90, %c0_91] : memref<1x32xf32, #tpu.memory_space<vmem>>, vector<1x32xf32>
      %153 = vector.broadcast %152 : vector<1x32xf32> to vector<256x32xf32>
      %154 = arith.addf %151, %153 : vector<256x32xf32>
      %c0_92 = arith.constant 0 : index
      %c0_93 = arith.constant 0 : index
      %155 = vector.load %arg10[%c0_92, %c0_93] : memref<32x32xf32, #tpu.memory_space<vmem>>, vector<32x32xf32>
      %cst_94 = arith.constant dense<0.000000e+00> : vector<256x32xf32>
      %156 = tpu.matmul %149, %155, %cst_94 {dimension_numbers = #tpu.dot_dimension_numbers<[1], [0], [0], [1], [0, 0, 1, 1], [], []>} : vector<256x32xf32>, vector<32x32xf32>, vector<256x32xf32> -> vector<256x32xf32>
      %c0_95 = arith.constant 0 : index
      %c0_96 = arith.constant 0 : index
      %157 = vector.load %arg11[%c0_95, %c0_96] : memref<1x32xf32, #tpu.memory_space<vmem>>, vector<1x32xf32>
      %158 = vector.broadcast %157 : vector<1x32xf32> to vector<256x32xf32>
      %159 = arith.addf %156, %158 : vector<256x32xf32>
      %160 = tpu.transpose %154, [1, 0] : vector<256x32xf32> -> vector<32x256xf32>
      %161 = vector.extract_strided_slice %160 {offsets = [0, 0], sizes = [8, 256], strides = [1, 1]} : vector<32x256xf32> to vector<8x256xf32>
      %c0_97 = arith.constant 0 : index
      %c0_98 = arith.constant 0 : index
      %c0_99 = arith.constant 0 : index
      %162 = vector.load %arg15[%c0_97, %c0_98, %c0_99] : memref<4x8x256xf32, #tpu.memory_space<vmem>>, vector<1x8x256xf32>
      %163 = vector.shape_cast %162 : vector<1x8x256xf32> to vector<8x256xf32>
      %164 = vector.shape_cast %161 : vector<8x256xf32> to vector<1x8x256xf32>
      tpu.vector_store %arg15[%c0_97, %c0_98, %c0_99], %164 {strides = array<i32>} : memref<4x8x256xf32, #tpu.memory_space<vmem>>, vector<1x8x256xf32>,
      %165 = vector.extract_strided_slice %159 {offsets = [0, 0], sizes = [256, 8], strides = [1, 1]} : vector<256x32xf32> to vector<256x8xf32>
      %c0_100 = arith.constant 0 : index
      %c0_101 = arith.constant 0 : index
      %c0_102 = arith.constant 0 : index
      %166 = vector.load %arg16[%c0_100, %c0_101, %c0_102] : memref<4x256x8xf32, #tpu.memory_space<vmem>>, vector<1x256x8xf32>
      %167 = vector.shape_cast %166 : vector<1x256x8xf32> to vector<256x8xf32>
      %168 = vector.shape_cast %165 : vector<256x8xf32> to vector<1x256x8xf32>
      tpu.vector_store %arg16[%c0_100, %c0_101, %c0_102], %168 {strides = array<i32>} : memref<4x256x8xf32, #tpu.memory_space<vmem>>, vector<1x256x8xf32>,
      %169 = vector.extract_strided_slice %160 {offsets = [8, 0], sizes = [8, 256], strides = [1, 1]} : vector<32x256xf32> to vector<8x256xf32>
      %c1_103 = arith.constant 1 : index
      %c0_104 = arith.constant 0 : index
      %c0_105 = arith.constant 0 : index
      %170 = vector.load %arg15[%c1_103, %c0_104, %c0_105] : memref<4x8x256xf32, #tpu.memory_space<vmem>>, vector<1x8x256xf32>
      %171 = vector.shape_cast %170 : vector<1x8x256xf32> to vector<8x256xf32>
      %172 = vector.shape_cast %169 : vector<8x256xf32> to vector<1x8x256xf32>
      tpu.vector_store %arg15[%c1_103, %c0_104, %c0_105], %172 {strides = array<i32>} : memref<4x8x256xf32, #tpu.memory_space<vmem>>, vector<1x8x256xf32>,
      %173 = vector.extract_strided_slice %159 {offsets = [0, 8], sizes = [256, 8], strides = [1, 1]} : vector<256x32xf32> to vector<256x8xf32>
      %c1_106 = arith.constant 1 : index
      %c0_107 = arith.constant 0 : index
      %c0_108 = arith.constant 0 : index
      %174 = vector.load %arg16[%c1_106, %c0_107, %c0_108] : memref<4x256x8xf32, #tpu.memory_space<vmem>>, vector<1x256x8xf32>
      %175 = vector.shape_cast %174 : vector<1x256x8xf32> to vector<256x8xf32>
      %176 = vector.shape_cast %173 : vector<256x8xf32> to vector<1x256x8xf32>
      tpu.vector_store %arg16[%c1_106, %c0_107, %c0_108], %176 {strides = array<i32>} : memref<4x256x8xf32, #tpu.memory_space<vmem>>, vector<1x256x8xf32>,
      %177 = vector.extract_strided_slice %160 {offsets = [16, 0], sizes = [8, 256], strides = [1, 1]} : vector<32x256xf32> to vector<8x256xf32>
      %c2_109 = arith.constant 2 : index
      %c0_110 = arith.constant 0 : index
      %c0_111 = arith.constant 0 : index
      %178 = vector.load %arg15[%c2_109, %c0_110, %c0_111] : memref<4x8x256xf32, #tpu.memory_space<vmem>>, vector<1x8x256xf32>
      %179 = vector.shape_cast %178 : vector<1x8x256xf32> to vector<8x256xf32>
      %180 = vector.shape_cast %177 : vector<8x256xf32> to vector<1x8x256xf32>
      tpu.vector_store %arg15[%c2_109, %c0_110, %c0_111], %180 {strides = array<i32>} : memref<4x8x256xf32, #tpu.memory_space<vmem>>, vector<1x8x256xf32>,
      %181 = vector.extract_strided_slice %159 {offsets = [0, 16], sizes = [256, 8], strides = [1, 1]} : vector<256x32xf32> to vector<256x8xf32>
      %c2_112 = arith.constant 2 : index
      %c0_113 = arith.constant 0 : index
      %c0_114 = arith.constant 0 : index
      %182 = vector.load %arg16[%c2_112, %c0_113, %c0_114] : memref<4x256x8xf32, #tpu.memory_space<vmem>>, vector<1x256x8xf32>
      %183 = vector.shape_cast %182 : vector<1x256x8xf32> to vector<256x8xf32>
      %184 = vector.shape_cast %181 : vector<256x8xf32> to vector<1x256x8xf32>
      tpu.vector_store %arg16[%c2_112, %c0_113, %c0_114], %184 {strides = array<i32>} : memref<4x256x8xf32, #tpu.memory_space<vmem>>, vector<1x256x8xf32>,
      %185 = vector.extract_strided_slice %160 {offsets = [24, 0], sizes = [8, 256], strides = [1, 1]} : vector<32x256xf32> to vector<8x256xf32>
      %c3_115 = arith.constant 3 : index
      %c0_116 = arith.constant 0 : index
      %c0_117 = arith.constant 0 : index
      %186 = vector.load %arg15[%c3_115, %c0_116, %c0_117] : memref<4x8x256xf32, #tpu.memory_space<vmem>>, vector<1x8x256xf32>
      %187 = vector.shape_cast %186 : vector<1x8x256xf32> to vector<8x256xf32>
      %188 = vector.shape_cast %185 : vector<8x256xf32> to vector<1x8x256xf32>
      tpu.vector_store %arg15[%c3_115, %c0_116, %c0_117], %188 {strides = array<i32>} : memref<4x8x256xf32, #tpu.memory_space<vmem>>, vector<1x8x256xf32>,
      %189 = vector.extract_strided_slice %159 {offsets = [0, 24], sizes = [256, 8], strides = [1, 1]} : vector<256x32xf32> to vector<256x8xf32>
      %c3_118 = arith.constant 3 : index
      %c0_119 = arith.constant 0 : index
      %c0_120 = arith.constant 0 : index
      %190 = vector.load %arg16[%c3_118, %c0_119, %c0_120] : memref<4x256x8xf32, #tpu.memory_space<vmem>>, vector<1x256x8xf32>
      %191 = vector.shape_cast %190 : vector<1x256x8xf32> to vector<256x8xf32>
      %192 = vector.shape_cast %189 : vector<256x8xf32> to vector<1x256x8xf32>
      tpu.vector_store %arg16[%c3_118, %c0_119, %c0_120], %192 {strides = array<i32>} : memref<4x256x8xf32, #tpu.memory_space<vmem>>, vector<1x256x8xf32>,
    } else {
    }
    %c0 = arith.constant 0 : index
    %c0_1 = arith.constant 0 : index
    %c0_2 = arith.constant 0 : index
    %3 = vector.load %arg2[%c0, %c0_1, %c0_2] : memref<1x32x256xf32, #tpu.memory_space<vmem>>, vector<1x32x256xf32>
    %4 = vector.shape_cast %3 : vector<1x32x256xf32> to vector<32x256xf32>
    %5 = tpu.transpose %4, [1, 0] : vector<32x256xf32> -> vector<256x32xf32>
    %c0_3 = arith.constant 0 : index
    %c0_4 = arith.constant 0 : index
    %6 = vector.load %arg4[%c0_3, %c0_4] : memref<1x32xf32, #tpu.memory_space<vmem>>, vector<1x32xf32>
    %c0_5 = arith.constant 0 : index
    %c0_6 = arith.constant 0 : index
    %7 = vector.load %arg5[%c0_5, %c0_6] : memref<1x32xf32, #tpu.memory_space<vmem>>, vector<1x32xf32>
    %cst = arith.constant dense<0.000000e+00> : vector<256xf32>
    %8 = vector.multi_reduction <add>, %5, %cst [1] : vector<256x32xf32> to vector<256xf32>
    %9 = vector.shape_cast %8 : vector<256xf32> to vector<256x1xf32>
    %cst_7 = arith.constant 3.200000e+01 : f32
    %10 = vector.broadcast %cst_7 : f32 to vector<256x1xf32>
    %11 = arith.divf %9, %10 : vector<256x1xf32>
    %12 = vector.broadcast %11 : vector<256x1xf32> to vector<256x32xf32>
    %13 = arith.subf %5, %12 : vector<256x32xf32>
    %14 = arith.mulf %13, %13 : vector<256x32xf32>
    %cst_8 = arith.constant dense<0.000000e+00> : vector<256xf32>
    %15 = vector.multi_reduction <add>, %14, %cst_8 [1] : vector<256x32xf32> to vector<256xf32>
    %16 = vector.shape_cast %15 : vector<256xf32> to vector<256x1xf32>
    %cst_9 = arith.constant 3.200000e+01 : f32
    %17 = vector.broadcast %cst_9 : f32 to vector<256x1xf32>
    %18 = arith.divf %16, %17 : vector<256x1xf32>
    %cst_10 = arith.constant 9.99999974E-6 : f32
    %19 = vector.broadcast %cst_10 : f32 to vector<256x1xf32>
    %20 = arith.addf %18, %19 : vector<256x1xf32>
    %21 = math.rsqrt %20 : vector<256x1xf32>
    %22 = vector.broadcast %21 : vector<256x1xf32> to vector<256x32xf32>
    %23 = arith.mulf %13, %22 : vector<256x32xf32>
    %24 = vector.broadcast %6 : vector<1x32xf32> to vector<256x32xf32>
    %25 = arith.mulf %23, %24 : vector<256x32xf32>
    %26 = vector.broadcast %7 : vector<1x32xf32> to vector<256x32xf32>
    %27 = arith.addf %25, %26 : vector<256x32xf32>
    %c0_11 = arith.constant 0 : index
    %c0_12 = arith.constant 0 : index
    %28 = vector.load %arg6[%c0_11, %c0_12] : memref<32x32xf32, #tpu.memory_space<vmem>>, vector<32x32xf32>
    %cst_13 = arith.constant dense<0.000000e+00> : vector<256x32xf32>
    %29 = tpu.matmul %27, %28, %cst_13 {dimension_numbers = #tpu.dot_dimension_numbers<[1], [0], [0], [1], [0, 0, 1, 1], [], []>} : vector<256x32xf32>, vector<32x32xf32>, vector<256x32xf32> -> vector<256x32xf32>
    %c0_14 = arith.constant 0 : index
    %c0_15 = arith.constant 0 : index
    %30 = vector.load %arg7[%c0_14, %c0_15] : memref<1x32xf32, #tpu.memory_space<vmem>>, vector<1x32xf32>
    %31 = vector.broadcast %30 : vector<1x32xf32> to vector<256x32xf32>
    %32 = arith.addf %29, %31 : vector<256x32xf32>
    %cst_16 = arith.constant 0.000000e+00 : f32
    %33 = vector.broadcast %cst_16 : f32 to vector<256x32xf32>
    %34 = vector.extract_strided_slice %32 {offsets = [0, 0], sizes = [256, 8], strides = [1, 1]} : vector<256x32xf32> to vector<256x8xf32>
    %c0_17 = arith.constant 0 : index
    %c0_18 = arith.constant 0 : index
    %c0_19 = arith.constant 0 : index
    %35 = vector.load %arg15[%c0_17, %c0_18, %c0_19] : memref<4x8x256xf32, #tpu.memory_space<vmem>>, vector<1x8x256xf32>
    %36 = vector.shape_cast %35 : vector<1x8x256xf32> to vector<8x256xf32>
    %cst_20 = arith.constant dense<0.000000e+00> : vector<256x256xf32>
    %37 = tpu.matmul %34, %36, %cst_20 {dimension_numbers = #tpu.dot_dimension_numbers<[1], [0], [0], [1], [0, 0, 1, 1], [], []>} : vector<256x8xf32>, vector<8x256xf32>, vector<256x256xf32> -> vector<256x256xf32>
    %cst_21 = arith.constant dense<0xFF800000> : vector<256xf32>
    %38 = vector.multi_reduction <maximumf>, %37, %cst_21 [1] : vector<256x256xf32> to vector<256xf32>
    %39 = vector.shape_cast %38 : vector<256xf32> to vector<256x1xf32>
    %40 = vector.broadcast %39 : vector<256x1xf32> to vector<256x256xf32>
    %41 = arith.subf %37, %40 : vector<256x256xf32>
    %42 = math.exp %41 : vector<256x256xf32>
    %cst_22 = arith.constant dense<0.000000e+00> : vector<256xf32>
    %43 = vector.multi_reduction <add>, %42, %cst_22 [1] : vector<256x256xf32> to vector<256xf32>
    %44 = vector.shape_cast %43 : vector<256xf32> to vector<256x1xf32>
    %45 = tpu.reciprocal %44 {approx = true} : vector<256x1xf32> -> vector<256x1xf32>
    %46 = vector.broadcast %45 : vector<256x1xf32> to vector<256x256xf32>
    %47 = arith.mulf %42, %46 : vector<256x256xf32>
    %c0_23 = arith.constant 0 : index
    %c0_24 = arith.constant 0 : index
    %c0_25 = arith.constant 0 : index
    %48 = vector.load %arg16[%c0_23, %c0_24, %c0_25] : memref<4x256x8xf32, #tpu.memory_space<vmem>>, vector<1x256x8xf32>
    %49 = vector.shape_cast %48 : vector<1x256x8xf32> to vector<256x8xf32>
    %cst_26 = arith.constant dense<0.000000e+00> : vector<256x8xf32>
    %50 = tpu.matmul %47, %49, %cst_26 {dimension_numbers = #tpu.dot_dimension_numbers<[1], [0], [0], [1], [0, 0, 1, 1], [], []>} : vector<256x256xf32>, vector<256x8xf32>, vector<256x8xf32> -> vector<256x8xf32>
    %c0_27 = arith.constant 0 : index
    %c0_28 = arith.constant 0 : index
    %c0_29 = arith.constant 0 : index
    %51 = vector.load %arg12[%c0_27, %c0_28, %c0_29] : memref<4x8x32xf32, #tpu.memory_space<vmem>>, vector<1x8x32xf32>
    %52 = vector.shape_cast %51 : vector<1x8x32xf32> to vector<8x32xf32>
    %cst_30 = arith.constant dense<0.000000e+00> : vector<256x32xf32>
    %53 = tpu.matmul %50, %52, %cst_30 {dimension_numbers = #tpu.dot_dimension_numbers<[1], [0], [0], [1], [0, 0, 1, 1], [], []>} : vector<256x8xf32>, vector<8x32xf32>, vector<256x32xf32> -> vector<256x32xf32>
    %54 = arith.addf %33, %53 : vector<256x32xf32>
    %55 = vector.extract_strided_slice %32 {offsets = [0, 8], sizes = [256, 8], strides = [1, 1]} : vector<256x32xf32> to vector<256x8xf32>
    %c1 = arith.constant 1 : index
    %c0_31 = arith.constant 0 : index
    %c0_32 = arith.constant 0 : index
    %56 = vector.load %arg15[%c1, %c0_31, %c0_32] : memref<4x8x256xf32, #tpu.memory_space<vmem>>, vector<1x8x256xf32>
    %57 = vector.shape_cast %56 : vector<1x8x256xf32> to vector<8x256xf32>
    %cst_33 = arith.constant dense<0.000000e+00> : vector<256x256xf32>
    %58 = tpu.matmul %55, %57, %cst_33 {dimension_numbers = #tpu.dot_dimension_numbers<[1], [0], [0], [1], [0, 0, 1, 1], [], []>} : vector<256x8xf32>, vector<8x256xf32>, vector<256x256xf32> -> vector<256x256xf32>
    %cst_34 = arith.constant dense<0xFF800000> : vector<256xf32>
    %59 = vector.multi_reduction <maximumf>, %58, %cst_34 [1] : vector<256x256xf32> to vector<256xf32>
    %60 = vector.shape_cast %59 : vector<256xf32> to vector<256x1xf32>
    %61 = vector.broadcast %60 : vector<256x1xf32> to vector<256x256xf32>
    %62 = arith.subf %58, %61 : vector<256x256xf32>
    %63 = math.exp %62 : vector<256x256xf32>
    %cst_35 = arith.constant dense<0.000000e+00> : vector<256xf32>
    %64 = vector.multi_reduction <add>, %63, %cst_35 [1] : vector<256x256xf32> to vector<256xf32>
    %65 = vector.shape_cast %64 : vector<256xf32> to vector<256x1xf32>
    %66 = tpu.reciprocal %65 {approx = true} : vector<256x1xf32> -> vector<256x1xf32>
    %67 = vector.broadcast %66 : vector<256x1xf32> to vector<256x256xf32>
    %68 = arith.mulf %63, %67 : vector<256x256xf32>
    %c1_36 = arith.constant 1 : index
    %c0_37 = arith.constant 0 : index
    %c0_38 = arith.constant 0 : index
    %69 = vector.load %arg16[%c1_36, %c0_37, %c0_38] : memref<4x256x8xf32, #tpu.memory_space<vmem>>, vector<1x256x8xf32>
    %70 = vector.shape_cast %69 : vector<1x256x8xf32> to vector<256x8xf32>
    %cst_39 = arith.constant dense<0.000000e+00> : vector<256x8xf32>
    %71 = tpu.matmul %68, %70, %cst_39 {dimension_numbers = #tpu.dot_dimension_numbers<[1], [0], [0], [1], [0, 0, 1, 1], [], []>} : vector<256x256xf32>, vector<256x8xf32>, vector<256x8xf32> -> vector<256x8xf32>
    %c1_40 = arith.constant 1 : index
    %c0_41 = arith.constant 0 : index
    %c0_42 = arith.constant 0 : index
    %72 = vector.load %arg12[%c1_40, %c0_41, %c0_42] : memref<4x8x32xf32, #tpu.memory_space<vmem>>, vector<1x8x32xf32>
    %73 = vector.shape_cast %72 : vector<1x8x32xf32> to vector<8x32xf32>
    %cst_43 = arith.constant dense<0.000000e+00> : vector<256x32xf32>
    %74 = tpu.matmul %71, %73, %cst_43 {dimension_numbers = #tpu.dot_dimension_numbers<[1], [0], [0], [1], [0, 0, 1, 1], [], []>} : vector<256x8xf32>, vector<8x32xf32>, vector<256x32xf32> -> vector<256x32xf32>
    %75 = arith.addf %54, %74 : vector<256x32xf32>
    %76 = vector.extract_strided_slice %32 {offsets = [0, 16], sizes = [256, 8], strides = [1, 1]} : vector<256x32xf32> to vector<256x8xf32>
    %c2 = arith.constant 2 : index
    %c0_44 = arith.constant 0 : index
    %c0_45 = arith.constant 0 : index
    %77 = vector.load %arg15[%c2, %c0_44, %c0_45] : memref<4x8x256xf32, #tpu.memory_space<vmem>>, vector<1x8x256xf32>
    %78 = vector.shape_cast %77 : vector<1x8x256xf32> to vector<8x256xf32>
    %cst_46 = arith.constant dense<0.000000e+00> : vector<256x256xf32>
    %79 = tpu.matmul %76, %78, %cst_46 {dimension_numbers = #tpu.dot_dimension_numbers<[1], [0], [0], [1], [0, 0, 1, 1], [], []>} : vector<256x8xf32>, vector<8x256xf32>, vector<256x256xf32> -> vector<256x256xf32>
    %cst_47 = arith.constant dense<0xFF800000> : vector<256xf32>
    %80 = vector.multi_reduction <maximumf>, %79, %cst_47 [1] : vector<256x256xf32> to vector<256xf32>
    %81 = vector.shape_cast %80 : vector<256xf32> to vector<256x1xf32>
    %82 = vector.broadcast %81 : vector<256x1xf32> to vector<256x256xf32>
    %83 = arith.subf %79, %82 : vector<256x256xf32>
    %84 = math.exp %83 : vector<256x256xf32>
    %cst_48 = arith.constant dense<0.000000e+00> : vector<256xf32>
    %85 = vector.multi_reduction <add>, %84, %cst_48 [1] : vector<256x256xf32> to vector<256xf32>
    %86 = vector.shape_cast %85 : vector<256xf32> to vector<256x1xf32>
    %87 = tpu.reciprocal %86 {approx = true} : vector<256x1xf32> -> vector<256x1xf32>
    %88 = vector.broadcast %87 : vector<256x1xf32> to vector<256x256xf32>
    %89 = arith.mulf %84, %88 : vector<256x256xf32>
    %c2_49 = arith.constant 2 : index
    %c0_50 = arith.constant 0 : index
    %c0_51 = arith.constant 0 : index
    %90 = vector.load %arg16[%c2_49, %c0_50, %c0_51] : memref<4x256x8xf32, #tpu.memory_space<vmem>>, vector<1x256x8xf32>
    %91 = vector.shape_cast %90 : vector<1x256x8xf32> to vector<256x8xf32>
    %cst_52 = arith.constant dense<0.000000e+00> : vector<256x8xf32>
    %92 = tpu.matmul %89, %91, %cst_52 {dimension_numbers = #tpu.dot_dimension_numbers<[1], [0], [0], [1], [0, 0, 1, 1], [], []>} : vector<256x256xf32>, vector<256x8xf32>, vector<256x8xf32> -> vector<256x8xf32>
    %c2_53 = arith.constant 2 : index
    %c0_54 = arith.constant 0 : index
    %c0_55 = arith.constant 0 : index
    %93 = vector.load %arg12[%c2_53, %c0_54, %c0_55] : memref<4x8x32xf32, #tpu.memory_space<vmem>>, vector<1x8x32xf32>
    %94 = vector.shape_cast %93 : vector<1x8x32xf32> to vector<8x32xf32>
    %cst_56 = arith.constant dense<0.000000e+00> : vector<256x32xf32>
    %95 = tpu.matmul %92, %94, %cst_56 {dimension_numbers = #tpu.dot_dimension_numbers<[1], [0], [0], [1], [0, 0, 1, 1], [], []>} : vector<256x8xf32>, vector<8x32xf32>, vector<256x32xf32> -> vector<256x32xf32>
    %96 = arith.addf %75, %95 : vector<256x32xf32>
    %97 = vector.extract_strided_slice %32 {offsets = [0, 24], sizes = [256, 8], strides = [1, 1]} : vector<256x32xf32> to vector<256x8xf32>
    %c3 = arith.constant 3 : index
    %c0_57 = arith.constant 0 : index
    %c0_58 = arith.constant 0 : index
    %98 = vector.load %arg15[%c3, %c0_57, %c0_58] : memref<4x8x256xf32, #tpu.memory_space<vmem>>, vector<1x8x256xf32>
    %99 = vector.shape_cast %98 : vector<1x8x256xf32> to vector<8x256xf32>
    %cst_59 = arith.constant dense<0.000000e+00> : vector<256x256xf32>
    %100 = tpu.matmul %97, %99, %cst_59 {dimension_numbers = #tpu.dot_dimension_numbers<[1], [0], [0], [1], [0, 0, 1, 1], [], []>} : vector<256x8xf32>, vector<8x256xf32>, vector<256x256xf32> -> vector<256x256xf32>
    %cst_60 = arith.constant dense<0xFF800000> : vector<256xf32>
    %101 = vector.multi_reduction <maximumf>, %100, %cst_60 [1] : vector<256x256xf32> to vector<256xf32>
    %102 = vector.shape_cast %101 : vector<256xf32> to vector<256x1xf32>
    %103 = vector.broadcast %102 : vector<256x1xf32> to vector<256x256xf32>
    %104 = arith.subf %100, %103 : vector<256x256xf32>
    %105 = math.exp %104 : vector<256x256xf32>
    %cst_61 = arith.constant dense<0.000000e+00> : vector<256xf32>
    %106 = vector.multi_reduction <add>, %105, %cst_61 [1] : vector<256x256xf32> to vector<256xf32>
    %107 = vector.shape_cast %106 : vector<256xf32> to vector<256x1xf32>
    %108 = tpu.reciprocal %107 {approx = true} : vector<256x1xf32> -> vector<256x1xf32>
    %109 = vector.broadcast %108 : vector<256x1xf32> to vector<256x256xf32>
    %110 = arith.mulf %105, %109 : vector<256x256xf32>
    %c3_62 = arith.constant 3 : index
    %c0_63 = arith.constant 0 : index
    %c0_64 = arith.constant 0 : index
    %111 = vector.load %arg16[%c3_62, %c0_63, %c0_64] : memref<4x256x8xf32, #tpu.memory_space<vmem>>, vector<1x256x8xf32>
    %112 = vector.shape_cast %111 : vector<1x256x8xf32> to vector<256x8xf32>
    %cst_65 = arith.constant dense<0.000000e+00> : vector<256x8xf32>
    %113 = tpu.matmul %110, %112, %cst_65 {dimension_numbers = #tpu.dot_dimension_numbers<[1], [0], [0], [1], [0, 0, 1, 1], [], []>} : vector<256x256xf32>, vector<256x8xf32>, vector<256x8xf32> -> vector<256x8xf32>
    %c3_66 = arith.constant 3 : index
    %c0_67 = arith.constant 0 : index
    %c0_68 = arith.constant 0 : index
    %114 = vector.load %arg12[%c3_66, %c0_67, %c0_68] : memref<4x8x32xf32, #tpu.memory_space<vmem>>, vector<1x8x32xf32>
    %115 = vector.shape_cast %114 : vector<1x8x32xf32> to vector<8x32xf32>
    %cst_69 = arith.constant dense<0.000000e+00> : vector<256x32xf32>
    %116 = tpu.matmul %113, %115, %cst_69 {dimension_numbers = #tpu.dot_dimension_numbers<[1], [0], [0], [1], [0, 0, 1, 1], [], []>} : vector<256x8xf32>, vector<8x32xf32>, vector<256x32xf32> -> vector<256x32xf32>
    %117 = arith.addf %96, %116 : vector<256x32xf32>
    %c0_70 = arith.constant 0 : index
    %c0_71 = arith.constant 0 : index
    %118 = vector.load %arg13[%c0_70, %c0_71] : memref<1x32xf32, #tpu.memory_space<vmem>>, vector<1x32xf32>
    %119 = vector.broadcast %118 : vector<1x32xf32> to vector<256x32xf32>
    %120 = arith.addf %117, %119 : vector<256x32xf32>
    %121 = tpu.transpose %120, [1, 0] : vector<256x32xf32> -> vector<32x256xf32>
    %c0_72 = arith.constant 0 : index
    %c0_73 = arith.constant 0 : index
    %c0_74 = arith.constant 0 : index
    %122 = vector.load %arg14[%c0_72, %c0_73, %c0_74] : memref<1x32x256xf32, #tpu.memory_space<vmem>>, vector<1x32x256xf32>
    %123 = vector.shape_cast %122 : vector<1x32x256xf32> to vector<32x256xf32>
    %124 = vector.shape_cast %121 : vector<32x256xf32> to vector<1x32x256xf32>
    tpu.vector_store %arg14[%c0_72, %c0_73, %c0_74], %124 {strides = array<i32>} : memref<1x32x256xf32, #tpu.memory_space<vmem>>, vector<1x32x256xf32>,
    return
  }
  func.func @transform_0(%arg0: i32, %arg1: i32) -> (i32, i32, i32) {
    %c0_i32 = arith.constant 0 : i32
    %c0_i32_0 = arith.constant 0 : i32
    return %arg0, %c0_i32, %arg1 : i32, i32, i32
  }
  func.func @transform_1(%arg0: i32, %arg1: i32) -> (i32, i32, i32) {
    %c0_i32 = arith.constant 0 : i32
    %c0_i32_0 = arith.constant 0 : i32
    %c0_i32_1 = arith.constant 0 : i32
    return %arg0, %c0_i32, %c0_i32_0 : i32, i32, i32
  }
  func.func @transform_2(%arg0: i32, %arg1: i32) -> (i32, i32) {
    %c0_i32 = arith.constant 0 : i32
    %c0_i32_0 = arith.constant 0 : i32
    %c0_i32_1 = arith.constant 0 : i32
    return %c0_i32, %c0_i32_0 : i32, i32
  }
  func.func @transform_3(%arg0: i32, %arg1: i32) -> (i32, i32) {
    %c0_i32 = arith.constant 0 : i32
    %c0_i32_0 = arith.constant 0 : i32
    %c0_i32_1 = arith.constant 0 : i32
    return %c0_i32, %c0_i32_0 : i32, i32
  }
  func.func @transform_4(%arg0: i32, %arg1: i32) -> (i32, i32) {
    %c0_i32 = arith.constant 0 : i32
    %c0_i32_0 = arith.constant 0 : i32
    %c0_i32_1 = arith.constant 0 : i32
    return %c0_i32, %c0_i32_0 : i32, i32
  }
  func.func @transform_5(%arg0: i32, %arg1: i32) -> (i32, i32) {
    %c0_i32 = arith.constant 0 : i32
    %c0_i32_0 = arith.constant 0 : i32
    %c0_i32_1 = arith.constant 0 : i32
    return %c0_i32, %c0_i32_0 : i32, i32
  }
  func.func @transform_6(%arg0: i32, %arg1: i32) -> (i32, i32) {
    %c0_i32 = arith.constant 0 : i32
    %c0_i32_0 = arith.constant 0 : i32
    %c0_i32_1 = arith.constant 0 : i32
    return %c0_i32, %c0_i32_0 : i32, i32
  }
  func.func @transform_7(%arg0: i32, %arg1: i32) -> (i32, i32) {
    %c0_i32 = arith.constant 0 : i32
    %c0_i32_0 = arith.constant 0 : i32
    %c0_i32_1 = arith.constant 0 : i32
    return %c0_i32, %c0_i32_0 : i32, i32
  }
  func.func @transform_8(%arg0: i32, %arg1: i32) -> (i32, i32) {
    %c0_i32 = arith.constant 0 : i32
    %c0_i32_0 = arith.constant 0 : i32
    %c0_i32_1 = arith.constant 0 : i32
    return %c0_i32, %c0_i32_0 : i32, i32
  }
  func.func @transform_9(%arg0: i32, %arg1: i32) -> (i32, i32) {
    %c0_i32 = arith.constant 0 : i32
    %c0_i32_0 = arith.constant 0 : i32
    %c0_i32_1 = arith.constant 0 : i32
    return %c0_i32, %c0_i32_0 : i32, i32
  }
  func.func @transform_10(%arg0: i32, %arg1: i32) -> (i32, i32, i32) {
    %c0_i32 = arith.constant 0 : i32
    %c0_i32_0 = arith.constant 0 : i32
    %c0_i32_1 = arith.constant 0 : i32
    %c0_i32_2 = arith.constant 0 : i32
    return %c0_i32, %c0_i32_0, %c0_i32_1 : i32, i32, i32
  }
  func.func @transform_11(%arg0: i32, %arg1: i32) -> (i32, i32) {
    %c0_i32 = arith.constant 0 : i32
    %c0_i32_0 = arith.constant 0 : i32
    %c0_i32_1 = arith.constant 0 : i32
    return %c0_i32, %c0_i32_0 : i32, i32
  }
  func.func @transform_12(%arg0: i32, %arg1: i32) -> (i32, i32, i32) {
    %c0_i32 = arith.constant 0 : i32
    %c0_i32_0 = arith.constant 0 : i32
    return %arg0, %c0_i32, %arg1 : i32, i32, i32
  }
}

</mosaic_0001>

<bundles_post_ra>
// kernel: tpu_custom_call.1
= control target key start
LH: loop header
LB: loop body
LE: loop exit
PB: predicated region body
PF: predicated region fallthrough
CT: control target
= control target key end

     0   :  { %s16845_s0 = inlined_call_operand.hbm [shape: f32[2,32,256], index: 0, kind: input, shape index: {}]   ;;  %s16846_s1 = inlined_call_operand.hbm [shape: f32[2,32,256], index: 1, kind: input, shape index: {}]   ;;  %s16847_s2 = inlined_call_operand.vmem [shape: f32[1,32], index: 2, kind: input, shape index: {}]   ;;  %s16848_s3 = inlined_call_operand.vmem [shape: f32[1,32], index: 3, kind: input, shape index: {}]   ;;  %s16849_s4 = inlined_call_operand.hbm [shape: f32[32,32], index: 4, kind: input, shape index: {}]   ;;  %s16850_s5 = inlined_call_operand.vmem [shape: f32[1,32], index: 5, kind: input, shape index: {}]   ;;  %s16851_s6 = inlined_call_operand.hbm [shape: f32[32,32], index: 6, kind: input, shape index: {}]   ;;  %s16852_s7 = inlined_call_operand.vmem [shape: f32[1,32], index: 7, kind: input, shape index: {}]   ;;  %s16853_s8 = inlined_call_operand.hbm [shape: f32[32,32], index: 8, kind: input, shape index: {}]   ;;  %s16854_s9 = inlined_call_operand.vmem [shape: f32[1,32], index: 9, kind: input, shape index: {}]   ;;  %s16855_s10 = inlined_call_operand.hbm [shape: f32[4,8,32], index: 10, kind: input, shape index: {}]   ;;  %s16856_s11 = inlined_call_operand.vmem [shape: f32[1,32], index: 11, kind: input, shape index: {}]   ;;  %s16857_s12 = inlined_call_operand.hbm [shape: f32[2,32,256], index: 12, kind: output, shape index: {}]  }
   0x1   :  { %17066 = sst [smem:[#allocation158_spill]] %s16849_s4 }
   0x2   :  { %17067 = sst [smem:[#allocation159_spill]] %s16851_s6 }
   0x3   :  { %17068 = sst [smem:[#allocation160_spill]] %s16853_s8 }
   0x4   :  { %17069 = sst [smem:[#allocation161_spill]] %s16855_s10 }
   0x5   :  { %17070 = sst [smem:[#allocation162_spill]] %s16857_s12 }
   0x6   :  { %17 = vsyncpa [#allocation5], 0 }
   0x7   :  { %19 = vsyncpa [#allocation5 + $0x1], 0 }
   0x8   :  { %20 = vsyncpa [#allocation8], 0 }
   0x9   :  { %22 = vsyncpa [#allocation8 + $0x1], 0 }
   0xa   :  { %23 = vsyncpa [#allocation11], 0 }
   0xb   :  { %24 = vsyncpa [#allocation14], 0 }
   0xc   :  { %25 = vsyncpa [#allocation6], 0 }
   0xd   :  { %27 = vsyncpa [#allocation6 + $0x1], 0  ;;  %s10858_s21 = smov 0   ;;  %s10860_s22 = smov 0  }
   0xe   :  { %s10862_s23 = smov 0   ;;  %s10864_s24 = smov 0  }
   0xf   :  { %s10866_s25 = smov 0   ;;  %s10868_s26 = smov 0  }
  0x10 LB: > { %17071 = sst [smem:[#allocation22_spill]] %s10757_s21  ;;  %s10889_s27 = sadd.s32 4294967295, %s10777_s26   ;;  %s10777_s26 = sphi %s10868_s26, %s33_s26   ;;  %s10773_s25 = sphi %s10866_s25, %s17734_s25   ;;  %s10769_s24 = sphi %s10864_s24, %s17733_s24   ;;  %s10765_s23 = sphi %s10862_s23, %s17732_s23   ;;  %s10761_s22 = sphi %s10860_s22, %s17736_s22   ;;  %s10757_s21 = sphi %s10858_s21, %s17735_s21  }
  0x11   : > { %17072 = sst [smem:[#allocation23_spill]] %s10765_s23  ;;  %s8893_s28 = sadd.s32 4294967294, %s10777_s26  }
  0x12   : > { %17073 = sst [smem:[#allocation24_spill]] %s10769_s24  ;;  %p67_p0 = scmp.ne.s32.totalorder %s10761_s22, %s10757_s21 }
  0x13   : > { %17074 = sst [smem:[#allocation25_spill]] %s10773_s25  ;;  %p68_p1 = scmp.eq.s32.totalorder %s10889_s27, 0 }
  0x14   : > { %p329_p2 = scmp.eq.s32.totalorder %s10889_s27, 1  ;;  %p335_p3 = scmp.eq.s32.totalorder %s8893_s28, 1 }
  0x15   : > { %p10898_p4 = por %p68_p1, %p67_p0  ;;  %p8894_p5 = scmp.ge.s32.totalorder %s10777_s26, 1 }
  0x16   : > { %p10903_p6 = por %p335_p3, %p67_p0  ;;  %p342_p7 = scmp.lt.s32.totalorder %s10777_s26, 3 }
  0x17   : > { %s17078_s4 = sld [smem:[#allocation158_spill]]  ;;  %s10779_s17 = smov [#allocation9]  }
  0x18   : > { %s17076_s30 = scalar_select %p10903_p6, 1, 0 }
  0x19   : > { %p10911_p8 = pnand %p8894_p5, %p342_p7  ;;  %s361_s18 = sshll.u32 %s10779_s17, 4  ;;  %s362_s18 = int_to_ptr.vmem [resolvable:$true] %s361_s18 }
  0x1a   : > { %17077 = sst [smem:[#allocation26_spill]] %s17076_s30  ;;  %p8899_p11 = scmp.ge.s32.totalorder %s10777_s26, 2 }
  0x1b   : > { %p9433_p9 = pneg %p10911_p8  ;;  %s17081_s6 = sld [smem:[#allocation159_spill]] }
  0x1c   : > { %s10780_s14 = smov 128   ;;  %s10782_s17 = smov [#allocation10]  }
  0x1d   : > { %s359_s15 = sshll.u32 %s17078_s4, 4  ;;  %p10919_p10 = pnand %p9433_p9, %p68_p1  ;;  %s360_s15 = int_to_ptr.hbm [resolvable:$true] %s359_s15 }
  0x1e   : > { %s10781_s4 = smov 8   ;;  %s378_s30 = sshll.u32 %s10782_s17, 4  ;;  %s379_s30 = int_to_ptr.vmem [resolvable:$true] %s378_s30 }
  0x1f   : > { %9436 = dma.hbm_to_vmem [thread:$0]  (!%p10919_p10), %s360_s15, 512, %s362_s18, [#allocation8], %s10780_s14, %s10780_s14, %s10781_s4  }
  0x20   : > { %s17082_s8 = sld [smem:[#allocation160_spill]]  ;;  %s10783_s18 = smov [#allocation12]  }
  0x21   : > { %s376_s13 = sshll.u32 %s17081_s6, 4  ;;  %s17083_s10 = sld [smem:[#allocation161_spill]]  ;;  %s377_s13 = int_to_ptr.hbm [resolvable:$true] %s376_s13 }
  0x22   : > { %9439 = dma.hbm_to_vmem [thread:$0]  (!%p10919_p10), %s377_s13, 512, %s379_s30, [#allocation11], %s10780_s14, %s10780_s14, %s10781_s4  }
  0x23   : > { %s395_s6 = sshll.u32 %s10783_s18, 4  ;;  %s10784_s12 = smov [#allocation13]   ;;  %s396_s6 = int_to_ptr.vmem [resolvable:$true] %s395_s6 }
  0x24   : > { %s412_s21 = sshll.u32 %s10784_s12, 4  ;;  %s45_s30 = sadd.s32 1, %s10773_s25  ;;  %s413_s21 = int_to_ptr.vmem [resolvable:$true] %s412_s21 }
  0x25   : > { %s54_s13 = sadd.s32 1, %s10765_s23  ;;  %p47_p12 = scmp.ge.s32.totalorder %s45_s30, 2 }
  0x26   : > { %s393_s24 = sshll.u32 %s17082_s8, 4  ;;  %p61_p13 = scmp.ne.s32.totalorder %s10765_s23, %s10761_s22  ;;  %s394_s24 = int_to_ptr.hbm [resolvable:$true] %s393_s24 }
  0x27   : > { %s410_s15 = sshll.u32 %s17083_s10, 4  ;;  %p62_p0 = scmp.eq.s32.totalorder %s10777_s26, 0  ;;  %s411_s15 = int_to_ptr.hbm [resolvable:$true] %s410_s15 }
  0x28   : > { %9442 = dma.hbm_to_vmem [thread:$0]  (!%p10919_p10), %s394_s24, 512, %s396_s6, [#allocation11], %s10780_s14, %s10780_s14, %s10781_s4  }
  0x29   : > { %9445 = dma.hbm_to_vmem [thread:$0]  (!%p10919_p10), %s411_s15, 512, %s413_s21, [#allocation14], %s10780_s14, %s10780_s14, %s10781_s4  }
  0x2a   : > { %p9461_p3 = scmp.lt.s32.totalorder %s10777_s26, 2  ;;  %s17738_s30 = smov (%p47_p12, %s45_s30), 0 }
  0x2b   : > { %17084 = sst [smem:[#allocation27_spill]] %s17738_s30  ;;  %p10949_p5 = por %p62_p0, %p61_p13 }
  0x2c   : > { %p10955_p7 = por %p329_p2, %p61_p13  ;;  %s49_s4 = ssub.s32 %s10773_s25, %s17738_s30 }
  0x2d   : > { %s429_s24 = sand.u32 1, %s10765_s23   ;;  %p52_p9 = scmp.eq.s32.totalorder %s49_s4, 0 }
  0x2e   : > { %s8900_s19 = sshll.u32 %s429_s24, 6  ;;  %s9399_s14 = sshll.u32 %s10773_s25, 6 }
  0x2f   : > { %s10964_s20 = scalar_select %p52_p9, %s10765_s23, %s54_s13  }
  0x30   : > { %s440_s18 = scalar_lea.hbm %s16845_s0, %s9399_s14  ;;  %s433_s21 = scalar_lea.vmem [#allocation4], %s8900_s19 }
  0x31   : > { %17087 = sst [smem:[#allocation28_spill]] %s10964_s20  ;;  %s441_s12 = sshll.u32 %s440_s18, 4  ;;  %s442_s12 = int_to_ptr.hbm [resolvable:$true] %s441_s12 }
  0x32   : > { %s443_s8 = sshll.u32 %s433_s21, 4  ;;  %p9447_p2 = pnand %p9461_p3, %p10949_p5  ;;  %s444_s8 = int_to_ptr.vmem [resolvable:$true] %s443_s8 }
  0x33   : > { %s462_s4 = scalar_lea.hbm %s16846_s1, %s9399_s14  ;;  %s430_s25 = scalar_lea.sflag [#allocation5], %s429_s24 }
  0x34   : > { %s10785_s13 = smov 256   ;;  %s10786_s20 = smov 16  }
  0x35   : > { %9449 = dma.hbm_to_vmem [thread:$0]  (!%p9447_p2), %s442_s12, 1024, %s444_s8, %s430_s25, %s10785_s13, %s10785_s13, %s10786_s20  }
  0x36   : > { %s463_s23 = sshll.u32 %s462_s4, 4  ;;  %s457_s28 = scalar_lea.vmem [#allocation7], %s8900_s19  ;;  %s464_s23 = int_to_ptr.hbm [resolvable:$true] %s463_s23 }
  0x37   : > { %s465_s15 = sshll.u32 %s457_s28, 4  ;;  %s453_s18 = sand.u32 1, %s10777_s26   ;;  %s466_s15 = int_to_ptr.vmem [resolvable:$true] %s465_s15 }
  0x38   : > { %s454_s21 = scalar_lea.sflag [#allocation8], %s453_s18  ;;  %477 = sbr.rel (%p10911_p8) target bundleno = 5454 (0x154e), region = 68 }
  0x39   : > { %9452 = dma.hbm_to_vmem [thread:$0]  (!%p9447_p2), %s464_s23, 1024, %s466_s15, %s454_s21, %s10785_s13, %s10785_s13, %s10786_s20  }
  0x3d   : > { %s10980_s17 = sand.u32 1, %s10761_s22  }
  0x3e   : > { %s10983_s10 = sshll.u32 %s10980_s17, 6  ;;  %s480_s8 = scalar_lea.sflag [#allocation5], %s10980_s17 }
  0x3f   : > { %s10987_s25 = scalar_lea.vmem [#allocation4], %s10983_s10 }
  0x40   : > { %10732 = dma.done.wait (%p10898_p4), %s480_s8, 1024  }
  0x41   : > { %10734 = vsyncadd (%p10898_p4), %s480_s8, 4294966272  ;;  %s489_s23 = sand.u32 1, %s10889_s27   ;;  %s493_s30 = scalar_lea.vmem [#allocation7], %s10983_s10 }
  0x42   : > { %s490_s16 = scalar_lea.sflag [#allocation8], %s489_s23 }
  0x43   : > { %10736 = dma.done.wait (%p10898_p4), %s490_s16, 1024  }
  0x44   : > { %10738 = vsyncadd (%p10898_p4), %s490_s16, 4294966272 }
  0x45   : > { %10740 = dma.done.wait (%p68_p1), [#allocation8], 512  }
  0x46   : > { %10742 = vsyncadd (%p68_p1), [#allocation8], 4294966784 }
  0x47   : > { %10744 = dma.done.wait (%p68_p1), [#allocation11], 1024  }
  0x48   : > { %10746 = vsyncadd (%p68_p1), [#allocation11], 4294966272 }
  0x49   : > { %10748 = dma.done.wait (%p68_p1), [#allocation14], 512  }
  0x4a   : > { %10750 = vsyncadd (%p68_p1), [#allocation14], 4294966784  ;;  %v2287_v0 = vld [vmem:[%s10987_s25] sm:$0xff]  ;;  %v567_v1 = vld [vmem:[%s493_s30 + $0x8] sm:$0xff]  ;;  %vm640_vm0 = vcmask 261120   ;;  %s10788_s27 = smov 120  }
  0x4b   : > { %2295 = vxpose.xlu1.b32.start [1/4] (short) %v2287_v0, 128  ;;  %606 = vxpose.xlu0.b32.start [1/4] (short) %v567_v1, 128  ;;  %v566_v2 = vld [vmem:[%s493_s30] sm:$0xff]  ;;  %v2289_v3 = vld [vmem:[%s10987_s25 + $0x10] sm:$0xff]  ;;  %v569_v4 = vld [vmem:[%s493_s30 + $0x18] sm:$0xff]  ;;  %s10790_s24 = smov 104   ;;  %s17727_s20 = sld [smem:[#allocation24_spill]] }
  0x4c   : > { %574 = vxpose.xlu2.b32.start [1/4] (short) %v566_v2, 128  ;;  %v568_v5 = vld [vmem:[%s493_s30 + $0x10] sm:$0xff]  ;;  %v2291_v6 = vld [vmem:[%s10987_s25 + $0x20] sm:$0xff]  ;;  %v571_v7 = vld [vmem:[%s493_s30 + $0x28] sm:$0xff]  ;;  %s559_s12 = scalar_lea.vmem [#allocation15], %s10983_s10  ;;  %s17728_s15 = sld [smem:[#allocation162_spill]] }
  0x4d   : > { %v570_v8 = vld [vmem:[%s493_s30 + $0x20] sm:$0xff]  ;;  %v2293_v9 = vld [vmem:[%s10987_s25 + $0x30] sm:$0xff]  ;;  %v573_v10 = vld [vmem:[%s493_s30 + $0x38] sm:$0xff]  ;;  %s8741_s18 = sshll.u32 %s559_s12, 4  ;;  %s8727_s8 = scalar_lea.sflag [#allocation6], %s10980_s17  ;;  %s8742_s18 = int_to_ptr.vmem [resolvable:$true] %s8741_s18 }
  0x4e   : > { %v572_v11 = vld [vmem:[%s493_s30 + $0x30] sm:$0xff] }
  0x51   : > { %s9401_s4 = sshll.u32 %s17727_s20, 6 }
  0x52   : > { %s8740_s10 = scalar_lea.hbm %s17728_s15, %s9401_s4  ;;  %s10699_s29 = scalar_lea.hbm %s17728_s15, 128 }
  0x53   : > { %2296 = vxpose.xlu1.b32.cont [2/4] (short) %v2289_v3, 128  ;;  %607 = vxpose.xlu0.b32.cont [2/4] (short) %v569_v4, 128  ;;  %v10787_v3 = vmov 32.0   ;;  %s8743_s21 = sshll.u32 %s8740_s10, 4  ;;  %s8744_s21 = int_to_ptr.hbm [resolvable:$true] %s8743_s21 }
  0x54   : > { %575 = vxpose.xlu2.b32.cont [2/4] (short) %v568_v5, 128  ;;  %9590 = vrcp.f32 %v10787_v3 }
  0x5a   : > { %v9591_v5 = vpop.eup %9590 }
  0x5b   : > { %2297 = vxpose.xlu1.b32.cont [3/4] (short) %v2291_v6, 128  ;;  %608 = vxpose.xlu0.b32.cont [3/4] (short) %v571_v7, 128  ;;  %vm742_vm1 = vweird.f32 %v9591_v5 }
  0x5c   : > { %576 = vxpose.xlu2.b32.cont [3/4] (short) %v570_v8, 128  ;;  %v738_v8 = vmul.f32 32.0, %v9591_v5 }
  0x63   : > { %2298 = vxpose.xlu1.b32.end [4/4] (short) %v2293_v9, 128  ;;  %609 = vxpose.xlu0.b32.end [4/4] (short) %v573_v10, 128 }
  0x64   : > { %577 = vxpose.xlu2.b32.end [4/4] (short) %v572_v11, 128  ;;  %v739_v11 = vsub.f32 1.0, %v738_v8 }
  0xe5   : > { %v11015_v12 = vpop.trf.xlu2 }
  0xe6   : > { %v641_v31 = vsel %vm640_vm0, %v11015_v12, 0.0 }
  0xed   : > { %v11017_v13 = vpop.trf.xlu2 }
  0xee   : > { %v644_v34 = vsel %vm640_vm0, %v11017_v13, 0.0 }
  0xef   : > { %v11019_v14 = vpop.trf.xlu0  ;;  %v11023_v16 = vpop.trf.xlu1 }
  0xf0   : > { %17088 = vst [vmem:[#allocation29_spill] sm:$0xff] %v11019_v14 }
  0xf5   : > { %v11021_v15 = vpop.trf.xlu2 }
  0xf6   : > { %v647_v38 = vsel %vm640_vm0, %v11021_v15, 0.0 }
  0xf7   : > { %v11025_v17 = vpop.trf.xlu0  ;;  %v11031_v20 = vpop.trf.xlu1 }
  0xf8   : > { %17089 = vst [vmem:[#allocation30_spill] sm:$0xff] %v11025_v17 }
  0xfd   : > { %v11027_v18 = vpop.trf.xlu2 }
  0xfe   : > { %v650_v42 = vsel %vm640_vm0, %v11027_v18, 0.0 }
  0xff   : > { %v11029_v19 = vpop.trf.xlu0  ;;  %v11037_v23 = vpop.trf.xlu1 }
 0x100   : > { %17090 = vst [vmem:[#allocation31_spill] sm:$0xff] %v11029_v19 }
 0x105   : > { %v11033_v21 = vpop.trf.xlu2 }
 0x106   : > { %v653_v46 = vsel %vm640_vm0, %v11033_v21, 0.0 }
 0x107   : > { %v11035_v22 = vpop.trf.xlu0  ;;  %v11043_v26 = vpop.trf.xlu1 }
 0x108   : > { %17091 = vst [vmem:[#allocation32_spill] sm:$0xff] %v11035_v22 }
 0x10d   : > { %v11041_v25 = vpop.trf.xlu2 }
 0x10e   : > { %v656_v50 = vsel %vm640_vm0, %v11041_v25, 0.0 }
 0x10f   : > { %v11039_v24 = vpop.trf.xlu0  ;;  %v11049_v29 = vpop.trf.xlu1 }
 0x110   : > { %17092 = vst [vmem:[#allocation33_spill] sm:$0xff] %v11039_v24 }
 0x115   : > { %v11047_v28 = vpop.trf.xlu2 }
 0x116   : > { %v659_v51 = vsel %vm640_vm0, %v11047_v28, 0.0 }
 0x117   : > { %v11045_v27 = vpop.trf.xlu0  ;;  %v11061_v35 = vpop.trf.xlu1 }
 0x118   : > { %17093 = vst [vmem:[#allocation34_spill] sm:$0xff] %v11045_v27 }
 0x11d   : > { %v11055_v32 = vpop.trf.xlu2 }
 0x11e   : > { %v662_v58 = vsel %vm640_vm0, %v11055_v32, 0.0 }
 0x11f   : > { %v11051_v30 = vpop.trf.xlu0  ;;  %v11071_v40 = vpop.trf.xlu1 }
 0x120   : > { %17094 = vst [vmem:[#allocation35_spill] sm:$0xff] %v11051_v30 }
 0x121   : > { %17096 = vst [vmem:[#allocation37_spill] sm:$0xff] %v11071_v40 }
 0x123   : > { %642 = vadd.xlane.f32.xlu1 %v641_v31 }
 0x125   : > { %v11063_v36 = vpop.trf.xlu2 }
 0x126   : > { %v665_v39 = vsel %vm640_vm0, %v11063_v36, 0.0 }
 0x127   : > { %v11057_v33 = vpop.trf.xlu0  ;;  %v11077_v43 = vpop.trf.xlu1 }
 0x128   : > { %17095 = vst [vmem:[#allocation36_spill] sm:$0xff] %v11057_v33 }
 0x12b   : > { %645 = vadd.xlane.f32.xlu1 %v644_v34 }
 0x12d   : > { %v11111_v60 = vpop.trf.xlu2 }
 0x12f   : > { %v11065_v37 = vpop.trf.xlu0  ;;  %v11085_v47 = vpop.trf.xlu1 }
 0x130   : > { %v713_v53 = vsel %vm640_vm0, %v11065_v37, 0.0 }
 0x133   : > { %648 = vadd.xlane.f32.xlu1 %v647_v38  ;;  %v740_v38 = vmul.f32 %v9591_v5, %v739_v11 }
 0x134   : > { %666 = vadd.xlane.f32.xlu0 %v665_v39 }
 0x135   : > { %v11121_v1 = vpop.trf.xlu2  ;;  %v741_v39 = vadd.f32 %v9591_v5, %v740_v38 }
 0x137   : > { %v11073_v41 = vpop.trf.xlu0  ;;  %v11095_v52 = vpop.trf.xlu1 }
 0x138   : > { %17097 = vst [vmem:[#allocation38_spill] sm:$0xff] %v11095_v52  ;;  %v716_v55 = vsel %vm640_vm0, %v11073_v41, 0.0 }
 0x13b   : > { %651 = vadd.xlane.f32.xlu1 %v650_v42  ;;  %v11139_v42 = vsel %vm742_vm1, %v9591_v5, %v741_v39 }
 0x13d   : > { %v11129_v7 = vpop.trf.xlu2 }
 0x13f   : > { %v11079_v44 = vpop.trf.xlu0  ;;  %v11099_v54 = vpop.trf.xlu1 }
 0x140   : > { %v719_v45 = vsel %vm640_vm0, %v11079_v44, 0.0 }
 0x141   : > { %720 = vadd.xlane.f32.xlu2 %v719_v45 }
 0x143   : > { %654 = vadd.xlane.f32.xlu1 %v653_v46 }
 0x145   : > { %v11137_v34 = vpop.trf.xlu2 }
 0x147   : > { %v11087_v48 = vpop.trf.xlu0  ;;  %v11103_v56 = vpop.trf.xlu1 }
 0x148   : > { %v722_v49 = vsel %vm640_vm0, %v11087_v48, 0.0  ;;  %17098 = vst [vmem:[#allocation39_spill] sm:$0xff] %v11103_v56 }
 0x149   : > { %723 = vadd.xlane.f32.xlu2 %v722_v49 }
 0x14b   : > { %657 = vadd.xlane.f32.xlu1 %v656_v50 }
 0x14d   : > { %v11141_v46 = vpop.trf.xlu2 }
 0x14f   : > { %v11105_v57 = vpop.trf.xlu0  ;;  %v11109_v59 = vpop.trf.xlu1 }
 0x150   : > { %v725_v61 = vsel %vm640_vm0, %v11105_v57, 0.0 }
 0x153   : > { %660 = vadd.xlane.f32.xlu1 %v659_v51 }
 0x157   : > { %v11115_v62 = vpop.trf.xlu0  ;;  %v11119_v0 = vpop.trf.xlu1 }
 0x158   : > { %v728_v63 = vsel %vm640_vm0, %v11115_v62, 0.0  ;;  %17099 = vst [vmem:[#allocation40_spill] sm:$0xff] %v11119_v0 }
 0x15b   : > { %714 = vadd.xlane.f32.xlu1 %v713_v53 }
 0x15f   : > { %v11123_v2 = vpop.trf.xlu0  ;;  %v11127_v6 = vpop.trf.xlu1 }
 0x160   : > { %v731_v4 = vsel %vm640_vm0, %v11123_v2, 0.0  ;;  %17100 = vst [vmem:[#allocation41_spill] sm:$0xff] %v11127_v6 }
 0x163   : > { %717 = vadd.xlane.f32.xlu1 %v716_v55 }
 0x167   : > { %v11131_v9 = vpop.trf.xlu0  ;;  %v11135_v31 = vpop.trf.xlu1 }
 0x168   : > { %v734_v10 = vsel %vm640_vm0, %v11131_v9, 0.0  ;;  %17101 = vst [vmem:[#allocation42_spill] sm:$0xff] %v11135_v31 }
 0x16b   : > { %663 = vadd.xlane.f32.xlu1 %v662_v58 }
 0x173   : > { %726 = vadd.xlane.f32.xlu1 %v725_v61  ;;  %v11151_v61 = vpop.trf.xlu2 }
 0x174   : > { %17102 = vst [vmem:[#allocation43_spill] sm:$0xff] %v11151_v61 }
 0x17b   : > { %729 = vadd.xlane.f32.xlu1 %v728_v63 }
 0x183   : > { %732 = vadd.xlane.f32.xlu1 %v731_v4 }
 0x18b   : > { %735 = vadd.xlane.f32.xlu1 %v734_v10  ;;  %v11163_v10 = vpop.trf.xlu2 }
 0x196   : > { %v643_v45 = vpop.xlane.xlu1 %642 }
 0x197   : > { %v744_v49 = vmul.f32 %v11139_v42, %v643_v45 }
 0x199   : > { %v11145_v50 = vsub.f32 %v11015_v12, %v744_v49 }
 0x19b   : > { %v808_v51 = vmul.f32 %v11145_v50, %v11145_v50 }
 0x19d   : > { %v840_v53 = vsel %vm640_vm0, %v808_v51, 0.0 }
 0x19e   : > { %v646_v55 = vpop.xlane.xlu1 %645  ;;  %841 = vadd.xlane.f32.xlu1 %v840_v53 }
 0x19f   : > { %v745_v58 = vmul.f32 %v11139_v42, %v646_v55 }
 0x1a1   : > { %v11154_v63 = vsub.f32 %v11017_v13, %v745_v58 }
 0x1a3   : > { %v809_v3 = vmul.f32 %v11154_v63, %v11154_v63 }
 0x1a5   : > { %v843_v12 = vsel %vm640_vm0, %v809_v3, 0.0 }
 0x1a6   : > { %v649_v4 = vpop.xlane.xlu1 %648  ;;  %844 = vadd.xlane.f32.xlu1 %v843_v12 }
 0x1a7   : > { %v746_v5 = vmul.f32 %v11139_v42, %v649_v4 }
 0x1a9   : > { %v11161_v8 = vsub.f32 %v11021_v15, %v746_v5 }
 0x1ab   : > { %v810_v11 = vmul.f32 %v11161_v8, %v11161_v8 }
 0x1ad   : > { %v846_v13 = vsel %vm640_vm0, %v810_v11, 0.0 }
 0x1ae   : > { %v652_v38 = vpop.xlane.xlu1 %651  ;;  %847 = vadd.xlane.f32.xlu0 %v846_v13 }
 0x1af   : > { %v747_v39 = vmul.f32 %v11139_v42, %v652_v38 }
 0x1b1   : > { %v11170_v45 = vsub.f32 %v11027_v18, %v747_v39 }
 0x1b3   : > { %v811_v49 = vmul.f32 %v11170_v45, %v11170_v45 }
 0x1b4   : > { %v721_v51 = vpop.xlane.xlu2 %720 }
 0x1b5   : > { %v849_v15 = vsel %vm640_vm0, %v811_v49, 0.0 }
 0x1b6   : > { %v655_v53 = vpop.xlane.xlu1 %654  ;;  %850 = vadd.xlane.f32.xlu0 %v849_v15 }
 0x1bc   : > { %v724_v55 = vpop.xlane.xlu2 %723 }
 0x1bd   : > { %v771_v58 = vmul.f32 %v11139_v42, %v724_v55 }
 0x1be   : > { %v658_v3 = vpop.xlane.xlu1 %657 }
 0x1bf   : > { %v11177_v12 = vsub.f32 %v11087_v48, %v771_v58  ;;  %v749_v4 = vmul.f32 %v11139_v42, %v658_v3 }
 0x1c1   : > { %v835_v18 = vmul.f32 %v11177_v12, %v11177_v12  ;;  %v11183_v5 = vsub.f32 %v11041_v25, %v749_v4  ;;  %v2368_v25 = vsel %vm640_vm0, %v11037_v23, 0.0 }
 0x1c3   : > { %v921_v11 = vsel %vm640_vm0, %v835_v18, 0.0  ;;  %v813_v38 = vmul.f32 %v11183_v5, %v11183_v5  ;;  %v770_v18 = vmul.f32 %v11139_v42, %v721_v51 }
 0x1c4   : > { %922 = vadd.xlane.f32.xlu2 %v921_v11  ;;  %v748_v11 = vmul.f32 %v11139_v42, %v655_v53  ;;  %v2362_v53 = vsel %vm640_vm0, %v11023_v16, 0.0 }
 0x1c5   : > { %v855_v39 = vsel %vm640_vm0, %v813_v38, 0.0  ;;  %v677_v38 = vsel %vm640_vm0, %v11137_v34, 0.0 }
 0x1c6   : > { %v661_v13 = vpop.xlane.xlu1 %660 }
 0x1cc   : > { %856 = vadd.xlane.f32.xlu2 %v855_v39 }
 0x1ce   : > { %v715_v48 = vpop.xlane.xlu1 %714 }
 0x1cf   : > { %v768_v49 = vmul.f32 %v11139_v42, %v715_v48  ;;  %v11209_v48 = vsub.f32 %v11079_v44, %v770_v18 }
 0x1d1   : > { %v11191_v15 = vsub.f32 %v11065_v37, %v768_v49  ;;  %v11212_v49 = vsub.f32 %v11033_v21, %v748_v11  ;;  %v834_v21 = vmul.f32 %v11209_v48, %v11209_v48 }
 0x1d3   : > { %v832_v55 = vmul.f32 %v11191_v15, %v11191_v15  ;;  %v812_v44 = vmul.f32 %v11212_v49, %v11212_v49 }
 0x1d4   : > { %2369 = vadd.xlane.f32.xlu2 %v2368_v25 }
 0x1d5   : > { %v912_v58 = vsel %vm640_vm0, %v832_v55, 0.0 }
 0x1d6   : > { %v718_v3 = vpop.xlane.xlu1 %717  ;;  %913 = vadd.xlane.f32.xlu0 %v912_v58 }
 0x1d7   : > { %v769_v4 = vmul.f32 %v11139_v42, %v718_v3  ;;  %v852_v3 = vsel %vm640_vm0, %v812_v44, 0.0 }
 0x1d9   : > { %v11202_v37 = vsub.f32 %v11073_v41, %v769_v4  ;;  %v918_v4 = vsel %vm640_vm0, %v834_v21, 0.0 }
 0x1db   : > { %v833_v39 = vmul.f32 %v11202_v37, %v11202_v37 }
 0x1dc   : > { %678 = vadd.xlane.f32.xlu2 %v677_v38 }
 0x1dd   : > { %v915_v51 = vsel %vm640_vm0, %v833_v39, 0.0 }
 0x1de   : > { %916 = vadd.xlane.f32.xlu1 %v915_v51  ;;  %v664_v41 = vpop.xlane.xlu1 %663  ;;  %2363 = vadd.xlane.f32.xlu0 %v2362_v53  ;;  %v671_v51 = vsel %vm640_vm0, %v11121_v1, 0.0 }
 0x1df   : > { %v751_v25 = vmul.f32 %v11139_v42, %v664_v41 }
 0x1e1   : > { %v11219_v55 = vsub.f32 %v11055_v32, %v751_v25  ;;  %v2374_v25 = vsel %vm640_vm0, %v11049_v29, 0.0 }
 0x1e3   : > { %v815_v58 = vmul.f32 %v11219_v55, %v11219_v55 }
 0x1e5   : > { %v861_v18 = vsel %vm640_vm0, %v815_v58, 0.0  ;;  %v2365_v58 = vsel %vm640_vm0, %v11031_v20, 0.0 }
 0x1e6   : > { %v727_v11 = vpop.xlane.xlu1 %726  ;;  %853 = vadd.xlane.f32.xlu0 %v852_v3  ;;  %919 = vadd.xlane.f32.xlu1 %v918_v4 }
 0x1e7   : > { %v772_v32 = vmul.f32 %v11139_v42, %v727_v11  ;;  %862 = vadd.xlane.f32.xlu2 %v861_v18  ;;  %v683_v18 = vsel %vm640_vm0, %v11151_v61, 0.0 }
 0x1e9   : > { %v11232_v38 = vsub.f32 %v11105_v57, %v772_v32 }
 0x1eb   : > { %v836_v39 = vmul.f32 %v11232_v38, %v11232_v38 }
 0x1ed   : > { %v924_v53 = vsel %vm640_vm0, %v836_v39, 0.0 }
 0x1ee   : > { %v730_v41 = vpop.xlane.xlu1 %729  ;;  %672 = vadd.xlane.f32.xlu0 %v671_v51  ;;  %925 = vadd.xlane.f32.xlu1 %v924_v53  ;;  %v674_v53 = vsel %vm640_vm0, %v11129_v7, 0.0 }
 0x1ef   : > { %v773_v44 = vmul.f32 %v11139_v42, %v730_v41  ;;  %2375 = vadd.xlane.f32.xlu2 %v2374_v25 }
 0x1f1   : > { %v11243_v57 = vsub.f32 %v11115_v62, %v773_v44  ;;  %v750_v62 = vmul.f32 %v11139_v42, %v661_v13 }
 0x1f3   : > { %v837_v21 = vmul.f32 %v11243_v57, %v11243_v57  ;;  %v11260_v51 = vsub.f32 %v11047_v28, %v750_v62  ;;  %v1640_v62 = vld [vmem:[#allocation12 + $0x8] sm:$0xff] }
 0x1f5   : > { %v927_v3 = vsel %vm640_vm0, %v837_v21, 0.0 }
 0x1f6   : > { %v733_v4 = vpop.xlane.xlu1 %732  ;;  %2366 = vadd.xlane.f32.xlu0 %v2365_v58  ;;  %928 = vadd.xlane.f32.xlu1 %v927_v3  ;;  %v1425_v3 = vld [vmem:[#allocation10 + $0x18] sm:$0xff] }
 0x1f7   : > { %v774_v11 = vmul.f32 %v11139_v42, %v733_v4  ;;  %684 = vadd.xlane.f32.xlu2 %v683_v18  ;;  %v1642_v4 = vld [vmem:[#allocation12 + $0x18] sm:$0xff]  ;;  %1538 = vmatpush.msra.mxu0 %v1425_v3  ;;  %v1424_v18 = vld [vmem:[#allocation10 + $0x10] sm:$0xff] }
 0x1f8   : > { %1659 = vmatpush.msra.mxu1 %v1642_v4  ;;  %9402 = vmatpush.msra.mxu2 %v1425_v3 }
 0x1f9   : > { %v11255_v32 = vsub.f32 %v11123_v2, %v774_v11  ;;  %v814_v2 = vmul.f32 %v11260_v51, %v11260_v51  ;;  %v1641_v11 = vld [vmem:[#allocation12 + $0x10] sm:$0xff]  ;;  %1539 = vmatpush.msra.mxu0 %v1424_v18 }
 0x1fa   : > { %1660 = vmatpush.msra.mxu1 %v1641_v11  ;;  %9403 = vmatpush.msra.mxu2 %v1424_v18  ;;  %v680_v18 = vsel %vm640_vm0, %v11141_v46, 0.0 }
 0x1fb   : > { %v838_v39 = vmul.f32 %v11255_v32, %v11255_v32  ;;  %v858_v21 = vsel %vm640_vm0, %v814_v2, 0.0 }
 0x1fc   : > { %1661 = vmatpush.msra.mxu1 %v1640_v62 }
 0x1fd   : > { %v930_v41 = vsel %vm640_vm0, %v838_v39, 0.0  ;;  %v2371_v39 = vsel %vm640_vm0, %v11043_v26, 0.0 }
 0x1fe   : > { %v736_v25 = vpop.xlane.xlu1 %735  ;;  %675 = vadd.xlane.f32.xlu0 %v674_v53  ;;  %931 = vadd.xlane.f32.xlu1 %v930_v41  ;;  %v668_v53 = vsel %vm640_vm0, %v11111_v60, 0.0  ;;  %v1422_v41 = vld [vmem:[#allocation10] sm:$0xff] }
 0x1ff   : > { %v775_v44 = vmul.f32 %v11139_v42, %v736_v25  ;;  %v1639_v25 = vld [vmem:[#allocation12] sm:$0xff] }
 0x200   : > { %1662 = vmatpush.msra.mxu1 %v1639_v25 }
 0x201   : > { %v11267_v13 = vsub.f32 %v11131_v9, %v775_v44  ;;  %v1423_v9 = vld [vmem:[#allocation10 + $0x8] sm:$0xff]  ;;  %v667_v44 = vpop.xlane.xlu0 %666 }
 0x202   : > { %1540 = vmatpush.msra.mxu0 %v1423_v9  ;;  %9404 = vmatpush.msra.mxu2 %v1423_v9  ;;  %v752_v2 = vmul.f32 %v11139_v42, %v667_v44 }
 0x203   : > { %v839_v28 = vmul.f32 %v11267_v13, %v11267_v13 }
 0x204   : > { %1541 = vmatpush.msra.mxu0 %v1422_v41  ;;  %9405 = vmatpush.msra.mxu2 %v1422_v41  ;;  %v11282_v3 = vsub.f32 %v11063_v36, %v752_v2 }
 0x205   : > { %v933_v58 = vsel %vm640_vm0, %v839_v28, 0.0 }
 0x206   : > { %859 = vadd.xlane.f32.xlu0 %v858_v21  ;;  %934 = vadd.xlane.f32.xlu1 %v933_v58 }
 0x207   : > { %9406 = vmatpush.msrb.mxu2 %v1642_v4 }
 0x209   : > { %9407 = vmatpush.msrb.mxu2 %v1641_v11 }
 0x20b   : > { %9408 = vmatpush.msrb.mxu2 %v1640_v62 }
 0x20d   : > { %9409 = vmatpush.msrb.mxu2 %v1639_v25 }
 0x20e   : > { %2372 = vadd.xlane.f32.xlu0 %v2371_v39  ;;  %669 = vadd.xlane.f32.xlu1 %v668_v53  ;;  %v816_v39 = vmul.f32 %v11282_v3, %v11282_v3 }
 0x210   : > { %v864_v44 = vsel %vm640_vm0, %v816_v39, 0.0  ;;  %v11296_v39 = vld [vmem:[%s16847_s2] ss:$0 sm:$0xff] }
 0x211   : > { %v842_v28 = vpop.xlane.xlu1 %841 }
 0x212   : > { %v936_v21 = vmul.f32 %v842_v28, %v11139_v42 }
 0x214   : > { %v968_v58 = vadd.f32 1e-05, %v936_v21 }
 0x216   : > { %9592 = vrsqrt.f32 %v968_v58  ;;  %681 = vadd.xlane.f32.xlu0 %v680_v18  ;;  %vm1006_vm3 = vweird.f32 %v968_v58 }
 0x219   : > { %v845_v9 = vpop.xlane.xlu1 %844 }
 0x21a   : > { %v937_v4 = vmul.f32 %v845_v9, %v11139_v42  ;;  %v2377_v9 = vsel %vm640_vm0, %v11061_v35, 0.0 }
 0x21c   : > { %v9593_v53 = vpop.eup %9592  ;;  %v969_v41 = vadd.f32 1e-05, %v937_v4 }
 0x21d   : > { %v1001_v11 = vmul.f32 %v9593_v53, %v968_v58  ;;  %vm1007_vm2 = vweird.f32 %v9593_v53  ;;  %v11302_v58 = vld [vmem:[%s16848_s3] ss:$0 sm:$0xff] }
 0x21e   : > { %9594 = vrsqrt.f32 %v969_v41  ;;  %865 = vadd.xlane.f32.xlu0 %v864_v44  ;;  %vm1008_vm4 = vmor %vm1006_vm3, %vm1007_vm2  ;;  %vm1016_vm6 = vweird.f32 %v969_v41 }
 0x21f   : > { %v1002_v36 = vmul.f32 %v9593_v53, %v1001_v11 }
 0x221   : > { %v1003_v2 = vmul.f32 0.5, %v1002_v36  ;;  %v848_v28 = vpop.xlane.xlu0 %847 }
 0x222   : > { %v938_v62 = vmul.f32 %v848_v28, %v11139_v42 }
 0x223   : > { %v1004_v21 = vsub.f32 1.5, %v1003_v2 }
 0x224   : > { %v9595_v25 = vpop.eup %9594  ;;  %v970_v18 = vadd.f32 1e-05, %v938_v62 }
 0x225   : > { %v1005_v33 = vmul.f32 %v9593_v53, %v1004_v21  ;;  %v1011_v30 = vmul.f32 %v9595_v25, %v969_v41  ;;  %vm1017_vm5 = vweird.f32 %v9595_v25 }
 0x226   : > { %9596 = vrsqrt.f32 %v970_v18  ;;  %2378 = vadd.xlane.f32.xlu0 %v2377_v9  ;;  %vm1018_vm7 = vmor %vm1016_vm6, %vm1017_vm5  ;;  %vm1026_vm9 = vweird.f32 %v970_v18 }
 0x227   : > { %v1012_v4 = vmul.f32 %v9595_v25, %v1011_v30  ;;  %v1009_v11 = vsel %vm1008_vm4, %v9593_v53, %v1005_v33  ;;  %v686_v53 = vsel %vm640_vm0, %v11163_v10, 0.0 }
 0x228   : > { %v1320_v44 = vmul.f32 %v1009_v11, %v11145_v50 }
 0x229   : > { %v1013_v36 = vmul.f32 0.5, %v1012_v4  ;;  %v851_v2 = vpop.xlane.xlu0 %850 }
 0x22a   : > { %v939_v28 = vmul.f32 %v851_v2, %v11139_v42  ;;  %v1355_v62 = vmul.f32 %v11296_v39, %v1320_v44 }
 0x22b   : > { %v1014_v21 = vsub.f32 1.5, %v1013_v36 }
 0x22c   : > { %v9597_v9 = vpop.eup %9596  ;;  %v971_v27 = vadd.f32 1e-05, %v939_v28  ;;  %v1390_v30 = vadd.f32 %v11302_v58, %v1355_v62 }
 0x22d   : > { %v1015_v33 = vmul.f32 %v9595_v25, %v1014_v21  ;;  %v1021_v50 = vmul.f32 %v9597_v9, %v970_v18  ;;  %vm1027_vm8 = vweird.f32 %v9597_v9 }
 0x22e   : > { %9598 = vrsqrt.f32 %v971_v27  ;;  %8914 = vmatmul.msk.f32.vlgmr.msra.gmra.mxu0 %vm640_vm0, %v1390_v30  ;;  %8946 = vmatmul.msk.f32.vlgmr.msra.gmra.mxu1 %vm640_vm0, %v1390_v30  ;;  %vm1028_vm10 = vmor %vm1026_vm9, %vm1027_vm8  ;;  %vm1036_vm12 = vweird.f32 %v971_v27 }
 0x22f   : > { %v1022_v4 = vmul.f32 %v9597_v9, %v1021_v50  ;;  %687 = vadd.xlane.f32.xlu0 %v686_v53  ;;  %v1019_v11 = vsel %vm1018_vm7, %v9595_v25, %v1015_v33  ;;  %v2380_v25 = vsel %vm640_vm0, %v11071_v40, 0.0 }
 0x230   : > { %v1321_v44 = vmul.f32 %v1019_v11, %v11154_v63 }
 0x231   : > { %v1023_v36 = vmul.f32 0.5, %v1022_v4 }
 0x232   : > { %v1356_v2 = vmul.f32 %v11296_v39, %v1321_v44 }
 0x233   : > { %v1024_v28 = vsub.f32 1.5, %v1023_v36 }
 0x234   : > { %v9599_v41 = vpop.eup %9598  ;;  %v1391_v62 = vadd.f32 %v11302_v58, %v1356_v2 }
 0x235   : > { %v1025_v21 = vmul.f32 %v9597_v9, %v1024_v28  ;;  %v1031_v24 = vmul.f32 %v9599_v41, %v971_v27  ;;  %vm1037_vm11 = vweird.f32 %v9599_v41 }
 0x236   : > { %8915 = vmatmul.msk.f32.gmra.mxu0 %vm640_vm0, %v1391_v62  ;;  %8947 = vmatmul.msk.f32.gmra.mxu1 %vm640_vm0, %v1391_v62  ;;  %vm1038_vm13 = vmor %vm1036_vm12, %vm1037_vm11 }
 0x237   : > { %v1032_v63 = vmul.f32 %v9599_v41, %v1031_v24  ;;  %2381 = vadd.xlane.f32.xlu0 %v2380_v25  ;;  %v1029_v30 = vsel %vm1028_vm10, %v9597_v9, %v1025_v21  ;;  %v923_v44 = vpop.xlane.xlu2 %922 }
 0x238   : > { %v1322_v33 = vmul.f32 %v1029_v30, %v11161_v8  ;;  %v963_v2 = vmul.f32 %v923_v44, %v11139_v42 }
 0x239   : > { %v1033_v50 = vmul.f32 0.5, %v1032_v63 }
 0x23a   : > { %v1357_v53 = vmul.f32 %v11296_v39, %v1322_v33  ;;  %v11330_v21 = vadd.f32 1e-05, %v963_v2 }
 0x23b   : > { %v1034_v4 = vsub.f32 1.5, %v1033_v50 }
 0x23c   : > { %v1392_v18 = vadd.f32 %v11302_v58, %v1357_v53  ;;  %vm1276_vm5 = vweird.f32 %v11330_v21 }
 0x23d   : > { %v1035_v11 = vmul.f32 %v9599_v41, %v1034_v4 }
 0x23e   : > { %8916 = vmatmul.msk.f32.gmra.mxu0 %vm640_vm0, %v1392_v18  ;;  %8948 = vmatmul.msk.f32.gmra.mxu1 %vm640_vm0, %v1392_v18 }
 0x23f   : > { %v1039_v24 = vsel %vm1038_vm13, %v9599_v41, %v1035_v11  ;;  %v857_v27 = vpop.xlane.xlu2 %856 }
 0x240   : > { %v1323_v9 = vmul.f32 %v1039_v24, %v11170_v45  ;;  %v941_v41 = vmul.f32 %v857_v27, %v11139_v42 }
 0x242   : > { %v1358_v8 = vmul.f32 %v11296_v39, %v1323_v9  ;;  %v11334_v45 = vadd.f32 1e-05, %v941_v41 }
 0x244   : > { %v1393_v36 = vadd.f32 %v11302_v58, %v1358_v8 }
 0x246   : > { %8917 = vmatmul.msk.f32.gmra.mxu0 %vm640_vm0, %v1393_v36  ;;  %8949 = vmatmul.msk.f32.gmra.mxu1 %vm640_vm0, %v1393_v36 }
 0x247   : > { %v11340_v53 = vpop.xlane.xlu2 %2369 }
 0x249   : > { %v914_v28 = vpop.xlane.xlu0 %913 }
 0x24a   : > { %v960_v62 = vmul.f32 %v914_v28, %v11139_v42 }
 0x24c   : > { %v992_v25 = vadd.f32 1e-05, %v960_v62 }
 0x24e   : > { %9600 = vrsqrt.f32 %v992_v25  ;;  %vm1246_vm15 = vweird.f32 %v992_v25 }
 0x24f   : > { %9602 = vrsqrt.f32 %v11330_v21  ;;  %v11357_v17 = vpop.xlane.xlu2 %678 }
 0x250   : > { %9604 = vrsqrt.f32 %v11334_v45 }
 0x251   : > { %v917_v63 = vpop.xlane.xlu1 %916  ;;  %v11336_v30 = vpop.xlane.xlu0 %2363 }
 0x252   : > { %v961_v33 = vmul.f32 %v917_v63, %v11139_v42 }
 0x254   : > { %v9601_v50 = vpop.eup %9600  ;;  %v993_v4 = vadd.f32 1e-05, %v961_v33 }
 0x255   : > { %v11342_v18 = vpop.eup %9602  ;;  %v1241_v11 = vmul.f32 %v9601_v50, %v992_v25  ;;  %vm1247_vm14 = vweird.f32 %v9601_v50 }
 0x256   : > { %9606 = vrsqrt.f32 %v993_v4  ;;  %v1271_v24 = vmul.f32 %v11342_v18, %v11330_v21  ;;  %v11346_v2 = vpop.eup %9604  ;;  %vm1248_vm1 = vmor %vm1246_vm15, %vm1247_vm14  ;;  %vm1256_vm3 = vweird.f32 %v993_v4  ;;  %vm1277_vm6 = vweird.f32 %v11342_v18 }
 0x257   : > { %v1242_v44 = vmul.f32 %v9601_v50, %v1241_v11  ;;  %vm1057_vm7 = vweird.f32 %v11346_v2  ;;  %vm11400_vm10 = vmor %vm1276_vm5, %vm1277_vm6  ;;  %vm1056_vm14 = vweird.f32 %v11334_v45 }
 0x258   : > { %v1272_v63 = vmul.f32 %v11342_v18, %v1271_v24 }
 0x259   : > { %v1243_v9 = vmul.f32 0.5, %v1242_v44  ;;  %v854_v8 = vpop.xlane.xlu0 %853  ;;  %v920_v36 = vpop.xlane.xlu1 %919  ;;  %v1051_v44 = vmul.f32 %v11346_v2, %v11334_v45 }
 0x25a   : > { %v940_v27 = vmul.f32 %v854_v8, %v11139_v42  ;;  %v962_v28 = vmul.f32 %v920_v36, %v11139_v42  ;;  %v1273_v24 = vmul.f32 0.5, %v1272_v63 }
 0x25b   : > { %v1244_v62 = vsub.f32 1.5, %v1243_v9 }
 0x25c   : > { %v9607_v41 = vpop.eup %9606  ;;  %v11351_v33 = vadd.f32 1e-05, %v940_v27  ;;  %v11353_v11 = vadd.f32 1e-05, %v962_v28  ;;  %v1052_v27 = vmul.f32 %v11346_v2, %v1051_v44 }
 0x25d   : > { %v1245_v22 = vmul.f32 %v9601_v50, %v1244_v62  ;;  %v1251_v19 = vmul.f32 %v9607_v41, %v993_v4  ;;  %vm1257_vm2 = vweird.f32 %v9607_v41 }
 0x25e   : > { %9608 = vrsqrt.f32 %v11351_v33  ;;  %vm1258_vm4 = vmor %vm1256_vm3, %vm1257_vm2  ;;  %vm1046_vm11 = vweird.f32 %v11351_v33  ;;  %vm1266_vm13 = vweird.f32 %v11353_v11 }
 0x25f   : > { %v1252_v9 = vmul.f32 %v9607_v41, %v1251_v19  ;;  %9610 = vrsqrt.f32 %v11353_v11  ;;  %v1249_v8 = vsel %vm1248_vm1, %v9601_v50, %v1245_v22  ;;  %v1274_v19 = vsub.f32 1.5, %v1273_v24  ;;  %vm11421_vm1 = vmor %vm1056_vm14, %vm1057_vm7 }
 0x260   : > { %v1344_v36 = vmul.f32 %v1249_v8, %v11191_v15  ;;  %v1053_v50 = vmul.f32 0.5, %v1052_v27  ;;  %v863_v8 = vpop.xlane.xlu2 %862 }
 0x261   : > { %v1253_v28 = vmul.f32 0.5, %v1252_v9  ;;  %v11363_v14 = vpop.xlane.xlu0 %672  ;;  %v926_v62 = vpop.xlane.xlu1 %925  ;;  %v1275_v4 = vmul.f32 %v11342_v18, %v1274_v19 }
 0x262   : > { %v964_v25 = vmul.f32 %v926_v62, %v11139_v42  ;;  %v1379_v31 = vmul.f32 %v11296_v39, %v1344_v36  ;;  %v1054_v27 = vsub.f32 1.5, %v1053_v50  ;;  %v943_v62 = vmul.f32 %v863_v8, %v11139_v42 }
 0x263   : > { %v1254_v6 = vsub.f32 1.5, %v1253_v28  ;;  %v1279_v45 = vsel %vm11400_vm10, %v11342_v18, %v1275_v4 }
 0x264   : > { %v9609_v56 = vpop.eup %9608  ;;  %v11367_v40 = vadd.f32 1e-05, %v964_v25  ;;  %v11370_v22 = vadd.f32 %v11302_v58, %v1379_v31 }
 0x265   : > { %v9611_v15 = vpop.eup %9610  ;;  %v1255_v63 = vmul.f32 %v9607_v41, %v1254_v6  ;;  %v1041_v44 = vmul.f32 %v9609_v56, %v11351_v33  ;;  %vm1047_vm8 = vweird.f32 %v9609_v56 }
 0x266   : > { %v1261_v9 = vmul.f32 %v9611_v15, %v11353_v11  ;;  %9612 = vrsqrt.f32 %v11367_v40  ;;  %8938 = vmatmul.msk.f32.vlgmr.msra.gmra.mxu2 %vm640_vm0, %v11370_v22  ;;  %vm1267_vm9 = vweird.f32 %v9611_v15  ;;  %vm1048_vm12 = vmor %vm1046_vm11, %vm1047_vm8  ;;  %vm1286_vm3 = vweird.f32 %v11367_v40 }
 0x267   : > { %v1042_v24 = vmul.f32 %v9609_v56, %v1041_v44  ;;  %v1259_v36 = vsel %vm1258_vm4, %v9607_v41, %v1255_v63  ;;  %vm1268_vm15 = vmor %vm1266_vm13, %vm1267_vm9 }
 0x268   : > { %v1262_v31 = vmul.f32 %v9611_v15, %v1261_v9  ;;  %v1345_v6 = vmul.f32 %v1259_v36, %v11202_v37 }
 0x269   : > { %v1043_v28 = vmul.f32 0.5, %v1042_v24  ;;  %v2367_v25 = vpop.xlane.xlu0 %2366  ;;  %v929_v61 = vpop.xlane.xlu1 %928  ;;  %v1055_v24 = vmul.f32 %v11346_v2, %v1054_v27 }
 0x26a   : > { %v1263_v0 = vmul.f32 0.5, %v1262_v31  ;;  %v2466_v52 = vmul.f32 %v2367_v25, %v11139_v42  ;;  %v965_v41 = vmul.f32 %v929_v61, %v11139_v42  ;;  %v1380_v63 = vmul.f32 %v11296_v39, %v1345_v6 }
 0x26b   : > { %v1044_v44 = vsub.f32 1.5, %v1043_v28 }
 0x26c   : > { %v11386_v37 = vpop.eup %9612  ;;  %v1264_v19 = vsub.f32 1.5, %v1263_v0  ;;  %v11389_v50 = vsub.f32 %v11031_v20, %v2466_v52  ;;  %v11391_v9 = vadd.f32 1e-05, %v965_v41  ;;  %v11394_v8 = vadd.f32 %v11302_v58, %v1380_v63 }
 0x26d   : > { %v1045_v36 = vmul.f32 %v9609_v56, %v1044_v44  ;;  %v1281_v20 = vmul.f32 %v11386_v37, %v11367_v40  ;;  %v11409_v0 = vadd.f32 1e-05, %v943_v62  ;;  %v1059_v63 = vsel %vm11421_vm1, %v11346_v2, %v1055_v24 }
 0x26e   : > { %v1265_v52 = vmul.f32 %v9611_v15, %v1264_v19  ;;  %9614 = vrsqrt.f32 %v11391_v9  ;;  %8939 = vmatmul.msk.f32.gmra.mxu2 %vm640_vm0, %v11394_v8  ;;  %v2530_v33 = vmul.f32 %v11389_v50, %v11389_v50  ;;  %v1325_v24 = vmul.f32 %v1059_v63, %v11183_v5 }
 0x26f   : > { %v1282_v21 = vmul.f32 %v11386_v37, %v1281_v20  ;;  %v1049_v31 = vsel %vm1048_vm12, %v9609_v56, %v1045_v36  ;;  %9616 = vrsqrt.f32 %v11409_v0  ;;  %vm1287_vm2 = vweird.f32 %v11386_v37 }
 0x270   : > { %v1324_v6 = vmul.f32 %v1049_v31, %v11212_v49  ;;  %v1269_v27 = vsel %vm1268_vm15, %v9611_v15, %v1265_v52  ;;  %v2564_v25 = vsel %vm640_vm0, %v2530_v33, 0.0  ;;  %v1347_v52 = vmul.f32 %v1279_v45, %v11177_v12  ;;  %vm11469_vm4 = vmor %vm1286_vm3, %vm1287_vm2 }
 0x271   : > { %v1283_v28 = vmul.f32 0.5, %v1282_v21  ;;  %v676_v62 = vpop.xlane.xlu0 %675  ;;  %v932_v41 = vpop.xlane.xlu1 %931  ;;  %v1346_v56 = vmul.f32 %v1269_v27, %v11209_v48  ;;  %2565 = vadd.xlane.f32.xlu0 %v2564_v25  ;;  %v1360_v31 = vmul.f32 %v11296_v39, %v1325_v24  ;;  %vm1296_vm6 = vweird.f32 %v11391_v9 }
 0x272   : > { %v755_v49 = vmul.f32 %v11139_v42, %v676_v62  ;;  %v966_v15 = vmul.f32 %v932_v41, %v11139_v42  ;;  %v1359_v18 = vmul.f32 %v11296_v39, %v1324_v6  ;;  %vm1076_vm1 = vweird.f32 %v11409_v0 }
 0x273   : > { %v1284_v4 = vsub.f32 1.5, %v1283_v28  ;;  %v1381_v44 = vmul.f32 %v11296_v39, %v1346_v56  ;;  %v1382_v28 = vmul.f32 %v11296_v39, %v1347_v52 }
 0x274   : > { %v11439_v19 = vpop.eup %9614  ;;  %v11442_v48 = vsub.f32 %v11129_v7, %v755_v49  ;;  %v11444_v61 = vadd.f32 1e-05, %v966_v15  ;;  %v1394_v2 = vadd.f32 %v11302_v58, %v1359_v18  ;;  %v1395_v18 = vadd.f32 %v11302_v58, %v1360_v31 }
 0x275   : > { %v1291_v36 = vmul.f32 %v11439_v19, %v11391_v9  ;;  %v11451_v20 = vadd.f32 %v11302_v58, %v1381_v44  ;;  %v1285_v21 = vmul.f32 %v11386_v37, %v1284_v4  ;;  %v11464_v33 = vpop.eup %9616  ;;  %v11491_v44 = vadd.f32 %v11302_v58, %v1382_v28 }
 0x276   : > { %9618 = vrsqrt.f32 %v11444_v61  ;;  %8918 = vmatmul.msk.f32.gmra.mxu0 %vm640_vm0, %v1394_v2  ;;  %8950 = vmatmul.msk.f32.gmra.mxu1 %vm640_vm0, %v1394_v2  ;;  %v819_v7 = vmul.f32 %v11442_v48, %v11442_v48  ;;  %v1071_v41 = vmul.f32 %v11464_v33, %v11409_v0  ;;  %vm1297_vm5 = vweird.f32 %v11439_v19 }
 0x277   : > { %v1292_v5 = vmul.f32 %v11439_v19, %v1291_v36  ;;  %8940 = vmatmul.msk.f32.gmra.mxu2 %vm640_vm0, %v11451_v20  ;;  %v1289_v40 = vsel %vm11469_vm4, %v11386_v37, %v1285_v21  ;;  %vm11505_vm7 = vmor %vm1296_vm6, %vm1297_vm5  ;;  %vm1306_vm9 = vweird.f32 %v11444_v61  ;;  %vm1077_vm12 = vweird.f32 %v11464_v33 }
 0x278   : > { %v873_v12 = vsel %vm640_vm0, %v819_v7, 0.0  ;;  %v1348_v37 = vmul.f32 %v1289_v40, %v11232_v38  ;;  %v1072_v24 = vmul.f32 %v11464_v33, %v1071_v41  ;;  %v2386_v7 = vsel %vm640_vm0, %v11085_v47, 0.0  ;;  %vm11584_vm2 = vmor %vm1076_vm1, %vm1077_vm12 }
 0x279   : > { %v1293_v6 = vmul.f32 0.5, %v1292_v5  ;;  %v860_v27 = vpop.xlane.xlu0 %859  ;;  %v935_v45 = vpop.xlane.xlu1 %934  ;;  %874 = vadd.xlane.f32.xlu0 %v873_v12 }
 0x27a   : > { %v942_v62 = vmul.f32 %v860_v27, %v11139_v42  ;;  %v967_v25 = vmul.f32 %v935_v45, %v11139_v42  ;;  %v1383_v12 = vmul.f32 %v11296_v39, %v1348_v37  ;;  %v1073_v27 = vmul.f32 0.5, %v1072_v24 }
 0x27b   : > { %v1294_v56 = vsub.f32 1.5, %v1293_v6  ;;  %v2465_v6 = vmul.f32 %v11336_v30, %v11139_v42 }
 0x27c   : > { %v11481_v63 = vpop.eup %9618  ;;  %v11483_v49 = vadd.f32 1e-05, %v942_v62  ;;  %v11485_v15 = vadd.f32 1e-05, %v967_v25  ;;  %v1074_v37 = vsub.f32 1.5, %v1073_v27 }
 0x27d   : > { %v1301_v4 = vmul.f32 %v11481_v63, %v11444_v61  ;;  %v1295_v2 = vmul.f32 %v11439_v19, %v1294_v56  ;;  %vm1307_vm8 = vweird.f32 %v11481_v63 }
 0x27e   : > { %9620 = vrsqrt.f32 %v11483_v49  ;;  %8919 = vmatmul.msk.f32.gmra.mxu0 %vm640_vm0, %v1395_v18  ;;  %8951 = vmatmul.msk.f32.gmra.mxu1 %vm640_vm0, %v1395_v18  ;;  %vm11551_vm10 = vmor %vm1306_vm9, %vm1307_vm8  ;;  %vm1066_vm13 = vweird.f32 %v11483_v49  ;;  %vm1316_vm3 = vweird.f32 %v11485_v15  ;;  %vm1826_vm8 = vcmask 64512  }
 0x27f   : > { %v1302_v36 = vmul.f32 %v11481_v63, %v1301_v4  ;;  %9622 = vrsqrt.f32 %v11485_v15  ;;  %8941 = vmatmul.msk.f32.gmra.mxu2 %vm640_vm0, %v11491_v44  ;;  %v1299_v9 = vsel %vm11505_vm7, %v11439_v19, %v1295_v2  ;;  %v11530_v19 = vadd.f32 %v11302_v58, %v1383_v12 }
 0x280   : > { %v1349_v30 = vmul.f32 %v1299_v9, %v11243_v57  ;;  %v11541_v4 = vsub.f32 %v11023_v16, %v2465_v6  ;;  %v754_v12 = vmul.f32 %v11139_v42, %v11363_v14  ;;  %v1075_v9 = vmul.f32 %v11464_v33, %v1074_v37 }
 0x281   : > { %v1303_v52 = vmul.f32 0.5, %v1302_v36  ;;  %v2373_v21 = vpop.xlane.xlu0 %2372  ;;  %v670_v5 = vpop.xlane.xlu1 %669  ;;  %2387 = vadd.xlane.f32.xlu0 %v2386_v7 }
 0x282   : > { %v2468_v31 = vmul.f32 %v2373_v21, %v11139_v42  ;;  %v753_v11 = vmul.f32 %v11139_v42, %v670_v5  ;;  %v1384_v21 = vmul.f32 %v11296_v39, %v1349_v30 }
 0x283   : > { %v1304_v45 = vsub.f32 1.5, %v1303_v52 }
 0x284   : > { %v9621_v28 = vpop.eup %9620  ;;  %v11520_v62 = vsub.f32 %v11043_v26, %v2468_v31  ;;  %v11523_v25 = vsub.f32 %v11111_v60, %v753_v11  ;;  %v2529_v11 = vmul.f32 %v11541_v4, %v11541_v4 }
 0x285   : > { %v11525_v40 = vpop.eup %9622  ;;  %v1061_v41 = vmul.f32 %v9621_v28, %v11483_v49  ;;  %v1305_v56 = vmul.f32 %v11481_v63, %v1304_v45  ;;  %vm1067_vm11 = vweird.f32 %v9621_v28 }
 0x286   : > { %v1311_v26 = vmul.f32 %v11525_v40, %v11485_v15  ;;  %v2532_v60 = vmul.f32 %v11520_v62, %v11520_v62  ;;  %v817_v18 = vmul.f32 %v11523_v25, %v11523_v25  ;;  %vm1068_vm14 = vmor %vm1066_vm13, %vm1067_vm11  ;;  %vm1317_vm15 = vweird.f32 %v11525_v40 }
 0x287   : > { %v1062_v2 = vmul.f32 %v9621_v28, %v1061_v41  ;;  %8942 = vmatmul.msk.f32.gmra.mxu2 %vm640_vm0, %v11530_v19  ;;  %v1309_v5 = vsel %vm11551_vm10, %v11481_v63, %v1305_v56  ;;  %v11571_v63 = vadd.f32 %v11302_v58, %v1384_v21  ;;  %v11589_v56 = vsub.f32 %v11121_v1, %v754_v12  ;;  %vm1318_vm4 = vmor %vm1316_vm3, %vm1317_vm15 }
 0x288   : > { %v1312_v57 = vmul.f32 %v11525_v40, %v1311_v26  ;;  %v2570_v24 = vsel %vm640_vm0, %v2532_v60, 0.0  ;;  %v867_v36 = vsel %vm640_vm0, %v817_v18, 0.0  ;;  %v1350_v14 = vmul.f32 %v1309_v5, %v11255_v32 }
 0x289   : > { %v1063_v16 = vmul.f32 0.5, %v1062_v2  ;;  %v682_v52 = vpop.xlane.xlu0 %681  ;;  %868 = vadd.xlane.f32.xlu2 %v867_v36  ;;  %2571 = vadd.xlane.f32.xlu0 %v2570_v24  ;;  %v1079_v18 = vsel %vm11584_vm2, %v11464_v33, %v1075_v9 }
 0x28a   : > { %v1313_v7 = vmul.f32 0.5, %v1312_v57  ;;  %v757_v61 = vmul.f32 %v11139_v42, %v682_v52  ;;  %v1327_v24 = vmul.f32 %v1079_v18, %v11219_v55  ;;  %v2392_v55 = vsel %vm640_vm0, %v11099_v54, 0.0 }
 0x28b   : > { %v1064_v31 = vsub.f32 1.5, %v1063_v16 }
 0x28c   : > { %v1314_v6 = vsub.f32 1.5, %v1313_v7  ;;  %v11567_v27 = vsub.f32 %v11141_v46, %v757_v61  ;;  %v2561_v46 = vsel %vm640_vm0, %v2529_v11, 0.0  ;;  %v1362_v38 = vmul.f32 %v11296_v39, %v1327_v24 }
 0x28d   : > { %v1065_v45 = vmul.f32 %v9621_v28, %v1064_v31  ;;  %v2467_v7 = vmul.f32 %v11340_v53, %v11139_v42 }
 0x28e   : > { %v1315_v41 = vmul.f32 %v11525_v40, %v1314_v6  ;;  %v821_v30 = vmul.f32 %v11567_v27, %v11567_v27  ;;  %v1397_v5 = vadd.f32 %v11302_v58, %v1362_v38  ;;  %v2383_v6 = vsel %vm640_vm0, %v11077_v43, 0.0 }
 0x28f   : > { %8943 = vmatmul.msk.f32.gmra.mxu2 %vm640_vm0, %v11571_v63  ;;  %v1069_v49 = vsel %vm1068_vm14, %v9621_v28, %v1065_v45  ;;  %v1385_v28 = vmul.f32 %v11296_v39, %v1350_v14 }
 0x290   : > { %v879_v26 = vsel %vm640_vm0, %v821_v30, 0.0  ;;  %v1326_v0 = vmul.f32 %v1069_v49, %v11260_v51  ;;  %v1319_v15 = vsel %vm1318_vm4, %v11525_v40, %v1315_v41  ;;  %v818_v51 = vmul.f32 %v11589_v56, %v11589_v56 }
 0x291   : > { %v866_v60 = vpop.xlane.xlu0 %865  ;;  %2562 = vadd.xlane.f32.xlu2 %v2561_v46  ;;  %880 = vadd.xlane.f32.xlu0 %v879_v26  ;;  %v11606_v36 = vadd.f32 %v11302_v58, %v1385_v28  ;;  %v1351_v33 = vmul.f32 %v1319_v15, %v11267_v13  ;;  %v756_v46 = vmul.f32 %v11139_v42, %v11357_v17  ;;  %v11659_v28 = vld [vmem:[%s16854_s9] ss:$0 sm:$0xff] }
 0x292   : > { %v944_v37 = vmul.f32 %v866_v60, %v11139_v42  ;;  %v1361_v1 = vmul.f32 %v11296_v39, %v1326_v0  ;;  %v870_v40 = vsel %vm640_vm0, %v818_v51, 0.0 }
 0x293   : > { %v1386_v52 = vmul.f32 %v11296_v39, %v1351_v33  ;;  %v11653_v60 = vsub.f32 %v11137_v34, %v756_v46 }
 0x294   : > { %v976_v2 = vadd.f32 1e-05, %v944_v37  ;;  %v1396_v57 = vadd.f32 %v11302_v58, %v1361_v1 }
 0x295   : > { %v11626_v31 = vadd.f32 %v11302_v58, %v1386_v52  ;;  %v820_v15 = vmul.f32 %v11653_v60, %v11653_v60 }
 0x296   : > { %9624 = vrsqrt.f32 %v976_v2  ;;  %8920 = vmatmul.msk.f32.gmra.mxu0 %vm640_vm0, %v1396_v57  ;;  %8952 = vmatmul.msk.f32.gmra.mxu1 %vm640_vm0, %v1396_v57  ;;  %vm1086_vm6 = vweird.f32 %v976_v2  ;;  %v2398_v57 = vsel %vm640_vm0, %v11109_v59, 0.0 }
 0x297   : > { %8944 = vmatmul.msk.f32.gmra.mxu2 %vm640_vm0, %v11606_v36 }
 0x299   : > { %v2379_v16 = vpop.xlane.xlu0 %2378  ;;  %871 = vadd.xlane.f32.xlu2 %v870_v40  ;;  %2393 = vadd.xlane.f32.xlu0 %v2392_v55  ;;  %v17117_v40 = vld [vmem:[#allocation38_spill] sm:$0xff]  ;;  %v17118_v55 = vld [vmem:[#allocation40_spill] sm:$0xff] }
 0x29a   : > { %v2470_v13 = vmul.f32 %v2379_v16, %v11139_v42  ;;  %v2389_v38 = vsel %vm640_vm0, %v17117_v40, 0.0  ;;  %v2401_v52 = vsel %vm640_vm0, %v17118_v55, 0.0 }
 0x29c   : > { %v9625_v21 = vpop.eup %9624  ;;  %v11622_v61 = vsub.f32 %v11061_v35, %v2470_v13  ;;  %v11635_v35 = vsub.f32 %v11037_v23, %v2467_v7 }
 0x29d   : > { %v1081_v12 = vmul.f32 %v9625_v21, %v976_v2  ;;  %vm1087_vm5 = vweird.f32 %v9625_v21  ;;  %v876_v2 = vsel %vm640_vm0, %v820_v15, 0.0 }
 0x29e   : > { %8921 = vmatmul.msk.f32.gmra.mxu0 %vm640_vm0, %v1397_v5  ;;  %8953 = vmatmul.msk.f32.gmra.mxu1 %vm640_vm0, %v1397_v5  ;;  %v2534_v11 = vmul.f32 %v11622_v61, %v11622_v61  ;;  %v2531_v23 = vmul.f32 %v11635_v35, %v11635_v35  ;;  %vm1088_vm7 = vmor %vm1086_vm6, %vm1087_vm5 }
 0x29f   : > { %v1082_v9 = vmul.f32 %v9625_v21, %v1081_v12  ;;  %8945 = vmatmul.msk.f32.gmra.mxu2 %vm640_vm0, %v11626_v31 }
 0x2a0   : > { %v2576_v53 = vsel %vm640_vm0, %v2534_v11, 0.0  ;;  %v2567_v17 = vsel %vm640_vm0, %v2531_v23, 0.0 }
 0x2a1   : > { %v1083_v45 = vmul.f32 0.5, %v1082_v9  ;;  %2384 = vadd.xlane.f32.xlu2 %v2383_v6  ;;  %2577 = vadd.xlane.f32.xlu0 %v2576_v53 }
 0x2a2   : > { %v688_v14 = vpop.xlane.xlu0 %687 }
 0x2a3   : > { %v1084_v41 = vsub.f32 1.5, %v1083_v45  ;;  %v759_v30 = vmul.f32 %v11139_v42, %v688_v14  ;;  %v17122_v14 = vld [vmem:[#allocation37_spill] sm:$0xff] }
 0x2a5   : > { %v1085_v49 = vmul.f32 %v9625_v21, %v1084_v41  ;;  %v11646_v32 = vsub.f32 %v11163_v10, %v759_v30  ;;  %v17123_v30 = vld [vmem:[#allocation39_spill] sm:$0xff] }
 0x2a6   : > { %v2395_v46 = vsel %vm640_vm0, %v17123_v30, 0.0 }
 0x2a7   : > { %8970 = vmatmul.msk.f32.vlgmr.msrb.gmra.mxu2 %vm640_vm0, %v11370_v22  ;;  %v823_v26 = vmul.f32 %v11646_v32, %v11646_v32  ;;  %v1089_v0 = vsel %vm1088_vm7, %v9625_v21, %v1085_v49 }
 0x2a8   : > { %v1328_v10 = vmul.f32 %v1089_v0, %v11282_v3  ;;  %v2376_v3 = vpop.xlane.xlu2 %2375 }
 0x2a9   : > { %v885_v18 = vsel %vm640_vm0, %v823_v26, 0.0  ;;  %2568 = vadd.xlane.f32.xlu2 %v2567_v17  ;;  %v2469_v24 = vmul.f32 %v2376_v3, %v11139_v42 }
 0x2aa   : > { %886 = vadd.xlane.f32.xlu0 %v885_v18  ;;  %v1363_v22 = vmul.f32 %v11296_v39, %v1328_v10  ;;  %v2382_v6 = vpop.xlane.xlu0 %2381 }
 0x2ab   : > { %v1664_v37 = vpop.f32.mrf.mxu1  ;;  %v2471_v45 = vmul.f32 %v2382_v6, %v11139_v42 }
 0x2ac   : > { %v11665_v34 = vadd.f32 %v11659_v28, %v1664_v37  ;;  %v1398_v1 = vadd.f32 %v11302_v58, %v1363_v22 }
 0x2ad   : > { %v11722_v41 = vsub.f32 %v17122_v14, %v2471_v45 }
 0x2ae   : > { %17115 = vst [vmem:[#allocation44_spill] sm:$0xff] %v11665_v34  ;;  %8922 = vmatmul.msk.f32.gmra.mxu0 %vm640_vm0, %v1398_v1  ;;  %8954 = vmatmul.msk.f32.gmra.mxu1 %vm640_vm0, %v1398_v1 }
 0x2af   : > { %1827 = vst.msk [vmem:[#allocation3] sm:$0xff] %vm1826_vm8, %v11665_v34  ;;  %8971 = vmatmul.msk.f32.gmra.mxu2 %vm640_vm0, %v11394_v8  ;;  %v11688_v8 = vsub.f32 %v11049_v29, %v2469_v24  ;;  %v17120_v29 = vld [vmem:[#allocation43_spill] sm:$0xff]  ;;  %v2535_v23 = vmul.f32 %v11722_v41, %v11722_v41 }
 0x2b0   : > { %v685_v16 = vpop.xlane.xlu2 %684 }
 0x2b1   : > { %877 = vadd.xlane.f32.xlu2 %v876_v2  ;;  %v758_v21 = vmul.f32 %v11139_v42, %v685_v16  ;;  %v3146_v16 = vld [vmem:[#allocation9 + $0x18] sm:$0xff] }
 0x2b2   : > { %2399 = vadd.xlane.f32.xlu0 %v2398_v57  ;;  %3259 = vmatpush.msra.mxu2 %v3146_v16 }
 0x2b3   : > { %v1667_v51 = vpop.f32.mrf.mxu1  ;;  %v11705_v5 = vsub.f32 %v17120_v29, %v758_v21  ;;  %v3145_v21 = vld [vmem:[#allocation9 + $0x10] sm:$0xff]  ;;  %v17130_v29 = vld [vmem:[#allocation41_spill] sm:$0xff] }
 0x2b4   : > { %v11681_v33 = vadd.f32 %v11659_v28, %v1667_v51  ;;  %3260 = vmatpush.msra.mxu2 %v3145_v21 }
 0x2b5   : > { %v822_v53 = vmul.f32 %v11705_v5, %v11705_v5 }
 0x2b6   : > { %17116 = vst [vmem:[#allocation45_spill] sm:$0xff] %v11681_v33 }
 0x2b7   : > { %1828 = vst.msk [vmem:[#allocation3 + $0x8] sm:$0xff] %vm1826_vm8, %v11681_v33  ;;  %8972 = vmatmul.msk.f32.gmra.mxu2 %vm640_vm0, %v11451_v20  ;;  %v2533_v20 = vmul.f32 %v11688_v8, %v11688_v8 }
 0x2b9   : > { %2390 = vadd.xlane.f32.xlu2 %v2389_v38  ;;  %v2573_v12 = vsel %vm640_vm0, %v2533_v20, 0.0 }
 0x2ba   : > { %2402 = vadd.xlane.f32.xlu0 %v2401_v52 }
 0x2bb   : > { %v1670_v13 = vpop.f32.mrf.mxu1 }
 0x2bc   : > { %v11696_v7 = vadd.f32 %v11659_v28, %v1670_v13 }
 0x2be   : > { %17119 = vst [vmem:[#allocation38_spill] sm:$0xff] %v11696_v7 }
 0x2bf   : > { %1829 = vst.msk [vmem:[#allocation3 + $0x10] sm:$0xff] %vm1826_vm8, %v11696_v7  ;;  %8973 = vmatmul.msk.f32.gmra.mxu2 %vm640_vm0, %v11491_v44  ;;  %v882_v44 = vsel %vm640_vm0, %v822_v53, 0.0 }
 0x2c1   : > { %2574 = vadd.xlane.f32.xlu2 %v2573_v12  ;;  %v2404_v12 = vsel %vm640_vm0, %v17130_v29, 0.0 }
 0x2c3   : > { %v1673_v11 = vpop.f32.mrf.mxu1 }
 0x2c4   : > { %v11709_v9 = vadd.f32 %v11659_v28, %v1673_v11 }
 0x2c6   : > { %17121 = vst [vmem:[#allocation40_spill] sm:$0xff] %v11709_v9 }
 0x2c7   : > { %1830 = vst.msk [vmem:[#allocation3 + $0x18] sm:$0xff] %vm1826_vm8, %v11709_v9  ;;  %8974 = vmatmul.msk.f32.gmra.mxu2 %vm640_vm0, %v11530_v19  ;;  %v2579_v19 = vsel %vm640_vm0, %v2535_v23, 0.0 }
 0x2c9   : > { %883 = vadd.xlane.f32.xlu2 %v882_v44  ;;  %v3144_v44 = vld [vmem:[#allocation9 + $0x8] sm:$0xff] }
 0x2ca   : > { %3261 = vmatpush.msra.mxu2 %v3144_v44 }
 0x2cf   : > { %8975 = vmatmul.msk.f32.gmra.mxu2 %vm640_vm0, %v11571_v63 }
 0x2d1   : > { %2396 = vadd.xlane.f32.xlu2 %v2395_v46  ;;  %v3143_v46 = vld [vmem:[#allocation9] sm:$0xff] }
 0x2d2   : > { %3262 = vmatpush.msra.mxu2 %v3143_v46 }
 0x2d7   : > { %8976 = vmatmul.msk.f32.gmra.mxu2 %vm640_vm0, %v11606_v36 }
 0x2d9   : > { %2580 = vadd.xlane.f32.xlu2 %v2579_v19 }
 0x2df   : > { %8977 = vmatmul.msk.f32.gmra.mxu2 %vm640_vm0, %v11626_v31 }
 0x2e4   : > { %v2566_v63 = vpop.xlane.xlu0 %2565 }
 0x2e5   : > { %v2658_v22 = vmul.f32 %v2566_v63, %v11139_v42 }
 0x2e7   : > { %v11751_v3 = vadd.f32 1e-05, %v2658_v22 }
 0x2e9   : > { %v11733_v49 = vpop.f32.mrf.mxu2  ;;  %9626 = vrsqrt.f32 %v11751_v3  ;;  %vm2737_vm1 = vweird.f32 %v11751_v3 }
 0x2ea   : > { %17124 = vst [vmem:[#allocation43_spill] sm:$0xff] %v11733_v49 }
 0x2ec   : > { %v875_v26 = vpop.xlane.xlu0 %874 }
 0x2ef   : > { %v11769_v6 = vpop.eup %9626 }
 0x2f0   : > { %v2732_v19 = vmul.f32 %v11769_v6, %v11751_v3  ;;  %vm2738_vm14 = vweird.f32 %v11769_v6 }
 0x2f1   : > { %v11735_v0 = vpop.f32.mrf.mxu2  ;;  %vm11828_vm2 = vmor %vm2737_vm1, %vm2738_vm14 }
 0x2f2   : > { %17125 = vst [vmem:[#allocation37_spill] sm:$0xff] %v11735_v0 }
 0x2f3   : > { %v1676_v17 = vpop.f32.mrf.mxu1 }
 0x2f4   : > { %v11738_v10 = vadd.f32 %v11659_v28, %v1676_v17  ;;  %v2388_v18 = vpop.xlane.xlu0 %2387 }
 0x2f5   : > { %v2473_v36 = vmul.f32 %v2388_v18, %v11139_v42 }
 0x2f6   : > { %17126 = vst [vmem:[#allocation39_spill] sm:$0xff] %v11738_v10 }
 0x2f7   : > { %1831 = vst.msk [vmem:[#allocation3 + $0x20] sm:$0xff] %vm1826_vm8, %v11738_v10  ;;  %v11745_v31 = vsub.f32 %v11085_v47, %v2473_v36  ;;  %v947_v47 = vmul.f32 %v875_v26, %v11139_v42  ;;  %v17132_v36 = vld [vmem:[#allocation42_spill] sm:$0xff] }
 0x2f8   : > { %v2407_v22 = vsel %vm640_vm0, %v17132_v36, 0.0 }
 0x2f9   : > { %v2537_v1 = vmul.f32 %v11745_v31, %v11745_v31  ;;  %v11762_v52 = vadd.f32 1e-05, %v947_v47 }
 0x2fa   : > { %v11747_v37 = vpop.f32.mrf.mxu2 }
 0x2fb   : > { %17127 = vst [vmem:[#allocation46_spill] sm:$0xff] %v11747_v37  ;;  %v1679_v15 = vpop.f32.mrf.mxu1  ;;  %v2585_v57 = vsel %vm640_vm0, %v2537_v1, 0.0  ;;  %vm1116_vm7 = vweird.f32 %v11762_v52 }
 0x2fc   : > { %v11754_v2 = vadd.f32 %v11659_v28, %v1679_v15  ;;  %v869_v51 = vpop.xlane.xlu2 %868  ;;  %2586 = vadd.xlane.f32.xlu0 %v2585_v57  ;;  %v2572_v20 = vpop.xlane.xlu0 %2571  ;;  %v2733_v15 = vmul.f32 %v11769_v6, %v2732_v19 }
 0x2fd   : > { %v945_v24 = vmul.f32 %v869_v51, %v11139_v42 }
 0x2fe   : > { %17128 = vst [vmem:[#allocation47_spill] sm:$0xff] %v11754_v2  ;;  %v2734_v44 = vmul.f32 0.5, %v2733_v15 }
 0x2ff   : > { %1832 = vst.msk [vmem:[#allocation3 + $0x28] sm:$0xff] %vm1826_vm8, %v11754_v2  ;;  %v977_v38 = vadd.f32 1e-05, %v945_v24 }
 0x300   : > { %v2735_v15 = vsub.f32 1.5, %v2734_v44 }
 0x301   : > { %9628 = vrsqrt.f32 %v977_v38  ;;  %vm1096_vm10 = vweird.f32 %v977_v38 }
 0x302   : > { %v11764_v13 = vpop.f32.mrf.mxu2  ;;  %9630 = vrsqrt.f32 %v11762_v52 }
 0x303   : > { %17129 = vst [vmem:[#allocation48_spill] sm:$0xff] %v11764_v13 }
 0x304   : > { %v2563_v11 = vpop.xlane.xlu2 %2562  ;;  %2405 = vadd.xlane.f32.xlu0 %v2404_v12  ;;  %v881_v24 = vpop.xlane.xlu0 %880  ;;  %v2660_v12 = vmul.f32 %v2572_v20, %v11139_v42 }
 0x305   : > { %v2657_v53 = vmul.f32 %v2563_v11, %v11139_v42  ;;  %v949_v34 = vmul.f32 %v881_v24, %v11139_v42  ;;  %v2736_v24 = vmul.f32 %v11769_v6, %v2735_v15 }
 0x307   : > { %v9629_v45 = vpop.eup %9628  ;;  %v2689_v14 = vadd.f32 1e-05, %v2657_v53 }
 0x308   : > { %v1091_v23 = vmul.f32 %v9629_v45, %v977_v38  ;;  %v11776_v17 = vpop.eup %9630  ;;  %vm1097_vm9 = vweird.f32 %v9629_v45 }
 0x309   : > { %9632 = vrsqrt.f32 %v2689_v14  ;;  %v1111_v16 = vmul.f32 %v11776_v17, %v11762_v52  ;;  %vm1098_vm11 = vmor %vm1096_vm10, %vm1097_vm9  ;;  %vm2727_vm13 = vweird.f32 %v2689_v14  ;;  %vm1117_vm4 = vweird.f32 %v11776_v17 }
 0x30a   : > { %v1092_v63 = vmul.f32 %v9629_v45, %v1091_v23  ;;  %v11774_v26 = vpop.f32.mrf.mxu2  ;;  %vm1118_vm9 = vmor %vm1116_vm7, %vm1117_vm4 }
 0x30b   : > { %17131 = vst [vmem:[#allocation41_spill] sm:$0xff] %v11774_v26 }
 0x30c   : > { %v1093_v18 = vmul.f32 0.5, %v1092_v63  ;;  %v872_v1 = vpop.xlane.xlu2 %871  ;;  %2408 = vadd.xlane.f32.xlu0 %v2407_v22  ;;  %v1112_v63 = vmul.f32 %v11776_v17, %v1111_v16 }
 0x30d   : > { %v946_v57 = vmul.f32 %v872_v1, %v11139_v42  ;;  %v11792_v1 = vadd.f32 1e-05, %v2660_v12 }
 0x30e   : > { %v1094_v51 = vsub.f32 1.5, %v1093_v18  ;;  %v1113_v16 = vmul.f32 0.5, %v1112_v63 }
 0x30f   : > { %v9633_v47 = vpop.eup %9632  ;;  %v11784_v21 = vadd.f32 1e-05, %v946_v57  ;;  %vm2757_vm14 = vweird.f32 %v11792_v1 }
 0x310   : > { %v1095_v11 = vmul.f32 %v9629_v45, %v1094_v51  ;;  %v2722_v53 = vmul.f32 %v9633_v47, %v2689_v14  ;;  %vm2728_vm12 = vweird.f32 %v9633_v47 }
 0x311   : > { %9634 = vrsqrt.f32 %v11784_v21  ;;  %vm2729_vm15 = vmor %vm2727_vm13, %vm2728_vm12  ;;  %vm1106_vm5 = vweird.f32 %v11784_v21 }
 0x312   : > { %v2723_v46 = vmul.f32 %v9633_v47, %v2722_v53  ;;  %v11788_v23 = vpop.f32.mrf.mxu2  ;;  %v1099_v19 = vsel %vm1098_vm11, %v9629_v45, %v1095_v11  ;;  %9636 = vrsqrt.f32 %v11792_v1 }
 0x313   : > { %17133 = vst [vmem:[#allocation42_spill] sm:$0xff] %v11788_v23  ;;  %v1682_v18 = vpop.f32.mrf.mxu1  ;;  %v1329_v22 = vmul.f32 %v1099_v19, %v11523_v25 }
 0x314   : > { %v2724_v57 = vmul.f32 0.5, %v2723_v46  ;;  %v11795_v20 = vadd.f32 %v11659_v28, %v1682_v18  ;;  %v2385_v38 = vpop.xlane.xlu2 %2384  ;;  %v11807_v46 = vpop.xlane.xlu0 %2393  ;;  %v11824_v18 = vld [vmem:[%s16847_s2] ss:$0 sm:$0xff] }
 0x315   : > { %v2472_v51 = vmul.f32 %v2385_v38, %v11139_v42  ;;  %v1364_v53 = vmul.f32 %v11296_v39, %v1329_v22 }
 0x316   : > { %17134 = vst [vmem:[#allocation49_spill] sm:$0xff] %v11795_v20  ;;  %v2725_v45 = vsub.f32 1.5, %v2724_v57 }
 0x317   : > { %1833 = vst.msk [vmem:[#allocation3 + $0x30] sm:$0xff] %vm1826_vm8, %v11795_v20  ;;  %v9635_v25 = vpop.eup %9634  ;;  %v11803_v12 = vsub.f32 %v11077_v43, %v2472_v51  ;;  %v1399_v11 = vadd.f32 %v11302_v58, %v1364_v53  ;;  %v11816_v58 = vadd.f32 1e-05, %v949_v34  ;;  %v1114_v34 = vsub.f32 1.5, %v1113_v16 }
 0x318   : > { %v2726_v44 = vmul.f32 %v9633_v47, %v2725_v45  ;;  %v1101_v39 = vmul.f32 %v9635_v25, %v11784_v21  ;;  %v11845_v16 = vpop.eup %9636  ;;  %vm1107_vm3 = vweird.f32 %v9635_v25 }
 0x319   : > { %8923 = vmatmul.msk.f32.gmra.mxu0 %vm640_vm0, %v1399_v11  ;;  %8955 = vmatmul.msk.f32.gmra.mxu1 %vm640_vm0, %v1399_v11  ;;  %v2536_v43 = vmul.f32 %v11803_v12, %v11803_v12  ;;  %v2740_v11 = vsel %vm11828_vm2, %v11769_v6, %v2736_v24  ;;  %9638 = vrsqrt.f32 %v11816_v58  ;;  %v2752_v24 = vmul.f32 %v11845_v16, %v11792_v1  ;;  %vm1108_vm6 = vmor %vm1106_vm5, %vm1107_vm3 }
 0x31a   : > { %v2730_v19 = vsel %vm2729_vm15, %v9633_v47, %v2726_v44  ;;  %v1102_v14 = vmul.f32 %v9635_v25, %v1101_v39  ;;  %v11818_v63 = vpop.f32.mrf.mxu2  ;;  %v3042_v6 = vmul.f32 %v2740_v11, %v11389_v50  ;;  %vm2758_vm12 = vweird.f32 %v11845_v16 }
 0x31b   : > { %17135 = vst [vmem:[#allocation50_spill] sm:$0xff] %v11818_v63  ;;  %v3041_v22 = vmul.f32 %v2730_v19, %v11541_v4  ;;  %v1685_v57 = vpop.f32.mrf.mxu1  ;;  %v2582_v38 = vsel %vm640_vm0, %v2536_v43, 0.0  ;;  %v11840_v4 = vld [vmem:[%s16848_s3] ss:$0 sm:$0xff]  ;;  %v1115_v19 = vmul.f32 %v11776_v17, %v1114_v34  ;;  %vm11939_vm15 = vmor %vm2757_vm14, %vm2758_vm12  ;;  %vm1136_vm5 = vweird.f32 %v11816_v58 }
 0x31c   : > { %v1103_v47 = vmul.f32 0.5, %v1102_v14  ;;  %v11833_v51 = vadd.f32 %v11659_v28, %v1685_v57  ;;  %2583 = vadd.xlane.f32.xlu2 %v2582_v38  ;;  %v2569_v3 = vpop.xlane.xlu2 %2568  ;;  %v3077_v34 = vmul.f32 %v11824_v18, %v3042_v6 }
 0x31d   : > { %v3076_v53 = vmul.f32 %v11824_v18, %v3041_v22  ;;  %v2659_v45 = vmul.f32 %v2569_v3, %v11139_v42  ;;  %v2578_v22 = vpop.xlane.xlu0 %2577  ;;  %v2753_v3 = vmul.f32 %v11845_v16, %v2752_v24 }
 0x31e   : > { %17138 = vst [vmem:[#allocation51_spill] sm:$0xff] %v11833_v51  ;;  %v1104_v44 = vsub.f32 1.5, %v1103_v47  ;;  %v1119_v47 = vsel %vm1118_vm9, %v11776_v17, %v1115_v19  ;;  %v11886_v17 = vld [vmem:[%s16848_s3] ss:$0 sm:$0xff]  ;;  %v2662_v19 = vmul.f32 %v2578_v22, %v11139_v42  ;;  %v3112_v6 = vadd.f32 %v11840_v4, %v3077_v34 }
 0x31f   : > { %1834 = vst.msk [vmem:[#allocation3 + $0x38] sm:$0xff] %vm1826_vm8, %v11833_v51  ;;  %v11851_v39 = vadd.f32 1e-05, %v2659_v45  ;;  %v3111_v43 = vadd.f32 %v11840_v4, %v3076_v53  ;;  %v11867_v50 = vpop.eup %9638  ;;  %v2754_v24 = vmul.f32 0.5, %v2753_v3 }
 0x320   : > { %v1105_v14 = vmul.f32 %v9635_v25, %v1104_v44  ;;  %v11902_v34 = vadd.f32 1e-05, %v2662_v19  ;;  %vm1137_vm1 = vweird.f32 %v11867_v50 }
 0x321   : > { %9640 = vrsqrt.f32 %v11851_v39  ;;  %8978 = vmatmul.msk.f32.vlgmr.msra.gmra.mxu2 %vm640_vm0, %v3111_v43  ;;  %v1331_v43 = vmul.f32 %v1119_v47, %v11442_v48  ;;  %vm2747_vm11 = vweird.f32 %v11851_v39 }
 0x322   : > { %v11862_v57 = vpop.f32.mrf.mxu2  ;;  %v1109_v38 = vsel %vm1108_vm6, %v9635_v25, %v1105_v14  ;;  %v11876_v25 = vld [vmem:[%s16847_s2] ss:$0 sm:$0xff]  ;;  %vm11969_vm6 = vmor %vm1136_vm5, %vm1137_vm1  ;;  %vm2777_vm12 = vweird.f32 %v11902_v34 }
 0x323   : > { %17139 = vst [vmem:[#allocation52_spill] sm:$0xff] %v11862_v57  ;;  %v1330_v21 = vmul.f32 %v1109_v38, %v11589_v56  ;;  %v1131_v56 = vmul.f32 %v11867_v50, %v11816_v58  ;;  %v1366_v47 = vmul.f32 %v11876_v25, %v1331_v43 }
 0x324   : > { %v878_v15 = vpop.xlane.xlu2 %877 }
 0x325   : > { %v948_v52 = vmul.f32 %v878_v15, %v11139_v42  ;;  %v1365_v53 = vmul.f32 %v11876_v25, %v1330_v21  ;;  %v1132_v15 = vmul.f32 %v11867_v50, %v1131_v56  ;;  %v887_v3 = vpop.xlane.xlu0 %886 }
 0x327   : > { %v9641_v45 = vpop.eup %9640  ;;  %v11881_v11 = vadd.f32 1e-05, %v948_v52  ;;  %v1400_v44 = vadd.f32 %v11886_v17, %v1365_v53  ;;  %v1133_v19 = vmul.f32 0.5, %v1132_v15 }
 0x328   : > { %v2742_v14 = vmul.f32 %v9641_v45, %v11851_v39  ;;  %vm2748_vm10 = vweird.f32 %v9641_v45 }
 0x329   : > { %9642 = vrsqrt.f32 %v11881_v11  ;;  %8924 = vmatmul.msk.f32.gmra.mxu0 %vm640_vm0, %v1400_v44  ;;  %8956 = vmatmul.msk.f32.gmra.mxu1 %vm640_vm0, %v1400_v44  ;;  %vm2749_vm13 = vmor %vm2747_vm11, %vm2748_vm10  ;;  %v1134_v1 = vsub.f32 1.5, %v1133_v19  ;;  %vm1126_vm3 = vweird.f32 %v11881_v11 }
 0x32a   : > { %v2743_v38 = vmul.f32 %v9641_v45, %v2742_v14  ;;  %v1736_v21 = vpop.f32.mrf.mxu2  ;;  %8979 = vmatmul.msk.f32.gmra.mxu2 %vm640_vm0, %v3112_v6  ;;  %v2755_v14 = vsub.f32 1.5, %v2754_v24  ;;  %v2475_v6 = vmul.f32 %v11807_v46, %v11139_v42  ;;  %v1401_v24 = vadd.f32 %v11886_v17, %v1366_v47 }
 0x32b   : > { %v11899_v48 = vadd.f32 %v11659_v28, %v1736_v21  ;;  %v1688_v22 = vpop.f32.mrf.mxu1  ;;  %9644 = vrsqrt.f32 %v11902_v34 }
 0x32c   : > { %v2744_v52 = vmul.f32 0.5, %v2743_v38  ;;  %v11905_v53 = vadd.f32 %v11659_v28, %v1688_v22  ;;  %v2391_v44 = vpop.xlane.xlu2 %2390  ;;  %v951_v38 = vmul.f32 %v887_v3, %v11139_v42  ;;  %v11930_v15 = vsub.f32 %v11099_v54, %v2475_v6 }
 0x32d   : > { %17140 = vst [vmem:[#allocation53_spill] sm:$0xff] %v11899_v48  ;;  %v2474_v56 = vmul.f32 %v2391_v44, %v11139_v42 }
 0x32e   : > { %17141 = vst [vmem:[#allocation54_spill] sm:$0xff] %v11905_v53  ;;  %v2745_v21 = vsub.f32 1.5, %v2744_v52  ;;  %v2756_v52 = vmul.f32 %v11845_v16, %v2755_v14 }
 0x32f   : > { %1851 = vst.msk [vmem:[#allocation3 + $0xc0] sm:$0xff] %vm1826_vm8, %v11899_v48  ;;  %v9643_v43 = vpop.eup %9642  ;;  %v11916_v22 = vsub.f32 %v17117_v40, %v2474_v56  ;;  %v11932_v56 = vadd.f32 1e-05, %v951_v38 }
 0x330   : > { %1835 = vst.msk [vmem:[#allocation3 + $0x40] sm:$0xff] %vm1826_vm8, %v11905_v53  ;;  %v2746_v44 = vmul.f32 %v9641_v45, %v2745_v21  ;;  %v1121_v46 = vmul.f32 %v9643_v43, %v11881_v11  ;;  %v2760_v38 = vsel %vm11939_vm15, %v11845_v16, %v2756_v52  ;;  %vm1127_vm2 = vweird.f32 %v9643_v43 }
 0x331   : > { %8925 = vmatmul.msk.f32.gmra.mxu0 %vm640_vm0, %v1401_v24  ;;  %8957 = vmatmul.msk.f32.gmra.mxu1 %vm640_vm0, %v1401_v24  ;;  %v2538_v40 = vmul.f32 %v11916_v22, %v11916_v22  ;;  %9646 = vrsqrt.f32 %v11932_v56  ;;  %v3044_v9 = vmul.f32 %v2760_v38, %v11520_v62  ;;  %vm1128_vm4 = vmor %vm1126_vm3, %vm1127_vm2  ;;  %vm1156_vm3 = vweird.f32 %v11932_v56 }
 0x332   : > { %v1122_v39 = vmul.f32 %v9643_v43, %v1121_v46  ;;  %v1739_v47 = vpop.f32.mrf.mxu2  ;;  %v2750_v3 = vsel %vm2749_vm13, %v9641_v45, %v2746_v44 }
 0x333   : > { %v11935_v14 = vadd.f32 %v11659_v28, %v1739_v47  ;;  %v2588_v21 = vsel %vm640_vm0, %v2538_v40, 0.0  ;;  %v3043_v24 = vmul.f32 %v2750_v3, %v11635_v35  ;;  %v11950_v35 = vpop.eup %9644  ;;  %v2539_v40 = vmul.f32 %v11930_v15, %v11930_v15 }
 0x334   : > { %v1123_v33 = vmul.f32 0.5, %v1122_v39  ;;  %2589 = vadd.xlane.f32.xlu1 %v2588_v21  ;;  %v2575_v54 = vpop.xlane.xlu2 %2574  ;;  %v1135_v39 = vmul.f32 %v11867_v50, %v1134_v1  ;;  %v3079_v1 = vmul.f32 %v11824_v18, %v3044_v9  ;;  %v2400_v9 = vpop.xlane.xlu0 %2399  ;;  %vm2778_vm10 = vweird.f32 %v11950_v35 }
 0x335   : > { %17142 = vst [vmem:[#allocation55_spill] sm:$0xff] %v11935_v14  ;;  %v2661_v45 = vmul.f32 %v2575_v54, %v11139_v42  ;;  %v3078_v6 = vmul.f32 %v11824_v18, %v3043_v24  ;;  %v2591_v11 = vsel %vm640_vm0, %v2539_v40, 0.0  ;;  %vm12033_vm13 = vmor %vm2777_vm12, %vm2778_vm10 }
 0x336   : > { %1852 = vst.msk [vmem:[#allocation3 + $0xc8] sm:$0xff] %vm1826_vm8, %v11935_v14  ;;  %v1124_v44 = vsub.f32 1.5, %v1123_v33  ;;  %v2772_v33 = vmul.f32 %v11950_v35, %v11902_v34  ;;  %v1139_v58 = vsel %vm11969_vm6, %v11867_v50, %v1135_v39  ;;  %v3114_v39 = vadd.f32 %v11840_v4, %v3079_v1 }
 0x337   : > { %v11954_v19 = vadd.f32 1e-05, %v2661_v45  ;;  %v3113_v46 = vadd.f32 %v11840_v4, %v3078_v6 }
 0x338   : > { %v1125_v47 = vmul.f32 %v9643_v43, %v1124_v44  ;;  %v2773_v54 = vmul.f32 %v11950_v35, %v2772_v33 }
 0x339   : > { %9648 = vrsqrt.f32 %v11954_v19  ;;  %8980 = vmatmul.msk.f32.gmra.mxu2 %vm640_vm0, %v3113_v46  ;;  %v1333_v46 = vmul.f32 %v1139_v58, %v11567_v27  ;;  %v2288_v27 = vld [vmem:[%s10987_s25 + $0x8] sm:$0xff]  ;;  %vm2767_vm9 = vweird.f32 %v11954_v19 }
 0x33a   : > { %v1742_v16 = vpop.f32.mrf.mxu2  ;;  %v1129_v52 = vsel %vm1128_vm4, %v9643_v43, %v1125_v47  ;;  %v11982_v43 = vpop.eup %9646  ;;  %v2774_v47 = vmul.f32 0.5, %v2773_v54 }
 0x33b   : > { %v11974_v62 = vadd.f32 %v11659_v28, %v1742_v16  ;;  %v1332_v21 = vmul.f32 %v1129_v52, %v11653_v60  ;;  %v1151_v50 = vmul.f32 %v11982_v43, %v11932_v56  ;;  %v1368_v3 = vmul.f32 %v11876_v25, %v1333_v46 }
 0x33c   : > { %2592 = vadd.xlane.f32.xlu1 %v2591_v11  ;;  %v884_v24 = vpop.xlane.xlu2 %883  ;;  %v2775_v1 = vsub.f32 1.5, %v2774_v47  ;;  %v2403_v34 = vpop.xlane.xlu0 %2402  ;;  %vm1157_vm14 = vweird.f32 %v11982_v43 }
 0x33d   : > { %17147 = vst [vmem:[#allocation56_spill] sm:$0xff] %v11974_v62  ;;  %v950_v45 = vmul.f32 %v884_v24, %v11139_v42  ;;  %v1367_v6 = vmul.f32 %v11876_v25, %v1332_v21  ;;  %v1152_v11 = vmul.f32 %v11982_v43, %v1151_v50  ;;  %v1403_v46 = vadd.f32 %v11886_v17, %v1368_v3  ;;  %vm1158_vm4 = vmor %vm1156_vm3, %vm1157_vm14 }
 0x33e   : > { %1853 = vst.msk [vmem:[#allocation3 + $0xd0] sm:$0xff] %vm1826_vm8, %v11974_v62  ;;  %v2776_v47 = vmul.f32 %v11950_v35, %v2775_v1  ;;  %v17174_v62 = vld [vmem:[#allocation35_spill] sm:$0xff] }
 0x33f   : > { %v9649_v60 = vpop.eup %9648  ;;  %v11989_v38 = vadd.f32 1e-05, %v950_v45  ;;  %v1402_v44 = vadd.f32 %v11886_v17, %v1367_v6  ;;  %v2477_v6 = vmul.f32 %v2400_v9, %v11139_v42  ;;  %v1153_v50 = vmul.f32 0.5, %v1152_v11 }
 0x340   : > { %v2762_v40 = vmul.f32 %v9649_v60, %v11954_v19  ;;  %vm2768_vm7 = vweird.f32 %v9649_v60 }
 0x341   : > { %9650 = vrsqrt.f32 %v11989_v38  ;;  %8926 = vmatmul.msk.f32.gmra.mxu0 %vm640_vm0, %v1402_v44  ;;  %8958 = vmatmul.msk.f32.gmra.mxu1 %vm640_vm0, %v1402_v44  ;;  %vm2769_vm11 = vmor %vm2767_vm9, %vm2768_vm7  ;;  %v1154_v1 = vsub.f32 1.5, %v1153_v50  ;;  %vm1146_vm1 = vweird.f32 %v11989_v38 }
 0x342   : > { %v2763_v33 = vmul.f32 %v9649_v60, %v2762_v40  ;;  %v1745_v16 = vpop.f32.mrf.mxu2  ;;  %8981 = vmatmul.msk.f32.gmra.mxu2 %vm640_vm0, %v3114_v39 }
 0x343   : > { %v12003_v52 = vadd.f32 %v11659_v28, %v1745_v16  ;;  %v2290_v16 = vld [vmem:[%s10987_s25 + $0x18] sm:$0xff] }
 0x344   : > { %v2764_v21 = vmul.f32 0.5, %v2763_v33  ;;  %v2397_v24 = vpop.xlane.xlu2 %2396 }
 0x345   : > { %17148 = vst [vmem:[#allocation57_spill] sm:$0xff] %v12003_v52  ;;  %v2476_v58 = vmul.f32 %v2397_v24, %v11139_v42  ;;  %2327 = vxpose.xlu2.b32.start [1/4] (short) %v2288_v27, 128  ;;  %v12026_v27 = vsub.f32 %v11109_v59, %v2477_v6 }
 0x346   : > { %1854 = vst.msk [vmem:[#allocation3 + $0xd8] sm:$0xff] %vm1826_vm8, %v12003_v52  ;;  %v2765_v54 = vsub.f32 1.5, %v2764_v21 }
 0x347   : > { %v9651_v45 = vpop.eup %9650  ;;  %v12012_v44 = vsub.f32 %v17123_v30, %v2476_v58 }
 0x348   : > { %v2766_v40 = vmul.f32 %v9649_v60, %v2765_v54  ;;  %v1141_v39 = vmul.f32 %v9651_v45, %v11989_v38  ;;  %vm1147_vm15 = vweird.f32 %v9651_v45 }
 0x349   : > { %8927 = vmatmul.msk.f32.gmra.mxu0 %vm640_vm0, %v1403_v46  ;;  %8959 = vmatmul.msk.f32.gmra.mxu1 %vm640_vm0, %v1403_v46  ;;  %v2540_v30 = vmul.f32 %v12012_v44, %v12012_v44  ;;  %v2478_v46 = vmul.f32 %v2403_v34, %v11139_v42  ;;  %vm1148_vm2 = vmor %vm1146_vm1, %vm1147_vm15 }
 0x34a   : > { %v1142_v9 = vmul.f32 %v9651_v45, %v1141_v39  ;;  %v1748_v33 = vpop.f32.mrf.mxu2  ;;  %v2770_v19 = vsel %vm2769_vm11, %v9649_v60, %v2766_v40  ;;  %v2541_v39 = vmul.f32 %v12026_v27, %v12026_v27 }
 0x34b   : > { %v12029_v3 = vadd.f32 %v11659_v28, %v1748_v33  ;;  %v2594_v11 = vsel %vm640_vm0, %v2540_v30, 0.0  ;;  %v3045_v21 = vmul.f32 %v2770_v19, %v11688_v8  ;;  %v2780_v8 = vsel %vm12033_vm13, %v11950_v35, %v2776_v47  ;;  %v2292_v33 = vld [vmem:[%s10987_s25 + $0x28] sm:$0xff] }
 0x34c   : > { %v1143_v58 = vmul.f32 0.5, %v1142_v9  ;;  %2595 = vadd.xlane.f32.xlu1 %v2594_v11  ;;  %v2581_v54 = vpop.xlane.xlu2 %2580  ;;  %v1155_v30 = vmul.f32 %v11982_v43, %v1154_v1  ;;  %v3046_v35 = vmul.f32 %v2780_v8, %v11622_v61  ;;  %v12058_v19 = vsub.f32 %v17118_v55, %v2478_v46 }
 0x34d   : > { %17149 = vst [vmem:[#allocation58_spill] sm:$0xff] %v12029_v3  ;;  %v2663_v59 = vmul.f32 %v2581_v54, %v11139_v42  ;;  %2328 = vxpose.xlu2.b32.cont [2/4] (short) %v2290_v16, 128  ;;  %v3080_v60 = vmul.f32 %v11824_v18, %v3045_v21  ;;  %v2597_v61 = vsel %vm640_vm0, %v2541_v39, 0.0 }
 0x34e   : > { %1855 = vst.msk [vmem:[#allocation3 + $0xe0] sm:$0xff] %vm1826_vm8, %v12029_v3  ;;  %v1144_v6 = vsub.f32 1.5, %v1143_v58  ;;  %v3081_v21 = vmul.f32 %v11824_v18, %v3046_v35  ;;  %v1159_v56 = vsel %vm1158_vm4, %v11982_v43, %v1155_v30  ;;  %v2542_v1 = vmul.f32 %v12058_v19, %v12058_v19 }
 0x34f   : > { %v2695_v50 = vadd.f32 1e-05, %v2663_v59  ;;  %v3115_v40 = vadd.f32 %v11840_v4, %v3080_v60  ;;  %v2294_v59 = vld [vmem:[%s10987_s25 + $0x38] sm:$0xff]  ;;  %s10693_s25 = sshra.s32 %s8744_s21, 4  ;;  %s10694_s25 = int_to_ptr.hbm [resolvable:$true] %s10693_s25 }
 0x350   : > { %v1145_v9 = vmul.f32 %v9651_v45, %v1144_v6  ;;  %v3116_v58 = vadd.f32 %v11840_v4, %v3081_v21  ;;  %v2600_v8 = vsel %vm640_vm0, %v2542_v1, 0.0  ;;  %v4192_v21 = vld [vmem:[#allocation3 + $0xd8] sm:$0xff]  ;;  %s10695_s23 = scalar_lea.hbm %s10694_s25, 64  ;;  %p10700_p10 = scmp.lt.s32.totalorder %s10694_s25, %s17728_s15 }
 0x351   : > { %9652 = vrsqrt.f32 %v2695_v50  ;;  %8982 = vmatmul.msk.f32.gmra.mxu2 %vm640_vm0, %v3115_v40  ;;  %vm2787_vm6 = vweird.f32 %v2695_v50  ;;  %p10696_p1 = scmp.ne.s32.totalorder %s10694_s25, %s10695_s23  ;;  %p10701_p12 = scmp.lt.s32.totalorder %s10699_s29, %s10695_s23 }
 0x352   : > { %v1751_v47 = vpop.f32.mrf.mxu2  ;;  %v1149_v16 = vsel %vm1148_vm2, %v9651_v45, %v1145_v9 }
 0x353   : > { %v12061_v11 = vadd.f32 %v11659_v28, %v1751_v47  ;;  %v1334_v38 = vmul.f32 %v1149_v16, %v11705_v5  ;;  %v1335_v5 = vmul.f32 %v1159_v56, %v11646_v32  ;;  %p10697_p4 = pnand %p10696_p1, %p10955_p7  ;;  %p10702_p13 = por %p10701_p12, %p10700_p10 }
 0x354   : > { %2598 = vadd.xlane.f32.xlu1 %v2597_v61 }
 0x355   : > { %17152 = vst [vmem:[#allocation59_spill] sm:$0xff] %v12061_v11  ;;  %2329 = vxpose.xlu2.b32.cont [3/4] (short) %v2292_v33, 128  ;;  %v1369_v55 = vmul.f32 %v11876_v25, %v1334_v38  ;;  %v1370_v6 = vmul.f32 %v11876_v25, %v1335_v5  ;;  %v4193_v38 = vld [vmem:[#allocation3 + $0xe0] sm:$0xff]  ;;  %p10698_p8 = pneg %p10697_p4 }
 0x356   : > { %1856 = vst.msk [vmem:[#allocation3 + $0xe8] sm:$0xff] %vm1826_vm8, %v12061_v11 }
 0x357   : > { %v9653_v45 = vpop.eup %9652  ;;  %v1404_v24 = vadd.f32 %v11886_v17, %v1369_v55  ;;  %v1405_v40 = vadd.f32 %v11886_v17, %v1370_v6  ;;  %v4190_v55 = vld [vmem:[#allocation3 + $0xc8] sm:$0xff]  ;;  %p10703_p0 = pnand %p10702_p13, %p10698_p8 }
 0x358   : > { %v2782_v34 = vmul.f32 %v9653_v45, %v2695_v50  ;;  %vm2788_vm5 = vweird.f32 %v9653_v45 }
 0x359   : > { %8928 = vmatmul.msk.f32.gmra.mxu0 %vm640_vm0, %v1404_v24  ;;  %8960 = vmatmul.msk.f32.gmra.mxu1 %vm640_vm0, %v1404_v24  ;;  %vm2789_vm7 = vmor %vm2787_vm6, %vm2788_vm5  ;;  %v4189_v24 = vld [vmem:[#allocation3 + $0xc0] sm:$0xff] }
 0x35a   : > { %v2783_v43 = vmul.f32 %v9653_v45, %v2782_v34  ;;  %v1754_v54 = vpop.f32.mrf.mxu2  ;;  %8983 = vmatmul.msk.f32.gmra.mxu2 %vm640_vm0, %v3116_v58 }
 0x35b   : > { %v12080_v60 = vadd.f32 %v11659_v28, %v1754_v54  ;;  %v17155_v54 = vld [vmem:[#allocation29_spill] sm:$0xff] }
 0x35c   : > { %v2784_v32 = vmul.f32 0.5, %v2783_v43  ;;  %2601 = vadd.xlane.f32.xlu1 %v2600_v8  ;;  %v17156_v8 = vld [vmem:[#allocation30_spill] sm:$0xff] }
 0x35d   : > { %17153 = vst [vmem:[#allocation60_spill] sm:$0xff] %v12080_v60  ;;  %2330 = vxpose.xlu2.b32.end [4/4] (short) %v2294_v59, 128  ;;  %v4194_v61 = vld [vmem:[#allocation3 + $0xe8] sm:$0xff]  ;;  %v689_v59 = vsel %vm640_vm0, %v17155_v54, 0.0  ;;  %v692_v6 = vsel %vm640_vm0, %v17156_v8, 0.0 }
 0x35e   : > { %1857 = vst.msk [vmem:[#allocation3 + $0xf0] sm:$0xff] %vm1826_vm8, %v12080_v60  ;;  %v2785_v46 = vsub.f32 1.5, %v2784_v32 }
 0x360   : > { %v2786_v39 = vmul.f32 %v9653_v45, %v2785_v46 }
 0x361   : > { %8929 = vmatmul.msk.f32.gmra.mxu0 %vm640_vm0, %v1405_v40  ;;  %8961 = vmatmul.msk.f32.gmra.mxu1 %vm640_vm0, %v1405_v40 }
 0x362   : > { %v1757_v30 = vpop.f32.mrf.mxu2  ;;  %v2790_v9 = vsel %vm2789_vm7, %v9653_v45, %v2786_v39 }
 0x363   : > { %v12090_v25 = vadd.f32 %v11659_v28, %v1757_v30  ;;  %v3047_v35 = vmul.f32 %v2790_v9, %v11722_v41  ;;  %v4191_v41 = vld [vmem:[#allocation3 + $0xd0] sm:$0xff] }
 0x365   : > { %17154 = vst [vmem:[#allocation61_spill] sm:$0xff] %v12090_v25  ;;  %v3082_v47 = vmul.f32 %v11824_v18, %v3047_v35  ;;  %v4195_v33 = vld [vmem:[#allocation3 + $0xf0] sm:$0xff] }
 0x366   : > { %1858 = vst.msk [vmem:[#allocation3 + $0xf8] sm:$0xff] %vm1826_vm8, %v12090_v25 }
 0x367   : > { %v3117_v17 = vadd.f32 %v11840_v4, %v3082_v47 }
 0x369   : > { %8984 = vmatmul.msk.f32.gmra.mxu2 %vm640_vm0, %v3117_v17 }
 0x36d   : > { %v4196_v50 = vld [vmem:[#allocation3 + $0xf8] sm:$0xff] }
 0x36e   : > { %4310 = vmatpush.msrb.mxu1 %v4196_v50 }
 0x36f   : > { %v2587_v16 = vpop.xlane.xlu0 %2586 }
 0x370   : > { %4311 = vmatpush.msrb.mxu1 %v4195_v33  ;;  %v2665_v58 = vmul.f32 %v2587_v16, %v11139_v42 }
 0x372   : > { %4312 = vmatpush.msrb.mxu1 %v4194_v61  ;;  %v2697_v43 = vadd.f32 1e-05, %v2665_v58 }
 0x374   : > { %4313 = vmatpush.msrb.mxu1 %v4193_v38  ;;  %9654 = vrsqrt.f32 %v2697_v43  ;;  %vm2807_vm13 = vweird.f32 %v2697_v43 }
 0x376   : > { %4314 = vmatpush.msrb.mxu1 %v4192_v21 }
 0x377   : > { %v2406_v56 = vpop.xlane.xlu0 %2405 }
 0x378   : > { %4315 = vmatpush.msrb.mxu1 %v4191_v41  ;;  %v2479_v45 = vmul.f32 %v2406_v56, %v11139_v42 }
 0x37a   : > { %4316 = vmatpush.msrb.mxu1 %v4190_v55  ;;  %v12100_v1 = vsub.f32 %v17130_v29, %v2479_v45  ;;  %v9655_v32 = vpop.eup %9654 }
 0x37b   : > { %v2802_v39 = vmul.f32 %v9655_v32, %v2697_v43  ;;  %vm2808_vm10 = vweird.f32 %v9655_v32 }
 0x37c   : > { %4317 = vmatpush.msrb.mxu1 %v4189_v24  ;;  %v2543_v5 = vmul.f32 %v12100_v1, %v12100_v1  ;;  %vm2809_vm14 = vmor %vm2807_vm13, %vm2808_vm10 }
 0x37d   : > { %v2803_v9 = vmul.f32 %v9655_v32, %v2802_v39 }
 0x37e   : > { %v2603_v34 = vsel %vm640_vm0, %v2543_v5, 0.0 }
 0x37f   : > { %2604 = vadd.xlane.f32.xlu1 %v2603_v34  ;;  %v2804_v17 = vmul.f32 0.5, %v2803_v9 }
 0x381   : > { %v2805_v16 = vsub.f32 1.5, %v2804_v17 }
 0x383   : > { %v2806_v21 = vmul.f32 %v9655_v32, %v2805_v16 }
 0x385   : > { %v2810_v24 = vsel %vm2809_vm14, %v9655_v32, %v2806_v21 }
 0x387   : > { %690 = vadd.xlane.f32.xlu1 %v689_v59 }
 0x38f   : > { %v2584_v29 = vpop.xlane.xlu2 %2583  ;;  %693 = vadd.xlane.f32.xlu1 %v692_v6  ;;  %v3049_v6 = vmul.f32 %v2810_v24, %v11745_v31 }
 0x390   : > { %v2664_v46 = vmul.f32 %v2584_v29, %v11139_v42 }
 0x391   : > { %v3084_v32 = vmul.f32 %v11824_v18, %v3049_v6 }
 0x392   : > { %v2696_v40 = vadd.f32 1e-05, %v2664_v46 }
 0x393   : > { %v3119_v9 = vadd.f32 %v11840_v4, %v3084_v32 }
 0x394   : > { %9656 = vrsqrt.f32 %v2696_v40  ;;  %vm2797_vm11 = vweird.f32 %v2696_v40 }
 0x396   : > { %v1691_v30 = vpop.f32.mrf.mxu1 }
 0x397   : > { %v12112_v35 = vadd.f32 %v11659_v28, %v1691_v30 }
 0x399   : > { %17157 = vst [vmem:[#allocation29_spill] sm:$0xff] %v12112_v35 }
 0x39a   : > { %1836 = vst.msk [vmem:[#allocation3 + $0x48] sm:$0xff] %vm1826_vm8, %v12112_v35  ;;  %v9657_v47 = vpop.eup %9656 }
 0x39b   : > { %v2792_v50 = vmul.f32 %v9657_v47, %v2696_v40  ;;  %vm2798_vm9 = vweird.f32 %v9657_v47 }
 0x39c   : > { %vm2799_vm12 = vmor %vm2797_vm11, %vm2798_vm9 }
 0x39d   : > { %v2793_v33 = vmul.f32 %v9657_v47, %v2792_v50 }
 0x39f   : > { %v2794_v61 = vmul.f32 0.5, %v2793_v33 }
 0x3a1   : > { %v2795_v38 = vsub.f32 1.5, %v2794_v61 }
 0x3a3   : > { %v2796_v41 = vmul.f32 %v9657_v47, %v2795_v38 }
 0x3a5   : > { %v2800_v56 = vsel %vm2799_vm12, %v9657_v47, %v2796_v41 }
 0x3a6   : > { %v1694_v55 = vpop.f32.mrf.mxu1  ;;  %v3048_v45 = vmul.f32 %v2800_v56, %v11803_v12 }
 0x3a7   : > { %v12118_v5 = vadd.f32 %v11659_v28, %v1694_v55  ;;  %v2590_v34 = vpop.xlane.xlu1 %2589 }
 0x3a8   : > { %v2666_v58 = vmul.f32 %v2590_v34, %v11139_v42  ;;  %v3083_v59 = vmul.f32 %v11824_v18, %v3048_v45  ;;  %v12140_v45 = vld [vmem:[%s16854_s9] ss:$0 sm:$0xff] }
 0x3a9   : > { %17158 = vst [vmem:[#allocation30_spill] sm:$0xff] %v12118_v5 }
 0x3aa   : > { %1837 = vst.msk [vmem:[#allocation3 + $0x50] sm:$0xff] %vm1826_vm8, %v12118_v5  ;;  %v2698_v43 = vadd.f32 1e-05, %v2666_v58  ;;  %v3118_v29 = vadd.f32 %v11840_v4, %v3083_v59 }
 0x3ac   : > { %9658 = vrsqrt.f32 %v2698_v43  ;;  %8985 = vmatmul.msk.f32.gmra.mxu2 %vm640_vm0, %v3118_v29  ;;  %vm2817_vm1 = vweird.f32 %v2698_v43 }
 0x3ae   : > { %v1697_v12 = vpop.f32.mrf.mxu1 }
 0x3af   : > { %v12129_v46 = vadd.f32 %v11659_v28, %v1697_v12  ;;  %v2593_v40 = vpop.xlane.xlu1 %2592 }
 0x3b0   : > { %v2667_v39 = vmul.f32 %v2593_v40, %v11139_v42 }
 0x3b1   : > { %17159 = vst [vmem:[#allocation62_spill] sm:$0xff] %v12129_v46 }
 0x3b2   : > { %1838 = vst.msk [vmem:[#allocation3 + $0x58] sm:$0xff] %vm1826_vm8, %v12129_v46  ;;  %v9659_v30 = vpop.eup %9658  ;;  %v2699_v31 = vadd.f32 1e-05, %v2667_v39 }
 0x3b3   : > { %v2812_v47 = vmul.f32 %v9659_v30, %v2698_v43  ;;  %vm2818_vm15 = vweird.f32 %v9659_v30 }
 0x3b4   : > { %9660 = vrsqrt.f32 %v2699_v31  ;;  %8986 = vmatmul.msk.f32.gmra.mxu2 %vm640_vm0, %v3119_v9  ;;  %vm2819_vm2 = vmor %vm2817_vm1, %vm2818_vm15  ;;  %vm2827_vm4 = vweird.f32 %v2699_v31 }
 0x3b5   : > { %v2813_v17 = vmul.f32 %v9659_v30, %v2812_v47 }
 0x3b7   : > { %v2814_v50 = vmul.f32 0.5, %v2813_v17 }
 0x3b9   : > { %v2815_v33 = vsub.f32 1.5, %v2814_v50 }
 0x3ba   : > { %v9661_v28 = vpop.eup %9660 }
 0x3bb   : > { %v2816_v16 = vmul.f32 %v9659_v30, %v2815_v33  ;;  %v2822_v61 = vmul.f32 %v9661_v28, %v2699_v31  ;;  %vm2828_vm3 = vweird.f32 %v9661_v28 }
 0x3bc   : > { %vm2829_vm5 = vmor %vm2827_vm4, %vm2828_vm3 }
 0x3bd   : > { %v2820_v38 = vsel %vm2819_vm2, %v9659_v30, %v2816_v16  ;;  %v2823_v21 = vmul.f32 %v9661_v28, %v2822_v61 }
 0x3be   : > { %v3050_v41 = vmul.f32 %v2820_v38, %v11916_v22  ;;  %v1700_v56 = vpop.f32.mrf.mxu1 }
 0x3bf   : > { %v2824_v55 = vmul.f32 0.5, %v2823_v21  ;;  %v12143_v24 = vadd.f32 %v12140_v45, %v1700_v56  ;;  %v2596_v34 = vpop.xlane.xlu1 %2595 }
 0x3c0   : > { %v2668_v58 = vmul.f32 %v2596_v34, %v11139_v42  ;;  %v3085_v59 = vmul.f32 %v11824_v18, %v3050_v41 }
 0x3c1   : > { %17160 = vst [vmem:[#allocation63_spill] sm:$0xff] %v12143_v24  ;;  %v2825_v6 = vsub.f32 1.5, %v2824_v55 }
 0x3c2   : > { %1839 = vst.msk [vmem:[#allocation3 + $0x60] sm:$0xff] %vm1826_vm8, %v12143_v24  ;;  %v2700_v22 = vadd.f32 1e-05, %v2668_v58  ;;  %v3120_v43 = vadd.f32 %v11840_v4, %v3085_v59 }
 0x3c3   : > { %v2826_v29 = vmul.f32 %v9661_v28, %v2825_v6 }
 0x3c4   : > { %9662 = vrsqrt.f32 %v2700_v22  ;;  %8987 = vmatmul.msk.f32.gmra.mxu2 %vm640_vm0, %v3120_v43  ;;  %vm2837_vm7 = vweird.f32 %v2700_v22 }
 0x3c5   : > { %v2830_v12 = vsel %vm2829_vm5, %v9661_v28, %v2826_v29 }
 0x3c6   : > { %v3051_v32 = vmul.f32 %v2830_v12, %v11930_v15  ;;  %v1703_v40 = vpop.f32.mrf.mxu1 }
 0x3c7   : > { %v12153_v39 = vadd.f32 %v12140_v45, %v1703_v40  ;;  %v2599_v30 = vpop.xlane.xlu1 %2598 }
 0x3c8   : > { %v2669_v9 = vmul.f32 %v2599_v30, %v11139_v42  ;;  %v3086_v47 = vmul.f32 %v11824_v18, %v3051_v32 }
 0x3c9   : > { %17161 = vst [vmem:[#allocation64_spill] sm:$0xff] %v12153_v39 }
 0x3ca   : > { %1840 = vst.msk [vmem:[#allocation3 + $0x68] sm:$0xff] %vm1826_vm8, %v12153_v39  ;;  %v9663_v31 = vpop.eup %9662  ;;  %v2701_v17 = vadd.f32 1e-05, %v2669_v9  ;;  %v3121_v50 = vadd.f32 %v11840_v4, %v3086_v47 }
 0x3cb   : > { %v2832_v33 = vmul.f32 %v9663_v31, %v2700_v22  ;;  %vm2838_vm6 = vweird.f32 %v9663_v31 }
 0x3cc   : > { %9664 = vrsqrt.f32 %v2701_v17  ;;  %8988 = vmatmul.msk.f32.gmra.mxu2 %vm640_vm0, %v3121_v50  ;;  %vm2839_vm9 = vmor %vm2837_vm7, %vm2838_vm6  ;;  %vm2847_vm11 = vweird.f32 %v2701_v17 }
 0x3cd   : > { %v2833_v15 = vmul.f32 %v9663_v31, %v2832_v33 }
 0x3cf   : > { %v2834_v28 = vmul.f32 0.5, %v2833_v15  ;;  %v2602_v16 = vpop.xlane.xlu1 %2601 }
 0x3d0   : > { %v2670_v61 = vmul.f32 %v2602_v16, %v11139_v42 }
 0x3d1   : > { %v2835_v38 = vsub.f32 1.5, %v2834_v28 }
 0x3d2   : > { %v9665_v21 = vpop.eup %9664  ;;  %v2702_v41 = vadd.f32 1e-05, %v2670_v61 }
 0x3d3   : > { %v2836_v56 = vmul.f32 %v9663_v31, %v2835_v38  ;;  %v2842_v55 = vmul.f32 %v9665_v21, %v2701_v17  ;;  %vm2848_vm10 = vweird.f32 %v9665_v21 }
 0x3d4   : > { %9666 = vrsqrt.f32 %v2702_v41  ;;  %vm2849_vm12 = vmor %vm2847_vm11, %vm2848_vm10  ;;  %vm2857_vm14 = vweird.f32 %v2702_v41 }
 0x3d5   : > { %v2840_v34 = vsel %vm2839_vm9, %v9663_v31, %v2836_v56  ;;  %v2843_v58 = vmul.f32 %v9665_v21, %v2842_v55 }
 0x3d6   : > { %v3052_v59 = vmul.f32 %v2840_v34, %v12012_v44  ;;  %v1706_v6 = vpop.f32.mrf.mxu1 }
 0x3d7   : > { %v2844_v43 = vmul.f32 0.5, %v2843_v58  ;;  %v12164_v29 = vadd.f32 %v12140_v45, %v1706_v6 }
 0x3d8   : > { %v3087_v12 = vmul.f32 %v11824_v18, %v3052_v59 }
 0x3d9   : > { %17162 = vst [vmem:[#allocation65_spill] sm:$0xff] %v12164_v29  ;;  %v2845_v32 = vsub.f32 1.5, %v2844_v43  ;;  %v4177_v43 = vld [vmem:[#allocation3 + $0x60] sm:$0xff] }
 0x3da   : > { %1841 = vst.msk [vmem:[#allocation3 + $0x70] sm:$0xff] %vm1826_vm8, %v12164_v29  ;;  %v9667_v22 = vpop.eup %9666  ;;  %v3122_v40 = vadd.f32 %v11840_v4, %v3087_v12 }
 0x3db   : > { %v2846_v30 = vmul.f32 %v9665_v21, %v2845_v32  ;;  %v2852_v9 = vmul.f32 %v9667_v22, %v2702_v41  ;;  %vm2858_vm13 = vweird.f32 %v9667_v22  ;;  %v4178_v41 = vld [vmem:[#allocation3 + $0x68] sm:$0xff]  ;;  %v4176_v32 = vld [vmem:[#allocation3 + $0x58] sm:$0xff] }
 0x3dc   : > { %8989 = vmatmul.msk.f32.gmra.mxu2 %vm640_vm0, %v3122_v40  ;;  %vm2859_vm15 = vmor %vm2857_vm14, %vm2858_vm13 }
 0x3dd   : > { %v2850_v44 = vsel %vm2849_vm12, %v9665_v21, %v2846_v30  ;;  %v2853_v47 = vmul.f32 %v9667_v22, %v2852_v9  ;;  %v4174_v9 = vld [vmem:[#allocation3 + $0x48] sm:$0xff] }
 0x3de   : > { %v3053_v31 = vmul.f32 %v2850_v44, %v12026_v27  ;;  %v1709_v50 = vpop.f32.mrf.mxu1  ;;  %v12175_v28 = vpop.trf.xlu2 }
 0x3df   : > { %v2854_v33 = vmul.f32 0.5, %v2853_v47  ;;  %v12173_v15 = vadd.f32 %v12140_v45, %v1709_v50  ;;  %v2410_v16 = vsel %vm640_vm0, %v12175_v28, 0.0  ;;  %v4173_v47 = vld [vmem:[#allocation3 + $0x40] sm:$0xff] }
 0x3e0   : > { %v3088_v17 = vmul.f32 %v11824_v18, %v3053_v31  ;;  %2411 = vadd.xlane.f32.xlu0 %v2410_v16  ;;  %v4171_v16 = vld [vmem:[#allocation3 + $0x30] sm:$0xff] }
 0x3e1   : > { %17163 = vst [vmem:[#allocation66_spill] sm:$0xff] %v12173_v15  ;;  %v2855_v61 = vsub.f32 1.5, %v2854_v33  ;;  %v4179_v59 = vld [vmem:[#allocation3 + $0x70] sm:$0xff]  ;;  %v4172_v33 = vld [vmem:[#allocation3 + $0x38] sm:$0xff] }
 0x3e2   : > { %1842 = vst.msk [vmem:[#allocation3 + $0x78] sm:$0xff] %vm1826_vm8, %v12173_v15  ;;  %v3123_v27 = vadd.f32 %v11840_v4, %v3088_v17  ;;  %v4170_v17 = vld [vmem:[#allocation3 + $0x28] sm:$0xff] }
 0x3e3   : > { %v2856_v38 = vmul.f32 %v9667_v22, %v2855_v61 }
 0x3e4   : > { %8990 = vmatmul.msk.f32.gmra.mxu2 %vm640_vm0, %v3123_v27  ;;  %v4169_v27 = vld [vmem:[#allocation3 + $0x20] sm:$0xff] }
 0x3e5   : > { %v2860_v45 = vsel %vm2859_vm15, %v9667_v22, %v2856_v38  ;;  %v4175_v22 = vld [vmem:[#allocation3 + $0x50] sm:$0xff] }
 0x3e6   : > { %v3054_v21 = vmul.f32 %v2860_v45, %v12058_v19  ;;  %v12185_v56 = vpop.trf.xlu2 }
 0x3e7   : > { %v2413_v55 = vsel %vm640_vm0, %v12185_v56, 0.0 }
 0x3e8   : > { %v3089_v58 = vmul.f32 %v11824_v18, %v3054_v21  ;;  %2414 = vadd.xlane.f32.xlu0 %v2413_v55  ;;  %v4168_v55 = vld [vmem:[#allocation3 + $0x18] sm:$0xff] }
 0x3e9   : > { %v4180_v34 = vld [vmem:[#allocation3 + $0x78] sm:$0xff] }
 0x3ea   : > { %4197 = vmatpush.msrb.mxu0 %v4180_v34  ;;  %v3124_v6 = vadd.f32 %v11840_v4, %v3089_v58  ;;  %v4167_v58 = vld [vmem:[#allocation3 + $0x10] sm:$0xff] }
 0x3ec   : > { %4198 = vmatpush.msrb.mxu0 %v4179_v59  ;;  %8991 = vmatmul.msk.f32.gmra.mxu2 %vm640_vm0, %v3124_v6  ;;  %v4166_v6 = vld [vmem:[#allocation3 + $0x8] sm:$0xff] }
 0x3ee   : > { %4199 = vmatpush.msrb.mxu0 %v4178_v41  ;;  %v12192_v19 = vpop.trf.xlu2 }
 0x3ef   : > { %v2416_v12 = vsel %vm640_vm0, %v12192_v19, 0.0 }
 0x3f0   : > { %4200 = vmatpush.msrb.mxu0 %v4177_v43  ;;  %2417 = vadd.xlane.f32.xlu0 %v2416_v12  ;;  %v4165_v43 = vld [vmem:[#allocation3] sm:$0xff]  ;;  %v12205_v12 = vpop.f32.mrf.mxu2 }
 0x3f2   : > { %4201 = vmatpush.msrb.mxu0 %v4176_v32  ;;  %v2605_v40 = vpop.xlane.xlu1 %2604 }
 0x3f3   : > { %v2671_v30 = vmul.f32 %v2605_v40, %v11139_v42 }
 0x3f4   : > { %4202 = vmatpush.msrb.mxu0 %v4175_v22 }
 0x3f5   : > { %v2703_v44 = vadd.f32 1e-05, %v2671_v30 }
 0x3f6   : > { %4203 = vmatpush.msrb.mxu0 %v4174_v9  ;;  %v12197_v31 = vpop.trf.xlu2 }
 0x3f7   : > { %9668 = vrsqrt.f32 %v2703_v44  ;;  %v2419_v50 = vsel %vm640_vm0, %v12197_v31, 0.0  ;;  %vm2867_vm2 = vweird.f32 %v2703_v44 }
 0x3f8   : > { %4204 = vmatpush.msrb.mxu0 %v4173_v47  ;;  %2420 = vadd.xlane.f32.xlu0 %v2419_v50 }
 0x3fa   : > { %4205 = vmatpush.msrb.mxu0 %v4172_v33  ;;  %v691_v35 = vpop.xlane.xlu1 %690 }
 0x3fc   : > { %4206 = vmatpush.msrb.mxu0 %v4171_v16  ;;  %v3267_v16 = vpop.f32.mrf.mxu2 }
 0x3fd   : > { %v9669_v61 = vpop.eup %9668 }
 0x3fe   : > { %4207 = vmatpush.msrb.mxu0 %v4170_v17  ;;  %v2862_v38 = vmul.f32 %v9669_v61, %v2703_v44  ;;  %v12201_v45 = vpop.trf.xlu2  ;;  %vm2868_vm1 = vweird.f32 %v9669_v61 }
 0x3ff   : > { %v2422_v21 = vsel %vm640_vm0, %v12201_v45, 0.0  ;;  %vm2869_vm3 = vmor %vm2867_vm2, %vm2868_vm1 }
 0x400   : > { %4208 = vmatpush.msrb.mxu0 %v4169_v27  ;;  %v2863_v34 = vmul.f32 %v9669_v61, %v2862_v38  ;;  %2423 = vadd.xlane.f32.xlu0 %v2422_v21  ;;  %v2409_v27 = vpop.xlane.xlu0 %2408 }
 0x402   : > { %4209 = vmatpush.msrb.mxu0 %v4168_v55  ;;  %v2864_v59 = vmul.f32 0.5, %v2863_v34 }
 0x404   : > { %4210 = vmatpush.msrb.mxu0 %v4167_v58  ;;  %v2865_v41 = vsub.f32 1.5, %v2864_v59  ;;  %v12219_v17 = vpop.f32.mrf.mxu2  ;;  %v12235_v58 = vld [vmem:[%s16850_s5] ss:$0 sm:$0xff] }
 0x405   : > { %v12238_v59 = vadd.f32 %v12235_v58, %v3267_v16 }
 0x406   : > { %4211 = vmatpush.msrb.mxu0 %v4166_v6  ;;  %v2866_v32 = vmul.f32 %v9669_v61, %v2865_v41  ;;  %v12207_v22 = vpop.trf.xlu2 }
 0x407   : > { %v2425_v40 = vsel %vm640_vm0, %v12207_v22, 0.0  ;;  %17165 = vst [vmem:[#allocation68_spill] sm:$0xff] %v12238_v59 }
 0x408   : > { %4212 = vmatpush.msrb.mxu0 %v4165_v43  ;;  %v2870_v30 = vsel %vm2869_vm3, %v9669_v61, %v2866_v32  ;;  %2426 = vadd.xlane.f32.xlu0 %v2425_v40  ;;  %v2480_v61 = vmul.f32 %v2409_v27, %v11139_v42 }
 0x409   : > { %v3055_v9 = vmul.f32 %v2870_v30, %v12100_v1 }
 0x40b   : > { %v3090_v47 = vmul.f32 %v11824_v18, %v3055_v9  ;;  %v12225_v18 = vsub.f32 %v17132_v36, %v2480_v61 }
 0x40c   : > { %v12222_v38 = vpop.f32.mrf.mxu2 }
 0x40d   : > { %v3125_v50 = vadd.f32 %v11840_v4, %v3090_v47  ;;  %17164 = vst [vmem:[#allocation67_spill] sm:$0xff] %v12222_v38  ;;  %v2544_v4 = vmul.f32 %v12225_v18, %v12225_v18 }
 0x40e   : > { %v12214_v33 = vpop.trf.xlu2 }
 0x40f   : > { %8992 = vmatmul.msk.f32.gmra.mxu2 %vm640_vm0, %v3125_v50  ;;  %v2428_v44 = vsel %vm640_vm0, %v12214_v33, 0.0  ;;  %v2606_v21 = vsel %vm640_vm0, %v2544_v4, 0.0 }
 0x410   : > { %2429 = vadd.xlane.f32.xlu1 %v2428_v44 }
 0x414   : > { %v3276_v1 = vpop.f32.mrf.mxu2 }
 0x415   : > { %v12245_v41 = vadd.f32 %v12235_v58, %v3276_v1 }
 0x416   : > { %v12242_v6 = vpop.trf.xlu2 }
 0x417   : > { %17166 = vst [vmem:[#allocation69_spill] sm:$0xff] %v12245_v41 }
 0x41c   : > { %v3279_v55 = vpop.f32.mrf.mxu2 }
 0x41d   : > { %v12254_v40 = vadd.f32 %v12235_v58, %v3279_v55 }
 0x41e   : > { %v12251_v32 = vpop.trf.xlu2 }
 0x41f   : > { %17167 = vst [vmem:[#allocation70_spill] sm:$0xff] %v12254_v40 }
 0x424   : > { %v12230_v34 = vpop.f32.mrf.mxu2 }
 0x426   : > { %v12267_v27 = vpop.trf.xlu2 }
 0x42e   : > { %2607 = vadd.xlane.f32.xlu2 %v2606_v21 }
 0x42f   : > { %v3285_v36 = vpop.f32.mrf.mxu2 }
 0x430   : > { %v12270_v61 = vadd.f32 %v12235_v58, %v3285_v36 }
 0x432   : > { %17168 = vst [vmem:[#allocation71_spill] sm:$0xff] %v12270_v61 }
 0x437   : > { %v12249_v43 = vpop.f32.mrf.mxu2 }
 0x446   : > { %4429 = vrot.lane.b32.xlu2 %v12238_v59, %s10788_s27 }
 0x447   : > { %v12259_v47 = vpop.f32.mrf.mxu2 }
 0x44e   : > { %4435 = vrot.lane.b32.xlu2 %v12245_v41, %s10788_s27 }
 0x44f   : > { %v3294_v21 = vpop.f32.mrf.mxu2 }
 0x453   : > { %v2412_v30 = vpop.xlane.xlu0 %2411 }
 0x454   : > { %v2481_v9 = vmul.f32 %v2412_v30, %v11139_v42  ;;  %v17169_v30 = vld [vmem:[#allocation31_spill] sm:$0xff] }
 0x456   : > { %4437 = vrot.lane.b32.xlu2 %v12254_v40, %s10788_s27  ;;  %v12262_v50 = vsub.f32 %v12175_v28, %v2481_v9  ;;  %v695_v9 = vsel %vm640_vm0, %v17169_v30, 0.0 }
 0x458   : > { %v2545_v44 = vmul.f32 %v12262_v50, %v12262_v50 }
 0x45a   : > { %v2609_v16 = vsel %vm640_vm0, %v2545_v44, 0.0  ;;  %v12284_v44 = vadd.f32 %v12235_v58, %v3294_v21 }
 0x45b   : > { %v2415_v4 = vpop.xlane.xlu0 %2414  ;;  %2610 = vadd.xlane.f32.xlu0 %v2609_v16 }
 0x45c   : > { %v2482_v1 = vmul.f32 %v2415_v4, %v11139_v42  ;;  %17170 = vst [vmem:[#allocation31_spill] sm:$0xff] %v12284_v44  ;;  %v12286_v4 = vpop.trf.xlu2 }
 0x45e   : > { %4441 = vrot.lane.b32.xlu2 %v12270_v61, %s10788_s27  ;;  %v12276_v28 = vsub.f32 %v12185_v56, %v2482_v1  ;;  %v2431_v1 = vsel %vm640_vm0, %v12242_v6, 0.0 }
 0x460   : > { %v2546_v55 = vmul.f32 %v12276_v28, %v12276_v28 }
 0x462   : > { %v2612_v36 = vsel %vm640_vm0, %v2546_v55, 0.0  ;;  %v17171_v55 = vld [vmem:[#allocation32_spill] sm:$0xff] }
 0x463   : > { %v2418_v16 = vpop.xlane.xlu0 %2417  ;;  %696 = vadd.xlane.f32.xlu0 %v695_v9  ;;  %2613 = vadd.xlane.f32.xlu1 %v2612_v36  ;;  %v698_v21 = vsel %vm640_vm0, %v17171_v55, 0.0 }
 0x464   : > { %v2483_v56 = vmul.f32 %v2418_v16, %v11139_v42  ;;  %v12301_v2 = vpop.trf.xlu2  ;;  %v2434_v16 = vsel %vm640_vm0, %v12251_v32, 0.0 }
 0x466   : > { %4447 = vrot.lane.b32.xlu2 %v12284_v44, %s10788_s27  ;;  %v12294_v10 = vsub.f32 %v12192_v19, %v2483_v56  ;;  %v12376_v44 = vld [vmem:[%s16847_s2] ss:$0 sm:$0xff] }
 0x468   : > { %v2547_v36 = vmul.f32 %v12294_v10, %v12294_v10 }
 0x46a   : > { %v2615_v19 = vsel %vm640_vm0, %v2547_v36, 0.0 }
 0x46b   : > { %v2421_v7 = vpop.xlane.xlu0 %2420  ;;  %699 = vadd.xlane.f32.xlu1 %v698_v21  ;;  %2432 = vadd.xlane.f32.xlu0 %v2431_v1 }
 0x46c   : > { %v2484_v9 = vmul.f32 %v2421_v7, %v11139_v42  ;;  %v12311_v1 = vpop.trf.xlu2  ;;  %v17172_v7 = vld [vmem:[#allocation33_spill] sm:$0xff] }
 0x46d   : > { %v701_v21 = vsel %vm640_vm0, %v17172_v7, 0.0 }
 0x46e   : > { %v12306_v20 = vsub.f32 %v12197_v31, %v2484_v9  ;;  %v2437_v9 = vsel %vm640_vm0, %v12267_v27, 0.0 }
 0x470   : > { %v2548_v56 = vmul.f32 %v12306_v20, %v12306_v20 }
 0x472   : > { %v2618_v51 = vsel %vm640_vm0, %v2548_v56, 0.0  ;;  %v760_v56 = vmul.f32 %v11139_v42, %v691_v35 }
 0x473   : > { %2616 = vadd.xlane.f32.xlu0 %v2615_v19  ;;  %2435 = vadd.xlane.f32.xlu1 %v2434_v16  ;;  %v2424_v48 = vpop.xlane.xlu0 %2423  ;;  %v17173_v16 = vld [vmem:[#allocation34_spill] sm:$0xff] }
 0x474   : > { %v2485_v31 = vmul.f32 %v2424_v48, %v11139_v42  ;;  %v704_v19 = vsel %vm640_vm0, %v17173_v16, 0.0  ;;  %v12324_v53 = vpop.trf.xlu2  ;;  %v2440_v48 = vsel %vm640_vm0, %v12286_v4, 0.0 }
 0x476   : > { %v12320_v36 = vsub.f32 %v12201_v45, %v2485_v31 }
 0x47b   : > { %702 = vadd.xlane.f32.xlu0 %v701_v21  ;;  %2619 = vadd.xlane.f32.xlu1 %v2618_v51  ;;  %v2549_v51 = vmul.f32 %v12320_v36, %v12320_v36  ;;  %v12332_v21 = vsub.f32 %v17155_v54, %v760_v56  ;;  %v2427_v31 = vpop.xlane.xlu0 %2426  ;;  %v707_v54 = vsel %vm640_vm0, %v17174_v62, 0.0  ;;  %v694_v56 = vpop.xlane.xlu1 %693 }
 0x47c   : > { %v12335_v5 = vpop.trf.xlu2 }
 0x47d   : > { %v2621_v45 = vsel %vm640_vm0, %v2549_v51, 0.0  ;;  %v824_v35 = vmul.f32 %v12332_v21, %v12332_v21  ;;  %v761_v51 = vmul.f32 %v11139_v42, %v694_v56 }
 0x47f   : > { %v888_v14 = vsel %vm640_vm0, %v824_v35, 0.0 }
 0x483   : > { %705 = vadd.xlane.f32.xlu1 %v704_v19  ;;  %2438 = vadd.xlane.f32.xlu0 %v2437_v9  ;;  %v2486_v9 = vmul.f32 %v2427_v31, %v11139_v42  ;;  %v2443_v31 = vsel %vm640_vm0, %v12301_v2, 0.0  ;;  %v2430_v35 = vpop.xlane.xlu1 %2429 }
 0x485   : > { %v12341_v19 = vsub.f32 %v12207_v22, %v2486_v9  ;;  %v12354_v22 = vsub.f32 %v17156_v8, %v761_v51  ;;  %v17175_v8 = vld [vmem:[#allocation36_spill] sm:$0xff] }
 0x486   : > { %v710_v51 = vsel %vm640_vm0, %v17175_v8, 0.0 }
 0x48b   : > { %2622 = vadd.xlane.f32.xlu0 %v2621_v45  ;;  %2441 = vadd.xlane.f32.xlu1 %v2440_v48  ;;  %v12347_v48 = vpop.trf.xlu2  ;;  %v2550_v45 = vmul.f32 %v12341_v19, %v12341_v19 }
 0x48d   : > { %v2624_v9 = vsel %vm640_vm0, %v2550_v45, 0.0 }
 0x493   : > { %889 = vadd.xlane.f32.xlu0 %v888_v14  ;;  %708 = vadd.xlane.f32.xlu1 %v707_v54  ;;  %v2487_v14 = vmul.f32 %v2430_v35, %v11139_v42  ;;  %v825_v54 = vmul.f32 %v12354_v22, %v12354_v22 }
 0x495   : > { %v12362_v25 = vsub.f32 %v12214_v33, %v2487_v14  ;;  %v891_v40 = vsel %vm640_vm0, %v825_v54, 0.0 }
 0x49b   : > { %2625 = vadd.xlane.f32.xlu0 %v2624_v9  ;;  %2444 = vadd.xlane.f32.xlu1 %v2443_v31  ;;  %v2551_v31 = vmul.f32 %v12362_v25, %v12362_v25  ;;  %v2446_v9 = vsel %vm640_vm0, %v12311_v1, 0.0 }
 0x49d   : > { %v2627_v35 = vsel %vm640_vm0, %v2551_v31, 0.0 }
 0x4a1   : > { %v2608_v56 = vpop.xlane.xlu2 %2607 }
 0x4a2   : > { %v2672_v46 = vmul.f32 %v2608_v56, %v11139_v42 }
 0x4a3   : > { %892 = vadd.xlane.f32.xlu0 %v891_v40  ;;  %711 = vadd.xlane.f32.xlu1 %v710_v51 }
 0x4a4   : > { %v2704_v45 = vadd.f32 1e-05, %v2672_v46 }
 0x4a6   : > { %9670 = vrsqrt.f32 %v2704_v45  ;;  %vm2877_vm5 = vweird.f32 %v2704_v45 }
 0x4ab   : > { %2628 = vadd.xlane.f32.xlu0 %v2627_v35  ;;  %2447 = vadd.xlane.f32.xlu1 %v2446_v9  ;;  %v12382_v9 = vld [vmem:[%s16848_s3] ss:$0 sm:$0xff] }
 0x4ac   : > { %v9671_v56 = vpop.eup %9670 }
 0x4ad   : > { %v2872_v33 = vmul.f32 %v9671_v56, %v2704_v45  ;;  %vm2878_vm4 = vweird.f32 %v9671_v56 }
 0x4ae   : > { %vm2879_vm6 = vmor %vm2877_vm5, %vm2878_vm4 }
 0x4af   : > { %v2873_v14 = vmul.f32 %v9671_v56, %v2872_v33 }
 0x4b1   : > { %v2874_v54 = vmul.f32 0.5, %v2873_v14 }
 0x4b3   : > { %v2875_v41 = vsub.f32 1.5, %v2874_v54 }
 0x4b5   : > { %v2876_v46 = vmul.f32 %v9671_v56, %v2875_v41 }
 0x4b7   : > { %v2880_v40 = vsel %vm2879_vm6, %v9671_v56, %v2876_v46 }
 0x4b8   : > { %v3056_v51 = vmul.f32 %v2880_v40, %v12225_v18 }
 0x4ba   : > { %v3091_v31 = vmul.f32 %v12376_v44, %v3056_v51 }
 0x4bc   : > { %v3126_v35 = vadd.f32 %v12382_v9, %v3091_v31 }
 0x4be   : > { %8993 = vmatmul.msk.f32.gmra.mxu2 %vm640_vm0, %v3126_v35 }
 0x4ce   : > { %v2611_v41 = vpop.xlane.xlu0 %2610 }
 0x4cf   : > { %v2673_v45 = vmul.f32 %v2611_v41, %v11139_v42 }
 0x4d1   : > { %v2705_v18 = vadd.f32 1e-05, %v2673_v45 }
 0x4d3   : > { %9672 = vrsqrt.f32 %v2705_v18  ;;  %vm2887_vm9 = vweird.f32 %v2705_v18 }
 0x4d6   : > { %v697_v56 = vpop.xlane.xlu0 %696  ;;  %v2614_v33 = vpop.xlane.xlu1 %2613 }
 0x4d7   : > { %v762_v14 = vmul.f32 %v11139_v42, %v697_v56  ;;  %v2674_v54 = vmul.f32 %v2614_v33, %v11139_v42 }
 0x4d9   : > { %v9673_v46 = vpop.eup %9672  ;;  %v12390_v40 = vsub.f32 %v17169_v30, %v762_v14  ;;  %v2706_v51 = vadd.f32 1e-05, %v2674_v54 }
 0x4da   : > { %v2882_v38 = vmul.f32 %v9673_v46, %v2705_v18  ;;  %vm2888_vm7 = vweird.f32 %v9673_v46 }
 0x4db   : > { %9674 = vrsqrt.f32 %v2706_v51  ;;  %v826_v31 = vmul.f32 %v12390_v40, %v12390_v40  ;;  %vm2889_vm10 = vmor %vm2887_vm9, %vm2888_vm7  ;;  %vm2897_vm12 = vweird.f32 %v2706_v51 }
 0x4dc   : > { %v2883_v35 = vmul.f32 %v9673_v46, %v2882_v38 }
 0x4dd   : > { %v894_v41 = vsel %vm640_vm0, %v826_v31, 0.0  ;;  %v2449_v31 = vsel %vm640_vm0, %v12324_v53, 0.0 }
 0x4de   : > { %v2884_v45 = vmul.f32 0.5, %v2883_v35  ;;  %v700_v59 = vpop.xlane.xlu1 %699  ;;  %v2433_v61 = vpop.xlane.xlu0 %2432  ;;  %895 = vadd.xlane.f32.xlu0 %v894_v41 }
 0x4df   : > { %v2488_v56 = vmul.f32 %v2433_v61, %v11139_v42  ;;  %v763_v30 = vmul.f32 %v11139_v42, %v700_v59 }
 0x4e0   : > { %v2885_v33 = vsub.f32 1.5, %v2884_v45 }
 0x4e1   : > { %v9675_v57 = vpop.eup %9674  ;;  %v12398_v14 = vsub.f32 %v12242_v6, %v2488_v56  ;;  %v12406_v45 = vsub.f32 %v17171_v55, %v763_v30 }
 0x4e2   : > { %v2886_v54 = vmul.f32 %v9673_v46, %v2885_v33  ;;  %v2892_v63 = vmul.f32 %v9675_v57, %v2706_v51  ;;  %vm2898_vm11 = vweird.f32 %v9675_v57 }
 0x4e3   : > { %v2552_v38 = vmul.f32 %v12398_v14, %v12398_v14  ;;  %v827_v30 = vmul.f32 %v12406_v45, %v12406_v45  ;;  %vm2899_vm13 = vmor %vm2897_vm12, %vm2898_vm11 }
 0x4e4   : > { %v2890_v35 = vsel %vm2889_vm10, %v9673_v46, %v2886_v54  ;;  %v2893_v61 = vmul.f32 %v9675_v57, %v2892_v63 }
 0x4e5   : > { %v3057_v41 = vmul.f32 %v2890_v35, %v12262_v50  ;;  %v2630_v59 = vsel %vm640_vm0, %v2552_v38, 0.0 }
 0x4e6   : > { %v2894_v6 = vmul.f32 0.5, %v2893_v61  ;;  %v2617_v56 = vpop.xlane.xlu0 %2616  ;;  %v2436_v18 = vpop.xlane.xlu1 %2435  ;;  %2631 = vadd.xlane.f32.xlu1 %v2630_v59  ;;  %2450 = vadd.xlane.f32.xlu0 %v2449_v31 }
 0x4e7   : > { %v2675_v33 = vmul.f32 %v2617_v56, %v11139_v42  ;;  %v2489_v23 = vmul.f32 %v2436_v18, %v11139_v42  ;;  %v3092_v26 = vmul.f32 %v12376_v44, %v3057_v41 }
 0x4e8   : > { %v2895_v46 = vsub.f32 1.5, %v2894_v6 }
 0x4e9   : > { %v2707_v63 = vadd.f32 1e-05, %v2675_v33  ;;  %v12413_v50 = vsub.f32 %v12251_v32, %v2489_v23  ;;  %v3127_v55 = vadd.f32 %v12382_v9, %v3092_v26  ;;  %v897_v23 = vsel %vm640_vm0, %v827_v30, 0.0 }
 0x4ea   : > { %v2896_v54 = vmul.f32 %v9675_v57, %v2895_v46  ;;  %v2452_v46 = vsel %vm640_vm0, %v12335_v5, 0.0 }
 0x4eb   : > { %9676 = vrsqrt.f32 %v2707_v63  ;;  %8994 = vmatmul.msk.f32.gmra.mxu2 %vm640_vm0, %v3127_v55  ;;  %v2553_v38 = vmul.f32 %v12413_v50, %v12413_v50  ;;  %vm2907_vm15 = vweird.f32 %v2707_v63 }
 0x4ec   : > { %v2900_v31 = vsel %vm2899_vm13, %v9675_v57, %v2896_v54 }
 0x4ed   : > { %v3058_v35 = vmul.f32 %v2900_v31, %v12276_v28  ;;  %v2633_v32 = vsel %vm640_vm0, %v2553_v38, 0.0 }
 0x4ee   : > { %v703_v26 = vpop.xlane.xlu0 %702  ;;  %v2620_v61 = vpop.xlane.xlu1 %2619  ;;  %898 = vadd.xlane.f32.xlu1 %v897_v23  ;;  %2634 = vadd.xlane.f32.xlu0 %v2633_v32 }
 0x4ef   : > { %v764_v51 = vmul.f32 %v11139_v42, %v703_v26  ;;  %v2676_v41 = vmul.f32 %v2620_v61, %v11139_v42  ;;  %v3093_v59 = vmul.f32 %v12376_v44, %v3058_v35 }
 0x4f1   : > { %v9677_v6 = vpop.eup %9676  ;;  %v12428_v56 = vsub.f32 %v17172_v7, %v764_v51  ;;  %v2708_v57 = vadd.f32 1e-05, %v2676_v41  ;;  %v3128_v28 = vadd.f32 %v12382_v9, %v3093_v59  ;;  %v2455_v59 = vsel %vm640_vm0, %v12347_v48, 0.0 }
 0x4f2   : > { %v2902_v18 = vmul.f32 %v9677_v6, %v2707_v63  ;;  %vm2908_vm14 = vweird.f32 %v9677_v6 }
 0x4f3   : > { %9678 = vrsqrt.f32 %v2708_v57  ;;  %8995 = vmatmul.msk.f32.gmra.mxu2 %vm640_vm0, %v3128_v28  ;;  %v828_v33 = vmul.f32 %v12428_v56, %v12428_v56  ;;  %vm2909_vm1 = vmor %vm2907_vm15, %vm2908_vm14  ;;  %vm2917_vm3 = vweird.f32 %v2708_v57 }
 0x4f4   : > { %v2903_v55 = vmul.f32 %v9677_v6, %v2902_v18 }
 0x4f5   : > { %v900_v30 = vsel %vm640_vm0, %v828_v33, 0.0 }
 0x4f6   : > { %v2904_v54 = vmul.f32 0.5, %v2903_v55  ;;  %v706_v38 = vpop.xlane.xlu1 %705  ;;  %v2439_v7 = vpop.xlane.xlu0 %2438  ;;  %901 = vadd.xlane.f32.xlu0 %v900_v30  ;;  %2453 = vadd.xlane.f32.xlu1 %v2452_v46 }
 0x4f7   : > { %v2490_v31 = vmul.f32 %v2439_v7, %v11139_v42  ;;  %v765_v32 = vmul.f32 %v11139_v42, %v706_v38 }
 0x4f8   : > { %v2905_v35 = vsub.f32 1.5, %v2904_v54 }
 0x4f9   : > { %v9679_v23 = vpop.eup %9678  ;;  %v12440_v26 = vsub.f32 %v12267_v27, %v2490_v31  ;;  %v12448_v46 = vsub.f32 %v17173_v16, %v765_v32 }
 0x4fa   : > { %v2906_v61 = vmul.f32 %v9677_v6, %v2905_v35  ;;  %v2912_v51 = vmul.f32 %v9679_v23, %v2708_v57  ;;  %vm2918_vm2 = vweird.f32 %v9679_v23 }
 0x4fb   : > { %v2554_v41 = vmul.f32 %v12440_v26, %v12440_v26  ;;  %v829_v35 = vmul.f32 %v12448_v46, %v12448_v46  ;;  %vm2919_vm4 = vmor %vm2917_vm3, %vm2918_vm2 }
 0x4fc   : > { %v2910_v28 = vsel %vm2909_vm1, %v9677_v6, %v2906_v61  ;;  %v2913_v18 = vmul.f32 %v9679_v23, %v2912_v51 }
 0x4fd   : > { %v3059_v33 = vmul.f32 %v2910_v28, %v12294_v10  ;;  %v2636_v27 = vsel %vm640_vm0, %v2554_v41, 0.0 }
 0x4fe   : > { %v2914_v55 = vmul.f32 0.5, %v2913_v18  ;;  %v2623_v30 = vpop.xlane.xlu0 %2622  ;;  %v2442_v63 = vpop.xlane.xlu1 %2441  ;;  %2637 = vadd.xlane.f32.xlu1 %v2636_v27  ;;  %2456 = vadd.xlane.f32.xlu0 %v2455_v59 }
 0x4ff   : > { %v2677_v54 = vmul.f32 %v2623_v30, %v11139_v42  ;;  %v2491_v38 = vmul.f32 %v2442_v63, %v11139_v42  ;;  %v3094_v7 = vmul.f32 %v12376_v44, %v3059_v33 }
 0x500   : > { %v2915_v6 = vsub.f32 1.5, %v2914_v55 }
 0x501   : > { %v2709_v31 = vadd.f32 1e-05, %v2677_v54  ;;  %v12455_v10 = vsub.f32 %v12286_v4, %v2491_v38  ;;  %v3129_v16 = vadd.f32 %v12382_v9, %v3094_v7  ;;  %v903_v4 = vsel %vm640_vm0, %v829_v35, 0.0 }
 0x502   : > { %v2916_v32 = vmul.f32 %v9679_v23, %v2915_v6 }
 0x503   : > { %9680 = vrsqrt.f32 %v2709_v31  ;;  %8996 = vmatmul.msk.f32.gmra.mxu2 %vm640_vm0, %v3129_v16  ;;  %v2555_v61 = vmul.f32 %v12455_v10, %v12455_v10  ;;  %vm2927_vm6 = vweird.f32 %v2709_v31 }
 0x504   : > { %v2920_v51 = vsel %vm2919_vm4, %v9679_v23, %v2916_v32 }
 0x505   : > { %v3060_v41 = vmul.f32 %v2920_v51, %v12306_v20  ;;  %v2639_v59 = vsel %vm640_vm0, %v2555_v61, 0.0  ;;  %v12479_v61 = vpop.f32.mrf.mxu0 }
 0x506   : > { %v890_v28 = vpop.xlane.xlu0 %889  ;;  %v709_v18 = vpop.xlane.xlu1 %708  ;;  %904 = vadd.xlane.f32.xlu1 %v903_v4  ;;  %2640 = vadd.xlane.f32.xlu0 %v2639_v59 }
 0x507   : > { %v952_v57 = vmul.f32 %v890_v28, %v11139_v42  ;;  %v766_v33 = vmul.f32 %v11139_v42, %v709_v18  ;;  %v3095_v27 = vmul.f32 %v12376_v44, %v3060_v41 }
 0x509   : > { %v9681_v55 = vpop.eup %9680  ;;  %v984_v30 = vadd.f32 1e-05, %v952_v57  ;;  %v12470_v23 = vsub.f32 %v17174_v62, %v766_v33  ;;  %v3130_v20 = vadd.f32 %v12382_v9, %v3095_v27 }
 0x50a   : > { %v2922_v63 = vmul.f32 %v9681_v55, %v2709_v31  ;;  %vm2928_vm5 = vweird.f32 %v9681_v55 }
 0x50b   : > { %9682 = vrsqrt.f32 %v984_v30  ;;  %8997 = vmatmul.msk.f32.gmra.mxu2 %vm640_vm0, %v3130_v20  ;;  %v830_v54 = vmul.f32 %v12470_v23, %v12470_v23  ;;  %vm2929_vm7 = vmor %vm2927_vm6, %vm2928_vm5  ;;  %vm1166_vm10 = vweird.f32 %v984_v30 }
 0x50c   : > { %v2923_v38 = vmul.f32 %v9681_v55, %v2922_v63 }
 0x50d   : > { %v906_v7 = vsel %vm640_vm0, %v830_v54, 0.0 }
 0x50e   : > { %v2924_v6 = vmul.f32 0.5, %v2923_v38  ;;  %v2626_v16 = vpop.xlane.xlu0 %2625  ;;  %v2445_v35 = vpop.xlane.xlu1 %2444  ;;  %907 = vadd.xlane.f32.xlu1 %v906_v7 }
 0x50f   : > { %v2678_v32 = vmul.f32 %v2626_v16, %v11139_v42  ;;  %v2492_v62 = vmul.f32 %v2445_v35, %v11139_v42 }
 0x510   : > { %v2925_v51 = vsub.f32 1.5, %v2924_v6 }
 0x511   : > { %v9683_v41 = vpop.eup %9682  ;;  %v2710_v4 = vadd.f32 1e-05, %v2678_v32  ;;  %v12482_v59 = vsub.f32 %v12301_v2, %v2492_v62  ;;  %v12495_v62 = vpop.f32.mrf.mxu0 }
 0x512   : > { %v2926_v28 = vmul.f32 %v9681_v55, %v2925_v51  ;;  %v1161_v18 = vmul.f32 %v9683_v41, %v984_v30  ;;  %vm1167_vm9 = vweird.f32 %v9683_v41 }
 0x513   : > { %9684 = vrsqrt.f32 %v2710_v4  ;;  %v2556_v57 = vmul.f32 %v12482_v59, %v12482_v59  ;;  %vm1168_vm11 = vmor %vm1166_vm10, %vm1167_vm9  ;;  %vm2937_vm13 = vweird.f32 %v2710_v4 }
 0x514   : > { %v2930_v33 = vsel %vm2929_vm7, %v9681_v55, %v2926_v28  ;;  %v1162_v27 = vmul.f32 %v9683_v41, %v1161_v18 }
 0x515   : > { %v3061_v20 = vmul.f32 %v2930_v33, %v12320_v36  ;;  %v2642_v63 = vsel %vm640_vm0, %v2556_v57, 0.0  ;;  %v12500_v57 = vpop.f32.mrf.mxu2 }
 0x516   : > { %v1163_v54 = vmul.f32 0.5, %v1162_v27  ;;  %v893_v38 = vpop.xlane.xlu0 %892  ;;  %v712_v7 = vpop.xlane.xlu1 %711  ;;  %2643 = vadd.xlane.f32.xlu0 %v2642_v63  ;;  %17176 = vst [vmem:[#allocation32_spill] sm:$0xff] %v12500_v57 }
 0x517   : > { %v953_v2 = vmul.f32 %v893_v38, %v11139_v42  ;;  %v767_v31 = vmul.f32 %v11139_v42, %v712_v7  ;;  %v3096_v6 = vmul.f32 %v12376_v44, %v3061_v20 }
 0x518   : > { %v1164_v16 = vsub.f32 1.5, %v1163_v54 }
 0x519   : > { %v9685_v35 = vpop.eup %9684  ;;  %v985_v32 = vadd.f32 1e-05, %v953_v2  ;;  %v12492_v55 = vsub.f32 %v17175_v8, %v767_v31  ;;  %v3131_v36 = vadd.f32 %v12382_v9, %v3096_v6  ;;  %v12509_v2 = vld [vmem:[%s16847_s2] ss:$0 sm:$0xff] }
 0x51a   : > { %v1165_v51 = vmul.f32 %v9683_v41, %v1164_v16  ;;  %v2932_v28 = vmul.f32 %v9685_v35, %v2710_v4  ;;  %vm2938_vm12 = vweird.f32 %v9685_v35 }
 0x51b   : > { %9686 = vrsqrt.f32 %v985_v32  ;;  %8998 = vmatmul.msk.f32.gmra.mxu2 %vm640_vm0, %v3131_v36  ;;  %v831_v18 = vmul.f32 %v12492_v55, %v12492_v55  ;;  %v12518_v36 = vld [vmem:[%s16848_s3] ss:$0 sm:$0xff]  ;;  %vm2939_vm14 = vmor %vm2937_vm13, %vm2938_vm12  ;;  %vm1176_vm1 = vweird.f32 %v985_v32 }
 0x51c   : > { %v2933_v33 = vmul.f32 %v9685_v35, %v2932_v28  ;;  %v1169_v27 = vsel %vm1168_vm11, %v9683_v41, %v1165_v51 }
 0x51d   : > { %v909_v8 = vsel %vm640_vm0, %v831_v18, 0.0  ;;  %v1336_v20 = vmul.f32 %v1169_v27, %v12332_v21 }
 0x51e   : > { %v2934_v63 = vmul.f32 0.5, %v2933_v33  ;;  %v2629_v54 = vpop.xlane.xlu0 %2628  ;;  %v2448_v38 = vpop.xlane.xlu1 %2447  ;;  %910 = vadd.xlane.f32.xlu1 %v909_v8 }
 0x51f   : > { %v2679_v30 = vmul.f32 %v2629_v54, %v11139_v42  ;;  %v2493_v7 = vmul.f32 %v2448_v38, %v11139_v42  ;;  %v1371_v31 = vmul.f32 %v12509_v2, %v1336_v20  ;;  %v12525_v33 = vpop.f32.mrf.mxu0  ;;  %v12529_v54 = vpop.f32.mrf.mxu2 }
 0x520   : > { %v2935_v41 = vsub.f32 1.5, %v2934_v63  ;;  %17177 = vst [vmem:[#allocation33_spill] sm:$0xff] %v12529_v54 }
 0x521   : > { %v9687_v6 = vpop.eup %9686  ;;  %v2711_v16 = vadd.f32 1e-05, %v2679_v30  ;;  %v12513_v21 = vsub.f32 %v12311_v1, %v2493_v7  ;;  %v1406_v51 = vadd.f32 %v12518_v36, %v1371_v31 }
 0x522   : > { %v2936_v28 = vmul.f32 %v9685_v35, %v2935_v41  ;;  %v1171_v18 = vmul.f32 %v9687_v6, %v985_v32  ;;  %vm1177_vm15 = vweird.f32 %v9687_v6 }
 0x523   : > { %9688 = vrsqrt.f32 %v2711_v16  ;;  %8930 = vmatmul.msk.f32.gmra.mxu0 %vm640_vm0, %v1406_v51  ;;  %8962 = vmatmul.msk.f32.gmra.mxu1 %vm640_vm0, %v1406_v51  ;;  %v2557_v1 = vmul.f32 %v12513_v21, %v12513_v21  ;;  %vm1178_vm2 = vmor %vm1176_vm1, %vm1177_vm15  ;;  %vm2947_vm4 = vweird.f32 %v2711_v16 }
 0x524   : > { %v2940_v27 = vsel %vm2939_vm14, %v9685_v35, %v2936_v28  ;;  %v1172_v8 = vmul.f32 %v9687_v6, %v1171_v18 }
 0x525   : > { %v3062_v20 = vmul.f32 %v2940_v27, %v12341_v19  ;;  %v2645_v63 = vsel %vm640_vm0, %v2557_v1, 0.0 }
 0x526   : > { %v1173_v4 = vmul.f32 0.5, %v1172_v8  ;;  %2646 = vadd.xlane.f32.xlu0 %v2645_v63 }
 0x527   : > { %v3097_v38 = vmul.f32 %v12376_v44, %v3062_v20  ;;  %v12535_v18 = vpop.f32.mrf.mxu0  ;;  %v12538_v8 = vpop.f32.mrf.mxu2 }
 0x528   : > { %v1174_v30 = vsub.f32 1.5, %v1173_v4 }
 0x529   : > { %v9689_v7 = vpop.eup %9688  ;;  %v3132_v31 = vadd.f32 %v12382_v9, %v3097_v38 }
 0x52a   : > { %v1175_v41 = vmul.f32 %v9687_v6, %v1174_v30  ;;  %v2942_v51 = vmul.f32 %v9689_v7, %v2711_v16  ;;  %vm2948_vm3 = vweird.f32 %v9689_v7 }
 0x52b   : > { %8999 = vmatmul.msk.f32.gmra.mxu2 %vm640_vm0, %v3132_v31  ;;  %vm2949_vm5 = vmor %vm2947_vm4, %vm2948_vm3 }
 0x52c   : > { %v2943_v19 = vmul.f32 %v9689_v7, %v2942_v51  ;;  %v1179_v35 = vsel %vm1178_vm2, %v9687_v6, %v1175_v41 }
 0x52d   : > { %v1337_v28 = vmul.f32 %v1179_v35, %v12354_v22 }
 0x52e   : > { %v2944_v1 = vmul.f32 0.5, %v2943_v19 }
 0x52f   : > { %v1372_v27 = vmul.f32 %v12509_v2, %v1337_v28  ;;  %v12544_v4 = vpop.f32.mrf.mxu0  ;;  %v12547_v30 = vpop.f32.mrf.mxu2 }
 0x530   : > { %v2945_v20 = vsub.f32 1.5, %v2944_v1 }
 0x531   : > { %v1407_v63 = vadd.f32 %v12518_v36, %v1372_v27 }
 0x532   : > { %v2946_v32 = vmul.f32 %v9689_v7, %v2945_v20 }
 0x533   : > { %8931 = vmatmul.msk.f32.gmra.mxu0 %vm640_vm0, %v1407_v63  ;;  %8963 = vmatmul.msk.f32.gmra.mxu1 %vm640_vm0, %v1407_v63 }
 0x534   : > { %v2950_v6 = vsel %vm2949_vm5, %v9689_v7, %v2946_v32 }
 0x535   : > { %v3063_v22 = vmul.f32 %v2950_v6, %v12362_v25 }
 0x537   : > { %v3098_v38 = vmul.f32 %v12376_v44, %v3063_v22  ;;  %v12551_v41 = vpop.f32.mrf.mxu0 }
 0x539   : > { %v3133_v31 = vadd.f32 %v12382_v9, %v3098_v38 }
 0x53b   : > { %9000 = vmatmul.msk.f32.gmra.mxu2 %vm640_vm0, %v3133_v31 }
 0x53f   : > { %v12558_v25 = vpop.f32.mrf.mxu0 }
 0x541   : > { %v3309_v16 = vpop.f32.mrf.mxu2 }
 0x542   : > { %v12554_v51 = vadd.f32 %v12235_v58, %v3309_v16 }
 0x544   : > { %17178 = vst [vmem:[#allocation34_spill] sm:$0xff] %v12554_v51  ;;  %4457 = vrot.lane.b32.xlu2 %v12554_v51, %s10788_s27 }
 0x547   : > { %v12560_v19 = vpop.f32.mrf.mxu0 }
 0x54f   : > { %v12563_v20 = vpop.f32.mrf.mxu0 }
 0x550   : > { %17179 = vst [vmem:[#allocation35_spill] sm:$0xff] %v12563_v20 }
 0x551   : > { %v896_v7 = vpop.xlane.xlu0 %895 }
 0x552   : > { %v954_v35 = vmul.f32 %v896_v7, %v11139_v42 }
 0x554   : > { %v986_v28 = vadd.f32 1e-05, %v954_v35 }
 0x556   : > { %9690 = vrsqrt.f32 %v986_v28  ;;  %vm1186_vm7 = vweird.f32 %v986_v28 }
 0x559   : > { %v2632_v1 = vpop.xlane.xlu1 %2631  ;;  %v2451_v27 = vpop.xlane.xlu0 %2450 }
 0x55a   : > { %v2680_v63 = vmul.f32 %v2632_v1, %v11139_v42  ;;  %v2494_v58 = vmul.f32 %v2451_v27, %v11139_v42  ;;  %v12573_v1 = vpop.f32.mrf.mxu0 }
 0x55b   : > { %17180 = vst [vmem:[#allocation36_spill] sm:$0xff] %v12573_v1 }
 0x55c   : > { %v9691_v32 = vpop.eup %9690  ;;  %v2712_v6 = vadd.f32 1e-05, %v2680_v63  ;;  %v12568_v22 = vsub.f32 %v12324_v53, %v2494_v58 }
 0x55d   : > { %v1181_v38 = vmul.f32 %v9691_v32, %v986_v28  ;;  %vm1187_vm6 = vweird.f32 %v9691_v32 }
 0x55e   : > { %9692 = vrsqrt.f32 %v2712_v6  ;;  %v2558_v31 = vmul.f32 %v12568_v22, %v12568_v22  ;;  %vm1188_vm9 = vmor %vm1186_vm7, %vm1187_vm6  ;;  %vm2957_vm11 = vweird.f32 %v2712_v6 }
 0x55f   : > { %v1182_v16 = vmul.f32 %v9691_v32, %v1181_v38 }
 0x560   : > { %v2648_v7 = vsel %vm640_vm0, %v2558_v31, 0.0 }
 0x561   : > { %v1183_v35 = vmul.f32 0.5, %v1182_v16  ;;  %v899_v51 = vpop.xlane.xlu1 %898  ;;  %v2635_v54 = vpop.xlane.xlu0 %2634  ;;  %2649 = vadd.xlane.f32.xlu1 %v2648_v7 }
 0x562   : > { %v955_v27 = vmul.f32 %v899_v51, %v11139_v42  ;;  %v2681_v63 = vmul.f32 %v2635_v54, %v11139_v42 }
 0x563   : > { %v1184_v53 = vsub.f32 1.5, %v1183_v35  ;;  %v12581_v35 = vpop.f32.mrf.mxu0 }
 0x564   : > { %v9693_v58 = vpop.eup %9692  ;;  %v987_v57 = vadd.f32 1e-05, %v955_v27  ;;  %v12577_v13 = vadd.f32 1e-05, %v2681_v63  ;;  %17181 = vst [vmem:[#allocation72_spill] sm:$0xff] %v12581_v35 }
 0x565   : > { %v1185_v37 = vmul.f32 %v9691_v32, %v1184_v53  ;;  %v2952_v38 = vmul.f32 %v9693_v58, %v2712_v6  ;;  %vm2958_vm10 = vweird.f32 %v9693_v58 }
 0x566   : > { %9694 = vrsqrt.f32 %v987_v57  ;;  %vm2959_vm12 = vmor %vm2957_vm11, %vm2958_vm10  ;;  %vm1196_vm15 = vweird.f32 %v987_v57  ;;  %vm2967_vm2 = vweird.f32 %v12577_v13 }
 0x567   : > { %v2953_v31 = vmul.f32 %v9693_v58, %v2952_v38  ;;  %9696 = vrsqrt.f32 %v12577_v13  ;;  %v1189_v16 = vsel %vm1188_vm9, %v9691_v32, %v1185_v37 }
 0x568   : > { %v1338_v7 = vmul.f32 %v1189_v16, %v12390_v40 }
 0x569   : > { %v2954_v51 = vmul.f32 0.5, %v2953_v31  ;;  %v902_v0 = vpop.xlane.xlu0 %901  ;;  %v2454_v54 = vpop.xlane.xlu1 %2453 }
 0x56a   : > { %v956_v27 = vmul.f32 %v902_v0, %v11139_v42  ;;  %v2495_v63 = vmul.f32 %v2454_v54, %v11139_v42  ;;  %v1373_v28 = vmul.f32 %v12509_v2, %v1338_v7 }
 0x56b   : > { %v2955_v53 = vsub.f32 1.5, %v2954_v51 }
 0x56c   : > { %v9695_v1 = vpop.eup %9694  ;;  %v12586_v38 = vadd.f32 1e-05, %v956_v27  ;;  %v12589_v37 = vsub.f32 %v12335_v5, %v2495_v63  ;;  %v1408_v40 = vadd.f32 %v12518_v36, %v1373_v28 }
 0x56d   : > { %v9697_v32 = vpop.eup %9696  ;;  %v2956_v31 = vmul.f32 %v9693_v58, %v2955_v53  ;;  %v1191_v16 = vmul.f32 %v9695_v1, %v987_v57  ;;  %vm1197_vm13 = vweird.f32 %v9695_v1 }
 0x56e   : > { %v2962_v0 = vmul.f32 %v9697_v32, %v12577_v13  ;;  %9698 = vrsqrt.f32 %v12586_v38  ;;  %8932 = vmatmul.msk.f32.gmra.mxu0 %vm640_vm0, %v1408_v40  ;;  %8964 = vmatmul.msk.f32.gmra.mxu1 %vm640_vm0, %v1408_v40  ;;  %v2559_v5 = vmul.f32 %v12589_v37, %v12589_v37  ;;  %vm2968_vm14 = vweird.f32 %v9697_v32  ;;  %vm1198_vm1 = vmor %vm1196_vm15, %vm1197_vm13 }
 0x56f   : > { %v2960_v7 = vsel %vm2959_vm12, %v9693_v58, %v2956_v31  ;;  %v1192_v51 = vmul.f32 %v9695_v1, %v1191_v16  ;;  %v12603_v16 = vpop.f32.mrf.mxu0  ;;  %vm2969_vm3 = vmor %vm2967_vm2, %vm2968_vm14  ;;  %vm1206_vm5 = vweird.f32 %v12586_v38 }
 0x570   : > { %v3064_v54 = vmul.f32 %v2960_v7, %v12398_v14  ;;  %v2963_v27 = vmul.f32 %v9697_v32, %v2962_v0  ;;  %v2651_v28 = vsel %vm640_vm0, %v2559_v5, 0.0 }
 0x571   : > { %v1193_v63 = vmul.f32 0.5, %v1192_v51  ;;  %v2638_v6 = vpop.xlane.xlu1 %2637  ;;  %v2457_v53 = vpop.xlane.xlu0 %2456  ;;  %2652 = vadd.xlane.f32.xlu0 %v2651_v28 }
 0x572   : > { %v2964_v35 = vmul.f32 0.5, %v2963_v27  ;;  %v2682_v49 = vmul.f32 %v2638_v6, %v11139_v42  ;;  %v2496_v20 = vmul.f32 %v2457_v53, %v11139_v42  ;;  %v3099_v58 = vmul.f32 %v12376_v44, %v3064_v54 }
 0x573   : > { %v1194_v40 = vsub.f32 1.5, %v1193_v63 }
 0x574   : > { %v9699_v31 = vpop.eup %9698  ;;  %v2965_v14 = vsub.f32 1.5, %v2964_v35  ;;  %v12605_v0 = vadd.f32 1e-05, %v2682_v49  ;;  %v12608_v7 = vsub.f32 %v12347_v48, %v2496_v20  ;;  %v3134_v51 = vadd.f32 %v12382_v9, %v3099_v58  ;;  %v12621_v58 = vpop.f32.mrf.mxu2 }
 0x575   : > { %v1195_v5 = vmul.f32 %v9695_v1, %v1194_v40  ;;  %v1201_v27 = vmul.f32 %v9699_v31, %v12586_v38  ;;  %17182 = vst [vmem:[#allocation73_spill] sm:$0xff] %v12621_v58  ;;  %vm1207_vm4 = vweird.f32 %v9699_v31 }
 0x576   : > { %v2966_v54 = vmul.f32 %v9697_v32, %v2965_v14  ;;  %9700 = vrsqrt.f32 %v12605_v0  ;;  %9001 = vmatmul.msk.f32.gmra.mxu2 %vm640_vm0, %v3134_v51  ;;  %v2560_v49 = vmul.f32 %v12608_v7, %v12608_v7  ;;  %vm1208_vm6 = vmor %vm1206_vm5, %vm1207_vm4  ;;  %vm2977_vm9 = vweird.f32 %v12605_v0 }
 0x577   : > { %v1202_v48 = vmul.f32 %v9699_v31, %v1201_v27  ;;  %v1199_v20 = vsel %vm1198_vm1, %v9695_v1, %v1195_v5 }
 0x578   : > { %v2970_v35 = vsel %vm2969_vm3, %v9697_v32, %v2966_v54  ;;  %v2654_v57 = vsel %vm640_vm0, %v2560_v49, 0.0  ;;  %v1339_v63 = vmul.f32 %v1199_v20, %v12406_v45  ;;  %v12627_v45 = vpop.f32.mrf.mxu0 }
 0x579   : > { %v3065_v6 = vmul.f32 %v2970_v35, %v12413_v50  ;;  %v1203_v28 = vmul.f32 0.5, %v1202_v48  ;;  %v905_v13 = vpop.xlane.xlu1 %904  ;;  %v2641_v53 = vpop.xlane.xlu0 %2640  ;;  %2655 = vadd.xlane.f32.xlu0 %v2654_v57 }
 0x57a   : > { %v957_v40 = vmul.f32 %v905_v13, %v11139_v42  ;;  %v2683_v14 = vmul.f32 %v2641_v53, %v11139_v42  ;;  %v1374_v51 = vmul.f32 %v12509_v2, %v1339_v63 }
 0x57b   : > { %v1204_v1 = vsub.f32 1.5, %v1203_v28  ;;  %v3100_v32 = vmul.f32 %v12376_v44, %v3065_v6 }
 0x57c   : > { %v9701_v5 = vpop.eup %9700  ;;  %v989_v50 = vadd.f32 1e-05, %v957_v40  ;;  %v12629_v27 = vadd.f32 1e-05, %v2683_v14  ;;  %v1409_v54 = vadd.f32 %v12518_v36, %v1374_v51  ;;  %v12642_v14 = vpop.f32.mrf.mxu2 }
 0x57d   : > { %v1205_v49 = vmul.f32 %v9699_v31, %v1204_v1  ;;  %v2972_v48 = vmul.f32 %v9701_v5, %v12605_v0  ;;  %v3135_v20 = vadd.f32 %v12382_v9, %v3100_v32  ;;  %vm2978_vm7 = vweird.f32 %v9701_v5  ;;  %17183 = vst [vmem:[#allocation74_spill] sm:$0xff] %v12642_v14 }
 0x57e   : > { %9702 = vrsqrt.f32 %v989_v50  ;;  %8933 = vmatmul.msk.f32.gmra.mxu0 %vm640_vm0, %v1409_v54  ;;  %8965 = vmatmul.msk.f32.gmra.mxu1 %vm640_vm0, %v1409_v54  ;;  %vm2979_vm10 = vmor %vm2977_vm9, %vm2978_vm7  ;;  %vm1216_vm13 = vweird.f32 %v989_v50  ;;  %vm2987_vm15 = vweird.f32 %v12629_v27 }
 0x57f   : > { %v2973_v35 = vmul.f32 %v9701_v5, %v2972_v48  ;;  %9704 = vrsqrt.f32 %v12629_v27  ;;  %9002 = vmatmul.msk.f32.gmra.mxu2 %vm640_vm0, %v3135_v20  ;;  %v1209_v57 = vsel %vm1208_vm6, %v9699_v31, %v1205_v49 }
 0x580   : > { %v1340_v63 = vmul.f32 %v1209_v57, %v12428_v56  ;;  %v12646_v56 = vpop.f32.mrf.mxu0 }
 0x581   : > { %v2974_v6 = vmul.f32 0.5, %v2973_v35  ;;  %v908_v38 = vpop.xlane.xlu1 %907 }
 0x582   : > { %v958_v28 = vmul.f32 %v908_v38, %v11139_v42  ;;  %v1375_v13 = vmul.f32 %v12509_v2, %v1340_v63 }
 0x583   : > { %v2975_v53 = vsub.f32 1.5, %v2974_v6 }
 0x584   : > { %v9703_v40 = vpop.eup %9702  ;;  %v990_v51 = vadd.f32 1e-05, %v958_v28  ;;  %v1410_v1 = vadd.f32 %v12518_v36, %v1375_v13  ;;  %v12657_v13 = vld [vmem:[%s16850_s5] ss:$0 sm:$0xff] }
 0x585   : > { %v9705_v32 = vpop.eup %9704  ;;  %v2976_v54 = vmul.f32 %v9701_v5, %v2975_v53  ;;  %v1211_v31 = vmul.f32 %v9703_v40, %v989_v50  ;;  %v12661_v53 = vadd.f32 %v12657_v13, %v12205_v12  ;;  %vm1217_vm11 = vweird.f32 %v9703_v40 }
 0x586   : > { %v2982_v49 = vmul.f32 %v9705_v32, %v12629_v27  ;;  %9706 = vrsqrt.f32 %v990_v51  ;;  %8934 = vmatmul.msk.f32.gmra.mxu0 %vm640_vm0, %v1410_v1  ;;  %8966 = vmatmul.msk.f32.gmra.mxu1 %vm640_vm0, %v1410_v1  ;;  %vm2988_vm12 = vweird.f32 %v9705_v32  ;;  %vm1218_vm14 = vmor %vm1216_vm13, %vm1217_vm11  ;;  %vm1226_vm3 = vweird.f32 %v990_v51 }
 0x587   : > { %v2980_v48 = vsel %vm2979_vm10, %v9701_v5, %v2976_v54  ;;  %v1212_v20 = vmul.f32 %v9703_v40, %v1211_v31  ;;  %17184 = vst [vmem:[#allocation75_spill] sm:$0xff] %v12661_v53  ;;  %v12663_v54 = vpop.f32.mrf.mxu2  ;;  %vm2989_vm1 = vmor %vm2987_vm15, %vm2988_vm12 }
 0x588   : > { %v3066_v35 = vmul.f32 %v2980_v48, %v12440_v26  ;;  %v2983_v57 = vmul.f32 %v9705_v32, %v2982_v49 }
 0x589   : > { %v1213_v63 = vmul.f32 0.5, %v1212_v20  ;;  %v2644_v6 = vpop.xlane.xlu0 %2643 }
 0x58a   : > { %v2984_v38 = vmul.f32 0.5, %v2983_v57  ;;  %v2684_v0 = vmul.f32 %v2644_v6, %v11139_v42  ;;  %v3101_v28 = vmul.f32 %v12376_v44, %v3066_v35  ;;  %v12666_v35 = vpop.f32.mrf.mxu0 }
 0x58b   : > { %v1214_v5 = vsub.f32 1.5, %v1213_v63 }
 0x58c   : > { %v9707_v26 = vpop.eup %9706  ;;  %v2985_v1 = vsub.f32 1.5, %v2984_v38  ;;  %v2716_v31 = vadd.f32 1e-05, %v2684_v0  ;;  %v3136_v49 = vadd.f32 %v12382_v9, %v3101_v28 }
 0x58d   : > { %v1215_v48 = vmul.f32 %v9703_v40, %v1214_v5  ;;  %v1221_v20 = vmul.f32 %v9707_v26, %v990_v51  ;;  %4427 = vrot.lane.b32.xlu0 %v12661_v53, %s10788_s27  ;;  %vm1227_vm2 = vweird.f32 %v9707_v26 }
 0x58e   : > { %v2986_v57 = vmul.f32 %v9705_v32, %v2985_v1  ;;  %9708 = vrsqrt.f32 %v2716_v31  ;;  %9003 = vmatmul.msk.f32.gmra.mxu2 %vm640_vm0, %v3136_v49  ;;  %v12679_v49 = vadd.f32 %v12657_v13, %v12219_v17  ;;  %vm1228_vm4 = vmor %vm1226_vm3, %vm1227_vm2  ;;  %vm2997_vm6 = vweird.f32 %v2716_v31 }
 0x58f   : > { %v1222_v12 = vmul.f32 %v9707_v26, %v1221_v20  ;;  %v1219_v63 = vsel %vm1218_vm14, %v9703_v40, %v1215_v48  ;;  %v12683_v20 = vpop.f32.mrf.mxu2 }
 0x590   : > { %v2990_v6 = vsel %vm2989_vm1, %v9705_v32, %v2986_v57  ;;  %v1341_v38 = vmul.f32 %v1219_v63, %v12448_v46  ;;  %17185 = vst [vmem:[#allocation76_spill] sm:$0xff] %v12679_v49 }
 0x591   : > { %v3067_v50 = vmul.f32 %v2990_v6, %v12455_v10  ;;  %v1223_v0 = vmul.f32 0.5, %v1222_v12  ;;  %v911_v28 = vpop.xlane.xlu1 %910 }
 0x592   : > { %v959_v5 = vmul.f32 %v911_v28, %v11139_v42  ;;  %v1376_v27 = vmul.f32 %v12509_v2, %v1341_v38  ;;  %v12690_v12 = vpop.f32.mrf.mxu0  ;;  %v12697_v28 = vadd.f32 %v12657_v13, %v12230_v34 }
 0x593   : > { %v1224_v1 = vsub.f32 1.5, %v1223_v0  ;;  %v3102_v14 = vmul.f32 %v12376_v44, %v3067_v50 }
 0x594   : > { %v9709_v58 = vpop.eup %9708  ;;  %v991_v40 = vadd.f32 1e-05, %v959_v5  ;;  %v1411_v46 = vadd.f32 %v12518_v36, %v1376_v27  ;;  %17186 = vst [vmem:[#allocation77_spill] sm:$0xff] %v12697_v28 }
 0x595   : > { %v1225_v32 = vmul.f32 %v9707_v26, %v1224_v1  ;;  %v2992_v10 = vmul.f32 %v9709_v58, %v2716_v31  ;;  %v3137_v48 = vadd.f32 %v12382_v9, %v3102_v14  ;;  %4431 = vrot.lane.b32.xlu0 %v12679_v49, %s10788_s27  ;;  %vm2998_vm5 = vweird.f32 %v9709_v58 }
 0x596   : > { %9710 = vrsqrt.f32 %v991_v40  ;;  %8935 = vmatmul.msk.f32.gmra.mxu0 %vm640_vm0, %v1411_v46  ;;  %8967 = vmatmul.msk.f32.gmra.mxu1 %vm640_vm0, %v1411_v46  ;;  %vm2999_vm7 = vmor %vm2997_vm6, %vm2998_vm5  ;;  %vm1236_vm10 = vweird.f32 %v991_v40 }
 0x597   : > { %v2993_v57 = vmul.f32 %v9709_v58, %v2992_v10  ;;  %9004 = vmatmul.msk.f32.gmra.mxu2 %vm640_vm0, %v3137_v48  ;;  %v1229_v17 = vsel %vm1228_vm4, %v9707_v26, %v1225_v32 }
 0x598   : > { %v1342_v51 = vmul.f32 %v1229_v17, %v12470_v23  ;;  %v12703_v23 = vld [vmem:[%s16852_s7] ss:$0 sm:$0xff] }
 0x599   : > { %v2994_v14 = vmul.f32 0.5, %v2993_v57  ;;  %v2647_v63 = vpop.xlane.xlu0 %2646  ;;  %v1544_v17 = vadd.f32 %v12703_v23, %v12479_v61 }
 0x59a   : > { %v2685_v6 = vmul.f32 %v2647_v63, %v11139_v42  ;;  %v1377_v38 = vmul.f32 %v12509_v2, %v1342_v51 }
 0x59b   : > { %v2995_v50 = vsub.f32 1.5, %v2994_v14 }
 0x59c   : > { %v9711_v0 = vpop.eup %9710  ;;  %v2717_v5 = vadd.f32 1e-05, %v2685_v6  ;;  %v1412_v26 = vadd.f32 %v12518_v36, %v1377_v38 }
 0x59d   : > { %v2996_v27 = vmul.f32 %v9709_v58, %v2995_v50  ;;  %v1231_v1 = vmul.f32 %v9711_v0, %v991_v40  ;;  %4439 = vrot.lane.b32.xlu0 %v12697_v28, %s10788_s27  ;;  %vm1237_vm9 = vweird.f32 %v9711_v0  ;;  %v12731_v50 = vadd.f32 %v12657_v13, %v12249_v43 }
 0x59e   : > { %9712 = vrsqrt.f32 %v2717_v5  ;;  %8936 = vmatmul.msk.f32.gmra.mxu0 %vm640_vm0, %v1412_v26  ;;  %v3324_v34 = vpop.f32.mrf.mxu2  ;;  %8968 = vmatmul.msk.f32.gmra.mxu1 %vm640_vm0, %v1412_v26  ;;  %vm1238_vm11 = vmor %vm1236_vm10, %vm1237_vm9  ;;  %vm3007_vm13 = vweird.f32 %v2717_v5 }
 0x59f   : > { %v3000_v46 = vsel %vm2999_vm7, %v9709_v58, %v2996_v27  ;;  %v1232_v32 = vmul.f32 %v9711_v0, %v1231_v1  ;;  %v12710_v10 = vadd.f32 %v12657_v13, %v3324_v34  ;;  %v12719_v58 = vld [vmem:[%s16854_s9] ss:$0 sm:$0xff]  ;;  %17189 = vst [vmem:[#allocation80_spill] sm:$0xff] %v12731_v50 }
 0x5a0   : > { %v3068_v48 = vmul.f32 %v3000_v46, %v12482_v59  ;;  %v1591_v57 = vpop.f32.mrf.mxu0  ;;  %v1712_v31 = vpop.f32.mrf.mxu1 }
 0x5a1   : > { %17187 = vst [vmem:[#allocation78_spill] sm:$0xff] %v12710_v10  ;;  %v1233_v51 = vmul.f32 0.5, %v1232_v32  ;;  %v1592_v14 = vadd.f32 %v12703_v23, %v1591_v57  ;;  %v12722_v63 = vadd.f32 %v12719_v58, %v1712_v31  ;;  %4467 = vrot.lane.b32.xlu2 %v12710_v10, %s10788_s27 }
 0x5a2   : > { %v3103_v59 = vmul.f32 %v12376_v44, %v3068_v48 }
 0x5a3   : > { %17188 = vst [vmem:[#allocation79_spill] sm:$0xff] %v12722_v63  ;;  %v1234_v6 = vsub.f32 1.5, %v1233_v51  ;;  %v9530_v38 = vpack.i.bf16 %v1592_v14, %v1544_v17  ;;  %v12758_v17 = vld [vmem:[%s16847_s2] ss:$0 sm:$0xff] }
 0x5a4   : > { %1843 = vst.msk [vmem:[#allocation3 + $0x80] sm:$0xff] %vm1826_vm8, %v12722_v63  ;;  %v9713_v61 = vpop.eup %9712  ;;  %v3138_v26 = vadd.f32 %v12382_v9, %v3103_v59  ;;  %v12741_v9 = vadd.f32 %v12657_v13, %v12259_v47  ;;  %v1547_v47 = vadd.f32 %v12703_v23, %v12495_v62  ;;  %v12770_v62 = vld [vmem:[%s16848_s3] ss:$0 sm:$0xff] }
 0x5a5   : > { %v1235_v27 = vmul.f32 %v9711_v0, %v1234_v6  ;;  %v3002_v1 = vmul.f32 %v9713_v61, %v2717_v5  ;;  %9531 = vxpose.xlu1.b32.start [1/16] (narrow) %v9530_v38, 32  ;;  %4443 = vrot.lane.b32.xlu0 %v12731_v50, %s10788_s27  ;;  %vm3008_vm12 = vweird.f32 %v9713_v61  ;;  %v12778_v6 = vadd.f32 %v12657_v13, %v12547_v30 }
 0x5a6   : > { %9005 = vmatmul.msk.f32.gmra.mxu2 %vm640_vm0, %v3138_v26  ;;  %17190 = vst [vmem:[#allocation81_spill] sm:$0xff] %v12741_v9  ;;  %vm3009_vm14 = vmor %vm3007_vm13, %vm3008_vm12 }
 0x5a7   : > { %v3003_v44 = vmul.f32 %v9713_v61, %v3002_v1  ;;  %v1239_v34 = vsel %vm1238_vm11, %v9711_v0, %v1235_v27  ;;  %17193 = vst [vmem:[#allocation84_spill] sm:$0xff] %v12778_v6 }
 0x5a8   : > { %v1343_v46 = vmul.f32 %v1239_v34, %v12492_v55 }
 0x5a9   : > { %v3004_v32 = vmul.f32 0.5, %v3003_v44 }
 0x5aa   : > { %v1378_v43 = vmul.f32 %v12509_v2, %v1343_v46 }
 0x5ab   : > { %v3005_v48 = vsub.f32 1.5, %v3004_v32 }
 0x5ac   : > { %v1413_v40 = vadd.f32 %v12518_v36, %v1378_v43 }
 0x5ad   : > { %v3006_v57 = vmul.f32 %v9713_v61, %v3005_v48  ;;  %4445 = vrot.lane.b32.xlu0 %v12741_v9, %s10788_s27 }
 0x5ae   : > { %8937 = vmatmul.msk.f32.gmra.mxu0 %vm640_vm0, %v1413_v40  ;;  %8969 = vmatmul.msk.f32.gmra.mxu1 %vm640_vm0, %v1413_v40  ;;  %v12788_v38 = vpop.f32.mrf.mxu2 }
 0x5af   : > { %v3010_v55 = vsel %vm3009_vm14, %v9713_v61, %v3006_v57  ;;  %v12792_v61 = vadd.f32 %v12657_v13, %v12683_v20 }
 0x5b0   : > { %v3069_v2 = vmul.f32 %v3010_v55, %v12513_v21  ;;  %v1594_v0 = vpop.f32.mrf.mxu0  ;;  %v1715_v31 = vpop.f32.mrf.mxu1  ;;  %v12765_v21 = vadd.f32 %v12657_v13, %v12538_v8  ;;  %v12784_v8 = vadd.f32 %v12657_v13, %v12663_v54 }
 0x5b1   : > { %v1595_v36 = vadd.f32 %v12703_v23, %v1594_v0  ;;  %v12753_v5 = vadd.f32 %v12719_v58, %v1715_v31  ;;  %17195 = vst [vmem:[#allocation86_spill] sm:$0xff] %v12792_v61 }
 0x5b2   : > { %v3104_v51 = vmul.f32 %v12758_v17, %v3069_v2  ;;  %17192 = vst [vmem:[#allocation83_spill] sm:$0xff] %v12765_v21 }
 0x5b3   : > { %17191 = vst [vmem:[#allocation82_spill] sm:$0xff] %v12753_v5  ;;  %v9532_v14 = vpack.i.bf16 %v1595_v36, %v1547_v47  ;;  %v1550_v47 = vadd.f32 %v12703_v23, %v12525_v33 }
 0x5b4   : > { %1844 = vst.msk [vmem:[#allocation3 + $0x88] sm:$0xff] %vm1826_vm8, %v12753_v5  ;;  %v3139_v59 = vadd.f32 %v12770_v62, %v3104_v51 }
 0x5b5   : > { %9533 = vxpose.xlu1.b32.cont [2/16] (narrow) %v9532_v14, 32  ;;  %4453 = vrot.lane.b32.xlu0 %v12765_v21, %s10788_s27  ;;  %17194 = vst [vmem:[#allocation85_spill] sm:$0xff] %v12784_v8 }
 0x5b6   : > { %9006 = vmatmul.msk.f32.gmra.mxu2 %vm640_vm0, %v3139_v59 }
 0x5bd   : > { %4455 = vrot.lane.b32.xlu0 %v12778_v6, %s10788_s27 }
 0x5be   : > { %v3330_v30 = vpop.f32.mrf.mxu2 }
 0x5bf   : > { %v12797_v26 = vadd.f32 %v12657_v13, %v3330_v30 }
 0x5c1   : > { %17196 = vst [vmem:[#allocation87_spill] sm:$0xff] %v12797_v26 }
 0x5c5   : > { %4463 = vrot.lane.b32.xlu0 %v12784_v8, %s10788_s27 }
 0x5cd   : > { %4465 = vrot.lane.b32.xlu0 %v12792_v61, %s10788_s27 }
 0x5d4   : > { %v2650_v27 = vpop.xlane.xlu1 %2649 }
 0x5d5   : > { %v2686_v54 = vmul.f32 %v2650_v27, %v11139_v42  ;;  %4471 = vrot.lane.b32.xlu0 %v12797_v26, %s10788_s27 }
 0x5d7   : > { %v2718_v1 = vadd.f32 1e-05, %v2686_v54 }
 0x5d9   : > { %9714 = vrsqrt.f32 %v2718_v1  ;;  %vm3017_vm1 = vweird.f32 %v2718_v1 }
 0x5dd   : > { %1924 = vrot.lane.b32.xlu0 %v12173_v15, %s10788_s27 }
 0x5df   : > { %v9715_v20 = vpop.eup %9714 }
 0x5e0   : > { %v3012_v44 = vmul.f32 %v9715_v20, %v2718_v1  ;;  %vm3018_vm15 = vweird.f32 %v9715_v20 }
 0x5e1   : > { %vm3019_vm2 = vmor %vm3017_vm1, %vm3018_vm15 }
 0x5e2   : > { %v3013_v34 = vmul.f32 %v9715_v20, %v3012_v44 }
 0x5e4   : > { %v3014_v46 = vmul.f32 0.5, %v3013_v34  ;;  %v2653_v32 = vpop.xlane.xlu0 %2652 }
 0x5e5   : > { %v2687_v48 = vmul.f32 %v2653_v32, %v11139_v42  ;;  %1954 = vrot.lane.b32.xlu0 %v12080_v60, %s10788_s27 }
 0x5e6   : > { %v3015_v43 = vsub.f32 1.5, %v3014_v46 }
 0x5e7   : > { %v2719_v57 = vadd.f32 1e-05, %v2687_v48 }
 0x5e8   : > { %v3016_v40 = vmul.f32 %v9715_v20, %v3015_v43 }
 0x5e9   : > { %9716 = vrsqrt.f32 %v2719_v57  ;;  %vm3027_vm4 = vweird.f32 %v2719_v57 }
 0x5ea   : > { %v3020_v55 = vsel %vm3019_vm2, %v9715_v20, %v3016_v40 }
 0x5eb   : > { %v3070_v2 = vmul.f32 %v3020_v55, %v12568_v22  ;;  %v1597_v0 = vpop.f32.mrf.mxu0  ;;  %v1718_v31 = vpop.f32.mrf.mxu1 }
 0x5ec   : > { %v1598_v36 = vadd.f32 %v12703_v23, %v1597_v0  ;;  %v12812_v51 = vadd.f32 %v12719_v58, %v1718_v31  ;;  %v2656_v14 = vpop.xlane.xlu0 %2655  ;;  %v1553_v31 = vadd.f32 %v12703_v23, %v12535_v18 }
 0x5ed   : > { %v3105_v59 = vmul.f32 %v12758_v17, %v3070_v2  ;;  %v2688_v27 = vmul.f32 %v2656_v14, %v11139_v42 }
 0x5ee   : > { %17197 = vst [vmem:[#allocation88_spill] sm:$0xff] %v12812_v51  ;;  %v9534_v30 = vpack.i.bf16 %v1598_v36, %v1550_v47 }
 0x5ef   : > { %1845 = vst.msk [vmem:[#allocation3 + $0x90] sm:$0xff] %vm1826_vm8, %v12812_v51  ;;  %v3140_v22 = vadd.f32 %v12770_v62, %v3105_v59  ;;  %v9717_v54 = vpop.eup %9716  ;;  %v2720_v1 = vadd.f32 1e-05, %v2688_v27 }
 0x5f0   : > { %9535 = vxpose.xlu1.b32.cont [3/16] (narrow) %v9534_v30, 32  ;;  %v3022_v33 = vmul.f32 %v9717_v54, %v2719_v57  ;;  %vm3028_vm3 = vweird.f32 %v9717_v54 }
 0x5f1   : > { %9007 = vmatmul.msk.f32.gmra.mxu2 %vm640_vm0, %v3140_v22  ;;  %9718 = vrsqrt.f32 %v2720_v1  ;;  %vm3029_vm5 = vmor %vm3027_vm4, %vm3028_vm3  ;;  %vm3037_vm6 = vweird.f32 %v2720_v1 }
 0x5f2   : > { %v3023_v20 = vmul.f32 %v9717_v54, %v3022_v33 }
 0x5f4   : > { %v3024_v44 = vmul.f32 0.5, %v3023_v20  ;;  %v1556_v20 = vadd.f32 %v12703_v23, %v12544_v4 }
 0x5f6   : > { %v3025_v34 = vsub.f32 1.5, %v3024_v44 }
 0x5f7   : > { %v9719_v46 = vpop.eup %9718 }
 0x5f8   : > { %v3026_v32 = vmul.f32 %v9717_v54, %v3025_v34  ;;  %v3032_v43 = vmul.f32 %v9719_v46, %v2720_v1  ;;  %vm3038_vm7 = vweird.f32 %v9719_v46 }
 0x5f9   : > { %v3333_v48 = vpop.f32.mrf.mxu2  ;;  %vm3039_vm9 = vmor %vm3037_vm6, %vm3038_vm7 }
 0x5fa   : > { %v12821_v42 = vadd.f32 %v12657_v13, %v3333_v48  ;;  %v3030_v40 = vsel %vm3029_vm5, %v9717_v54, %v3026_v32  ;;  %v3033_v55 = vmul.f32 %v9719_v46, %v3032_v43 }
 0x5fb   : > { %v1600_v2 = vpop.f32.mrf.mxu0  ;;  %v1721_v0 = vpop.f32.mrf.mxu1  ;;  %v3071_v47 = vmul.f32 %v3030_v40, %v12589_v37 }
 0x5fc   : > { %17198 = vst [vmem:[#allocation89_spill] sm:$0xff] %v12821_v42  ;;  %v1601_v36 = vadd.f32 %v12703_v23, %v1600_v2  ;;  %v12828_v14 = vadd.f32 %v12719_v58, %v1721_v0  ;;  %4473 = vrot.lane.b32.xlu2 %v12821_v42, %s10788_s27  ;;  %v3034_v57 = vmul.f32 0.5, %v3033_v55 }
 0x5fd   : > { %v3106_v30 = vmul.f32 %v12758_v17, %v3071_v47 }
 0x5fe   : > { %17199 = vst [vmem:[#allocation90_spill] sm:$0xff] %v12828_v14  ;;  %v9536_v59 = vpack.i.bf16 %v1601_v36, %v1553_v31  ;;  %v3035_v18 = vsub.f32 1.5, %v3034_v57  ;;  %v12874_v36 = vpop.permute.xlu2 %4429 }
 0x5ff   : > { %1846 = vst.msk [vmem:[#allocation3 + $0x98] sm:$0xff] %vm1826_vm8, %v12828_v14  ;;  %v12835_v37 = vpop.permute.xlu0 %4427  ;;  %v3141_v27 = vadd.f32 %v12770_v62, %v3106_v30  ;;  %v1562_v30 = vadd.f32 %v12703_v23, %v12558_v25 }
 0x600   : > { %17200 = vst [vmem:[#allocation91_spill] sm:$0xff] %v12835_v37  ;;  %9537 = vxpose.xlu1.b32.cont [4/16] (narrow) %v9536_v59, 32  ;;  %v3036_v22 = vmul.f32 %v9719_v46, %v3035_v18 }
 0x601   : > { %9008 = vmatmul.msk.f32.gmra.mxu2 %vm640_vm0, %v3141_v27  ;;  %17206 = vst [vmem:[#allocation97_spill] sm:$0xff] %v12874_v36 }
 0x602   : > { %v3040_v54 = vsel %vm3039_vm9, %v9719_v46, %v3036_v22 }
 0x603   : > { %v1603_v33 = vpop.f32.mrf.mxu0  ;;  %v1724_v1 = vpop.f32.mrf.mxu1  ;;  %v3072_v44 = vmul.f32 %v3040_v54, %v12608_v7 }
 0x604   : > { %v1604_v34 = vadd.f32 %v12703_v23, %v1603_v33  ;;  %v12844_v32 = vadd.f32 %v12719_v58, %v1724_v1  ;;  %1922 = vrot.lane.b32.xlu2 %v12164_v29, %s10788_s27  ;;  %v12854_v7 = vpop.f32.mrf.mxu2 }
 0x605   : > { %v3107_v46 = vmul.f32 %v12758_v17, %v3072_v44  ;;  %v1559_v17 = vadd.f32 %v12703_v23, %v12551_v41 }
 0x606   : > { %17201 = vst [vmem:[#allocation92_spill] sm:$0xff] %v12844_v32  ;;  %v9538_v43 = vpack.i.bf16 %v1604_v34, %v1556_v20  ;;  %v12892_v33 = vpop.permute.xlu2 %4435  ;;  %v1565_v34 = vadd.f32 %v12703_v23, %v12560_v19 }
 0x607   : > { %1847 = vst.msk [vmem:[#allocation3 + $0xa0] sm:$0xff] %vm1826_vm8, %v12844_v32  ;;  %v12851_v48 = vpop.permute.xlu0 %4431  ;;  %v3142_v4 = vadd.f32 %v12770_v62, %v3107_v46 }
 0x608   : > { %17202 = vst [vmem:[#allocation93_spill] sm:$0xff] %v12851_v48  ;;  %9539 = vxpose.xlu1.b32.cont [5/16] (narrow) %v9538_v43, 32 }
 0x609   : > { %9009 = vmatmul.msk.f32.gmra.mxu2 %vm640_vm0, %v3142_v4  ;;  %17209 = vst [vmem:[#allocation100_spill] sm:$0xff] %v12892_v33 }
 0x60c   : > { %1952 = vrot.lane.b32.xlu2 %v12061_v11, %s10788_s27 }
 0x60e   : > { %v12900_v20 = vpop.permute.xlu2 %4437 }
 0x60f   : > { %v12859_v40 = vpop.permute.xlu0 %4439  ;;  %17211 = vst [vmem:[#allocation102_spill] sm:$0xff] %v12900_v20 }
 0x610   : > { %17203 = vst [vmem:[#allocation94_spill] sm:$0xff] %v12859_v40 }
 0x611   : > { %v3339_v55 = vpop.f32.mrf.mxu2 }
 0x612   : > { %v12862_v2 = vadd.f32 %v12657_v13, %v3339_v55 }
 0x613   : > { %v1606_v0 = vpop.f32.mrf.mxu0  ;;  %v1727_v62 = vpop.f32.mrf.mxu1 }
 0x614   : > { %17204 = vst [vmem:[#allocation95_spill] sm:$0xff] %v12862_v2  ;;  %v1607_v31 = vadd.f32 %v12703_v23, %v1606_v0  ;;  %4477 = vrot.lane.b32.xlu0 %v12862_v2, %s10788_s27  ;;  %1918 = vrot.lane.b32.xlu2 %v12143_v24, %s10788_s27  ;;  %v12872_v47 = vadd.f32 %v12719_v58, %v1727_v62  ;;  %v17214_v62 = vld [vmem:[#allocation43_spill] sm:$0xff] }
 0x616   : > { %17205 = vst [vmem:[#allocation96_spill] sm:$0xff] %v12872_v47  ;;  %v9540_v57 = vpack.i.bf16 %v1607_v31, %v1559_v17  ;;  %v17213_v17 = vld [vmem:[#allocation35_spill] sm:$0xff]  ;;  %v12916_v19 = vpop.permute.xlu2 %4441 }
 0x617   : > { %1848 = vst.msk [vmem:[#allocation3 + $0xa8] sm:$0xff] %vm1826_vm8, %v12872_v47  ;;  %v12878_v59 = vpop.permute.xlu0 %4443  ;;  %v1568_v31 = vadd.f32 %v12703_v23, %v17213_v17 }
 0x618   : > { %17207 = vst [vmem:[#allocation98_spill] sm:$0xff] %v12878_v59  ;;  %9541 = vxpose.xlu1.b32.cont [6/16] (narrow) %v9540_v57, 32  ;;  %v1616_v57 = vadd.f32 %v12703_v23, %v17214_v62 }
 0x619   : > { %17215 = vst [vmem:[#allocation35_spill] sm:$0xff] %v12916_v19 }
 0x61b   : > { %v1609_v41 = vpop.f32.mrf.mxu0  ;;  %v1730_v27 = vpop.f32.mrf.mxu1 }
 0x61c   : > { %v1610_v18 = vadd.f32 %v12703_v23, %v1609_v41  ;;  %1920 = vrot.lane.b32.xlu0 %v12153_v39, %s10788_s27  ;;  %1950 = vrot.lane.b32.xlu2 %v12029_v3, %s10788_s27  ;;  %v12888_v22 = vadd.f32 %v12719_v58, %v1730_v27  ;;  %v9546_v41 = vpack.i.bf16 %v1616_v57, %v1568_v31  ;;  %v17217_v27 = vld [vmem:[#allocation36_spill] sm:$0xff]  ;;  %v4183_v57 = vld [vmem:[#allocation3 + $0x90] sm:$0xff] }
 0x61d   : > { %v4184_v31 = vld [vmem:[#allocation3 + $0x98] sm:$0xff] }
 0x61e   : > { %17208 = vst [vmem:[#allocation99_spill] sm:$0xff] %v12888_v22  ;;  %v9542_v54 = vpack.i.bf16 %v1610_v18, %v1562_v30  ;;  %v12924_v17 = vpop.permute.xlu2 %4447 }
 0x61f   : > { %1849 = vst.msk [vmem:[#allocation3 + $0xb0] sm:$0xff] %vm1826_vm8, %v12888_v22  ;;  %v12894_v1 = vpop.permute.xlu0 %4445 }
 0x620   : > { %17210 = vst [vmem:[#allocation101_spill] sm:$0xff] %v12894_v1  ;;  %9543 = vxpose.xlu1.b32.cont [7/16] (narrow) %v9542_v54, 32  ;;  %v1571_v54 = vadd.f32 %v12703_v23, %v17217_v27  ;;  %v17222_v27 = vld [vmem:[#allocation46_spill] sm:$0xff] }
 0x621   : > { %17219 = vst [vmem:[#allocation36_spill] sm:$0xff] %v12924_v17 }
 0x624   : > { %1948 = vrot.lane.b32.xlu2 %v12003_v52, %s10788_s27 }
 0x626   : > { %v4187_v18 = vld [vmem:[#allocation3 + $0xb0] sm:$0xff] }
 0x627   : > { %v12898_v25 = vpop.permute.xlu0 %4453 }
 0x62b   : > { %v1612_v44 = vpop.f32.mrf.mxu0  ;;  %v1733_v46 = vpop.f32.mrf.mxu1 }
 0x62c   : > { %v1613_v43 = vadd.f32 %v12703_v23, %v1612_v44  ;;  %v12906_v4 = vadd.f32 %v12719_v58, %v1733_v46  ;;  %v4186_v44 = vld [vmem:[#allocation3 + $0xa8] sm:$0xff]  ;;  %v4185_v46 = vld [vmem:[#allocation3 + $0xa0] sm:$0xff] }
 0x62e   : > { %17212 = vst [vmem:[#allocation103_spill] sm:$0xff] %v12906_v4  ;;  %v9544_v55 = vpack.i.bf16 %v1613_v43, %v1565_v34  ;;  %v17218_v34 = vld [vmem:[#allocation37_spill] sm:$0xff] }
 0x62f   : > { %1850 = vst.msk [vmem:[#allocation3 + $0xb8] sm:$0xff] %vm1826_vm8, %v12906_v4  ;;  %v12910_v0 = vpop.permute.xlu0 %4455  ;;  %v1619_v43 = vadd.f32 %v12703_v23, %v17218_v34  ;;  %v4181_v34 = vld [vmem:[#allocation3 + $0x80] sm:$0xff] }
 0x630   : > { %9545 = vxpose.xlu1.b32.cont [8/16] (narrow) %v9544_v55, 32 }
 0x631   : > { %v9548_v55 = vpack.i.bf16 %v1619_v43, %v1571_v54  ;;  %v12932_v43 = vpop.permute.xlu2 %4457 }
 0x636   : > { %v4188_v30 = vld [vmem:[#allocation3 + $0xb8] sm:$0xff] }
 0x637   : > { %4318 = vmatpush.msrb.mxu1 %v4188_v30  ;;  %v12918_v58 = vpop.permute.xlu0 %4463 }
 0x638   : > { %17216 = vst [vmem:[#allocation43_spill] sm:$0xff] %v12918_v58  ;;  %9547 = vxpose.xlu1.b32.cont [9/16] (narrow) %v9546_v41, 32  ;;  %v17221_v41 = vld [vmem:[#allocation72_spill] sm:$0xff] }
 0x639   : > { %4319 = vmatpush.msrb.mxu1 %v4187_v18  ;;  %v1574_v30 = vadd.f32 %v12703_v23, %v17221_v41  ;;  %v4182_v18 = vld [vmem:[#allocation3 + $0x88] sm:$0xff]  ;;  %v12940_v52 = vpop.permute.xlu2 %4467 }
 0x63a   : > { %17225 = vst [vmem:[#allocation46_spill] sm:$0xff] %v12940_v52 }
 0x63b   : > { %4320 = vmatpush.msrb.mxu1 %v4186_v44  ;;  %v1622_v44 = vadd.f32 %v12703_v23, %v17222_v27  ;;  %v17226_v27 = vld [vmem:[#allocation41_spill] sm:$0xff] }
 0x63d   : > { %4321 = vmatpush.msrb.mxu1 %v4185_v46  ;;  %v9550_v54 = vpack.i.bf16 %v1622_v44, %v1574_v30  ;;  %v1580_v30 = vadd.f32 %v12703_v23, %v12627_v45  ;;  %v1628_v44 = vadd.f32 %v12703_v23, %v17226_v27 }
 0x63f   : > { %4322 = vmatpush.msrb.mxu1 %v4184_v31  ;;  %v12926_v62 = vpop.permute.xlu0 %4465  ;;  %v17224_v31 = vld [vmem:[#allocation48_spill] sm:$0xff] }
 0x640   : > { %17220 = vst [vmem:[#allocation37_spill] sm:$0xff] %v12926_v62  ;;  %9549 = vxpose.xlu1.b32.cont [10/16] (narrow) %v9548_v55, 32  ;;  %v1577_v55 = vadd.f32 %v12703_v23, %v12603_v16 }
 0x641   : > { %4323 = vmatpush.msrb.mxu1 %v4183_v57  ;;  %v1625_v57 = vadd.f32 %v12703_v23, %v17224_v31  ;;  %v17228_v31 = vld [vmem:[#allocation42_spill] sm:$0xff] }
 0x643   : > { %4324 = vmatpush.msrb.mxu1 %v4182_v18  ;;  %v9552_v41 = vpack.i.bf16 %v1625_v57, %v1577_v55  ;;  %v1583_v55 = vadd.f32 %v12703_v23, %v12646_v56  ;;  %v1631_v57 = vadd.f32 %v12703_v23, %v17228_v31  ;;  %v1589_v56 = vadd.f32 %v12703_v23, %v12690_v12 }
 0x645   : > { %4325 = vmatpush.msrb.mxu1 %v4181_v34  ;;  %v9554_v34 = vpack.i.bf16 %v1628_v44, %v1580_v30  ;;  %v17229_v30 = vld [vmem:[#allocation50_spill] sm:$0xff] }
 0x646   : > { %v1634_v27 = vadd.f32 %v12703_v23, %v17229_v30 }
 0x647   : > { %v12934_v46 = vpop.permute.xlu0 %4471 }
 0x648   : > { %17223 = vst [vmem:[#allocation72_spill] sm:$0xff] %v12934_v46  ;;  %9551 = vxpose.xlu1.b32.cont [11/16] (narrow) %v9550_v54, 32 }
 0x64f   : > { %v1925_v18 = vpop.permute.xlu0 %1924 }
 0x650   : > { %9553 = vxpose.xlu1.b32.cont [12/16] (narrow) %v9552_v41, 32  ;;  %2006 = vst.msk [vmem:[#allocation3 + $0x178] sm:$0xff] %vm1826_vm8, %v1925_v18  ;;  %v9556_v41 = vpack.i.bf16 %v1631_v57, %v1583_v55  ;;  %v1586_v18 = vadd.f32 %v12703_v23, %v12666_v35 }
 0x652   : > { %v9558_v44 = vpack.i.bf16 %v1634_v27, %v1586_v18 }
 0x656   : > { %v12947_v54 = vpop.permute.xlu2 %4473 }
 0x657   : > { %17227 = vst [vmem:[#allocation48_spill] sm:$0xff] %v12947_v54  ;;  %v1955_v16 = vpop.permute.xlu0 %1954  ;;  %v5277_v3 = vld [vmem:[#allocation3 + $0x178] sm:$0xff] }
 0x658   : > { %9555 = vxpose.xlu1.b32.cont [13/16] (narrow) %v9554_v34, 32  ;;  %2021 = vst.msk [vmem:[#allocation3 + $0x1f0] sm:$0xff] %vm1826_vm8, %v1955_v16  ;;  %5294 = vmatpush.msra.mxu0 %v5277_v3  ;;  %v17230_v16 = vld [vmem:[#allocation52_spill] sm:$0xff] }
 0x659   : > { %v1637_v55 = vadd.f32 %v12703_v23, %v17230_v16 }
 0x65b   : > { %v9560_v31 = vpack.i.bf16 %v1637_v55, %v1589_v56  ;;  %v17234_v55 = vld [vmem:[#allocation67_spill] sm:$0xff] }
 0x65e   : > { %v1923_v45 = vpop.permute.xlu2 %1922 }
 0x65f   : > { %2005 = vst.msk [vmem:[#allocation3 + $0x170] sm:$0xff] %vm1826_vm8, %v1923_v45 }
 0x660   : > { %9557 = vxpose.xlu1.b32.cont [14/16] (narrow) %v9556_v41, 32 }
 0x666   : > { %v1953_v34 = vpop.permute.xlu2 %1952  ;;  %v5276_v3 = vld [vmem:[#allocation3 + $0x170] sm:$0xff] }
 0x667   : > { %2020 = vst.msk [vmem:[#allocation3 + $0x1e8] sm:$0xff] %vm1826_vm8, %v1953_v34  ;;  %5295 = vmatpush.msra.mxu0 %v5276_v3  ;;  %v17232_v34 = vld [vmem:[#allocation71_spill] sm:$0xff]  ;;  %v17233_v3 = vld [vmem:[#allocation68_spill] sm:$0xff] }
 0x668   : > { %9559 = vxpose.xlu1.b32.cont [15/16] (narrow) %v9558_v44, 32 }
 0x66e   : > { %v1919_v57 = vpop.permute.xlu2 %1918 }
 0x66f   : > { %2003 = vst.msk [vmem:[#allocation3 + $0x160] sm:$0xff] %vm1826_vm8, %v1919_v57  ;;  %v17236_v57 = vld [vmem:[#allocation31_spill] sm:$0xff] }
 0x670   : > { %9561 = vxpose.xlu1.b32.end [16/16] (narrow) %v9560_v31, 32  ;;  %v12987_v31 = vadd.f32 %v12657_v13, %v17234_v55  ;;  %v17246_v55 = vld [vmem:[#allocation74_spill] sm:$0xff] }
 0x672   : > { %17235 = vst [vmem:[#allocation42_spill] sm:$0xff] %v12987_v31 }
 0x676   : > { %v1951_v35 = vpop.permute.xlu2 %1950  ;;  %v5274_v30 = vld [vmem:[#allocation3 + $0x160] sm:$0xff] }
 0x677   : > { %2019 = vst.msk [vmem:[#allocation3 + $0x1e0] sm:$0xff] %vm1826_vm8, %v1951_v35  ;;  %v17237_v35 = vld [vmem:[#allocation32_spill] sm:$0xff] }
 0x67e   : > { %v1949_v41 = vpop.permute.xlu2 %1948 }
 0x67f   : > { %2018 = vst.msk [vmem:[#allocation3 + $0x1d8] sm:$0xff] %vm1826_vm8, %v1949_v41  ;;  %v12995_v41 = vadd.f32 %v12657_v13, %v17237_v35  ;;  %v13035_v35 = vadd.f32 %v12657_v13, %v17246_v55  ;;  %v17251_v55 = vld [vmem:[#allocation62_spill] sm:$0xff] }
 0x681   : > { %17238 = vst [vmem:[#allocation50_spill] sm:$0xff] %v12995_v41 }
 0x682   : > { %17247 = vst [vmem:[#allocation32_spill] sm:$0xff] %v13035_v35 }
 0x686   : > { %v12967_v45 = vpop.permute.xlu0 %4477 }
 0x687   : > { %17231 = vst [vmem:[#allocation41_spill] sm:$0xff] %v12967_v45 }
 0x68e   : > { %v1921_v18 = vpop.permute.xlu0 %1920 }
 0x68f   : > { %2004 = vst.msk [vmem:[#allocation3 + $0x168] sm:$0xff] %vm1826_vm8, %v1921_v18  ;;  %v17239_v18 = vld [vmem:[#allocation69_spill] sm:$0xff] }
 0x696   : > { %v5275_v12 = vld [vmem:[#allocation3 + $0x168] sm:$0xff] }
 0x697   : > { %5296 = vmatpush.msra.mxu0 %v5275_v12  ;;  %v17240_v12 = vld [vmem:[#allocation33_spill] sm:$0xff] }
 0x699   : > { %5297 = vmatpush.msra.mxu0 %v5274_v30  ;;  %v13003_v30 = vadd.f32 %v12657_v13, %v17240_v12  ;;  %v13045_v12 = vadd.f32 %v12657_v13, %v12788_v38  ;;  %v17250_v38 = vld [vmem:[#allocation61_spill] sm:$0xff] }
 0x69b   : > { %17241 = vst [vmem:[#allocation52_spill] sm:$0xff] %v13003_v30 }
 0x69c   : > { %v9562_v23 = vpop.trf.xlu1  ;;  %17248 = vst [vmem:[#allocation33_spill] sm:$0xff] %v13045_v12 }
 0x69d   : > { %v9563_v27 = vunpack.i.l.bf16 %v9562_v23  ;;  %v9566_v44 = vunpack.i.h.bf16 %v9562_v23  ;;  %v17242_v23 = vld [vmem:[#allocation70_spill] sm:$0xff] }
 0x69f   : > { %3474 = vmatpush.msrb.mxu2 %v9563_v27  ;;  %9410 = vmatpush.msra.mxu3 %v9563_v27  ;;  %v17243_v27 = vld [vmem:[#allocation73_spill] sm:$0xff] }
 0x6a0   : > { %9010 = vmatmul.msk.f32.vlgmr.msrb.gmra.mxu2 %vm1826_vm8, %v12661_v53  ;;  %9017 = vmatmul.msk.f32.vlgmr.msra.gmra.mxu3 %vm1826_vm8, %v17232_v34 }
 0x6a1   : > { %3587 = vmatpush.msrb.mxu3 %v9566_v44  ;;  %v13025_v44 = vadd.f32 %v12657_v13, %v17243_v27  ;;  %v13053_v27 = vadd.f32 %v12657_v13, %v12854_v7 }
 0x6a3   : > { %17244 = vst [vmem:[#allocation67_spill] sm:$0xff] %v13025_v44 }
 0x6a4   : > { %v12982_v56 = vpop.trf.xlu1  ;;  %17249 = vst [vmem:[#allocation73_spill] sm:$0xff] %v13053_v27 }
 0x6a5   : > { %v9568_v16 = vunpack.i.l.bf16 %v12982_v56 }
 0x6a7   : > { %4570 = vmatpush.msra.mxu2 %v9568_v16  ;;  %v17245_v16 = vld [vmem:[#allocation34_spill] sm:$0xff] }
 0x6a8   : > { %9011 = vmatmul.msk.f32.gmra.mxu2 %vm1826_vm8, %v17233_v3  ;;  %9018 = vmatmul.msk.f32.gmra.mxu3 %vm1826_vm8, %v12731_v50 }
 0x6ac   : > { %v13067_v7 = vpop.trf.xlu1 }
 0x6ad   : > { %17252 = vst [vmem:[#allocation74_spill] sm:$0xff] %v13067_v7 }
 0x6b0   : > { %9012 = vmatmul.msk.f32.gmra.mxu2 %vm1826_vm8, %v12679_v49  ;;  %9019 = vmatmul.msk.f32.gmra.mxu3 %vm1826_vm8, %v12741_v9 }
 0x6b4   : > { %v13071_v11 = vpop.trf.xlu1 }
 0x6b5   : > { %17253 = vst [vmem:[#allocation104_spill] sm:$0xff] %v13071_v11 }
 0x6b8   : > { %9013 = vmatmul.msk.f32.gmra.mxu2 %vm1826_vm8, %v12987_v31  ;;  %9020 = vmatmul.msk.f32.gmra.mxu3 %vm1826_vm8, %v17236_v57 }
 0x6c0   : > { %9014 = vmatmul.msk.f32.gmra.mxu2 %vm1826_vm8, %v17239_v18  ;;  %9021 = vmatmul.msk.f32.gmra.mxu3 %vm1826_vm8, %v12995_v41 }
 0x6c8   : > { %9015 = vmatmul.msk.f32.gmra.mxu2 %vm1826_vm8, %v17242_v23  ;;  %9022 = vmatmul.msk.f32.gmra.mxu3 %vm1826_vm8, %v13003_v30 }
 0x6ca   : > { %4433 = vrot.lane.b32.xlu1 %v12987_v31, %s10788_s27 }
 0x6d0   : > { %9016 = vmatmul.msk.f32.gmra.mxu2 %vm1826_vm8, %v12697_v28  ;;  %9023 = vmatmul.msk.f32.gmra.mxu3 %vm1826_vm8, %v12765_v21 }
 0x6d2   : > { %4449 = vrot.lane.b32.xlu1 %v12995_v41, %s10788_s27 }
 0x6d8   : > { %9024 = vmatmul.msk.f32.gmra.mxu3 %vm1826_vm8, %v12778_v6  ;;  %9074 = vmatmul.msk.f32.vlgmr.msra.gmra.mxu2 %vm1826_vm8, %v12835_v37 }
 0x6da   : > { %4451 = vrot.lane.b32.xlu1 %v13003_v30, %s10788_s27 }
 0x6e0   : > { %9025 = vmatmul.msk.f32.gmra.mxu3 %vm1826_vm8, %v17245_v16  ;;  %9075 = vmatmul.msk.f32.gmra.mxu2 %vm1826_vm8, %v12874_v36 }
 0x6e2   : > { %4459 = vrot.lane.b32.xlu1 %v13025_v44, %s10788_s27 }
 0x6e8   : > { %9026 = vmatmul.msk.f32.gmra.mxu3 %vm1826_vm8, %v13025_v44  ;;  %9076 = vmatmul.msk.f32.gmra.mxu2 %vm1826_vm8, %v12851_v48 }
 0x6ea   : > { %4461 = vrot.lane.b32.xlu1 %v13035_v35, %s10788_s27 }
 0x6f0   : > { %9027 = vmatmul.msk.f32.gmra.mxu3 %vm1826_vm8, %v13035_v35 }
 0x6f2   : > { %4469 = vrot.lane.b32.xlu1 %v13045_v12, %s10788_s27 }
 0x6f8   : > { %9028 = vmatmul.msk.f32.gmra.mxu3 %vm1826_vm8, %v12784_v8 }
 0x6fa   : > { %4475 = vrot.lane.b32.xlu1 %v13053_v27, %s10788_s27 }
 0x700   : > { %9029 = vmatmul.msk.f32.gmra.mxu3 %vm1826_vm8, %v12792_v61 }
 0x702   : > { %1956 = vrot.lane.b32.xlu1 %v17250_v38, %s10788_s27 }
 0x708   : > { %9030 = vmatmul.msk.f32.gmra.mxu3 %vm1826_vm8, %v12710_v10 }
 0x70a   : > { %1916 = vrot.lane.b32.xlu1 %v17251_v55, %s10788_s27  ;;  %v3342_v55 = vpop.f32.mrf.mxu2 }
 0x70b   : > { %v13088_v39 = vadd.f32 %v12657_v13, %v3342_v55 }
 0x70d   : > { %17254 = vst [vmem:[#allocation105_spill] sm:$0xff] %v13088_v39 }
 0x710   : > { %9031 = vmatmul.msk.f32.gmra.mxu3 %vm1826_vm8, %v13045_v12 }
 0x712   : > { %v3345_v15 = vpop.f32.mrf.mxu2 }
 0x713   : > { %v13099_v7 = vadd.f32 %v12657_v13, %v3345_v15 }
 0x715   : > { %17256 = vst [vmem:[#allocation107_spill] sm:$0xff] %v13099_v7 }
 0x718   : > { %9032 = vmatmul.msk.f32.gmra.mxu3 %vm1826_vm8, %v12797_v26 }
 0x71a   : > { %v3348_v63 = vpop.f32.mrf.mxu2 }
 0x71b   : > { %v13110_v5 = vadd.f32 %v12657_v13, %v3348_v63 }
 0x71d   : > { %17257 = vst [vmem:[#allocation108_spill] sm:$0xff] %v13110_v5 }
 0x720   : > { %9033 = vmatmul.msk.f32.gmra.mxu3 %vm1826_vm8, %v12821_v42 }
 0x722   : > { %v3351_v51 = vpop.f32.mrf.mxu2 }
 0x723   : > { %v13077_v60 = vpop.f32.mrf.mxu3  ;;  %v13121_v32 = vadd.f32 %v12657_v13, %v3351_v51 }
 0x725   : > { %17258 = vst [vmem:[#allocation109_spill] sm:$0xff] %v13121_v32 }
 0x728   : > { %9034 = vmatmul.msk.f32.gmra.mxu3 %vm1826_vm8, %v13053_v27 }
 0x72a   : > { %v3354_v22 = vpop.f32.mrf.mxu2 }
 0x72b   : > { %v13081_v38 = vpop.f32.mrf.mxu3 }
 0x730   : > { %9035 = vmatmul.msk.f32.gmra.mxu3 %vm1826_vm8, %v12862_v2 }
 0x733   : > { %v13085_v24 = vpop.f32.mrf.mxu3 }
 0x738   : > { %9036 = vmatmul.msk.f32.gmra.mxu3 %vm1826_vm8, %v13088_v39 }
 0x73b   : > { %v13092_v29 = vpop.f32.mrf.mxu3 }
 0x73c   : > { %v13094_v11 = vpop.permute.xlu1 %4433 }
 0x73d   : > { %17255 = vst [vmem:[#allocation106_spill] sm:$0xff] %v13094_v11  ;;  %9077 = vmatmul.msk.f32.gmra.mxu2 %vm1826_vm8, %v13094_v11 }
 0x740   : > { %9037 = vmatmul.msk.f32.gmra.mxu3 %vm1826_vm8, %v13099_v7 }
 0x743   : > { %v13103_v55 = vpop.f32.mrf.mxu3 }
 0x744   : > { %v13105_v14 = vpop.permute.xlu1 %4449 }
 0x745   : > { %9078 = vmatmul.msk.f32.gmra.mxu2 %vm1826_vm8, %v12892_v33  ;;  %v13132_v33 = vadd.f32 %v12657_v13, %v3354_v22 }
 0x747   : > { %17259 = vst [vmem:[#allocation110_spill] sm:$0xff] %v13132_v33 }
 0x748   : > { %9038 = vmatmul.msk.f32.gmra.mxu3 %vm1826_vm8, %v13110_v5 }
 0x74b   : > { %v13114_v15 = vpop.f32.mrf.mxu3 }
 0x74c   : > { %v13116_v47 = vpop.permute.xlu1 %4451 }
 0x74d   : > { %9079 = vmatmul.msk.f32.gmra.mxu2 %vm1826_vm8, %v12900_v20  ;;  %v3357_v20 = vpop.f32.mrf.mxu2 }
 0x74e   : > { %v13143_v48 = vadd.f32 %v12657_v13, %v3357_v20 }
 0x750   : > { %9039 = vmatmul.msk.f32.gmra.mxu3 %vm1826_vm8, %v13121_v32  ;;  %17261 = vst [vmem:[#allocation112_spill] sm:$0xff] %v13143_v48 }
 0x753   : > { %v13125_v63 = vpop.f32.mrf.mxu3 }
 0x754   : > { %v13127_v4 = vpop.permute.xlu1 %4459 }
 0x755   : > { %9080 = vmatmul.msk.f32.gmra.mxu2 %vm1826_vm8, %v12859_v40 }
 0x758   : > { %9040 = vmatmul.msk.f32.gmra.mxu3 %vm1826_vm8, %v13132_v33 }
 0x75b   : > { %v13136_v51 = vpop.f32.mrf.mxu3 }
 0x75c   : > { %v13138_v11 = vpop.permute.xlu1 %4461 }
 0x75d   : > { %17260 = vst [vmem:[#allocation111_spill] sm:$0xff] %v13138_v11  ;;  %9081 = vmatmul.msk.f32.gmra.mxu2 %vm1826_vm8, %v12916_v19 }
 0x760   : > { %9041 = vmatmul.msk.f32.gmra.mxu3 %vm1826_vm8, %v13143_v48 }
 0x763   : > { %v13147_v40 = vpop.f32.mrf.mxu3 }
 0x764   : > { %v13149_v22 = vpop.permute.xlu1 %4469 }
 0x765   : > { %17262 = vst [vmem:[#allocation113_spill] sm:$0xff] %v13149_v22  ;;  %9082 = vmatmul.msk.f32.gmra.mxu2 %vm1826_vm8, %v12878_v59 }
 0x768   : > { %9042 = vmatmul.msk.f32.vlgmr.msrb.gmra.mxu3 %vm1826_vm8, %v12661_v53 }
 0x76b   : > { %v13155_v36 = vpop.f32.mrf.mxu3 }
 0x76c   : > { %v13157_v37 = vpop.permute.xlu1 %4475 }
 0x76d   : > { %17263 = vst [vmem:[#allocation114_spill] sm:$0xff] %v13157_v37  ;;  %9083 = vmatmul.msk.f32.gmra.mxu2 %vm1826_vm8, %v12894_v1 }
 0x770   : > { %9043 = vmatmul.msk.f32.gmra.mxu3 %vm1826_vm8, %v17233_v3  ;;  %v5292_v3 = vld [vmem:[#allocation3 + $0x1f0] sm:$0xff] }
 0x773   : > { %v13163_v13 = vpop.f32.mrf.mxu3 }
 0x774   : > { %v1957_v20 = vpop.permute.xlu1 %1956 }
 0x775   : > { %2022 = vst.msk [vmem:[#allocation3 + $0x1f8] sm:$0xff] %vm1826_vm8, %v1957_v20  ;;  %9084 = vmatmul.msk.f32.gmra.mxu2 %vm1826_vm8, %v12924_v17  ;;  %v5291_v20 = vld [vmem:[#allocation3 + $0x1e8] sm:$0xff]  ;;  %v5290_v17 = vld [vmem:[#allocation3 + $0x1e0] sm:$0xff] }
 0x778   : > { %9044 = vmatmul.msk.f32.gmra.mxu3 %vm1826_vm8, %v12679_v49 }
 0x77b   : > { %v13170_v53 = vpop.f32.mrf.mxu3 }
 0x77c   : > { %v1917_v59 = vpop.permute.xlu1 %1916  ;;  %v5293_v19 = vld [vmem:[#allocation3 + $0x1f8] sm:$0xff] }
 0x77d   : > { %2002 = vst.msk [vmem:[#allocation3 + $0x158] sm:$0xff] %vm1826_vm8, %v1917_v59  ;;  %9085 = vmatmul.msk.f32.gmra.mxu2 %vm1826_vm8, %v13105_v14  ;;  %5407 = vmatpush.msra.mxu1 %v5293_v19  ;;  %v5289_v59 = vld [vmem:[#allocation3 + $0x1d8] sm:$0xff] }
 0x77f   : > { %5408 = vmatpush.msra.mxu1 %v5292_v3 }
 0x780   : > { %9045 = vmatmul.msk.f32.gmra.mxu3 %vm1826_vm8, %v12987_v31 }
 0x781   : > { %5409 = vmatpush.msra.mxu1 %v5291_v20  ;;  %v13198_v20 = vpop.f32.mrf.mxu2 }
 0x783   : > { %v13177_v1 = vpop.f32.mrf.mxu3  ;;  %5410 = vmatpush.msra.mxu1 %v5290_v17 }
 0x784   : > { %v5273_v49 = vld [vmem:[#allocation3 + $0x158] sm:$0xff] }
 0x785   : > { %9086 = vmatmul.msk.f32.gmra.mxu2 %vm1826_vm8, %v13116_v47  ;;  %5298 = vmatpush.msra.mxu0 %v5273_v49  ;;  %v9571_v49 = vunpack.i.h.bf16 %v12982_v56 }
 0x786   : > { %5411 = vmatpush.msra.mxu1 %v5289_v59 }
 0x787   : > { %4683 = vmatpush.msra.mxu3 %v9571_v49 }
 0x788   : > { %9046 = vmatmul.msk.f32.gmra.mxu3 %vm1826_vm8, %v17239_v18 }
 0x78b   : > { %v13183_v19 = vpop.f32.mrf.mxu3 }
 0x78c   : > { %17264 = vst [vmem:[#allocation115_spill] sm:$0xff] %v13183_v19 }
 0x78d   : > { %9087 = vmatmul.msk.f32.gmra.mxu2 %vm1826_vm8, %v12898_v25 }
 0x790   : > { %9047 = vmatmul.msk.f32.gmra.mxu3 %vm1826_vm8, %v17242_v23  ;;  %v13208_v23 = vpop.f32.mrf.mxu2 }
 0x793   : > { %v13189_v3 = vpop.f32.mrf.mxu3 }
 0x795   : > { %9088 = vmatmul.msk.f32.gmra.mxu2 %vm1826_vm8, %v12910_v0 }
 0x798   : > { %9048 = vmatmul.msk.f32.gmra.mxu3 %vm1826_vm8, %v12697_v28  ;;  %v13218_v49 = vpop.f32.mrf.mxu2 }
 0x79b   : > { %v13196_v17 = vpop.f32.mrf.mxu3 }
 0x79d   : > { %9089 = vmatmul.msk.f32.gmra.mxu2 %vm1826_vm8, %v12932_v43 }
 0x7a0   : > { %9049 = vmatmul.msk.f32.gmra.mxu3 %vm1826_vm8, %v17232_v34  ;;  %v13226_v34 = vpop.f32.mrf.mxu2 }
 0x7a3   : > { %v13204_v59 = vpop.f32.mrf.mxu3 }
 0x7a5   : > { %9090 = vmatmul.msk.f32.gmra.mxu2 %vm1826_vm8, %v13127_v4 }
 0x7a8   : > { %9050 = vmatmul.msk.f32.gmra.mxu3 %vm1826_vm8, %v12731_v50  ;;  %v13236_v31 = vpop.f32.mrf.mxu2 }
 0x7ab   : > { %v13212_v56 = vpop.f32.mrf.mxu3 }
 0x7ad   : > { %9091 = vmatmul.msk.f32.gmra.mxu2 %vm1826_vm8, %v13138_v11  ;;  %v17269_v11 = vld [vmem:[#allocation91_spill] sm:$0xff] }
 0x7b0   : > { %9051 = vmatmul.msk.f32.gmra.mxu3 %vm1826_vm8, %v12741_v9  ;;  %v13246_v18 = vpop.f32.mrf.mxu2 }
 0x7b3   : > { %v13220_v28 = vpop.f32.mrf.mxu3 }
 0x7b5   : > { %9092 = vmatmul.msk.f32.gmra.mxu2 %vm1826_vm8, %v12918_v58 }
 0x7b8   : > { %9052 = vmatmul.msk.f32.gmra.mxu3 %vm1826_vm8, %v17236_v57 }
 0x7bb   : > { %v13228_v50 = vpop.f32.mrf.mxu3 }
 0x7bd   : > { %9093 = vmatmul.msk.f32.gmra.mxu2 %vm1826_vm8, %v12926_v62 }
 0x7c0   : > { %9053 = vmatmul.msk.f32.gmra.mxu3 %vm1826_vm8, %v12995_v41 }
 0x7c3   : > { %v13234_v9 = vpop.f32.mrf.mxu3 }
 0x7c5   : > { %9094 = vmatmul.msk.f32.gmra.mxu2 %vm1826_vm8, %v12940_v52  ;;  %v13256_v52 = vpop.f32.mrf.mxu2 }
 0x7c8   : > { %9054 = vmatmul.msk.f32.gmra.mxu3 %vm1826_vm8, %v13003_v30 }
 0x7cb   : > { %v13242_v57 = vpop.f32.mrf.mxu3 }
 0x7cd   : > { %9095 = vmatmul.msk.f32.gmra.mxu2 %vm1826_vm8, %v13149_v22  ;;  %v13264_v22 = vpop.f32.mrf.mxu2 }
 0x7ce   : > { %17266 = vst [vmem:[#allocation117_spill] sm:$0xff] %v13264_v22 }
 0x7d0   : > { %9055 = vmatmul.msk.f32.gmra.mxu3 %vm1826_vm8, %v12765_v21 }
 0x7d3   : > { %v13250_v41 = vpop.f32.mrf.mxu3 }
 0x7d5   : > { %9096 = vmatmul.msk.f32.gmra.mxu2 %vm1826_vm8, %v12934_v46  ;;  %v13276_v62 = vpop.f32.mrf.mxu2 }
 0x7d6   : > { %17268 = vst [vmem:[#allocation119_spill] sm:$0xff] %v13276_v62 }
 0x7d8   : > { %9056 = vmatmul.msk.f32.gmra.mxu3 %vm1826_vm8, %v12778_v6 }
 0x7db   : > { %v13258_v30 = vpop.f32.mrf.mxu3 }
 0x7dc   : > { %17265 = vst [vmem:[#allocation116_spill] sm:$0xff] %v13258_v30 }
 0x7dd   : > { %9097 = vmatmul.msk.f32.gmra.mxu2 %vm1826_vm8, %v12947_v54 }
 0x7e0   : > { %9057 = vmatmul.msk.f32.gmra.mxu3 %vm1826_vm8, %v17245_v16 }
 0x7e3   : > { %v13266_v21 = vpop.f32.mrf.mxu3 }
 0x7e4   : > { %17267 = vst [vmem:[#allocation118_spill] sm:$0xff] %v13266_v21 }
 0x7e5   : > { %9098 = vmatmul.msk.f32.gmra.mxu2 %vm1826_vm8, %v13157_v37 }
 0x7e8   : > { %9058 = vmatmul.msk.f32.gmra.mxu3 %vm1826_vm8, %v13025_v44 }
 0x7eb   : > { %v13272_v6 = vpop.f32.mrf.mxu3 }
 0x7ec   : > { %v3685_v46 = vmax.f32 %v13198_v20, %v13272_v6 }
 0x7ed   : > { %9099 = vmatmul.msk.f32.gmra.mxu2 %vm1826_vm8, %v12967_v45 }
 0x7ee   : > { %3686 = vmax.xlane.f32.xlu0 %v3685_v46 }
 0x7f0   : > { %9059 = vmatmul.msk.f32.gmra.mxu3 %vm1826_vm8, %v13035_v35 }
 0x7f3   : > { %v13282_v16 = vpop.f32.mrf.mxu3 }
 0x7f4   : > { %v3688_v37 = vmax.f32 %v13208_v23, %v13282_v16 }
 0x7f6   : > { %3689 = vmax.xlane.f32.xlu0 %v3688_v37 }
 0x7f8   : > { %9060 = vmatmul.msk.f32.gmra.mxu3 %vm1826_vm8, %v12784_v8 }
 0x7fb   : > { %v13288_v44 = vpop.f32.mrf.mxu3 }
 0x7fc   : > { %v3691_v54 = vmax.f32 %v13218_v49, %v13288_v44 }
 0x7fe   : > { %3692 = vmax.xlane.f32.xlu0 %v3691_v54 }
 0x800   : > { %9061 = vmatmul.msk.f32.gmra.mxu3 %vm1826_vm8, %v12792_v61 }
 0x803   : > { %v13294_v46 = vpop.f32.mrf.mxu3 }
 0x804   : > { %v3694_v35 = vmax.f32 %v13226_v34, %v13294_v46 }
 0x806   : > { %3695 = vmax.xlane.f32.xlu0 %v3694_v35 }
 0x808   : > { %9062 = vmatmul.msk.f32.gmra.mxu3 %vm1826_vm8, %v12710_v10 }
 0x80b   : > { %v13300_v37 = vpop.f32.mrf.mxu3 }
 0x80c   : > { %v3697_v8 = vmax.f32 %v13236_v31, %v13300_v37 }
 0x80e   : > { %3698 = vmax.xlane.f32.xlu2 %v3697_v8 }
 0x810   : > { %9063 = vmatmul.msk.f32.gmra.mxu3 %vm1826_vm8, %v13045_v12 }
 0x813   : > { %v13306_v54 = vpop.f32.mrf.mxu3 }
 0x814   : > { %v3700_v61 = vmax.f32 %v13246_v18, %v13306_v54 }
 0x816   : > { %3701 = vmax.xlane.f32.xlu0 %v3700_v61 }
 0x818   : > { %9064 = vmatmul.msk.f32.gmra.mxu3 %vm1826_vm8, %v12797_v26 }
 0x81b   : > { %v13312_v35 = vpop.f32.mrf.mxu3 }
 0x81c   : > { %v3703_v10 = vmax.f32 %v13256_v52, %v13312_v35 }
 0x81e   : > { %3704 = vmax.xlane.f32.xlu2 %v3703_v10 }
 0x820   : > { %9065 = vmatmul.msk.f32.gmra.mxu3 %vm1826_vm8, %v12821_v42 }
 0x823   : > { %v13318_v8 = vpop.f32.mrf.mxu3 }
 0x824   : > { %v3706_v12 = vmax.f32 %v13077_v60, %v13318_v8 }
 0x826   : > { %3707 = vmax.xlane.f32.xlu2 %v3706_v12 }
 0x828   : > { %9066 = vmatmul.msk.f32.gmra.mxu3 %vm1826_vm8, %v13053_v27 }
 0x82b   : > { %v13324_v61 = vpop.f32.mrf.mxu3 }
 0x82c   : > { %v3709_v26 = vmax.f32 %v13081_v38, %v13324_v61 }
 0x82e   : > { %3710 = vmax.xlane.f32.xlu2 %v3709_v26 }
 0x830   : > { %9067 = vmatmul.msk.f32.gmra.mxu3 %vm1826_vm8, %v12862_v2 }
 0x833   : > { %v13330_v10 = vpop.f32.mrf.mxu3 }
 0x834   : > { %v3712_v42 = vmax.f32 %v13085_v24, %v13330_v10 }
 0x836   : > { %3713 = vmax.xlane.f32.xlu2 %v3712_v42 }
 0x838   : > { %9068 = vmatmul.msk.f32.gmra.mxu3 %vm1826_vm8, %v13088_v39 }
 0x83b   : > { %v13336_v12 = vpop.f32.mrf.mxu3 }
 0x83c   : > { %v3715_v27 = vmax.f32 %v13092_v29, %v13336_v12 }
 0x83e   : > { %3716 = vmax.xlane.f32.xlu2 %v3715_v27 }
 0x840   : > { %9069 = vmatmul.msk.f32.gmra.mxu3 %vm1826_vm8, %v13099_v7 }
 0x843   : > { %v13342_v26 = vpop.f32.mrf.mxu3 }
 0x844   : > { %v3718_v2 = vmax.f32 %v13103_v55, %v13342_v26 }
 0x846   : > { %3719 = vmax.xlane.f32.xlu2 %v3718_v2 }
 0x848   : > { %9070 = vmatmul.msk.f32.gmra.mxu3 %vm1826_vm8, %v13110_v5 }
 0x84b   : > { %v13348_v42 = vpop.f32.mrf.mxu3 }
 0x84c   : > { %v3721_v39 = vmax.f32 %v13114_v15, %v13348_v42 }
 0x84e   : > { %3722 = vmax.xlane.f32.xlu2 %v3721_v39 }
 0x850   : > { %9071 = vmatmul.msk.f32.gmra.mxu3 %vm1826_vm8, %v13121_v32 }
 0x853   : > { %v13354_v27 = vpop.f32.mrf.mxu3 }
 0x854   : > { %v3724_v7 = vmax.f32 %v13125_v63, %v13354_v27 }
 0x856   : > { %3725 = vmax.xlane.f32.xlu2 %v3724_v7 }
 0x858   : > { %9072 = vmatmul.msk.f32.gmra.mxu3 %vm1826_vm8, %v13132_v33 }
 0x85b   : > { %v13360_v2 = vpop.f32.mrf.mxu3 }
 0x85c   : > { %v3727_v5 = vmax.f32 %v13136_v51, %v13360_v2 }
 0x85e   : > { %3728 = vmax.xlane.f32.xlu2 %v3727_v5 }
 0x860   : > { %9073 = vmatmul.msk.f32.gmra.mxu3 %vm1826_vm8, %v13143_v48 }
 0x861   : > { %v3687_v39 = vpop.xlane.xlu0 %3686 }
 0x862   : > { %v3781_v32 = vsub.f32 %v13198_v20, %v3687_v39  ;;  %v3782_v45 = vsub.f32 %v13272_v6, %v3687_v39 }
 0x863   : > { %v13368_v62 = vpop.f32.mrf.mxu3 }
 0x864   : > { %v3845_v7 = vmul.f32 1.442695, %v3781_v32  ;;  %v3847_v58 = vmul.f32 1.442695, %v3782_v45  ;;  %v3730_v33 = vmax.f32 %v13147_v40, %v13368_v62 }
 0x866   : > { %9720 = vpow2.f32 %v3845_v7  ;;  %3731 = vmax.xlane.f32.xlu0 %v3730_v33  ;;  %v17272_v33 = vld [vmem:[#allocation97_spill] sm:$0xff] }
 0x867   : > { %9722 = vpow2.f32 %v3847_v58 }
 0x868   : > { %9106 = vmatmul.msk.f32.vlgmr.msra.gmra.mxu3 %vm1826_vm8, %v17269_v11 }
 0x869   : > { %v3690_v5 = vpop.xlane.xlu0 %3689 }
 0x86a   : > { %v3783_v48 = vsub.f32 %v13208_v23, %v3690_v5  ;;  %v3784_v20 = vsub.f32 %v13282_v16, %v3690_v5 }
 0x86b   : > { %v13376_v22 = vpop.f32.mrf.mxu3 }
 0x86c   : > { %v13378_v6 = vpop.eup %9720  ;;  %v3849_v32 = vmul.f32 1.442695, %v3783_v48  ;;  %v3851_v45 = vmul.f32 1.442695, %v3784_v20  ;;  %v3733_v39 = vmax.f32 %v13155_v36, %v13376_v22 }
 0x86d   : > { %17270 = vst [vmem:[#allocation91_spill] sm:$0xff] %v13378_v6  ;;  %v13382_v7 = vpop.eup %9722 }
 0x86e   : > { %17271 = vst [vmem:[#allocation120_spill] sm:$0xff] %v13382_v7  ;;  %9724 = vpow2.f32 %v3849_v32  ;;  %3734 = vmax.xlane.f32.xlu2 %v3733_v39  ;;  %v3973_v11 = vadd.f32 %v13382_v7, %v13378_v6 }
 0x86f   : > { %9726 = vpow2.f32 %v3851_v45 }
 0x870   : > { %3974 = vadd.xlane.f32.xlu0 %v3973_v11  ;;  %9107 = vmatmul.msk.f32.gmra.mxu3 %vm1826_vm8, %v17272_v33  ;;  %v17274_v11 = vld [vmem:[#allocation93_spill] sm:$0xff] }
 0x871   : > { %v3693_v58 = vpop.xlane.xlu0 %3692 }
 0x872   : > { %v3785_v16 = vsub.f32 %v13218_v49, %v3693_v58  ;;  %v3786_v32 = vsub.f32 %v13288_v44, %v3693_v58 }
 0x873   : > { %v13388_v23 = vpop.f32.mrf.mxu3 }
 0x874   : > { %v13390_v48 = vpop.eup %9724  ;;  %v3736_v5 = vmax.f32 %v13163_v13, %v13388_v23  ;;  %v3853_v39 = vmul.f32 1.442695, %v3785_v16  ;;  %v3855_v33 = vmul.f32 1.442695, %v3786_v32  ;;  %v17275_v16 = vld [vmem:[#allocation106_spill] sm:$0xff] }
 0x875   : > { %v13395_v20 = vpop.eup %9726 }
 0x876   : > { %17273 = vst [vmem:[#allocation97_spill] sm:$0xff] %v13395_v20  ;;  %3737 = vmax.xlane.f32.xlu1 %v3736_v5  ;;  %v3976_v45 = vadd.f32 %v13395_v20, %v13390_v48  ;;  %9728 = vpow2.f32 %v3853_v39 }
 0x877   : > { %9730 = vpow2.f32 %v3855_v33 }
 0x878   : > { %3977 = vadd.xlane.f32.xlu0 %v3976_v45  ;;  %9108 = vmatmul.msk.f32.gmra.mxu3 %vm1826_vm8, %v17274_v11 }
 0x879   : > { %v3696_v7 = vpop.xlane.xlu0 %3695 }
 0x87a   : > { %v3787_v49 = vsub.f32 %v13226_v34, %v3696_v7  ;;  %v3788_v44 = vsub.f32 %v13294_v46, %v3696_v7 }
 0x87b   : > { %v13402_v6 = vpop.f32.mrf.mxu3 }
 0x87c   : > { %v3739_v21 = vmax.f32 %v13170_v53, %v13402_v6  ;;  %v3857_v58 = vmul.f32 1.442695, %v3787_v49  ;;  %v3859_v5 = vmul.f32 1.442695, %v3788_v44  ;;  %v13410_v32 = vpop.eup %9728 }
 0x87d   : > { %v13414_v34 = vpop.eup %9730 }
 0x87e   : > { %17276 = vst [vmem:[#allocation93_spill] sm:$0xff] %v13414_v34  ;;  %9732 = vpow2.f32 %v3857_v58  ;;  %v3979_v7 = vadd.f32 %v13414_v34, %v13410_v32 }
 0x87f   : > { %9734 = vpow2.f32 %v3859_v5 }
 0x880   : > { %3740 = vmax.xlane.f32.xlu0 %v3739_v21  ;;  %9109 = vmatmul.msk.f32.gmra.mxu3 %vm1826_vm8, %v17275_v16 }
 0x881   : > { %v3699_v45 = vpop.xlane.xlu2 %3698 }
 0x882   : > { %v3789_v11 = vsub.f32 %v13236_v31, %v3699_v45  ;;  %v3790_v39 = vsub.f32 %v13300_v37, %v3699_v45  ;;  %v17277_v31 = vld [vmem:[#allocation100_spill] sm:$0xff] }
 0x883   : > { %v13416_v20 = vpop.f32.mrf.mxu3 }
 0x884   : > { %v3861_v33 = vmul.f32 1.442695, %v3789_v11  ;;  %v3863_v46 = vmul.f32 1.442695, %v3790_v39  ;;  %v3742_v21 = vmax.f32 %v13177_v1, %v13416_v20  ;;  %v13424_v49 = vpop.eup %9732 }
 0x885   : > { %v13426_v44 = vpop.eup %9734 }
 0x886   : > { %9736 = vpow2.f32 %v3861_v33  ;;  %3743 = vmax.xlane.f32.xlu1 %v3742_v21  ;;  %v3982_v39 = vadd.f32 %v13426_v44, %v13424_v49 }
 0x887   : > { %9738 = vpow2.f32 %v3863_v46 }
 0x888   : > { %3980 = vadd.xlane.f32.xlu0 %v3979_v7  ;;  %9110 = vmatmul.msk.f32.gmra.mxu3 %vm1826_vm8, %v17277_v31  ;;  %v17281_v7 = vld [vmem:[#allocation102_spill] sm:$0xff] }
 0x889   : > { %v3702_v37 = vpop.xlane.xlu0 %3701 }
 0x88a   : > { %v3791_v5 = vsub.f32 %v13246_v18, %v3702_v37  ;;  %v3792_v11 = vsub.f32 %v13306_v54, %v3702_v37  ;;  %v17282_v37 = vld [vmem:[#allocation94_spill] sm:$0xff] }
 0x88b   : > { %v13428_v58 = vpop.f32.mrf.mxu3 }
 0x88c   : > { %17278 = vst [vmem:[#allocation106_spill] sm:$0xff] %v13428_v58  ;;  %v13430_v16 = vpop.eup %9736  ;;  %v3865_v46 = vmul.f32 1.442695, %v3791_v5  ;;  %v3867_v21 = vmul.f32 1.442695, %v3792_v11  ;;  %v3745_v54 = vmax.f32 %v13183_v19, %v13428_v58  ;;  %v17283_v58 = vld [vmem:[#allocation35_spill] sm:$0xff] }
 0x88d   : > { %17279 = vst [vmem:[#allocation100_spill] sm:$0xff] %v13430_v16  ;;  %v13433_v45 = vpop.eup %9738 }
 0x88e   : > { %17280 = vst [vmem:[#allocation121_spill] sm:$0xff] %v13433_v45  ;;  %v3985_v33 = vadd.f32 %v13433_v45, %v13430_v16  ;;  %9740 = vpow2.f32 %v3865_v46 }
 0x88f   : > { %9742 = vpow2.f32 %v3867_v21 }
 0x890   : > { %3983 = vadd.xlane.f32.xlu0 %v3982_v39  ;;  %3986 = vadd.xlane.f32.xlu2 %v3985_v33 }
 0x891   : > { %9111 = vmatmul.msk.f32.gmra.mxu3 %vm1826_vm8, %v17281_v7  ;;  %v3705_v31 = vpop.xlane.xlu2 %3704 }
 0x892   : > { %v3793_v21 = vsub.f32 %v13256_v52, %v3705_v31 }
 0x893   : > { %v13442_v34 = vpop.f32.mrf.mxu3 }
 0x894   : > { %v3748_v18 = vmax.f32 %v13189_v3, %v13442_v34  ;;  %v13450_v11 = vpop.eup %9740 }
 0x895   : > { %v13454_v46 = vpop.eup %9742 }
 0x896   : > { %3749 = vmax.xlane.f32.xlu1 %v3748_v18  ;;  %v3794_v18 = vsub.f32 %v13312_v35, %v3705_v31 }
 0x898   : > { %3746 = vmax.xlane.f32.xlu0 %v3745_v54  ;;  %v3988_v54 = vadd.f32 %v13454_v46, %v13450_v11 }
 0x899   : > { %9112 = vmatmul.msk.f32.gmra.mxu3 %vm1826_vm8, %v17282_v37  ;;  %v3708_v5 = vpop.xlane.xlu2 %3707  ;;  %v3869_v37 = vmul.f32 1.442695, %v3793_v21 }
 0x89a   : > { %v3795_v39 = vsub.f32 %v13077_v60, %v3708_v5  ;;  %v3796_v33 = vsub.f32 %v13318_v8, %v3708_v5  ;;  %v3871_v60 = vmul.f32 1.442695, %v3794_v18 }
 0x89b   : > { %v13456_v7 = vpop.f32.mrf.mxu3 }
 0x89c   : > { %v3873_v45 = vmul.f32 1.442695, %v3795_v39  ;;  %v3875_v16 = vmul.f32 1.442695, %v3796_v33  ;;  %v3751_v31 = vmax.f32 %v13196_v17, %v13456_v7 }
 0x89e   : > { %9744 = vpow2.f32 %v3873_v45 }
 0x89f   : > { %9746 = vpow2.f32 %v3875_v16 }
 0x8a0   : > { %3989 = vadd.xlane.f32.xlu0 %v3988_v54  ;;  %9748 = vpow2.f32 %v3869_v37 }
 0x8a1   : > { %9113 = vmatmul.msk.f32.gmra.mxu3 %vm1826_vm8, %v17283_v58  ;;  %v3711_v8 = vpop.xlane.xlu2 %3710  ;;  %9750 = vpow2.f32 %v3871_v60 }
 0x8a2   : > { %v3797_v52 = vsub.f32 %v13081_v38, %v3711_v8  ;;  %v3798_v16 = vsub.f32 %v13324_v61, %v3711_v8  ;;  %v17286_v38 = vld [vmem:[#allocation98_spill] sm:$0xff]  ;;  %v17288_v8 = vld [vmem:[#allocation101_spill] sm:$0xff] }
 0x8a3   : > { %v13464_v5 = vpop.f32.mrf.mxu3 }
 0x8a4   : > { %v13466_v19 = vpop.eup %9744  ;;  %v3754_v35 = vmax.f32 %v13204_v59, %v13464_v5  ;;  %v3877_v39 = vmul.f32 1.442695, %v3797_v52  ;;  %v3879_v33 = vmul.f32 1.442695, %v3798_v16 }
 0x8a5   : > { %17284 = vst [vmem:[#allocation102_spill] sm:$0xff] %v13466_v19  ;;  %v13471_v45 = vpop.eup %9746 }
 0x8a6   : > { %17285 = vst [vmem:[#allocation94_spill] sm:$0xff] %v13471_v45  ;;  %3755 = vmax.xlane.f32.xlu1 %v3754_v35  ;;  %v3994_v58 = vadd.f32 %v13471_v45, %v13466_v19  ;;  %v13480_v18 = vpop.eup %9748  ;;  %9752 = vpow2.f32 %v3877_v39 }
 0x8a7   : > { %v13482_v54 = vpop.eup %9750  ;;  %9754 = vpow2.f32 %v3879_v33 }
 0x8a8   : > { %3752 = vmax.xlane.f32.xlu0 %v3751_v31  ;;  %3995 = vadd.xlane.f32.xlu2 %v3994_v58  ;;  %17287 = vst [vmem:[#allocation35_spill] sm:$0xff] %v13482_v54  ;;  %v3991_v60 = vadd.f32 %v13482_v54, %v13480_v18 }
 0x8a9   : > { %9114 = vmatmul.msk.f32.gmra.mxu3 %vm1826_vm8, %v17286_v38  ;;  %v3714_v21 = vpop.xlane.xlu2 %3713 }
 0x8aa   : > { %v3799_v31 = vsub.f32 %v13085_v24, %v3714_v21  ;;  %v3800_v39 = vsub.f32 %v13330_v10, %v3714_v21 }
 0x8ab   : > { %v13484_v61 = vpop.f32.mrf.mxu3 }
 0x8ac   : > { %v3757_v37 = vmax.f32 %v13212_v56, %v13484_v61  ;;  %v13492_v35 = vpop.eup %9752  ;;  %v3881_v38 = vmul.f32 1.442695, %v3799_v31 }
 0x8ad   : > { %v13494_v16 = vpop.eup %9754 }
 0x8ae   : > { %v3997_v33 = vadd.f32 %v13494_v16, %v13492_v35  ;;  %9756 = vpow2.f32 %v3881_v38 }
 0x8b0   : > { %3992 = vadd.xlane.f32.xlu0 %v3991_v60  ;;  %3758 = vmax.xlane.f32.xlu2 %v3757_v37  ;;  %v3883_v37 = vmul.f32 1.442695, %v3800_v39  ;;  %v17289_v60 = vld [vmem:[#allocation36_spill] sm:$0xff] }
 0x8b1   : > { %9115 = vmatmul.msk.f32.gmra.mxu3 %vm1826_vm8, %v17288_v8  ;;  %v3717_v52 = vpop.xlane.xlu2 %3716 }
 0x8b2   : > { %v3801_v54 = vsub.f32 %v13092_v29, %v3717_v52  ;;  %9758 = vpow2.f32 %v3883_v37  ;;  %v3802_v39 = vsub.f32 %v13336_v12, %v3717_v52 }
 0x8b3   : > { %v13497_v58 = vpop.f32.mrf.mxu3 }
 0x8b4   : > { %v3887_v38 = vmul.f32 1.442695, %v3802_v39 }
 0x8b8   : > { %3998 = vadd.xlane.f32.xlu0 %v3997_v33  ;;  %v3760_v33 = vmax.f32 %v13220_v28, %v13497_v58 }
 0x8b9   : > { %9116 = vmatmul.msk.f32.gmra.mxu3 %vm1826_vm8, %v17289_v60  ;;  %v3720_v8 = vpop.xlane.xlu2 %3719 }
 0x8ba   : > { %v3803_v45 = vsub.f32 %v13103_v55, %v3720_v8  ;;  %v3804_v19 = vsub.f32 %v13342_v26, %v3720_v8  ;;  %v3885_v55 = vmul.f32 1.442695, %v3801_v54  ;;  %v13514_v26 = vpop.eup %9756 }
 0x8bb   : > { %v13506_v24 = vpop.f32.mrf.mxu3 }
 0x8bc   : > { %v3889_v10 = vmul.f32 1.442695, %v3803_v45  ;;  %v3891_v21 = vmul.f32 1.442695, %v3804_v19  ;;  %v3763_v31 = vmax.f32 %v13228_v50, %v13506_v24  ;;  %v13519_v45 = vpop.eup %9758 }
 0x8bd   : > { %v4000_v8 = vadd.f32 %v13519_v45, %v13514_v26 }
 0x8be   : > { %9760 = vpow2.f32 %v3889_v10  ;;  %3764 = vmax.xlane.f32.xlu1 %v3763_v31 }
 0x8bf   : > { %9762 = vpow2.f32 %v3891_v21 }
 0x8c0   : > { %3761 = vmax.xlane.f32.xlu0 %v3760_v33  ;;  %9764 = vpow2.f32 %v3885_v55 }
 0x8c1   : > { %9117 = vmatmul.msk.f32.gmra.mxu3 %vm1826_vm8, %v13105_v14  ;;  %v3723_v29 = vpop.xlane.xlu2 %3722  ;;  %9766 = vpow2.f32 %v3887_v38 }
 0x8c2   : > { %v3805_v19 = vsub.f32 %v13114_v15, %v3723_v29  ;;  %v3806_v12 = vsub.f32 %v13348_v42, %v3723_v29 }
 0x8c3   : > { %v13522_v52 = vpop.f32.mrf.mxu3 }
 0x8c4   : > { %17290 = vst [vmem:[#allocation98_spill] sm:$0xff] %v13522_v52  ;;  %v13524_v37 = vpop.eup %9760  ;;  %v3893_v60 = vmul.f32 1.442695, %v3805_v19  ;;  %v3895_v15 = vmul.f32 1.442695, %v3806_v12 }
 0x8c5   : > { %v13526_v54 = vpop.eup %9762 }
 0x8c6   : > { %v4006_v14 = vadd.f32 %v13526_v54, %v13524_v37  ;;  %v13534_v10 = vpop.eup %9764  ;;  %9768 = vpow2.f32 %v3893_v60 }
 0x8c7   : > { %v13537_v31 = vpop.eup %9766  ;;  %9770 = vpow2.f32 %v3895_v15 }
 0x8c8   : > { %4001 = vadd.xlane.f32.xlu0 %v4000_v8  ;;  %4007 = vadd.xlane.f32.xlu2 %v4006_v14 }
 0x8c9   : > { %9118 = vmatmul.msk.f32.gmra.mxu3 %vm1826_vm8, %v13116_v47  ;;  %v3726_v42 = vpop.xlane.xlu2 %3725  ;;  %v4003_v47 = vadd.f32 %v13537_v31, %v13534_v10 }
 0x8ca   : > { %v3807_v21 = vsub.f32 %v13125_v63, %v3726_v42  ;;  %v3808_v39 = vsub.f32 %v13354_v27, %v3726_v42  ;;  %v3766_v42 = vmax.f32 %v13234_v9, %v13522_v52 }
 0x8cb   : > { %v13540_v33 = vpop.f32.mrf.mxu3 }
 0x8cc   : > { %v3769_v55 = vmax.f32 %v13242_v57, %v13540_v33  ;;  %v3897_v38 = vmul.f32 1.442695, %v3807_v21  ;;  %v3899_v29 = vmul.f32 1.442695, %v3808_v39  ;;  %v13546_v19 = vpop.eup %9768 }
 0x8cd   : > { %v13548_v63 = vpop.eup %9770 }
 0x8ce   : > { %3770 = vmax.xlane.f32.xlu1 %v3769_v55  ;;  %9772 = vpow2.f32 %v3897_v38  ;;  %v4009_v15 = vadd.f32 %v13548_v63, %v13546_v19 }
 0x8cf   : > { %9774 = vpow2.f32 %v3899_v29 }
 0x8d0   : > { %4004 = vadd.xlane.f32.xlu0 %v4003_v47 }
 0x8d1   : > { %9119 = vmatmul.msk.f32.gmra.mxu3 %vm1826_vm8, %v12898_v25  ;;  %v3729_v27 = vpop.xlane.xlu2 %3728 }
 0x8d2   : > { %v3809_v12 = vsub.f32 %v13136_v51, %v3729_v27  ;;  %v3810_v60 = vsub.f32 %v13360_v2, %v3729_v27 }
 0x8d3   : > { %v13554_v8 = vpop.f32.mrf.mxu3 }
 0x8d4   : > { %v3772_v14 = vmax.f32 %v13250_v41, %v13554_v8  ;;  %v3901_v21 = vmul.f32 1.442695, %v3809_v12  ;;  %v3903_v25 = vmul.f32 1.442695, %v3810_v60  ;;  %v13562_v39 = vpop.eup %9772 }
 0x8d5   : > { %v13564_v51 = vpop.eup %9774 }
 0x8d6   : > { %3773 = vmax.xlane.f32.xlu2 %v3772_v14  ;;  %4010 = vadd.xlane.f32.xlu1 %v4009_v15  ;;  %9776 = vpow2.f32 %v3901_v21  ;;  %v4012_v60 = vadd.f32 %v13564_v51, %v13562_v39 }
 0x8d7   : > { %9778 = vpow2.f32 %v3903_v25 }
 0x8d8   : > { %3767 = vmax.xlane.f32.xlu0 %v3766_v42 }
 0x8d9   : > { %9120 = vmatmul.msk.f32.gmra.mxu3 %vm1826_vm8, %v12910_v0  ;;  %v3732_v2 = vpop.xlane.xlu0 %3731 }
 0x8da   : > { %v3811_v55 = vsub.f32 %v13147_v40, %v3732_v2  ;;  %v3812_v38 = vsub.f32 %v13368_v62, %v3732_v2 }
 0x8db   : > { %v13570_v47 = vpop.f32.mrf.mxu3 }
 0x8dc   : > { %17291 = vst [vmem:[#allocation101_spill] sm:$0xff] %v13570_v47  ;;  %v3905_v29 = vmul.f32 1.442695, %v3811_v55  ;;  %v3907_v27 = vmul.f32 1.442695, %v3812_v38  ;;  %v3775_v12 = vmax.f32 %v13258_v30, %v13570_v47  ;;  %v13576_v0 = vpop.eup %9776 }
 0x8dd   : > { %v13578_v40 = vpop.eup %9778 }
 0x8de   : > { %9780 = vpow2.f32 %v3905_v29  ;;  %4013 = vadd.xlane.f32.xlu1 %v4012_v60  ;;  %v4015_v2 = vadd.f32 %v13578_v40, %v13576_v0  ;;  %v17292_v60 = vld [vmem:[#allocation118_spill] sm:$0xff] }
 0x8df   : > { %9782 = vpow2.f32 %v3907_v27 }
 0x8e0   : > { %3776 = vmax.xlane.f32.xlu0 %v3775_v12 }
 0x8e1   : > { %9121 = vmatmul.msk.f32.gmra.mxu3 %vm1826_vm8, %v12932_v43  ;;  %v3735_v62 = vpop.xlane.xlu2 %3734 }
 0x8e2   : > { %v3813_v14 = vsub.f32 %v13155_v36, %v3735_v62  ;;  %v3814_v15 = vsub.f32 %v13376_v22, %v3735_v62 }
 0x8e3   : > { %v3975_v42 = vpop.xlane.xlu0 %3974  ;;  %v13584_v21 = vpop.f32.mrf.mxu3 }
 0x8e4   : > { %v13586_v25 = vpop.eup %9780  ;;  %9784 = vrcp.f32 %v3975_v42  ;;  %v3909_v38 = vmul.f32 1.442695, %v3813_v14  ;;  %v3911_v29 = vmul.f32 1.442695, %v3814_v15  ;;  %v3778_v62 = vmax.f32 %v17292_v60, %v13584_v21 }
 0x8e5   : > { %v13590_v55 = vpop.eup %9782 }
 0x8e6   : > { %4016 = vadd.xlane.f32.xlu1 %v4015_v2  ;;  %v4018_v43 = vadd.f32 %v13590_v55, %v13586_v25  ;;  %9786 = vpow2.f32 %v3909_v38  ;;  %v17294_v2 = vld [vmem:[#allocation91_spill] sm:$0xff]  ;;  %v17296_v38 = vld [vmem:[#allocation117_spill] sm:$0xff] }
 0x8e7   : > { %9788 = vpow2.f32 %v3911_v29  ;;  %v17297_v29 = vld [vmem:[#allocation111_spill] sm:$0xff] }
 0x8e8   : > { %4019 = vadd.xlane.f32.xlu2 %v4018_v43  ;;  %v17295_v43 = vld [vmem:[#allocation120_spill] sm:$0xff] }
 0x8e9   : > { %9122 = vmatmul.msk.f32.gmra.mxu3 %vm1826_vm8, %v13127_v4  ;;  %v3738_v36 = vpop.xlane.xlu1 %3737 }
 0x8ea   : > { %v9785_v22 = vpop.eup %9784  ;;  %v3815_v27 = vsub.f32 %v13163_v13, %v3738_v36  ;;  %v3816_v12 = vsub.f32 %v13388_v23, %v3738_v36 }
 0x8eb   : > { %v3978_v14 = vpop.xlane.xlu0 %3977  ;;  %v13600_v42 = vpop.f32.mrf.mxu3  ;;  %v4101_v15 = vmul.f32 %v9785_v22, %v17294_v2  ;;  %v4102_v47 = vmul.f32 %v9785_v22, %v17295_v43 }
 0x8ec   : > { %17293 = vst [vmem:[#allocation36_spill] sm:$0xff] %v13600_v42  ;;  %v3913_v30 = vmul.f32 1.442695, %v3815_v27  ;;  %v3915_v4 = vmul.f32 1.442695, %v3816_v12  ;;  %9790 = vrcp.f32 %v3978_v14  ;;  %v4781_v52 = vmax.f32 %v17296_v38, %v13600_v42  ;;  %v13606_v13 = vpop.eup %9786  ;;  %v17299_v14 = vld [vmem:[#allocation97_spill] sm:$0xff] }
 0x8ed   : > { %4213 = vmatmul.f32.vlgmr.msrb.gmra.mxu0 %v4101_v15  ;;  %4326 = vmatmul.f32.vlgmr.msrb.gmra.mxu1 %v4102_v47  ;;  %v13608_v23 = vpop.eup %9788  ;;  %v17309_v38 = vld [vmem:[#allocation106_spill] sm:$0xff] }
 0x8ee   : > { %9792 = vpow2.f32 %v3913_v30  ;;  %4782 = vmax.xlane.f32.xlu0 %v4781_v52  ;;  %3779 = vmax.xlane.f32.xlu1 %v3778_v62  ;;  %v4021_v52 = vadd.f32 %v13608_v23, %v13606_v13 }
 0x8ef   : > { %9794 = vpow2.f32 %v3915_v4 }
 0x8f1   : > { %9123 = vmatmul.msk.f32.gmra.mxu3 %vm1826_vm8, %v17297_v29  ;;  %v17300_v29 = vld [vmem:[#allocation43_spill] sm:$0xff] }
 0x8f2   : > { %v9791_v36 = vpop.eup %9790 }
 0x8f3   : > { %v3741_v22 = vpop.xlane.xlu0 %3740  ;;  %v13612_v27 = vpop.f32.mrf.mxu3  ;;  %v4103_v12 = vmul.f32 %v9791_v36, %v13390_v48  ;;  %v4104_v2 = vmul.f32 %v9791_v36, %v17299_v14 }
 0x8f4   : > { %17298 = vst [vmem:[#allocation118_spill] sm:$0xff] %v13612_v27  ;;  %v13616_v47 = vpop.eup %9792  ;;  %v3817_v30 = vsub.f32 %v13170_v53, %v3741_v22  ;;  %v3818_v15 = vsub.f32 %v13402_v6, %v3741_v22  ;;  %v13628_v36 = vpop.f32.mrf.mxu2 }
 0x8f5   : > { %v13621_v62 = vpop.eup %9794  ;;  %4216 = vmatmul.f32.gmra.mxu0 %v4103_v12  ;;  %4329 = vmatmul.f32.gmra.mxu1 %v4104_v2  ;;  %v17302_v2 = vld [vmem:[#allocation119_spill] sm:$0xff] }
 0x8f6   : > { %4022 = vadd.xlane.f32.xlu0 %v4021_v52  ;;  %v4024_v43 = vadd.f32 %v13621_v62, %v13616_v47  ;;  %v3917_v48 = vmul.f32 1.442695, %v3817_v30  ;;  %v3919_v4 = vmul.f32 1.442695, %v3818_v15  ;;  %v4784_v52 = vmax.f32 %v17302_v2, %v13612_v27  ;;  %v17304_v27 = vld [vmem:[#allocation93_spill] sm:$0xff] }
 0x8f8   : > { %4025 = vadd.xlane.f32.xlu2 %v4024_v43  ;;  %9796 = vpow2.f32 %v3917_v48 }
 0x8f9   : > { %9124 = vmatmul.msk.f32.gmra.mxu3 %vm1826_vm8, %v17300_v29  ;;  %v3744_v53 = vpop.xlane.xlu1 %3743 }
 0x8fa   : > { %v3819_v14 = vsub.f32 %v13177_v1, %v3744_v53  ;;  %v3820_v6 = vsub.f32 %v13416_v20, %v3744_v53  ;;  %v17303_v1 = vld [vmem:[#allocation37_spill] sm:$0xff] }
 0x8fb   : > { %v3981_v22 = vpop.xlane.xlu0 %3980  ;;  %v13632_v12 = vpop.f32.mrf.mxu3 }
 0x8fc   : > { %17301 = vst [vmem:[#allocation91_spill] sm:$0xff] %v13632_v12  ;;  %9798 = vrcp.f32 %v3981_v22  ;;  %v4787_v30 = vmax.f32 %v13628_v36, %v13632_v12  ;;  %v3921_v15 = vmul.f32 1.442695, %v3819_v14  ;;  %v3923_v43 = vmul.f32 1.442695, %v3820_v6 }
 0x8fd   : > { %9800 = vpow2.f32 %v3919_v4  ;;  %v13646_v4 = vpop.f32.mrf.mxu2 }
 0x8fe   : > { %4785 = vmax.xlane.f32.xlu0 %v4784_v52  ;;  %v13638_v29 = vpop.eup %9796  ;;  %9802 = vpow2.f32 %v3921_v15  ;;  %17305 = vst [vmem:[#allocation120_spill] sm:$0xff] %v13646_v4 }
 0x8ff   : > { %9804 = vpow2.f32 %v3923_v43 }
 0x900   : > { %4788 = vmax.xlane.f32.xlu2 %v4787_v30 }
 0x901   : > { %9125 = vmatmul.msk.f32.gmra.mxu3 %vm1826_vm8, %v17303_v1 }
 0x902   : > { %v9799_v20 = vpop.eup %9798 }
 0x903   : > { %v13642_v48 = vpop.eup %9800  ;;  %v3984_v53 = vpop.xlane.xlu0 %3983  ;;  %v4105_v22 = vmul.f32 %v9799_v20, %v13410_v32  ;;  %v4106_v2 = vmul.f32 %v9799_v20, %v17304_v27  ;;  %v17307_v27 = vld [vmem:[#allocation46_spill] sm:$0xff] }
 0x904   : > { %9806 = vrcp.f32 %v3984_v53  ;;  %v13648_v14 = vpop.f32.mrf.mxu3  ;;  %v4027_v52 = vadd.f32 %v13642_v48, %v13638_v29  ;;  %v3987_v30 = vpop.xlane.xlu2 %3986 }
 0x905   : > { %17306 = vst [vmem:[#allocation111_spill] sm:$0xff] %v13648_v14  ;;  %v4790_v6 = vmax.f32 %v13646_v4, %v13648_v14  ;;  %4219 = vmatmul.f32.gmra.mxu0 %v4105_v22  ;;  %4332 = vmatmul.f32.gmra.mxu1 %v4106_v2  ;;  %v13654_v15 = vpop.eup %9802  ;;  %9808 = vrcp.f32 %v3987_v30 }
 0x906   : > { %v13656_v32 = vpop.eup %9804 }
 0x907   : > { %4791 = vmax.xlane.f32.xlu1 %v4790_v6  ;;  %v4030_v30 = vadd.f32 %v13656_v32, %v13654_v15 }
 0x908   : > { %4028 = vadd.xlane.f32.xlu2 %v4027_v52  ;;  %v17308_v52 = vld [vmem:[#allocation115_spill] sm:$0xff] }
 0x909   : > { %9126 = vmatmul.msk.f32.gmra.mxu3 %vm1826_vm8, %v17307_v27  ;;  %v3750_v43 = vpop.xlane.xlu1 %3749 }
 0x90a   : > { %v9807_v1 = vpop.eup %9806  ;;  %v3823_v20 = vsub.f32 %v13189_v3, %v3750_v43  ;;  %v3824_v2 = vsub.f32 %v13442_v34, %v3750_v43  ;;  %v17311_v43 = vld [vmem:[#allocation100_spill] sm:$0xff] }
 0x90b   : > { %v3747_v53 = vpop.xlane.xlu0 %3746  ;;  %v4107_v22 = vmul.f32 %v9807_v1, %v13424_v49  ;;  %v4108_v6 = vmul.f32 %v9807_v1, %v13426_v44  ;;  %v9809_v34 = vpop.eup %9808  ;;  %v17310_v49 = vld [vmem:[#allocation113_spill] sm:$0xff] }
 0x90c   : > { %v3929_v14 = vmul.f32 1.442695, %v3823_v20  ;;  %v3931_v4 = vmul.f32 1.442695, %v3824_v2  ;;  %v3821_v42 = vsub.f32 %v17308_v52, %v3747_v53  ;;  %v3822_v12 = vsub.f32 %v17309_v38, %v3747_v53  ;;  %v17312_v38 = vld [vmem:[#allocation121_spill] sm:$0xff] }
 0x90d   : > { %4222 = vmatmul.f32.gmra.mxu0 %v4107_v22  ;;  %4335 = vmatmul.f32.gmra.mxu1 %v4108_v6  ;;  %v4109_v1 = vmul.f32 %v9809_v34, %v17311_v43  ;;  %v4110_v20 = vmul.f32 %v9809_v34, %v17312_v38  ;;  %v17313_v22 = vld [vmem:[#allocation72_spill] sm:$0xff] }
 0x90e   : > { %9810 = vpow2.f32 %v3929_v14  ;;  %v3925_v3 = vmul.f32 1.442695, %v3821_v42  ;;  %v3927_v27 = vmul.f32 1.442695, %v3822_v12 }
 0x90f   : > { %9812 = vpow2.f32 %v3931_v4  ;;  %4031 = vadd.xlane.f32.xlu1 %v4030_v30 }
 0x910   : > { %9814 = vpow2.f32 %v3925_v3 }
 0x911   : > { %9816 = vpow2.f32 %v3927_v27  ;;  %9127 = vmatmul.msk.f32.gmra.mxu3 %vm1826_vm8, %v17310_v49 }
 0x913   : > { %v3990_v44 = vpop.xlane.xlu0 %3989 }
 0x914   : > { %v13672_v2 = vpop.eup %9810  ;;  %9818 = vrcp.f32 %v3990_v44 }
 0x915   : > { %v13674_v53 = vpop.eup %9812  ;;  %4225 = vmatmul.f32.gmra.mxu0 %v4109_v1  ;;  %4338 = vmatmul.f32.gmra.mxu1 %v4110_v20 }
 0x916   : > { %v13676_v42 = vpop.eup %9814  ;;  %v4036_v12 = vadd.f32 %v13674_v53, %v13672_v2 }
 0x917   : > { %v13680_v4 = vpop.eup %9816 }
 0x918   : > { %4037 = vadd.xlane.f32.xlu0 %v4036_v12  ;;  %v4033_v14 = vadd.f32 %v13680_v4, %v13676_v42  ;;  %v17314_v12 = vld [vmem:[#allocation48_spill] sm:$0xff] }
 0x919   : > { %9128 = vmatmul.msk.f32.gmra.mxu3 %vm1826_vm8, %v17313_v22  ;;  %v3756_v52 = vpop.xlane.xlu1 %3755 }
 0x91a   : > { %v9819_v6 = vpop.eup %9818  ;;  %4034 = vadd.xlane.f32.xlu2 %v4033_v14  ;;  %v3827_v43 = vsub.f32 %v13204_v59, %v3756_v52  ;;  %v3828_v20 = vsub.f32 %v13464_v5, %v3756_v52 }
 0x91b   : > { %v3753_v30 = vpop.xlane.xlu0 %3752  ;;  %v3996_v3 = vpop.xlane.xlu2 %3995  ;;  %v4111_v27 = vmul.f32 %v9819_v6, %v13450_v11  ;;  %v4112_v34 = vmul.f32 %v9819_v6, %v13454_v46 }
 0x91c   : > { %v3825_v49 = vsub.f32 %v13196_v17, %v3753_v30  ;;  %v3826_v44 = vsub.f32 %v13456_v7, %v3753_v30  ;;  %v3937_v11 = vmul.f32 1.442695, %v3827_v43  ;;  %v3939_v14 = vmul.f32 1.442695, %v3828_v20 }
 0x91d   : > { %4228 = vmatmul.f32.gmra.mxu0 %v4111_v27  ;;  %4341 = vmatmul.f32.gmra.mxu1 %v4112_v34  ;;  %v17315_v27 = vld [vmem:[#allocation114_spill] sm:$0xff] }
 0x91e   : > { %v3933_v1 = vmul.f32 1.442695, %v3825_v49  ;;  %v3935_v38 = vmul.f32 1.442695, %v3826_v44  ;;  %v17316_v49 = vld [vmem:[#allocation35_spill] sm:$0xff] }
 0x920   : > { %9820 = vpow2.f32 %v3933_v1  ;;  %v17317_v1 = vld [vmem:[#allocation56_spill] sm:$0xff] }
 0x921   : > { %9822 = vpow2.f32 %v3935_v38  ;;  %9129 = vmatmul.msk.f32.gmra.mxu3 %vm1826_vm8, %v17314_v12 }
 0x923   : > { %v3993_v46 = vpop.xlane.xlu0 %3992  ;;  %v3759_v22 = vpop.xlane.xlu2 %3758 }
 0x924   : > { %9824 = vrcp.f32 %v3993_v46  ;;  %v3829_v17 = vsub.f32 %v13212_v56, %v3759_v22  ;;  %v3830_v7 = vsub.f32 %v13484_v61, %v3759_v22  ;;  %v17319_v22 = vld [vmem:[#allocation102_spill] sm:$0xff] }
 0x925   : > { %9826 = vpow2.f32 %v3937_v11 }
 0x926   : > { %v13696_v6 = vpop.eup %9820  ;;  %v3941_v59 = vmul.f32 1.442695, %v3829_v17  ;;  %v3943_v30 = vmul.f32 1.442695, %v3830_v7  ;;  %9828 = vpow2.f32 %v3939_v14  ;;  %v17318_v14 = vld [vmem:[#allocation41_spill] sm:$0xff]  ;;  %v17320_v7 = vld [vmem:[#allocation94_spill] sm:$0xff] }
 0x927   : > { %v13698_v5 = vpop.eup %9822 }
 0x928   : > { %9830 = vpow2.f32 %v3941_v59  ;;  %v4039_v52 = vadd.f32 %v13698_v5, %v13696_v6 }
 0x929   : > { %9832 = vpow2.f32 %v3943_v30  ;;  %9130 = vmatmul.msk.f32.gmra.mxu3 %vm1826_vm8, %v17315_v27  ;;  %v17321_v27 = vld [vmem:[#allocation55_spill] sm:$0xff] }
 0x92a   : > { %v9825_v34 = vpop.eup %9824  ;;  %9834 = vrcp.f32 %v3996_v3  ;;  %4040 = vadd.xlane.f32.xlu2 %v4039_v52 }
 0x92b   : > { %v3999_v56 = vpop.xlane.xlu0 %3998  ;;  %v4113_v61 = vmul.f32 %v9825_v34, %v13480_v18  ;;  %v4114_v44 = vmul.f32 %v9825_v34, %v17316_v49  ;;  %v13706_v43 = vpop.eup %9826 }
 0x92c   : > { %1946 = vrot.lane.b32.xlu0 %v17317_v1, %s10788_s27  ;;  %v13710_v38 = vpop.eup %9828  ;;  %9836 = vrcp.f32 %v3999_v56  ;;  %v17349_v1 = vld [vmem:[#allocation36_spill] sm:$0xff] }
 0x92d   : > { %4231 = vmatmul.f32.gmra.mxu0 %v4113_v61  ;;  %4344 = vmatmul.f32.gmra.mxu1 %v4114_v44  ;;  %v4042_v11 = vadd.f32 %v13710_v38, %v13706_v43 }
 0x92e   : > { %v13712_v20 = vpop.eup %9830 }
 0x92f   : > { %v13714_v12 = vpop.eup %9832 }
 0x930   : > { %v9835_v3 = vpop.eup %9834  ;;  %v4045_v18 = vadd.f32 %v13714_v12, %v13712_v20 }
 0x931   : > { %9131 = vmatmul.msk.f32.gmra.mxu3 %vm1826_vm8, %v17318_v14  ;;  %v4115_v17 = vmul.f32 %v9835_v3, %v17319_v22  ;;  %v4116_v59 = vmul.f32 %v9835_v3, %v17320_v7  ;;  %v13728_v56 = vpop.xlane.xlu1 %3764 }
 0x932   : > { %4043 = vadd.xlane.f32.xlu2 %v4042_v11  ;;  %4046 = vadd.xlane.f32.xlu1 %v4045_v18  ;;  %v9837_v49 = vpop.eup %9836 }
 0x933   : > { %v3762_v46 = vpop.xlane.xlu0 %3761  ;;  %v4117_v11 = vmul.f32 %v9837_v49, %v13492_v35  ;;  %v4118_v3 = vmul.f32 %v9837_v49, %v13494_v16  ;;  %v13740_v16 = vpop.f32.mrf.mxu3 }
 0x934   : > { %v3831_v30 = vsub.f32 %v13220_v28, %v3762_v46  ;;  %v3832_v52 = vsub.f32 %v13497_v58, %v3762_v46  ;;  %1944 = vrot.lane.b32.xlu0 %v17321_v27, %s10788_s27 }
 0x935   : > { %4234 = vmatmul.f32.gmra.mxu0 %v4115_v17  ;;  %4347 = vmatmul.f32.gmra.mxu1 %v4116_v59  ;;  %v13742_v59 = vpop.f32.mrf.mxu2 }
 0x936   : > { %v3945_v34 = vmul.f32 1.442695, %v3831_v30  ;;  %v3947_v61 = vmul.f32 1.442695, %v3832_v52  ;;  %v4793_v30 = vmax.f32 %v13742_v59, %v13740_v16 }
 0x938   : > { %9838 = vpow2.f32 %v3945_v34 }
 0x939   : > { %9840 = vpow2.f32 %v3947_v61 }
 0x93b   : > { %v4002_v44 = vpop.xlane.xlu0 %4001  ;;  %v4008_v7 = vpop.xlane.xlu2 %4007 }
 0x93c   : > { %9842 = vrcp.f32 %v4002_v44 }
 0x93d   : > { %4237 = vmatmul.f32.gmra.mxu0 %v4117_v11  ;;  %4350 = vmatmul.f32.gmra.mxu1 %v4118_v3 }
 0x93e   : > { %v13732_v28 = vpop.eup %9838 }
 0x93f   : > { %v13734_v58 = vpop.eup %9840 }
 0x940   : > { %v4048_v18 = vadd.f32 %v13734_v58, %v13732_v28 }
 0x941   : > { %v3771_v14 = vpop.xlane.xlu1 %3770 }
 0x942   : > { %v9843_v46 = vpop.eup %9842  ;;  %4049 = vadd.xlane.f32.xlu2 %v4048_v18  ;;  %v3837_v52 = vsub.f32 %v13242_v57, %v3771_v14 }
 0x943   : > { %v4005_v22 = vpop.xlane.xlu0 %4004  ;;  %v4119_v17 = vmul.f32 %v9843_v46, %v13514_v26  ;;  %v4120_v35 = vmul.f32 %v9843_v46, %v13519_v45  ;;  %v3838_v26 = vsub.f32 %v13540_v33, %v3771_v14  ;;  %v17322_v45 = vld [vmem:[#allocation30_spill] sm:$0xff] }
 0x944   : > { %9844 = vrcp.f32 %v4005_v22  ;;  %v3957_v11 = vmul.f32 1.442695, %v3837_v52  ;;  %v17323_v22 = vld [vmem:[#allocation105_spill] sm:$0xff] }
 0x945   : > { %4240 = vmatmul.f32.gmra.mxu0 %v4119_v17  ;;  %4353 = vmatmul.f32.gmra.mxu1 %v4120_v35  ;;  %9846 = vrcp.f32 %v4008_v7  ;;  %v3959_v18 = vmul.f32 1.442695, %v3838_v26 }
 0x946   : > { %9848 = vpow2.f32 %v3957_v11 }
 0x949   : > { %v4011_v61 = vpop.xlane.xlu1 %4010  ;;  %v3774_v3 = vpop.xlane.xlu2 %3773 }
 0x94a   : > { %v9845_v34 = vpop.eup %9844  ;;  %4794 = vmax.xlane.f32.xlu2 %v4793_v30  ;;  %v3839_v57 = vsub.f32 %v13250_v41, %v3774_v3  ;;  %9850 = vrcp.f32 %v4011_v61  ;;  %v3840_v33 = vsub.f32 %v13554_v8, %v3774_v3  ;;  %v17324_v8 = vld [vmem:[#allocation29_spill] sm:$0xff]  ;;  %v17325_v3 = vld [vmem:[#allocation54_spill] sm:$0xff] }
 0x94b   : > { %1914 = vrot.lane.b32.xlu1 %v17322_v45, %s10788_s27  ;;  %v4121_v49 = vmul.f32 %v9845_v34, %v13534_v10  ;;  %v4122_v44 = vmul.f32 %v9845_v34, %v13537_v31  ;;  %v9847_v46 = vpop.eup %9846  ;;  %9852 = vpow2.f32 %v3959_v18  ;;  %v13754_v14 = vpop.xlane.xlu0 %3767 }
 0x94c   : > { %v4123_v10 = vmul.f32 %v9847_v46, %v13524_v37  ;;  %v4124_v31 = vmul.f32 %v9847_v46, %v13526_v54  ;;  %v3961_v17 = vmul.f32 1.442695, %v3839_v57  ;;  %v13760_v7 = vpop.eup %9848  ;;  %v3963_v41 = vmul.f32 1.442695, %v3840_v33 }
 0x94d   : > { %4243 = vmatmul.f32.gmra.mxu0 %v4121_v49  ;;  %4356 = vmatmul.f32.gmra.mxu1 %v4122_v44 }
 0x94e   : > { %9854 = vpow2.f32 %v3961_v17 }
 0x950   : > { %v9851_v30 = vpop.eup %9850 }
 0x951   : > { %v4014_v35 = vpop.xlane.xlu1 %4013  ;;  %v13762_v52 = vpop.eup %9852  ;;  %v4125_v37 = vmul.f32 %v9851_v30, %v13546_v19  ;;  %v4126_v54 = vmul.f32 %v9851_v30, %v13548_v63 }
 0x952   : > { %9856 = vrcp.f32 %v4014_v35  ;;  %v4057_v34 = vadd.f32 %v13762_v52, %v13760_v7 }
 0x953   : > { %4479 = vrot.lane.b32.xlu1 %v17323_v22, %s10788_s27  ;;  %9858 = vpow2.f32 %v3963_v41  ;;  %v13770_v26 = vpop.xlane.xlu0 %3776  ;;  %v3834_v41 = vsub.f32 %v13506_v24, %v13728_v56  ;;  %v17326_v24 = vld [vmem:[#allocation98_spill] sm:$0xff] }
 0x954   : > { %v13772_v61 = vpop.eup %9854 }
 0x955   : > { %4246 = vmatmul.f32.gmra.mxu0 %v4123_v10  ;;  %4359 = vmatmul.f32.gmra.mxu1 %v4124_v31 }
 0x958   : > { %v9857_v44 = vpop.eup %9856 }
 0x959   : > { %v4017_v49 = vpop.xlane.xlu1 %4016  ;;  %v13774_v11 = vpop.eup %9858  ;;  %v4127_v63 = vmul.f32 %v9857_v44, %v13562_v39  ;;  %v4128_v18 = vmul.f32 %v9857_v44, %v13564_v51  ;;  %v3833_v51 = vsub.f32 %v13228_v50, %v13728_v56  ;;  %v3835_v50 = vsub.f32 %v13234_v9, %v13754_v14 }
 0x95a   : > { %9860 = vrcp.f32 %v4017_v49  ;;  %v4060_v46 = vadd.f32 %v13774_v11, %v13772_v61  ;;  %v3836_v56 = vsub.f32 %v17326_v24, %v13754_v14 }
 0x95b   : > { %1912 = vrot.lane.b32.xlu1 %v17324_v8, %s10788_s27  ;;  %v4020_v19 = vpop.xlane.xlu2 %4019 }
 0x95c   : > { %9862 = vrcp.f32 %v4020_v19  ;;  %v3953_v19 = vmul.f32 1.442695, %v3835_v50  ;;  %v13826_v50 = vpop.f32.mrf.mxu2 }
 0x95d   : > { %4249 = vmatmul.f32.gmra.mxu0 %v4125_v37  ;;  %4362 = vmatmul.f32.gmra.mxu1 %v4126_v54  ;;  %v3949_v54 = vmul.f32 1.442695, %v3833_v51 }
 0x95e   : > { %4058 = vadd.xlane.f32.xlu0 %v4057_v34  ;;  %v3951_v34 = vmul.f32 1.442695, %v3834_v41 }
 0x960   : > { %v9861_v33 = vpop.eup %9860 }
 0x961   : > { %v13782_v57 = vpop.xlane.xlu0 %4782  ;;  %v4129_v31 = vmul.f32 %v9861_v33, %v13576_v0  ;;  %v4130_v17 = vmul.f32 %v9861_v33, %v13578_v40  ;;  %v13792_v0 = vpop.xlane.xlu1 %3779 }
 0x962   : > { %1910 = vrot.lane.b32.xlu2 %v17325_v3, %s10788_s27  ;;  %v9863_v35 = vpop.eup %9862 }
 0x963   : > { %v4131_v30 = vmul.f32 %v9863_v35, %v13586_v25  ;;  %v4132_v37 = vmul.f32 %v9863_v35, %v13590_v55  ;;  %v17327_v25 = vld [vmem:[#allocation53_spill] sm:$0xff] }
 0x965   : > { %4252 = vmatmul.f32.gmra.mxu0 %v4127_v63  ;;  %4365 = vmatmul.f32.gmra.mxu1 %v4128_v18  ;;  %v3955_v63 = vmul.f32 1.442695, %v3836_v56 }
 0x966   : > { %4061 = vadd.xlane.f32.xlu0 %v4060_v46 }
 0x969   : > { %v4023_v39 = vpop.xlane.xlu0 %4022 }
 0x96a   : > { %9864 = vrcp.f32 %v4023_v39 }
 0x96b   : > { %v4026_v10 = vpop.xlane.xlu2 %4025  ;;  %9866 = vpow2.f32 %v3949_v54  ;;  %v13822_v54 = vpop.f32.mrf.mxu3 }
 0x96c   : > { %9868 = vpow2.f32 %v3951_v34 }
 0x96d   : > { %4255 = vmatmul.f32.gmra.mxu0 %v4129_v31  ;;  %4368 = vmatmul.f32.gmra.mxu1 %v4130_v17  ;;  %9870 = vrcp.f32 %v4026_v10  ;;  %v17328_v10 = vld [vmem:[#allocation116_spill] sm:$0xff]  ;;  %v17330_v17 = vld [vmem:[#allocation51_spill] sm:$0xff] }
 0x96e   : > { %9872 = vpow2.f32 %v3953_v19  ;;  %v3841_v31 = vsub.f32 %v17328_v10, %v13770_v26  ;;  %v17332_v10 = vld [vmem:[#allocation49_spill] sm:$0xff] }
 0x96f   : > { %9874 = vpow2.f32 %v3955_v63 }
 0x970   : > { %v9865_v49 = vpop.eup %9864  ;;  %v3965_v51 = vmul.f32 1.442695, %v3841_v31 }
 0x971   : > { %v4133_v55 = vmul.f32 %v9865_v49, %v13606_v13  ;;  %v4134_v44 = vmul.f32 %v9865_v49, %v13608_v23  ;;  %v13806_v46 = vpop.eup %9866  ;;  %v17329_v13 = vld [vmem:[#allocation101_spill] sm:$0xff]  ;;  %v13838_v19 = vpop.xlane.xlu0 %4785 }
 0x972   : > { %v13808_v9 = vpop.eup %9868  ;;  %v3842_v23 = vsub.f32 %v17329_v13, %v13770_v26 }
 0x973   : > { %v13794_v40 = vpop.xlane.xlu2 %4788  ;;  %v9871_v14 = vpop.eup %9870  ;;  %v4051_v39 = vadd.f32 %v13808_v9, %v13806_v46 }
 0x974   : > { %v4135_v35 = vmul.f32 %v9871_v14, %v13616_v47  ;;  %v4136_v41 = vmul.f32 %v9871_v14, %v13621_v62  ;;  %v4796_v47 = vmax.f32 %v13826_v50, %v13822_v54  ;;  %v17331_v62 = vld [vmem:[#allocation103_spill] sm:$0xff] }
 0x975   : > { %4258 = vmatmul.f32.gmra.mxu0 %v4131_v30  ;;  %4371 = vmatmul.f32.gmra.mxu1 %v4132_v37  ;;  %v3967_v30 = vmul.f32 1.442695, %v3842_v23  ;;  %v13820_v37 = vpop.eup %9872 }
 0x976   : > { %v13824_v26 = vpop.eup %9874 }
 0x977   : > { %v4054_v24 = vadd.f32 %v13824_v26, %v13820_v37 }
 0x97a   : > { %1942 = vrot.lane.b32.xlu0 %v17327_v25, %s10788_s27  ;;  %v13804_v18 = vpop.xlane.xlu1 %4791 }
 0x97b   : > { %v4029_v33 = vpop.xlane.xlu2 %4028 }
 0x97c   : > { %9876 = vrcp.f32 %v4029_v33 }
 0x97d   : > { %4261 = vmatmul.f32.gmra.mxu0 %v4133_v55  ;;  %4374 = vmatmul.f32.gmra.mxu1 %v4134_v44  ;;  %9878 = vpow2.f32 %v3965_v51 }
 0x97e   : > { %9880 = vpow2.f32 %v3967_v30 }
 0x982   : > { %1908 = vrot.lane.b32.xlu0 %v17330_v17, %s10788_s27  ;;  %v4032_v34 = vpop.xlane.xlu1 %4031  ;;  %v9877_v49 = vpop.eup %9876 }
 0x983   : > { %9882 = vrcp.f32 %v4032_v34  ;;  %v4137_v56 = vmul.f32 %v9877_v49, %v13638_v29  ;;  %v4138_v55 = vmul.f32 %v9877_v49, %v13642_v48  ;;  %v13836_v44 = vpop.eup %9878  ;;  %v17335_v34 = vld [vmem:[#allocation92_spill] sm:$0xff] }
 0x984   : > { %v13840_v63 = vpop.eup %9880 }
 0x985   : > { %4052 = vadd.xlane.f32.xlu1 %v4051_v39  ;;  %4264 = vmatmul.f32.gmra.mxu0 %v4135_v35  ;;  %v4063_v29 = vadd.f32 %v13840_v63, %v13836_v44  ;;  %v17333_v39 = vld [vmem:[#allocation99_spill] sm:$0xff] }
 0x986   : > { %4377 = vmatmul.f32.gmra.mxu1 %v4136_v41 }
 0x989   : > { %v9883_v14 = vpop.eup %9882 }
 0x98a   : > { %1940 = vrot.lane.b32.xlu0 %v17331_v62, %s10788_s27  ;;  %v4139_v48 = vmul.f32 %v9883_v14, %v13654_v15  ;;  %v4140_v31 = vmul.f32 %v9883_v14, %v13656_v32  ;;  %v17334_v32 = vld [vmem:[#allocation47_spill] sm:$0xff] }
 0x98b   : > { %4797 = vmax.xlane.f32.xlu2 %v4796_v47  ;;  %v4038_v13 = vpop.xlane.xlu0 %4037  ;;  %v17338_v14 = vld [vmem:[#allocation107_spill] sm:$0xff] }
 0x98d   : > { %4055 = vadd.xlane.f32.xlu1 %v4054_v24  ;;  %4267 = vmatmul.f32.gmra.mxu0 %v4137_v56  ;;  %v4035_v33 = vpop.xlane.xlu2 %4034 }
 0x98e   : > { %4380 = vmatmul.f32.gmra.mxu1 %v4138_v55  ;;  %9884 = vrcp.f32 %v4035_v33  ;;  %v17336_v55 = vld [vmem:[#allocation96_spill] sm:$0xff]  ;;  %v17337_v33 = vld [vmem:[#allocation38_spill] sm:$0xff] }
 0x98f   : > { %9886 = vrcp.f32 %v4038_v13  ;;  %v17339_v13 = vld [vmem:[#allocation88_spill] sm:$0xff] }
 0x992   : > { %1906 = vrot.lane.b32.xlu0 %v17332_v10, %s10788_s27 }
 0x994   : > { %v9885_v23 = vpop.eup %9884 }
 0x995   : > { %4064 = vadd.xlane.f32.xlu1 %v4063_v29  ;;  %4270 = vmatmul.f32.gmra.mxu0 %v4139_v48  ;;  %v4141_v35 = vmul.f32 %v9885_v23, %v13676_v42  ;;  %v4142_v51 = vmul.f32 %v9885_v23, %v13680_v4  ;;  %v9887_v15 = vpop.eup %9886 }
 0x996   : > { %4383 = vmatmul.f32.gmra.mxu1 %v4140_v31  ;;  %v4143_v49 = vmul.f32 %v9887_v15, %v13672_v2  ;;  %v4144_v42 = vmul.f32 %v9887_v15, %v13674_v53 }
 0x99a   : > { %1938 = vrot.lane.b32.xlu0 %v17333_v39, %s10788_s27 }
 0x99d   : > { %v4041_v41 = vpop.xlane.xlu2 %4040  ;;  %4273 = vmatmul.f32.gmra.mxu0 %v4141_v35 }
 0x99e   : > { %4386 = vmatmul.f32.gmra.mxu1 %v4142_v51  ;;  %v1947_v30 = vpop.permute.xlu0 %1946  ;;  %9888 = vrcp.f32 %v4041_v41  ;;  %v13874_v41 = vpop.f32.mrf.mxu0 }
 0x99f   : > { %2017 = vst.msk [vmem:[#allocation3 + $0x1d0] sm:$0xff] %vm1826_vm8, %v1947_v30  ;;  %v17341_v30 = vld [vmem:[#allocation45_spill] sm:$0xff] }
 0x9a2   : > { %1904 = vrot.lane.b32.xlu0 %v17334_v32, %s10788_s27 }
 0x9a3   : > { %1934 = vrot.lane.b32.xlu2 %v17335_v34, %s10788_s27 }
 0x9a4   : > { %v9889_v56 = vpop.eup %9888 }
 0x9a5   : > { %4276 = vmatmul.f32.gmra.mxu0 %v4143_v49  ;;  %v4044_v24 = vpop.xlane.xlu2 %4043  ;;  %v4145_v2 = vmul.f32 %v9889_v56, %v13696_v6  ;;  %v4146_v53 = vmul.f32 %v9889_v56, %v13698_v5  ;;  %v4047_v48 = vpop.xlane.xlu1 %4046  ;;  %v17340_v5 = vld [vmem:[#allocation39_spill] sm:$0xff]  ;;  %v17343_v56 = vld [vmem:[#allocation82_spill] sm:$0xff] }
 0x9a6   : > { %4389 = vmatmul.f32.gmra.mxu1 %v4144_v42  ;;  %v1945_v4 = vpop.permute.xlu0 %1944  ;;  %v5288_v47 = vld [vmem:[#allocation3 + $0x1d0] sm:$0xff]  ;;  %9890 = vrcp.f32 %v4044_v24  ;;  %v13879_v49 = vpop.f32.mrf.mxu1  ;;  %v3843_v24 = vsub.f32 %v17292_v60, %v13792_v0  ;;  %v17345_v60 = vld [vmem:[#allocation44_spill] sm:$0xff] }
 0x9a7   : > { %2016 = vst.msk [vmem:[#allocation3 + $0x1c8] sm:$0xff] %vm1826_vm8, %v1945_v4  ;;  %5412 = vmatpush.msra.mxu1 %v5288_v47  ;;  %9892 = vrcp.f32 %v4047_v48  ;;  %v17342_v4 = vld [vmem:[#allocation40_spill] sm:$0xff] }
 0x9aa   : > { %1936 = vrot.lane.b32.xlu0 %v17336_v55, %s10788_s27 }
 0x9ab   : > { %1898 = vrot.lane.b32.xlu2 %v17337_v33, %s10788_s27 }
 0x9ac   : > { %v9891_v31 = vpop.eup %9890 }
 0x9ad   : > { %4279 = vmatmul.f32.gmra.mxu0 %v4145_v2  ;;  %v4147_v23 = vmul.f32 %v9891_v31, %v13706_v43  ;;  %v4148_v35 = vmul.f32 %v9891_v31, %v13710_v38  ;;  %v9893_v51 = vpop.eup %9892  ;;  %v3969_v2 = vmul.f32 1.442695, %v3843_v24  ;;  %v13917_v24 = vpop.f32.mrf.mxu2 }
 0x9ae   : > { %4481 = vrot.lane.b32.xlu1 %v17338_v14, %s10788_s27  ;;  %4392 = vmatmul.f32.gmra.mxu1 %v4146_v53  ;;  %v5287_v29 = vld [vmem:[#allocation3 + $0x1c8] sm:$0xff]  ;;  %v4149_v15 = vmul.f32 %v9893_v51, %v13712_v20  ;;  %v4150_v43 = vmul.f32 %v9893_v51, %v13714_v12  ;;  %v3844_v20 = vsub.f32 %v13584_v21, %v13792_v0  ;;  %v13894_v53 = vpop.f32.mrf.mxu0 }
 0x9af   : > { %5413 = vmatpush.msra.mxu1 %v5287_v29  ;;  %v17344_v21 = vld [vmem:[#allocation90_spill] sm:$0xff] }
 0x9b0   : > { %v3971_v48 = vmul.f32 1.442695, %v3844_v20 }
 0x9b3   : > { %1930 = vrot.lane.b32.xlu2 %v17339_v13, %s10788_s27 }
 0x9b5   : > { %v4050_v6 = vpop.xlane.xlu2 %4049  ;;  %4282 = vmatmul.f32.gmra.mxu0 %v4147_v23 }
 0x9b6   : > { %1902 = vrot.lane.b32.xlu1 %v17340_v5, %s10788_s27  ;;  %4395 = vmatmul.f32.gmra.mxu1 %v4148_v35  ;;  %9894 = vrcp.f32 %v4050_v6  ;;  %v13897_v6 = vpop.f32.mrf.mxu1 }
 0x9b7   : > { %9896 = vpow2.f32 %v3969_v2  ;;  %v17346_v2 = vld [vmem:[#allocation108_spill] sm:$0xff] }
 0x9b8   : > { %9898 = vpow2.f32 %v3971_v48 }
 0x9bb   : > { %1896 = vrot.lane.b32.xlu2 %v17341_v30, %s10788_s27 }
 0x9bc   : > { %v9895_v47 = vpop.eup %9894 }
 0x9bd   : > { %v1915_v38 = vpop.permute.xlu1 %1914  ;;  %v13882_v42 = vpop.xlane.xlu2 %4794  ;;  %4285 = vmatmul.f32.gmra.mxu0 %v4149_v15  ;;  %v4151_v12 = vmul.f32 %v9895_v47, %v13732_v28  ;;  %v4152_v29 = vmul.f32 %v9895_v47, %v13734_v58 }
 0x9be   : > { %2001 = vst.msk [vmem:[#allocation3 + $0x150] sm:$0xff] %vm1826_vm8, %v1915_v38  ;;  %1900 = vrot.lane.b32.xlu1 %v17342_v4, %s10788_s27  ;;  %4398 = vmatmul.f32.gmra.mxu1 %v4150_v43  ;;  %v13906_v58 = vpop.eup %9896  ;;  %v13915_v47 = vpop.f32.mrf.mxu3 }
 0x9bf   : > { %v13909_v0 = vpop.eup %9898 }
 0x9c0   : > { %v4066_v51 = vadd.f32 %v13909_v0, %v13906_v58 }
 0x9c3   : > { %1928 = vrot.lane.b32.xlu2 %v17343_v56, %s10788_s27 }
 0x9c5   : > { %v4480_v31 = vpop.permute.xlu1 %4479  ;;  %v1911_v23 = vpop.permute.xlu2 %1910  ;;  %4288 = vmatmul.f32.gmra.mxu0 %v4151_v12  ;;  %v5272_v35 = vld [vmem:[#allocation3 + $0x150] sm:$0xff]  ;;  %v4881_v12 = vsub.f32 %v13628_v36, %v13794_v40  ;;  %v4799_v36 = vmax.f32 %v13917_v24, %v13915_v47 }
 0x9c6   : > { %1999 = vst.msk [vmem:[#allocation3 + $0x140] sm:$0xff] %vm1826_vm8, %v1911_v23  ;;  %1932 = vrot.lane.b32.xlu1 %v17344_v21, %s10788_s27  ;;  %4401 = vmatmul.f32.gmra.mxu1 %v4152_v29  ;;  %v17347_v29 = vld [vmem:[#allocation91_spill] sm:$0xff]  ;;  %v13929_v23 = vpop.f32.mrf.mxu1 }
 0x9c7   : > { %9100 = vmatmul.msk.f32.gmra.mxu2 %vm1826_vm8, %v4480_v31  ;;  %9132 = vmatmul.msk.f32.gmra.mxu3 %vm1826_vm8, %v4480_v31  ;;  %v4882_v48 = vsub.f32 %v17347_v29, %v13794_v40  ;;  %v13927_v31 = vpop.f32.mrf.mxu0 }
 0x9c8   : > { %5299 = vmatpush.msra.mxu0 %v5272_v35  ;;  %v13931_v35 = vpop.f32.mrf.mxu3 }
 0x9cb   : > { %1894 = vrot.lane.b32.xlu2 %v17345_v60, %s10788_s27 }
 0x9cd   : > { %v1913_v28 = vpop.permute.xlu1 %1912  ;;  %v5270_v43 = vld [vmem:[#allocation3 + $0x140] sm:$0xff] }
 0x9ce   : > { %2000 = vst.msk [vmem:[#allocation3 + $0x148] sm:$0xff] %vm1826_vm8, %v1913_v28  ;;  %v4949_v28 = vmul.f32 1.442695, %v4881_v12  ;;  %v13942_v34 = vpop.f32.mrf.mxu1 }
 0x9cf   : > { %v13940_v29 = vpop.f32.mrf.mxu0 }
 0x9d0   : > { %9900 = vpow2.f32 %v4949_v28  ;;  %v13944_v56 = vpop.f32.mrf.mxu3 }
 0x9d1   : > { %v13913_v38 = vpop.xlane.xlu0 %4058 }
 0x9d4   : > { %4067 = vadd.xlane.f32.xlu0 %v4066_v51 }
 0x9d5   : > { %v5271_v15 = vld [vmem:[#allocation3 + $0x148] sm:$0xff] }
 0x9d6   : > { %5300 = vmatpush.msra.mxu0 %v5271_v15  ;;  %v13933_v15 = vpop.f32.mrf.mxu2  ;;  %v13957_v62 = vpop.f32.mrf.mxu1 }
 0x9d7   : > { %v4802_v40 = vmax.f32 %v13933_v15, %v13931_v35  ;;  %v13955_v13 = vpop.f32.mrf.mxu0 }
 0x9d8   : > { %5301 = vmatpush.msra.mxu0 %v5270_v43  ;;  %v4951_v43 = vmul.f32 1.442695, %v4882_v48  ;;  %v13947_v48 = vpop.eup %9900 }
 0x9d9   : > { %v13919_v20 = vpop.xlane.xlu0 %4061 }
 0x9da   : > { %9902 = vpow2.f32 %v4951_v43 }
 0x9e0   : > { %v13949_v28 = vpop.eup %9902 }
 0x9e8   : > { %4483 = vrot.lane.b32.xlu0 %v17346_v2, %s10788_s27 }
 0x9ec   : > { %v1943_v51 = vpop.permute.xlu0 %1942 }
 0x9ed   : > { %2015 = vst.msk [vmem:[#allocation3 + $0x1c0] sm:$0xff] %vm1826_vm8, %v1943_v51  ;;  %v13951_v51 = vpop.f32.mrf.mxu2 }
 0x9f0   : > { %4800 = vmax.xlane.f32.xlu1 %v4799_v36  ;;  %v5075_v36 = vadd.f32 %v13949_v28, %v13947_v48 }
 0x9f4   : > { %4803 = vmax.xlane.f32.xlu2 %v4802_v40  ;;  %v1909_v12 = vpop.permute.xlu0 %1908  ;;  %v5286_v39 = vld [vmem:[#allocation3 + $0x1c0] sm:$0xff] }
 0x9f5   : > { %1998 = vst.msk [vmem:[#allocation3 + $0x138] sm:$0xff] %vm1826_vm8, %v1909_v12  ;;  %5414 = vmatpush.msra.mxu1 %v5286_v39  ;;  %v17348_v39 = vld [vmem:[#allocation117_spill] sm:$0xff]  ;;  %v13970_v30 = vpop.f32.mrf.mxu2 }
 0x9f6   : > { %v4877_v12 = vsub.f32 %v17348_v39, %v13782_v57 }
 0x9f8   : > { %v4053_v43 = vpop.xlane.xlu1 %4052 }
 0x9f9   : > { %9904 = vrcp.f32 %v4053_v43  ;;  %v13964_v43 = vpop.f32.mrf.mxu3 }
 0x9fc   : > { %5076 = vadd.xlane.f32.xlu2 %v5075_v36  ;;  %v1941_v40 = vpop.permute.xlu0 %1940  ;;  %v5269_v55 = vld [vmem:[#allocation3 + $0x138] sm:$0xff]  ;;  %v4878_v36 = vsub.f32 %v17349_v1, %v13782_v57 }
 0x9fd   : > { %2014 = vst.msk [vmem:[#allocation3 + $0x1b8] sm:$0xff] %vm1826_vm8, %v1941_v40  ;;  %5302 = vmatpush.msra.mxu0 %v5269_v55  ;;  %v4808_v55 = vmax.f32 %v13970_v30, %v13964_v43  ;;  %v4941_v40 = vmul.f32 1.442695, %v4877_v12 }
 0x9fe   : > { %v13962_v21 = vpop.xlane.xlu2 %4797  ;;  %v4943_v39 = vmul.f32 1.442695, %v4878_v36 }
 0x9ff   : > { %v9905_v27 = vpop.eup %9904  ;;  %v4887_v4 = vsub.f32 %v13826_v50, %v13962_v21 }
 0xa00   : > { %v4056_v25 = vpop.xlane.xlu1 %4055  ;;  %v4153_v2 = vmul.f32 %v9905_v27, %v13806_v46  ;;  %v4154_v60 = vmul.f32 %v9905_v27, %v13808_v9  ;;  %v13975_v27 = vpop.f32.mrf.mxu0 }
 0xa01   : > { %9906 = vrcp.f32 %v4056_v25  ;;  %v13977_v46 = vpop.f32.mrf.mxu1 }
 0xa02   : > { %4291 = vmatmul.f32.gmra.mxu0 %v4153_v2  ;;  %4404 = vmatmul.f32.gmra.mxu1 %v4154_v60  ;;  %9908 = vpow2.f32 %v4941_v40  ;;  %v17350_v60 = vld [vmem:[#allocation79_spill] sm:$0xff] }
 0xa03   : > { %9910 = vrcp.f32 %v13913_v38 }
 0xa04   : > { %4809 = vmax.xlane.f32.xlu2 %v4808_v55  ;;  %v1907_v14 = vpop.permute.xlu0 %1906  ;;  %v5285_v33 = vld [vmem:[#allocation3 + $0x1b8] sm:$0xff]  ;;  %9912 = vpow2.f32 %v4943_v39  ;;  %v17351_v39 = vld [vmem:[#allocation109_spill] sm:$0xff] }
 0xa05   : > { %1997 = vst.msk [vmem:[#allocation3 + $0x130] sm:$0xff] %vm1826_vm8, %v1907_v14  ;;  %5415 = vmatpush.msra.mxu1 %v5285_v33  ;;  %9914 = vrcp.f32 %v13919_v20 }
 0xa06   : > { %v1935_v1 = vpop.permute.xlu2 %1934 }
 0xa07   : > { %v9907_v57 = vpop.eup %9906  ;;  %2011 = vst.msk [vmem:[#allocation3 + $0x1a0] sm:$0xff] %vm1826_vm8, %v1935_v1 }
 0xa08   : > { %v4155_v25 = vmul.f32 %v9907_v57, %v13820_v37  ;;  %v4156_v9 = vmul.f32 %v9907_v57, %v13824_v26  ;;  %v13985_v33 = vpop.eup %9908  ;;  %v13990_v55 = vpop.f32.mrf.mxu0 }
 0xa09   : > { %1926 = vrot.lane.b32.xlu1 %v17350_v60, %s10788_s27  ;;  %v9911_v12 = vpop.eup %9910  ;;  %v13992_v37 = vpop.f32.mrf.mxu1 }
 0xa0a   : > { %4294 = vmatmul.f32.gmra.mxu0 %v4155_v25  ;;  %4407 = vmatmul.f32.gmra.mxu1 %v4156_v9  ;;  %v13988_v38 = vpop.eup %9912  ;;  %v4157_v26 = vmul.f32 %v9911_v12, %v13760_v7  ;;  %v4158_v40 = vmul.f32 %v9911_v12, %v13762_v52  ;;  %v4065_v57 = vpop.xlane.xlu1 %4064 }
 0xa0b   : > { %v5069_v1 = vadd.f32 %v13988_v38, %v13985_v33  ;;  %9916 = vrcp.f32 %v4065_v57 }
 0xa0c   : > { %v1939_v14 = vpop.permute.xlu0 %1938  ;;  %v5268_v2 = vld [vmem:[#allocation3 + $0x130] sm:$0xff] }
 0xa0d   : > { %2013 = vst.msk [vmem:[#allocation3 + $0x1b0] sm:$0xff] %vm1826_vm8, %v1939_v14  ;;  %5303 = vmatpush.msra.mxu0 %v5268_v2  ;;  %v9915_v14 = vpop.eup %9914  ;;  %v4805_v2 = vmax.f32 %v13951_v51, %v13944_v56 }
 0xa0e   : > { %v1899_v36 = vpop.permute.xlu2 %1898  ;;  %v4159_v7 = vmul.f32 %v9915_v14, %v13772_v61  ;;  %v4160_v52 = vmul.f32 %v9915_v14, %v13774_v11 }
 0xa0f   : > { %1993 = vst.msk [vmem:[#allocation3 + $0x110] sm:$0xff] %vm1826_vm8, %v1899_v36 }
 0xa10   : > { %v14008_v12 = vpop.f32.mrf.mxu0 }
 0xa11   : > { %4485 = vrot.lane.b32.xlu1 %v17351_v39, %s10788_s27  ;;  %v14010_v36 = vpop.f32.mrf.mxu1  ;;  %v9917_v57 = vpop.eup %9916 }
 0xa12   : > { %4297 = vmatmul.f32.gmra.mxu0 %v4157_v26  ;;  %4410 = vmatmul.f32.gmra.mxu1 %v4158_v40  ;;  %v17352_v26 = vld [vmem:[#allocation112_spill] sm:$0xff] }
 0xa13   : > { %5070 = vadd.xlane.f32.xlu0 %v5069_v1 }
 0xa14   : > { %v1905_v25 = vpop.permute.xlu0 %1904  ;;  %v5284_v9 = vld [vmem:[#allocation3 + $0x1b0] sm:$0xff] }
 0xa15   : > { %1996 = vst.msk [vmem:[#allocation3 + $0x128] sm:$0xff] %vm1826_vm8, %v1905_v25  ;;  %5416 = vmatpush.msra.mxu1 %v5284_v9  ;;  %v4161_v25 = vmul.f32 %v9917_v57, %v13836_v44  ;;  %v4162_v9 = vmul.f32 %v9917_v57, %v13840_v63  ;;  %v17354_v44 = vld [vmem:[#allocation118_spill] sm:$0xff] }
 0xa16   : > { %v1931_v20 = vpop.permute.xlu2 %1930  ;;  %v4880_v63 = vsub.f32 %v17354_v44, %v13838_v19  ;;  %v14042_v44 = vpop.f32.mrf.mxu3 }
 0xa17   : > { %2009 = vst.msk [vmem:[#allocation3 + $0x190] sm:$0xff] %vm1826_vm8, %v1931_v20 }
 0xa18   : > { %v14020_v14 = vpop.f32.mrf.mxu0 }
 0xa19   : > { %v14022_v20 = vpop.f32.mrf.mxu1 }
 0xa1a   : > { %4300 = vmatmul.f32.gmra.mxu0 %v4159_v7  ;;  %4413 = vmatmul.f32.gmra.mxu1 %v4160_v52 }
 0xa1b   : > { %4806 = vmax.xlane.f32.xlu0 %v4805_v2  ;;  %v5282_v2 = vld [vmem:[#allocation3 + $0x1a0] sm:$0xff] }
 0xa1c   : > { %4489 = vrot.lane.b32.xlu2 %v17352_v26, %s10788_s27  ;;  %v1937_v40 = vpop.permute.xlu0 %1936  ;;  %v5267_v1 = vld [vmem:[#allocation3 + $0x128] sm:$0xff]  ;;  %v5264_v26 = vld [vmem:[#allocation3 + $0x110] sm:$0xff] }
 0xa1d   : > { %2012 = vst.msk [vmem:[#allocation3 + $0x1a8] sm:$0xff] %vm1826_vm8, %v1937_v40  ;;  %5304 = vmatpush.msra.mxu0 %v5267_v1  ;;  %v17353_v40 = vld [vmem:[#allocation119_spill] sm:$0xff] }
 0xa1e   : > { %v1897_v61 = vpop.permute.xlu2 %1896  ;;  %v4879_v1 = vsub.f32 %v17353_v40, %v13838_v19  ;;  %v17357_v40 = vld [vmem:[#allocation110_spill] sm:$0xff] }
 0xa1f   : > { %1992 = vst.msk [vmem:[#allocation3 + $0x108] sm:$0xff] %vm1826_vm8, %v1897_v61 }
 0xa20   : > { %v4482_v11 = vpop.permute.xlu1 %4481  ;;  %v4945_v61 = vmul.f32 1.442695, %v4879_v1 }
 0xa21   : > { %9101 = vmatmul.msk.f32.gmra.mxu2 %vm1826_vm8, %v4482_v11  ;;  %9133 = vmatmul.msk.f32.gmra.mxu3 %vm1826_vm8, %v4482_v11  ;;  %v4947_v11 = vmul.f32 1.442695, %v4880_v63  ;;  %v4885_v63 = vsub.f32 %v13742_v59, %v13882_v42 }
 0xa22   : > { %4303 = vmatmul.f32.gmra.mxu0 %v4161_v25  ;;  %4416 = vmatmul.f32.gmra.mxu1 %v4162_v9  ;;  %v14030_v25 = vpop.f32.mrf.mxu0  ;;  %v14032_v9 = vpop.f32.mrf.mxu1  ;;  %9918 = vpow2.f32 %v4945_v61 }
 0xa23   : > { %17355 = vst [vmem:[#allocation97_spill] sm:$0xff] %v14030_v25  ;;  %9920 = vpow2.f32 %v4947_v11  ;;  %v4886_v11 = vsub.f32 %v13740_v16, %v13882_v42  ;;  %v17360_v16 = vld [vmem:[#allocation74_spill] sm:$0xff] }
 0xa24   : > { %v5283_v7 = vld [vmem:[#allocation3 + $0x1a8] sm:$0xff]  ;;  %17356 = vst [vmem:[#allocation43_spill] sm:$0xff] %v14032_v9  ;;  %v9573_v42 = vunpack.i.l.bf16 %v17360_v16 }
 0xa25   : > { %5417 = vmatpush.msra.mxu1 %v5283_v7  ;;  %v4959_v59 = vmul.f32 1.442695, %v4886_v11  ;;  %v5280_v11 = vld [vmem:[#allocation3 + $0x190] sm:$0xff] }
 0xa26   : > { %v1929_v52 = vpop.permute.xlu2 %1928  ;;  %v5263_v39 = vld [vmem:[#allocation3 + $0x108] sm:$0xff] }
 0xa27   : > { %2008 = vst.msk [vmem:[#allocation3 + $0x188] sm:$0xff] %vm1826_vm8, %v1929_v52  ;;  %5418 = vmatpush.msra.mxu1 %v5282_v2 }
 0xa28   : > { %v1903_v57 = vpop.permute.xlu1 %1902  ;;  %v14038_v19 = vpop.eup %9918 }
 0xa29   : > { %1995 = vst.msk [vmem:[#allocation3 + $0x120] sm:$0xff] %vm1826_vm8, %v1903_v57  ;;  %v14040_v1 = vpop.eup %9920 }
 0xa2a   : > { %v14046_v57 = vpop.f32.mrf.mxu0  ;;  %v14048_v61 = vpop.f32.mrf.mxu1  ;;  %v5072_v60 = vadd.f32 %v14040_v1, %v14038_v19 }
 0xa2b   : > { %17358 = vst [vmem:[#allocation37_spill] sm:$0xff] %v14046_v57 }
 0xa2c   : > { %17359 = vst [vmem:[#allocation93_spill] sm:$0xff] %v14048_v61 }
 0xa2e   : > { %v1895_v7 = vpop.permute.xlu2 %1894 }
 0xa2f   : > { %1991 = vst.msk [vmem:[#allocation3 + $0x100] sm:$0xff] %vm1826_vm8, %v1895_v7  ;;  %4487 = vrot.lane.b32.xlu0 %v17357_v40, %s10788_s27  ;;  %v14050_v7 = vpop.f32.mrf.mxu2  ;;  %v4957_v40 = vmul.f32 1.442695, %v4885_v63  ;;  %s10789_s27 = smov 112  }
 0xa30   : > { %v1901_v52 = vpop.permute.xlu1 %1900  ;;  %v5266_v2 = vld [vmem:[#allocation3 + $0x120] sm:$0xff] }
 0xa31   : > { %1994 = vst.msk [vmem:[#allocation3 + $0x118] sm:$0xff] %vm1826_vm8, %v1901_v52  ;;  %5305 = vmatpush.msra.mxu0 %v5266_v2  ;;  %9922 = vpow2.f32 %v4957_v40  ;;  %v4961_v40 = vmul.f32 1.442695, %v4887_v4 }
 0xa32   : > { %9924 = vpow2.f32 %v4959_v59  ;;  %v14068_v63 = vpop.f32.mrf.mxu1 }
 0xa33   : > { %17362 = vst [vmem:[#allocation115_spill] sm:$0xff] %v14068_v63  ;;  %9926 = vpow2.f32 %v4961_v40 }
 0xa36   : > { %v5262_v5 = vld [vmem:[#allocation3 + $0x100] sm:$0xff] }
 0xa37   : > { %v14070_v50 = vpop.f32.mrf.mxu2  ;;  %v14074_v59 = vpop.eup %9922 }
 0xa38   : > { %v1933_v52 = vpop.permute.xlu1 %1932  ;;  %v5265_v2 = vld [vmem:[#allocation3 + $0x118] sm:$0xff]  ;;  %v14078_v22 = vpop.eup %9924 }
 0xa39   : > { %2010 = vst.msk [vmem:[#allocation3 + $0x198] sm:$0xff] %vm1826_vm8, %v1933_v52  ;;  %5306 = vmatpush.msra.mxu0 %v5265_v2  ;;  %v4888_v52 = vsub.f32 %v13822_v54, %v13962_v21  ;;  %v14062_v2 = vpop.f32.mrf.mxu3  ;;  %v5279_v21 = vld [vmem:[#allocation3 + $0x188] sm:$0xff] }
 0xa3a   : > { %v4814_v54 = vmax.f32 %v14070_v50, %v14062_v2  ;;  %v14086_v32 = vpop.f32.mrf.mxu1 }
 0xa3b   : > { %5073 = vadd.xlane.f32.xlu1 %v5072_v60  ;;  %5307 = vmatpush.msra.mxu0 %v5264_v26  ;;  %v4811_v26 = vmax.f32 %v14050_v7, %v14042_v44  ;;  %17366 = vst [vmem:[#allocation113_spill] sm:$0xff] %v14086_v32 }
 0xa3d   : > { %5308 = vmatpush.msra.mxu0 %v5263_v39  ;;  %v14066_v39 = vpop.f32.mrf.mxu0 }
 0xa3e   : > { %17361 = vst [vmem:[#allocation46_spill] sm:$0xff] %v14066_v39 }
 0xa3f   : > { %5309 = vmatpush.msra.mxu0 %v5262_v5  ;;  %v4963_v5 = vmul.f32 1.442695, %v4888_v52 }
 0xa40   : > { %v5281_v60 = vld [vmem:[#allocation3 + $0x198] sm:$0xff] }
 0xa41   : > { %6086 = vmatpush.msrb.mxu0 %v9573_v42  ;;  %5419 = vmatpush.msra.mxu1 %v5281_v60  ;;  %v17363_v42 = vld [vmem:[#allocation120_spill] sm:$0xff]  ;;  %v17364_v60 = vld [vmem:[#allocation111_spill] sm:$0xff]  ;;  %9928 = vpow2.f32 %v4963_v5 }
 0xa42   : > { %v4883_v10 = vsub.f32 %v17363_v42, %v13804_v18  ;;  %v4884_v4 = vsub.f32 %v17364_v60, %v13804_v18  ;;  %v14098_v42 = vpop.f32.mrf.mxu2 }
 0xa43   : > { %4812 = vmax.xlane.f32.xlu1 %v4811_v26  ;;  %5420 = vmatpush.msra.mxu1 %v5280_v11  ;;  %v5081_v26 = vadd.f32 %v14078_v22, %v14074_v59 }
 0xa44   : > { %v4953_v52 = vmul.f32 1.442695, %v4883_v10  ;;  %v4955_v11 = vmul.f32 1.442695, %v4884_v4  ;;  %v14094_v10 = vpop.f32.mrf.mxu3 }
 0xa45   : > { %4815 = vmax.xlane.f32.xlu2 %v4814_v54  ;;  %5421 = vmatpush.msra.mxu1 %v5279_v21  ;;  %v14084_v8 = vpop.f32.mrf.mxu0  ;;  %v14088_v54 = vpop.eup %9926 }
 0xa46   : > { %17365 = vst [vmem:[#allocation106_spill] sm:$0xff] %v14084_v8 }
 0xa47   : > { %v4068_v17 = vpop.xlane.xlu0 %4067  ;;  %v14090_v21 = vpop.eup %9928 }
 0xa48   : > { %9930 = vrcp.f32 %v4068_v17  ;;  %v5084_v5 = vadd.f32 %v14090_v21, %v14088_v54 }
 0xa49   : > { %9932 = vpow2.f32 %v4953_v52 }
 0xa4a   : > { %9934 = vpow2.f32 %v4955_v11 }
 0xa4b   : > { %5082 = vadd.xlane.f32.xlu1 %v5081_v26  ;;  %v14106_v26 = vpop.f32.mrf.mxu1 }
 0xa4c   : > { %17368 = vst [vmem:[#allocation121_spill] sm:$0xff] %v14106_v26  ;;  %v14112_v11 = vpop.f32.mrf.mxu3 }
 0xa4d   : > { %v14104_v52 = vpop.f32.mrf.mxu0 }
 0xa4e   : > { %v9931_v18 = vpop.eup %9930  ;;  %17367 = vst [vmem:[#allocation100_spill] sm:$0xff] %v14104_v52 }
 0xa4f   : > { %v4163_v40 = vmul.f32 %v9931_v18, %v13906_v58  ;;  %v4164_v17 = vmul.f32 %v9931_v18, %v13909_v0  ;;  %v14100_v60 = vpop.eup %9932  ;;  %v4817_v0 = vmax.f32 %v14098_v42, %v14094_v10 }
 0xa50   : > { %v14102_v4 = vpop.eup %9934 }
 0xa51   : > { %4306 = vmatmul.f32.gmra.mxu0 %v4163_v40  ;;  %4419 = vmatmul.f32.gmra.mxu1 %v4164_v17  ;;  %v5078_v58 = vadd.f32 %v14102_v4, %v14100_v60  ;;  %v14115_v40 = vpop.f32.mrf.mxu2 }
 0xa52   : > { %v4820_v3 = vmax.f32 %v14115_v40, %v14112_v11 }
 0xa53   : > { %5085 = vadd.xlane.f32.xlu1 %v5084_v5  ;;  %v14120_v5 = vpop.f32.mrf.mxu1 }
 0xa54   : > { %17370 = vst [vmem:[#allocation48_spill] sm:$0xff] %v14120_v5 }
 0xa55   : > { %v14118_v17 = vpop.f32.mrf.mxu0 }
 0xa56   : > { %17369 = vst [vmem:[#allocation72_spill] sm:$0xff] %v14118_v17 }
 0xa59   : > { %5079 = vadd.xlane.f32.xlu0 %v5078_v58  ;;  %v14124_v58 = vpop.f32.mrf.mxu3  ;;  %v14128_v52 = vpop.f32.mrf.mxu2 }
 0xa5a   : > { %v4484_v18 = vpop.permute.xlu0 %4483  ;;  %v4823_v63 = vmax.f32 %v14128_v52, %v14124_v58 }
 0xa5b   : > { %4818 = vmax.xlane.f32.xlu1 %v4817_v0  ;;  %9102 = vmatmul.msk.f32.gmra.mxu2 %vm1826_vm8, %v4484_v18  ;;  %v14136_v39 = vpop.f32.mrf.mxu1 }
 0xa5c   : > { %9134 = vmatmul.msk.f32.gmra.mxu3 %vm1826_vm8, %v4484_v18  ;;  %17372 = vst [vmem:[#allocation35_spill] sm:$0xff] %v14136_v39 }
 0xa63   : > { %v4801_v45 = vpop.xlane.xlu1 %4800  ;;  %4821 = vmax.xlane.f32.xlu1 %v4820_v3  ;;  %v14134_v3 = vpop.f32.mrf.mxu0 }
 0xa64   : > { %v4889_v26 = vsub.f32 %v13917_v24, %v4801_v45  ;;  %v4890_v0 = vsub.f32 %v13915_v47, %v4801_v45  ;;  %17371 = vst [vmem:[#allocation114_spill] sm:$0xff] %v14134_v3 }
 0xa66   : > { %v4965_v32 = vmul.f32 1.442695, %v4889_v26  ;;  %v4967_v8 = vmul.f32 1.442695, %v4890_v0  ;;  %v14140_v26 = vpop.f32.mrf.mxu3 }
 0xa67   : > { %v4804_v18 = vpop.xlane.xlu2 %4803 }
 0xa68   : > { %9936 = vpow2.f32 %v4965_v32  ;;  %v4891_v17 = vsub.f32 %v13933_v15, %v4804_v18  ;;  %v4892_v5 = vsub.f32 %v13931_v35, %v4804_v18  ;;  %v14146_v15 = vpop.f32.mrf.mxu2 }
 0xa69   : > { %9938 = vpow2.f32 %v4967_v8  ;;  %v4826_v8 = vmax.f32 %v14146_v15, %v14140_v26 }
 0xa6a   : > { %v4969_v24 = vmul.f32 1.442695, %v4891_v17  ;;  %v4971_v45 = vmul.f32 1.442695, %v4892_v5  ;;  %v14154_v17 = vpop.f32.mrf.mxu1 }
 0xa6b   : > { %4824 = vmax.xlane.f32.xlu1 %v4823_v63  ;;  %v14152_v63 = vpop.f32.mrf.mxu0  ;;  %17374 = vst [vmem:[#allocation102_spill] sm:$0xff] %v14154_v17 }
 0xa6c   : > { %9940 = vpow2.f32 %v4969_v24  ;;  %17373 = vst [vmem:[#allocation41_spill] sm:$0xff] %v14152_v63 }
 0xa6d   : > { %9942 = vpow2.f32 %v4971_v45 }
 0xa6e   : > { %v14138_v47 = vpop.eup %9936  ;;  %v14169_v63 = vpop.f32.mrf.mxu3 }
 0xa6f   : > { %v14142_v32 = vpop.eup %9938  ;;  %v14144_v35 = vpop.xlane.xlu2 %5076 }
 0xa70   : > { %v5087_v0 = vadd.f32 %v14142_v32, %v14138_v47 }
 0xa72   : > { %5088 = vadd.xlane.f32.xlu0 %v5087_v0  ;;  %v14156_v5 = vpop.eup %9940  ;;  %v14167_v17 = vpop.f32.mrf.mxu1 }
 0xa73   : > { %4827 = vmax.xlane.f32.xlu1 %v4826_v8  ;;  %v14158_v18 = vpop.eup %9942  ;;  %v14165_v8 = vpop.f32.mrf.mxu0  ;;  %17377 = vst [vmem:[#allocation116_spill] sm:$0xff] %v14167_v17 }
 0xa74   : > { %17375 = vst [vmem:[#allocation94_spill] sm:$0xff] %v14158_v18  ;;  %v5090_v3 = vadd.f32 %v14158_v18, %v14156_v5 }
 0xa75   : > { %17376 = vst [vmem:[#allocation98_spill] sm:$0xff] %v14165_v8 }
 0xa76   : > { %v14186_v8 = vpop.f32.mrf.mxu3 }
 0xa77   : > { %v4810_v24 = vpop.xlane.xlu2 %4809  ;;  %17382 = vst [vmem:[#allocation119_spill] sm:$0xff] %v14186_v8 }
 0xa78   : > { %v4895_v45 = vsub.f32 %v13970_v30, %v4810_v24  ;;  %v4896_v39 = vsub.f32 %v13964_v43, %v4810_v24  ;;  %v14171_v30 = vpop.f32.mrf.mxu2 }
 0xa7a   : > { %v4977_v61 = vmul.f32 1.442695, %v4895_v45  ;;  %v4979_v57 = vmul.f32 1.442695, %v4896_v39  ;;  %5091 = vadd.xlane.f32.xlu0 %v5090_v3  ;;  %v14184_v17 = vpop.f32.mrf.mxu1 }
 0xa7b   : > { %v1927_v0 = vpop.permute.xlu1 %1926  ;;  %17381 = vst [vmem:[#allocation36_spill] sm:$0xff] %v14184_v17  ;;  %v17384_v17 = vld [vmem:[#allocation104_spill] sm:$0xff] }
 0xa7c   : > { %9944 = vpow2.f32 %v4977_v61  ;;  %2007 = vst.msk [vmem:[#allocation3 + $0x180] sm:$0xff] %vm1826_vm8, %v1927_v0  ;;  %v9576_v61 = vunpack.i.h.bf16 %v17360_v16  ;;  %v14182_v0 = vpop.f32.mrf.mxu0 }
 0xa7d   : > { %9946 = vpow2.f32 %v4979_v57  ;;  %17380 = vst [vmem:[#allocation117_spill] sm:$0xff] %v14182_v0 }
 0xa80   : > { %v14188_v9 = vpop.f32.mrf.mxu2 }
 0xa81   : > { %17383 = vst [vmem:[#allocation118_spill] sm:$0xff] %v14188_v9 }
 0xa82   : > { %v14173_v43 = vpop.eup %9944  ;;  %v14199_v18 = vpop.f32.mrf.mxu1 }
 0xa83   : > { %17378 = vst [vmem:[#allocation101_spill] sm:$0xff] %v14173_v43  ;;  %v14175_v24 = vpop.eup %9946  ;;  %v4486_v45 = vpop.permute.xlu1 %4485  ;;  %v5278_v39 = vld [vmem:[#allocation3 + $0x180] sm:$0xff] }
 0xa84   : > { %17379 = vst [vmem:[#allocation91_spill] sm:$0xff] %v14175_v24  ;;  %9103 = vmatmul.msk.f32.gmra.mxu2 %vm1826_vm8, %v4486_v45  ;;  %9135 = vmatmul.msk.f32.gmra.mxu3 %vm1826_vm8, %v4486_v45  ;;  %v5096_v3 = vadd.f32 %v14175_v24, %v14173_v43  ;;  %v4832_v45 = vmax.f32 %v14188_v9, %v14186_v8  ;;  %v4423_v24 = vld [vmem:[#allocation13] sm:$0xff]  ;;  %v14197_v43 = vpop.f32.mrf.mxu0 }
 0xa85   : > { %5422 = vmatpush.msra.mxu1 %v5278_v39  ;;  %5842 = vmatpush.msrb.mxu3 %v4423_v24 }
 0xa86   : > { %5097 = vadd.xlane.f32.xlu2 %v5096_v3  ;;  %v5071_v57 = vpop.xlane.xlu0 %5070 }
 0xa87   : > { %6199 = vmatpush.msrb.mxu1 %v9576_v61  ;;  %9948 = vrcp.f32 %v5071_v57  ;;  %v9578_v57 = vunpack.i.l.bf16 %v17384_v17 }
 0xa8d   : > { %v9949_v16 = vpop.eup %9948 }
 0xa8e   : > { %v5197_v25 = vmul.f32 %v9949_v16, %v13985_v33  ;;  %v5198_v39 = vmul.f32 %v9949_v16, %v13988_v38  ;;  %4833 = vmax.xlane.f32.xlu2 %v4832_v45  ;;  %v4807_v61 = vpop.xlane.xlu0 %4806  ;;  %v14207_v38 = vpop.f32.mrf.mxu1 }
 0xa8f   : > { %v4893_v3 = vsub.f32 %v13951_v51, %v4807_v61  ;;  %v4894_v0 = vsub.f32 %v13944_v56, %v4807_v61  ;;  %v14205_v56 = vpop.f32.mrf.mxu0 }
 0xa90   : > { %5310 = vmatmul.f32.vlgmr.msra.gmra.mxu0 %v5197_v25  ;;  %5423 = vmatmul.f32.vlgmr.msra.gmra.mxu1 %v5198_v39 }
 0xa91   : > { %v4973_v8 = vmul.f32 1.442695, %v4893_v3  ;;  %v4975_v9 = vmul.f32 1.442695, %v4894_v0  ;;  %7425 = vmatpush.msra.mxu1 %v9578_v57  ;;  %v4490_v0 = vpop.permute.xlu2 %4489  ;;  %v4328_v3 = vadd.f32 %v13879_v49, %v13874_v41 }
 0xa93   : > { %9950 = vpow2.f32 %v4973_v8 }
 0xa94   : > { %9952 = vpow2.f32 %v4975_v9  ;;  %v4829_v9 = vmax.f32 %v14171_v30, %v14169_v63 }
 0xa96   : > { %v14217_v24 = vpop.f32.mrf.mxu1 }
 0xa97   : > { %v14215_v8 = vpop.f32.mrf.mxu0 }
 0xa99   : > { %v14201_v33 = vpop.eup %9950 }
 0xa9a   : > { %v14203_v51 = vpop.eup %9952 }
 0xa9b   : > { %v5093_v25 = vadd.f32 %v14203_v51, %v14201_v33 }
 0xa9d   : > { %5094 = vadd.xlane.f32.xlu0 %v5093_v25 }
 0xa9e   : > { %v14223_v61 = vpop.f32.mrf.mxu1 }
 0xa9f   : > { %v14221_v39 = vpop.f32.mrf.mxu0  ;;  %17385 = vst [vmem:[#allocation74_spill] sm:$0xff] %v14223_v61 }
 0xaa1   : > { %v4488_v45 = vpop.permute.xlu0 %4487 }
 0xaa2   : > { %9104 = vmatmul.msk.f32.gmra.mxu2 %vm1826_vm8, %v4488_v45  ;;  %9136 = vmatmul.msk.f32.gmra.mxu3 %vm1826_vm8, %v4488_v45 }
 0xaa5   : > { %4830 = vmax.xlane.f32.xlu0 %v4829_v9 }
 0xaa7   : > { %v14235_v49 = vpop.f32.mrf.mxu0 }
 0xaaa   : > { %9105 = vmatmul.msk.f32.gmra.mxu2 %vm1826_vm8, %v4490_v0  ;;  %9137 = vmatmul.msk.f32.gmra.mxu3 %vm1826_vm8, %v4490_v0 }
 0xaae   : > { %v5074_v16 = vpop.xlane.xlu1 %5073 }
 0xaaf   : > { %9954 = vrcp.f32 %v5074_v16  ;;  %v4331_v16 = vadd.f32 %v13897_v6, %v13894_v53 }
 0xab0   : > { %9956 = vrcp.f32 %v14144_v35 }
 0xab2   : > { %9170 = vmatmul.msk.f32.vlgmr.msrb.gmra.mxu3 %vm1826_vm8, %v4328_v3  ;;  %v14237_v3 = vpop.f32.mrf.mxu1 }
 0xab5   : > { %v9955_v57 = vpop.eup %9954 }
 0xab6   : > { %v4813_v25 = vpop.xlane.xlu1 %4812  ;;  %v5199_v45 = vmul.f32 %v9955_v57, %v14038_v19  ;;  %v5200_v9 = vmul.f32 %v9955_v57, %v14040_v1 }
 0xab7   : > { %v4897_v0 = vsub.f32 %v14050_v7, %v4813_v25  ;;  %v4898_v17 = vsub.f32 %v14042_v44, %v4813_v25  ;;  %v9957_v7 = vpop.eup %9956 }
 0xab8   : > { %5313 = vmatmul.f32.gmra.mxu0 %v5199_v45  ;;  %5426 = vmatmul.f32.gmra.mxu1 %v5200_v9  ;;  %v4816_v41 = vpop.xlane.xlu2 %4815  ;;  %v5201_v6 = vmul.f32 %v9957_v7, %v13947_v48  ;;  %v5202_v25 = vmul.f32 %v9957_v7, %v13949_v28  ;;  %v14244_v45 = vpop.f32.mrf.mxu3 }
 0xab9   : > { %v4981_v35 = vmul.f32 1.442695, %v4897_v0  ;;  %v4983_v61 = vmul.f32 1.442695, %v4898_v17  ;;  %v4899_v19 = vsub.f32 %v14070_v50, %v4816_v41  ;;  %v4900_v1 = vsub.f32 %v14062_v2, %v4816_v41  ;;  %v14252_v9 = vpop.f32.mrf.mxu2  ;;  %v14257_v48 = vpop.f32.mrf.mxu0 }
 0xaba   : > { %9171 = vmatmul.msk.f32.gmra.mxu3 %vm1826_vm8, %v4331_v16  ;;  %v4334_v50 = vadd.f32 %v13929_v23, %v13927_v31  ;;  %v14259_v28 = vpop.f32.mrf.mxu1  ;;  %v4337_v41 = vadd.f32 %v13942_v34, %v13940_v29 }
 0xabb   : > { %9958 = vpow2.f32 %v4981_v35  ;;  %v4985_v44 = vmul.f32 1.442695, %v4899_v19  ;;  %v4987_v57 = vmul.f32 1.442695, %v4900_v1  ;;  %v4835_v19 = vmax.f32 %v14252_v9, %v14244_v45 }
 0xabc   : > { %9960 = vpow2.f32 %v4983_v61 }
 0xabd   : > { %9962 = vpow2.f32 %v4985_v44 }
 0xabe   : > { %9964 = vpow2.f32 %v4987_v57  ;;  %v5083_v53 = vpop.xlane.xlu1 %5082 }
 0xac0   : > { %5316 = vmatmul.f32.gmra.mxu0 %v5201_v6  ;;  %5429 = vmatmul.f32.gmra.mxu1 %v5202_v25  ;;  %v14269_v35 = vpop.f32.mrf.mxu3 }
 0xac1   : > { %v14248_v2 = vpop.eup %9958  ;;  %v14274_v1 = vpop.f32.mrf.mxu2 }
 0xac2   : > { %v14250_v17 = vpop.eup %9960  ;;  %9172 = vmatmul.msk.f32.gmra.mxu3 %vm1826_vm8, %v4334_v50  ;;  %v4838_v44 = vmax.f32 %v14274_v1, %v14269_v35  ;;  %v14278_v57 = vpop.f32.mrf.mxu0  ;;  %v4340_v50 = vadd.f32 %v13957_v62, %v13955_v13 }
 0xac3   : > { %v14255_v61 = vpop.eup %9962  ;;  %v5099_v0 = vadd.f32 %v14250_v17, %v14248_v2  ;;  %v14280_v6 = vpop.f32.mrf.mxu1 }
 0xac4   : > { %v14263_v31 = vpop.eup %9964  ;;  %17386 = vst [vmem:[#allocation120_spill] sm:$0xff] %v14280_v6 }
 0xac5   : > { %5100 = vadd.xlane.f32.xlu1 %v5099_v0  ;;  %v5102_v23 = vadd.f32 %v14263_v31, %v14255_v61 }
 0xac6   : > { %v5086_v16 = vpop.xlane.xlu1 %5085 }
 0xac7   : > { %5103 = vadd.xlane.f32.xlu0 %v5102_v23 }
 0xaca   : > { %9173 = vmatmul.msk.f32.gmra.mxu3 %vm1826_vm8, %v4337_v41  ;;  %v14289_v6 = vpop.f32.mrf.mxu0 }
 0xacc   : > { %v5080_v7 = vpop.xlane.xlu0 %5079 }
 0xacd   : > { %9966 = vrcp.f32 %v5080_v7  ;;  %4836 = vmax.xlane.f32.xlu1 %v4835_v19 }
 0xace   : > { %v4819_v34 = vpop.xlane.xlu1 %4818  ;;  %9968 = vrcp.f32 %v5083_v53 }
 0xacf   : > { %v4901_v29 = vsub.f32 %v14098_v42, %v4819_v34  ;;  %v4902_v25 = vsub.f32 %v14094_v10, %v4819_v34  ;;  %4839 = vmax.xlane.f32.xlu0 %v4838_v44  ;;  %v14291_v42 = vpop.f32.mrf.mxu1  ;;  %v4343_v44 = vadd.f32 %v13977_v46, %v13975_v27 }
 0xad1   : > { %v4989_v0 = vmul.f32 1.442695, %v4901_v29  ;;  %v4991_v23 = vmul.f32 1.442695, %v4902_v25  ;;  %v14301_v25 = vpop.f32.mrf.mxu3 }
 0xad2   : > { %9174 = vmatmul.msk.f32.gmra.mxu3 %vm1826_vm8, %v4340_v50 }
 0xad3   : > { %v9967_v41 = vpop.eup %9966  ;;  %9970 = vpow2.f32 %v4989_v0  ;;  %v14310_v0 = vpop.f32.mrf.mxu0 }
 0xad4   : > { %9972 = vpow2.f32 %v4991_v23  ;;  %v5203_v7 = vmul.f32 %v9967_v41, %v14100_v60  ;;  %v5204_v19 = vmul.f32 %v9967_v41, %v14102_v4  ;;  %v9969_v53 = vpop.eup %9968 }
 0xad5   : > { %9974 = vrcp.f32 %v5086_v16  ;;  %v5205_v27 = vmul.f32 %v9969_v53, %v14074_v59  ;;  %v5206_v46 = vmul.f32 %v9969_v53, %v14078_v22 }
 0xad6   : > { %v4822_v10 = vpop.xlane.xlu1 %4821  ;;  %5319 = vmatmul.f32.gmra.mxu0 %v5203_v7  ;;  %5432 = vmatmul.f32.gmra.mxu1 %v5204_v19  ;;  %v4346_v19 = vadd.f32 %v13992_v37, %v13990_v55 }
 0xad7   : > { %v4903_v62 = vsub.f32 %v14115_v40, %v4822_v10  ;;  %v4904_v13 = vsub.f32 %v14112_v11, %v4822_v10  ;;  %v14306_v11 = vpop.f32.mrf.mxu2  ;;  %v14312_v16 = vpop.f32.mrf.mxu1 }
 0xad9   : > { %v14297_v34 = vpop.eup %9970  ;;  %v4993_v60 = vmul.f32 1.442695, %v4903_v62  ;;  %v4995_v29 = vmul.f32 1.442695, %v4904_v13  ;;  %v4841_v13 = vmax.f32 %v14306_v11, %v14301_v25 }
 0xada   : > { %v14299_v4 = vpop.eup %9972  ;;  %9175 = vmatmul.msk.f32.gmra.mxu3 %vm1826_vm8, %v4343_v44 }
 0xadb   : > { %9976 = vpow2.f32 %v4993_v60  ;;  %v5105_v40 = vadd.f32 %v14299_v4, %v14297_v34  ;;  %v9975_v7 = vpop.eup %9974 }
 0xadc   : > { %9978 = vpow2.f32 %v4995_v29  ;;  %v5207_v55 = vmul.f32 %v9975_v7, %v14088_v54  ;;  %v5208_v37 = vmul.f32 %v9975_v7, %v14090_v21  ;;  %v14339_v54 = vpop.f32.mrf.mxu0 }
 0xadd   : > { %5106 = vadd.xlane.f32.xlu2 %v5105_v40 }
 0xade   : > { %v4825_v50 = vpop.xlane.xlu1 %4824  ;;  %5322 = vmatmul.f32.gmra.mxu0 %v5205_v27  ;;  %5435 = vmatmul.f32.gmra.mxu1 %v5206_v46  ;;  %v4349_v27 = vadd.f32 %v14010_v36, %v14008_v12 }
 0xadf   : > { %v4905_v23 = vsub.f32 %v14128_v52, %v4825_v50  ;;  %v4906_v41 = vsub.f32 %v14124_v58, %v4825_v50  ;;  %v14327_v58 = vpop.f32.mrf.mxu3  ;;  %v14331_v44 = vpop.f32.mrf.mxu2 }
 0xae0   : > { %v14341_v21 = vpop.f32.mrf.mxu1 }
 0xae1   : > { %v14318_v10 = vpop.eup %9976  ;;  %v4997_v59 = vmul.f32 1.442695, %v4905_v23  ;;  %v4999_v22 = vmul.f32 1.442695, %v4906_v41  ;;  %17387 = vst [vmem:[#allocation111_spill] sm:$0xff] %v14341_v21  ;;  %v17412_v21 = vld [vmem:[#allocation48_spill] sm:$0xff] }
 0xae2   : > { %v14320_v62 = vpop.eup %9978  ;;  %9176 = vmatmul.msk.f32.gmra.mxu3 %vm1826_vm8, %v4346_v19 }
 0xae3   : > { %9980 = vpow2.f32 %v4997_v59  ;;  %v5108_v52 = vadd.f32 %v14320_v62, %v14318_v10 }
 0xae4   : > { %9982 = vpow2.f32 %v4999_v22 }
 0xae5   : > { %v5089_v53 = vpop.xlane.xlu0 %5088  ;;  %5109 = vadd.xlane.f32.xlu1 %v5108_v52  ;;  %4842 = vmax.xlane.f32.xlu2 %v4841_v13  ;;  %v4352_v13 = vadd.f32 %v14022_v20, %v14020_v14  ;;  %v5521_v52 = vld [vmem:[#allocation13 + $0x8] sm:$0xff] }
 0xae6   : > { %9984 = vrcp.f32 %v5089_v53  ;;  %v4828_v60 = vpop.xlane.xlu1 %4827  ;;  %5325 = vmatmul.f32.gmra.mxu0 %v5207_v55  ;;  %5438 = vmatmul.f32.gmra.mxu1 %v5208_v37  ;;  %v17390_v20 = vld [vmem:[#allocation94_spill] sm:$0xff] }
 0xae7   : > { %v4907_v29 = vsub.f32 %v14146_v15, %v4828_v60  ;;  %v4908_v40 = vsub.f32 %v14140_v26, %v4828_v60  ;;  %v4844_v15 = vmax.f32 %v14331_v44, %v14327_v58  ;;  %v14352_v59 = vpop.f32.mrf.mxu3  ;;  %v14354_v22 = vpop.f32.mrf.mxu2  ;;  %5633 = vmatpush.msrb.mxu2 %v5521_v52 }
 0xae8   : > { %v14367_v53 = vpop.f32.mrf.mxu1 }
 0xae9   : > { %v14337_v46 = vpop.eup %9980  ;;  %v5001_v50 = vmul.f32 1.442695, %v4907_v29  ;;  %v5003_v23 = vmul.f32 1.442695, %v4908_v40  ;;  %17389 = vst [vmem:[#allocation123_spill] sm:$0xff] %v14367_v53 }
 0xaea   : > { %v14343_v41 = vpop.eup %9982  ;;  %9177 = vmatmul.msk.f32.gmra.mxu3 %vm1826_vm8, %v4349_v27 }
 0xaeb   : > { %9986 = vpow2.f32 %v5001_v50  ;;  %v5111_v26 = vadd.f32 %v14343_v41, %v14337_v46  ;;  %v17391_v50 = vld [vmem:[#allocation97_spill] sm:$0xff] }
 0xaec   : > { %v9985_v12 = vpop.eup %9984  ;;  %9988 = vpow2.f32 %v5003_v23  ;;  %v17392_v23 = vld [vmem:[#allocation43_spill] sm:$0xff] }
 0xaed   : > { %4845 = vmax.xlane.f32.xlu1 %v4844_v15  ;;  %v5092_v36 = vpop.xlane.xlu0 %5091  ;;  %5112 = vadd.xlane.f32.xlu0 %v5111_v26  ;;  %v5209_v7 = vmul.f32 %v9985_v12, %v14138_v47  ;;  %v5210_v19 = vmul.f32 %v9985_v12, %v14142_v32  ;;  %v4847_v47 = vmax.f32 %v14354_v22, %v14352_v59  ;;  %v14365_v32 = vpop.f32.mrf.mxu0 }
 0xaee   : > { %9990 = vrcp.f32 %v5092_v36  ;;  %17388 = vst [vmem:[#allocation122_spill] sm:$0xff] %v14365_v32  ;;  %v4355_v15 = vadd.f32 %v17392_v23, %v17391_v50  ;;  %v17410_v32 = vld [vmem:[#allocation91_spill] sm:$0xff] }
 0xaef   : > { %5328 = vmatmul.f32.gmra.mxu0 %v5209_v7  ;;  %5441 = vmatmul.f32.gmra.mxu1 %v5210_v19  ;;  %v14373_v27 = vpop.f32.mrf.mxu3  ;;  %v14377_v12 = vpop.f32.mrf.mxu2  ;;  %v17395_v19 = vld [vmem:[#allocation37_spill] sm:$0xff] }
 0xaf0   : > { %v4850_v36 = vmax.f32 %v14377_v12, %v14373_v27 }
 0xaf1   : > { %v14358_v55 = vpop.eup %9986 }
 0xaf2   : > { %v14360_v37 = vpop.eup %9988  ;;  %9178 = vmatmul.msk.f32.gmra.mxu3 %vm1826_vm8, %v4352_v13  ;;  %v17396_v13 = vld [vmem:[#allocation93_spill] sm:$0xff] }
 0xaf3   : > { %v5114_v60 = vadd.f32 %v14360_v37, %v14358_v55  ;;  %v4358_v52 = vadd.f32 %v17396_v13, %v17395_v19 }
 0xaf4   : > { %v9991_v29 = vpop.eup %9990 }
 0xaf5   : > { %5115 = vadd.xlane.f32.xlu2 %v5114_v60  ;;  %4848 = vmax.xlane.f32.xlu0 %v4847_v47  ;;  %v5211_v14 = vmul.f32 %v9991_v29, %v14156_v5  ;;  %v5212_v40 = vmul.f32 %v9991_v29, %v17390_v20  ;;  %v14382_v7 = vpop.f32.mrf.mxu0  ;;  %v14384_v5 = vpop.f32.mrf.mxu1  ;;  %v17397_v60 = vld [vmem:[#allocation118_spill] sm:$0xff] }
 0xaf6   : > { %17393 = vst [vmem:[#allocation94_spill] sm:$0xff] %v14382_v7 }
 0xaf7   : > { %5331 = vmatmul.f32.gmra.mxu0 %v5211_v14  ;;  %5444 = vmatmul.f32.gmra.mxu1 %v5212_v40  ;;  %17394 = vst [vmem:[#allocation97_spill] sm:$0xff] %v14384_v5  ;;  %v17398_v14 = vld [vmem:[#allocation119_spill] sm:$0xff]  ;;  %v17401_v5 = vld [vmem:[#allocation46_spill] sm:$0xff]  ;;  %v14397_v53 = vpop.f32.mrf.mxu3  ;;  %v14400_v19 = vpop.f32.mrf.mxu2 }
 0xaf9   : > { %v5098_v26 = vpop.xlane.xlu2 %5097 }
 0xafa   : > { %9179 = vmatmul.msk.f32.gmra.mxu3 %vm1826_vm8, %v4355_v15 }
 0xafd   : > { %4851 = vmax.xlane.f32.xlu2 %v4850_v36  ;;  %v14391_v23 = vpop.f32.mrf.mxu0  ;;  %v14393_v15 = vpop.f32.mrf.mxu1  ;;  %v17402_v36 = vld [vmem:[#allocation115_spill] sm:$0xff] }
 0xafe   : > { %17399 = vst [vmem:[#allocation43_spill] sm:$0xff] %v14391_v23  ;;  %v4361_v7 = vadd.f32 %v17402_v36, %v17401_v5 }
 0xaff   : > { %17400 = vst [vmem:[#allocation37_spill] sm:$0xff] %v14393_v15  ;;  %v14414_v36 = vpop.f32.mrf.mxu2 }
 0xb01   : > { %v4834_v47 = vpop.xlane.xlu2 %4833 }
 0xb02   : > { %v4911_v29 = vsub.f32 %v17397_v60, %v4834_v47  ;;  %v4912_v20 = vsub.f32 %v17398_v14, %v4834_v47  ;;  %9180 = vmatmul.msk.f32.gmra.mxu3 %vm1826_vm8, %v4358_v52 }
 0xb04   : > { %v5009_v40 = vmul.f32 1.442695, %v4911_v29  ;;  %v5011_v50 = vmul.f32 1.442695, %v4912_v20  ;;  %v17405_v20 = vld [vmem:[#allocation106_spill] sm:$0xff] }
 0xb06   : > { %9992 = vpow2.f32 %v5009_v40  ;;  %v17406_v40 = vld [vmem:[#allocation113_spill] sm:$0xff] }
 0xb07   : > { %9994 = vpow2.f32 %v5011_v50  ;;  %v4364_v50 = vadd.f32 %v17406_v40, %v17405_v20  ;;  %v17407_v40 = vld [vmem:[#allocation100_spill] sm:$0xff] }
 0xb0a   : > { %9181 = vmatmul.msk.f32.gmra.mxu3 %vm1826_vm8, %v4361_v7  ;;  %v14412_v7 = vpop.f32.mrf.mxu3 }
 0xb0c   : > { %v14402_v13 = vpop.eup %9992 }
 0xb0d   : > { %17403 = vst [vmem:[#allocation93_spill] sm:$0xff] %v14402_v13  ;;  %v14404_v52 = vpop.eup %9994  ;;  %v5311_v47 = vpop.f32.mrf.mxu0 }
 0xb0e   : > { %17404 = vst [vmem:[#allocation118_spill] sm:$0xff] %v14404_v52  ;;  %v5424_v60 = vpop.f32.mrf.mxu1  ;;  %v5120_v14 = vadd.f32 %v14404_v52, %v14402_v13 }
 0xb0f   : > { %v5425_v29 = vadd.f32 %v5424_v60, %v5311_v47  ;;  %v4856_v47 = vmax.f32 %v14414_v36, %v14412_v7 }
 0xb10   : > { %5121 = vadd.xlane.f32.xlu0 %v5120_v14  ;;  %v5095_v5 = vpop.xlane.xlu0 %5094 }
 0xb11   : > { %9138 = vmatmul.msk.f32.vlgmr.msrb.gmra.mxu2 %vm1826_vm8, %v5425_v29  ;;  %9996 = vrcp.f32 %v5095_v5  ;;  %v17408_v29 = vld [vmem:[#allocation121_spill] sm:$0xff] }
 0xb12   : > { %9182 = vmatmul.msk.f32.gmra.mxu3 %vm1826_vm8, %v4364_v50  ;;  %9998 = vrcp.f32 %v5098_v26  ;;  %v4367_v5 = vadd.f32 %v17408_v29, %v17407_v40 }
 0xb17   : > { %v9997_v60 = vpop.eup %9996 }
 0xb18   : > { %4857 = vmax.xlane.f32.xlu0 %v4856_v47  ;;  %v4831_v52 = vpop.xlane.xlu0 %4830  ;;  %v5213_v20 = vmul.f32 %v9997_v60, %v14201_v33  ;;  %v5214_v14 = vmul.f32 %v9997_v60, %v14203_v51  ;;  %v9999_v26 = vpop.eup %9998  ;;  %v17409_v47 = vld [vmem:[#allocation101_spill] sm:$0xff]  ;;  %v17411_v60 = vld [vmem:[#allocation72_spill] sm:$0xff] }
 0xb19   : > { %v4909_v50 = vsub.f32 %v14171_v30, %v4831_v52  ;;  %v4910_v13 = vsub.f32 %v14169_v63, %v4831_v52  ;;  %v5215_v33 = vmul.f32 %v9999_v26, %v17409_v47  ;;  %v5216_v51 = vmul.f32 %v9999_v26, %v17410_v32  ;;  %v14441_v32 = vpop.f32.mrf.mxu3 }
 0xb1a   : > { %5334 = vmatmul.f32.gmra.mxu0 %v5213_v20  ;;  %5447 = vmatmul.f32.gmra.mxu1 %v5214_v14  ;;  %v4370_v40 = vadd.f32 %v17412_v21, %v17411_v60  ;;  %v4853_v21 = vmax.f32 %v14400_v19, %v14397_v53  ;;  %v17415_v20 = vld [vmem:[#allocation41_spill] sm:$0xff]  ;;  %v17416_v14 = vld [vmem:[#allocation102_spill] sm:$0xff]  ;;  %v17418_v60 = vld [vmem:[#allocation116_spill] sm:$0xff] }
 0xb1b   : > { %v5005_v15 = vmul.f32 1.442695, %v4909_v50  ;;  %v5007_v23 = vmul.f32 1.442695, %v4910_v13  ;;  %9183 = vmatmul.msk.f32.gmra.mxu3 %vm1826_vm8, %v4367_v5  ;;  %v4376_v29 = vadd.f32 %v17416_v14, %v17415_v20 }
 0xb1d   : > { %10000 = vpow2.f32 %v5005_v15  ;;  %v17414_v15 = vld [vmem:[#allocation35_spill] sm:$0xff] }
 0xb1e   : > { %10002 = vpow2.f32 %v5007_v23  ;;  %v17413_v23 = vld [vmem:[#allocation114_spill] sm:$0xff] }
 0xb1f   : > { %v4373_v52 = vadd.f32 %v17414_v15, %v17413_v23 }
 0xb21   : > { %v14446_v47 = vpop.f32.mrf.mxu3 }
 0xb22   : > { %5337 = vmatmul.f32.gmra.mxu0 %v5215_v33  ;;  %5450 = vmatmul.f32.gmra.mxu1 %v5216_v51  ;;  %v17417_v51 = vld [vmem:[#allocation98_spill] sm:$0xff] }
 0xb23   : > { %v14429_v30 = vpop.eup %10000  ;;  %9184 = vmatmul.msk.f32.gmra.mxu3 %vm1826_vm8, %v4370_v40  ;;  %v4379_v40 = vadd.f32 %v17418_v60, %v17417_v51 }
 0xb24   : > { %v14432_v63 = vpop.eup %10002 }
 0xb25   : > { %v5117_v13 = vadd.f32 %v14432_v63, %v14429_v30 }
 0xb27   : > { %5118 = vadd.xlane.f32.xlu1 %v5117_v13 }
 0xb29   : > { %v14452_v20 = vpop.f32.mrf.mxu3 }
 0xb2b   : > { %9185 = vmatmul.msk.f32.gmra.mxu3 %vm1826_vm8, %v4373_v52 }
 0xb2f   : > { %4854 = vmax.xlane.f32.xlu1 %v4853_v21 }
 0xb33   : > { %9186 = vmatmul.msk.f32.gmra.mxu3 %vm1826_vm8, %v4376_v29 }
 0xb35   : > { %v5314_v5 = vpop.f32.mrf.mxu0  ;;  %v5427_v50 = vpop.f32.mrf.mxu1 }
 0xb36   : > { %v5428_v26 = vadd.f32 %v5427_v50, %v5314_v5  ;;  %v17419_v50 = vld [vmem:[#allocation117_spill] sm:$0xff] }
 0xb38   : > { %v5101_v33 = vpop.xlane.xlu1 %5100  ;;  %9139 = vmatmul.msk.f32.gmra.mxu2 %vm1826_vm8, %v5428_v26  ;;  %v17420_v26 = vld [vmem:[#allocation36_spill] sm:$0xff] }
 0xb39   : > { %10004 = vrcp.f32 %v5101_v33  ;;  %v4382_v33 = vadd.f32 %v17420_v26, %v17419_v50 }
 0xb3a   : > { %v5104_v13 = vpop.xlane.xlu0 %5103 }
 0xb3b   : > { %9187 = vmatmul.msk.f32.gmra.mxu3 %vm1826_vm8, %v4379_v40  ;;  %10006 = vrcp.f32 %v5104_v13 }
 0xb3d   : > { %v5317_v23 = vpop.f32.mrf.mxu0  ;;  %v5430_v15 = vpop.f32.mrf.mxu1 }
 0xb3e   : > { %v5431_v52 = vadd.f32 %v5430_v15, %v5317_v23 }
 0xb3f   : > { %v10005_v21 = vpop.eup %10004 }
 0xb40   : > { %v4837_v14 = vpop.xlane.xlu1 %4836  ;;  %9140 = vmatmul.msk.f32.gmra.mxu2 %vm1826_vm8, %v5431_v52  ;;  %v5217_v29 = vmul.f32 %v10005_v21, %v14248_v2  ;;  %v5218_v5 = vmul.f32 %v10005_v21, %v14250_v17 }
 0xb41   : > { %v4913_v51 = vsub.f32 %v14252_v9, %v4837_v14  ;;  %v4914_v60 = vsub.f32 %v14244_v45, %v4837_v14  ;;  %v10007_v2 = vpop.eup %10006  ;;  %v14464_v9 = vpop.f32.mrf.mxu3 }
 0xb42   : > { %v4840_v40 = vpop.xlane.xlu0 %4839  ;;  %5340 = vmatmul.f32.gmra.mxu0 %v5217_v29  ;;  %5453 = vmatmul.f32.gmra.mxu1 %v5218_v5  ;;  %v5219_v45 = vmul.f32 %v10007_v2, %v14255_v61  ;;  %v5220_v14 = vmul.f32 %v10007_v2, %v14263_v31  ;;  %v14475_v5 = vpop.f32.mrf.mxu2 }
 0xb43   : > { %v5013_v13 = vmul.f32 1.442695, %v4913_v51  ;;  %v5015_v23 = vmul.f32 1.442695, %v4914_v60  ;;  %v4915_v15 = vsub.f32 %v14274_v1, %v4840_v40  ;;  %v4916_v52 = vsub.f32 %v14269_v35, %v4840_v40  ;;  %9188 = vmatmul.msk.f32.gmra.mxu3 %vm1826_vm8, %v4382_v33 }
 0xb44   : > { %v4385_v1 = vadd.f32 %v14199_v18, %v14197_v43  ;;  %v4388_v33 = vadd.f32 %v14207_v38, %v14205_v56 }
 0xb45   : > { %10008 = vpow2.f32 %v5013_v13  ;;  %v5017_v17 = vmul.f32 1.442695, %v4915_v15  ;;  %v5019_v21 = vmul.f32 1.442695, %v4916_v52 }
 0xb46   : > { %10010 = vpow2.f32 %v5015_v23  ;;  %v4859_v23 = vmax.f32 %v14475_v5, %v14441_v32 }
 0xb47   : > { %10012 = vpow2.f32 %v5017_v17 }
 0xb48   : > { %10014 = vpow2.f32 %v5019_v21  ;;  %v4391_v21 = vadd.f32 %v14217_v24, %v14215_v8 }
 0xb49   : > { %v14485_v43 = vpop.f32.mrf.mxu3 }
 0xb4a   : > { %5343 = vmatmul.f32.gmra.mxu0 %v5219_v45  ;;  %5456 = vmatmul.f32.gmra.mxu1 %v5220_v14  ;;  %v14490_v40 = vpop.f32.mrf.mxu2 }
 0xb4b   : > { %v14470_v35 = vpop.eup %10008  ;;  %9189 = vmatmul.msk.f32.gmra.mxu3 %vm1826_vm8, %v4385_v1  ;;  %v4862_v52 = vmax.f32 %v14490_v40, %v14446_v47 }
 0xb4c   : > { %v14473_v29 = vpop.eup %10010 }
 0xb4d   : > { %v14477_v50 = vpop.eup %10012  ;;  %v5123_v61 = vadd.f32 %v14473_v29, %v14470_v35 }
 0xb4e   : > { %v14481_v26 = vpop.eup %10014 }
 0xb4f   : > { %5124 = vadd.xlane.f32.xlu2 %v5123_v61  ;;  %v5126_v18 = vadd.f32 %v14481_v26, %v14477_v50 }
 0xb50   : > { %v5107_v31 = vpop.xlane.xlu2 %5106 }
 0xb51   : > { %5127 = vadd.xlane.f32.xlu1 %v5126_v18  ;;  %10016 = vrcp.f32 %v5107_v31  ;;  %v14503_v1 = vpop.f32.mrf.mxu3 }
 0xb53   : > { %9190 = vmatmul.msk.f32.gmra.mxu3 %vm1826_vm8, %v4388_v33  ;;  %v5320_v51 = vpop.f32.mrf.mxu0  ;;  %v5433_v60 = vpop.f32.mrf.mxu1 }
 0xb54   : > { %v5434_v13 = vadd.f32 %v5433_v60, %v5320_v51  ;;  %v17421_v51 = vld [vmem:[#allocation74_spill] sm:$0xff] }
 0xb55   : > { %v4394_v60 = vadd.f32 %v17421_v51, %v14221_v39 }
 0xb56   : > { %9141 = vmatmul.msk.f32.gmra.mxu2 %vm1826_vm8, %v5434_v13 }
 0xb57   : > { %v10017_v15 = vpop.eup %10016  ;;  %4860 = vmax.xlane.f32.xlu2 %v4859_v23 }
 0xb58   : > { %v5110_v56 = vpop.xlane.xlu1 %5109  ;;  %v4843_v38 = vpop.xlane.xlu2 %4842  ;;  %v5221_v2 = vmul.f32 %v10017_v15, %v14297_v34  ;;  %v5222_v17 = vmul.f32 %v10017_v15, %v14299_v4 }
 0xb59   : > { %10018 = vrcp.f32 %v5110_v56  ;;  %4863 = vmax.xlane.f32.xlu1 %v4862_v52  ;;  %v4917_v45 = vsub.f32 %v14306_v11, %v4843_v38  ;;  %v4918_v14 = vsub.f32 %v14301_v25, %v4843_v38 }
 0xb5a   : > { %5346 = vmatmul.f32.gmra.mxu0 %v5221_v2  ;;  %5459 = vmatmul.f32.gmra.mxu1 %v5222_v17  ;;  %v14523_v17 = vpop.f32.mrf.mxu2 }
 0xb5b   : > { %v5021_v61 = vmul.f32 1.442695, %v4917_v45  ;;  %v5023_v18 = vmul.f32 1.442695, %v4918_v14  ;;  %9191 = vmatmul.msk.f32.gmra.mxu3 %vm1826_vm8, %v4391_v21  ;;  %v5323_v34 = vpop.f32.mrf.mxu0  ;;  %v5436_v31 = vpop.f32.mrf.mxu1 }
 0xb5c   : > { %v5437_v4 = vadd.f32 %v5436_v31, %v5323_v34 }
 0xb5d   : > { %10020 = vpow2.f32 %v5021_v61 }
 0xb5e   : > { %10022 = vpow2.f32 %v5023_v18  ;;  %9142 = vmatmul.msk.f32.gmra.mxu2 %vm1826_vm8, %v5437_v4  ;;  %v4397_v18 = vadd.f32 %v14237_v3, %v14235_v49  ;;  %v4865_v49 = vmax.f32 %v14523_v17, %v14452_v20 }
 0xb5f   : > { %v10019_v8 = vpop.eup %10018 }
 0xb60   : > { %v4846_v24 = vpop.xlane.xlu1 %4845  ;;  %v5113_v11 = vpop.xlane.xlu0 %5112  ;;  %v5223_v25 = vmul.f32 %v10019_v8, %v14318_v10  ;;  %v5224_v33 = vmul.f32 %v10019_v8, %v14320_v62 }
 0xb61   : > { %v4919_v13 = vsub.f32 %v14331_v44, %v4846_v24  ;;  %v4920_v23 = vsub.f32 %v14327_v58, %v4846_v24  ;;  %10024 = vrcp.f32 %v5113_v11  ;;  %v14518_v62 = vpop.f32.mrf.mxu3 }
 0xb62   : > { %5349 = vmatmul.f32.gmra.mxu0 %v5223_v25  ;;  %5462 = vmatmul.f32.gmra.mxu1 %v5224_v33  ;;  %17422 = vst [vmem:[#allocation119_spill] sm:$0xff] %v14518_v62  ;;  %v14542_v33 = vpop.f32.mrf.mxu2 }
 0xb63   : > { %v14513_v15 = vpop.eup %10020  ;;  %v5025_v52 = vmul.f32 1.442695, %v4919_v13  ;;  %v5027_v56 = vmul.f32 1.442695, %v4920_v23  ;;  %9192 = vmatmul.msk.f32.gmra.mxu3 %vm1826_vm8, %v4394_v60  ;;  %v5326_v38 = vpop.f32.mrf.mxu0  ;;  %v4400_v23 = vadd.f32 %v14259_v28, %v14257_v48 }
 0xb64   : > { %v5439_v10 = vpop.f32.mrf.mxu1  ;;  %v14516_v2 = vpop.eup %10022 }
 0xb65   : > { %v5440_v39 = vadd.f32 %v5439_v10, %v5326_v38  ;;  %10026 = vpow2.f32 %v5025_v52  ;;  %v5129_v58 = vadd.f32 %v14516_v2, %v14513_v15 }
 0xb66   : > { %10028 = vpow2.f32 %v5027_v56 }
 0xb67   : > { %9143 = vmatmul.msk.f32.gmra.mxu2 %vm1826_vm8, %v5440_v39  ;;  %v10025_v44 = vpop.eup %10024  ;;  %5130 = vadd.xlane.f32.xlu0 %v5129_v58 }
 0xb68   : > { %v4849_v21 = vpop.xlane.xlu0 %4848  ;;  %v5116_v45 = vpop.xlane.xlu2 %5115  ;;  %v5225_v14 = vmul.f32 %v10025_v44, %v14337_v46  ;;  %v5226_v61 = vmul.f32 %v10025_v44, %v14343_v41 }
 0xb69   : > { %v4921_v34 = vsub.f32 %v14354_v22, %v4849_v21  ;;  %v4922_v31 = vsub.f32 %v14352_v59, %v4849_v21  ;;  %10030 = vrcp.f32 %v5116_v45  ;;  %v14540_v22 = vpop.f32.mrf.mxu3  ;;  %v17425_v21 = vld [vmem:[#allocation120_spill] sm:$0xff] }
 0xb6a   : > { %5352 = vmatmul.f32.gmra.mxu0 %v5225_v14  ;;  %5465 = vmatmul.f32.gmra.mxu1 %v5226_v61  ;;  %17423 = vst [vmem:[#allocation46_spill] sm:$0xff] %v14540_v22  ;;  %v4403_v45 = vadd.f32 %v17425_v21, %v14278_v57  ;;  %v17433_v21 = vld [vmem:[#allocation97_spill] sm:$0xff] }
 0xb6b   : > { %v14531_v4 = vpop.eup %10026  ;;  %v5029_v8 = vmul.f32 1.442695, %v4921_v34  ;;  %v5031_v24 = vmul.f32 1.442695, %v4922_v31  ;;  %9193 = vmatmul.msk.f32.gmra.mxu3 %vm1826_vm8, %v4397_v18  ;;  %v4406_v31 = vadd.f32 %v14291_v42, %v14289_v6 }
 0xb6c   : > { %v14534_v11 = vpop.eup %10028  ;;  %v5329_v46 = vpop.f32.mrf.mxu0 }
 0xb6d   : > { %v5442_v41 = vpop.f32.mrf.mxu1  ;;  %10032 = vpow2.f32 %v5029_v8  ;;  %v5132_v59 = vadd.f32 %v14534_v11, %v14531_v4 }
 0xb6e   : > { %v5443_v3 = vadd.f32 %v5442_v41, %v5329_v46  ;;  %10034 = vpow2.f32 %v5031_v24  ;;  %v4409_v41 = vadd.f32 %v14312_v16, %v14310_v0 }
 0xb6f   : > { %v10031_v25 = vpop.eup %10030  ;;  %5133 = vadd.xlane.f32.xlu2 %v5132_v59  ;;  %4866 = vmax.xlane.f32.xlu0 %v4865_v49 }
 0xb70   : > { %9144 = vmatmul.msk.f32.gmra.mxu2 %vm1826_vm8, %v5443_v3  ;;  %v4852_v51 = vpop.xlane.xlu2 %4851  ;;  %v5227_v60 = vmul.f32 %v10031_v25, %v14358_v55  ;;  %v5228_v13 = vmul.f32 %v10031_v25, %v14360_v37  ;;  %v4868_v37 = vmax.f32 %v14542_v33, %v14464_v9 }
 0xb71   : > { %v4923_v52 = vsub.f32 %v14377_v12, %v4852_v51  ;;  %v4924_v56 = vsub.f32 %v14373_v27, %v4852_v51  ;;  %v14560_v27 = vpop.f32.mrf.mxu2  ;;  %v14562_v12 = vpop.f32.mrf.mxu3  ;;  %v17428_v51 = vld [vmem:[#allocation111_spill] sm:$0xff] }
 0xb72   : > { %5355 = vmatmul.f32.gmra.mxu0 %v5227_v60  ;;  %5468 = vmatmul.f32.gmra.mxu1 %v5228_v13  ;;  %17424 = vst [vmem:[#allocation115_spill] sm:$0xff] %v14562_v12  ;;  %v4871_v18 = vmax.f32 %v14560_v27, %v14485_v43  ;;  %v4412_v60 = vadd.f32 %v17428_v51, %v14339_v54 }
 0xb73   : > { %v14551_v38 = vpop.eup %10032  ;;  %v5033_v10 = vmul.f32 1.442695, %v4923_v52  ;;  %v5035_v39 = vmul.f32 1.442695, %v4924_v56  ;;  %9194 = vmatmul.msk.f32.gmra.mxu3 %vm1826_vm8, %v4400_v23  ;;  %v17430_v56 = vld [vmem:[#allocation122_spill] sm:$0xff] }
 0xb74   : > { %v14554_v58 = vpop.eup %10034  ;;  %v5332_v55 = vpop.f32.mrf.mxu0 }
 0xb75   : > { %v5445_v44 = vpop.f32.mrf.mxu1  ;;  %10036 = vpow2.f32 %v5033_v10  ;;  %v5135_v28 = vadd.f32 %v14554_v58, %v14551_v38  ;;  %v17431_v10 = vld [vmem:[#allocation123_spill] sm:$0xff] }
 0xb76   : > { %v5446_v48 = vadd.f32 %v5445_v44, %v5332_v55  ;;  %10038 = vpow2.f32 %v5035_v39  ;;  %v4415_v39 = vadd.f32 %v17431_v10, %v17430_v56 }
 0xb77   : > { %4869 = vmax.xlane.f32.xlu2 %v4868_v37  ;;  %5136 = vadd.xlane.f32.xlu1 %v5135_v28  ;;  %v17432_v28 = vld [vmem:[#allocation94_spill] sm:$0xff] }
 0xb78   : > { %9145 = vmatmul.msk.f32.gmra.mxu2 %vm1826_vm8, %v5446_v48 }
 0xb79   : > { %v14578_v8 = vpop.f32.mrf.mxu2  ;;  %v14580_v57 = vpop.f32.mrf.mxu3 }
 0xb7a   : > { %17426 = vst [vmem:[#allocation106_spill] sm:$0xff] %v14580_v57  ;;  %v4874_v46 = vmax.f32 %v14578_v8, %v14503_v1 }
 0xb7b   : > { %v14567_v14 = vpop.eup %10036  ;;  %9195 = vmatmul.msk.f32.gmra.mxu3 %vm1826_vm8, %v4403_v45  ;;  %v4418_v45 = vadd.f32 %v17433_v21, %v17432_v28 }
 0xb7c   : > { %v14570_v61 = vpop.eup %10038 }
 0xb7d   : > { %v5138_v34 = vadd.f32 %v14570_v61, %v14567_v14 }
 0xb7f   : > { %4872 = vmax.xlane.f32.xlu1 %v4871_v18  ;;  %5139 = vadd.xlane.f32.xlu0 %v5138_v34 }
 0xb81   : > { %v14588_v3 = vpop.f32.mrf.mxu3 }
 0xb82   : > { %17427 = vst [vmem:[#allocation113_spill] sm:$0xff] %v14588_v3 }
 0xb83   : > { %v5122_v24 = vpop.xlane.xlu0 %5121  ;;  %9196 = vmatmul.msk.f32.gmra.mxu3 %vm1826_vm8, %v4406_v31 }
 0xb87   : > { %4875 = vmax.xlane.f32.xlu0 %v4874_v46 }
 0xb89   : > { %v14597_v0 = vpop.f32.mrf.mxu3 }
 0xb8a   : > { %17429 = vst [vmem:[#allocation100_spill] sm:$0xff] %v14597_v0 }
 0xb8b   : > { %v4858_v49 = vpop.xlane.xlu0 %4857  ;;  %9197 = vmatmul.msk.f32.gmra.mxu3 %vm1826_vm8, %v4409_v41 }
 0xb8c   : > { %v4927_v6 = vsub.f32 %v14414_v36, %v4858_v49  ;;  %v4928_v42 = vsub.f32 %v14412_v7, %v4858_v49 }
 0xb8e   : > { %v5041_v59 = vmul.f32 1.442695, %v4927_v6  ;;  %v5043_v25 = vmul.f32 1.442695, %v4928_v42 }
 0xb90   : > { %10040 = vpow2.f32 %v5041_v59 }
 0xb91   : > { %10042 = vpow2.f32 %v5043_v25  ;;  %v14609_v18 = vpop.f32.mrf.mxu3  ;;  %v17436_v25 = vld [vmem:[#allocation37_spill] sm:$0xff] }
 0xb92   : > { %17434 = vst [vmem:[#allocation121_spill] sm:$0xff] %v14609_v18 }
 0xb93   : > { %9198 = vmatmul.msk.f32.gmra.mxu3 %vm1826_vm8, %v4412_v60  ;;  %v17437_v60 = vld [vmem:[#allocation93_spill] sm:$0xff] }
 0xb96   : > { %v14595_v13 = vpop.eup %10040 }
 0xb97   : > { %v14599_v16 = vpop.eup %10042  ;;  %v5335_v23 = vpop.f32.mrf.mxu0 }
 0xb98   : > { %v5448_v52 = vpop.f32.mrf.mxu1  ;;  %v5144_v7 = vadd.f32 %v14599_v16, %v14595_v13 }
 0xb99   : > { %v5449_v36 = vadd.f32 %v5448_v52, %v5335_v23  ;;  %v17438_v23 = vld [vmem:[#allocation118_spill] sm:$0xff]  ;;  %v14621_v52 = vpop.f32.mrf.mxu3 }
 0xb9a   : > { %5145 = vadd.xlane.f32.xlu1 %v5144_v7  ;;  %v5119_v54 = vpop.xlane.xlu1 %5118  ;;  %17439 = vst [vmem:[#allocation101_spill] sm:$0xff] %v14621_v52  ;;  %v14818_v52 = vpop.f32.mrf.mxu2 }
 0xb9b   : > { %9146 = vmatmul.msk.f32.gmra.mxu2 %vm1826_vm8, %v5449_v36  ;;  %10044 = vrcp.f32 %v5119_v54  ;;  %9199 = vmatmul.msk.f32.gmra.mxu3 %vm1826_vm8, %v4415_v39  ;;  %17478 = vst [vmem:[#allocation91_spill] sm:$0xff] %v14818_v52 }
 0xb9c   : > { %10046 = vrcp.f32 %v5122_v24  ;;  %v17435_v24 = vld [vmem:[#allocation43_spill] sm:$0xff] }
 0xb9d   : > { %v4421_v51 = vadd.f32 %v17436_v25, %v17435_v24 }
 0xb9f   : > { %v5338_v55 = vpop.f32.mrf.mxu0 }
 0xba0   : > { %v5451_v44 = vpop.f32.mrf.mxu1 }
 0xba1   : > { %v5452_v37 = vadd.f32 %v5451_v44, %v5338_v55  ;;  %v10045_v48 = vpop.eup %10044 }
 0xba2   : > { %v4855_v34 = vpop.xlane.xlu1 %4854  ;;  %v5229_v31 = vmul.f32 %v10045_v48, %v14429_v30  ;;  %v5230_v46 = vmul.f32 %v10045_v48, %v14432_v63  ;;  %v10047_v59 = vpop.eup %10046 }
 0xba3   : > { %9147 = vmatmul.msk.f32.gmra.mxu2 %vm1826_vm8, %v5452_v37  ;;  %v4925_v41 = vsub.f32 %v14400_v19, %v4855_v34  ;;  %v4926_v49 = vsub.f32 %v14397_v53, %v4855_v34  ;;  %9200 = vmatmul.msk.f32.gmra.mxu3 %vm1826_vm8, %v4418_v45  ;;  %v5231_v30 = vmul.f32 %v10047_v59, %v17437_v60 }
 0xba4   : > { %5358 = vmatmul.f32.gmra.mxu0 %v5229_v31  ;;  %5471 = vmatmul.f32.gmra.mxu1 %v5230_v46  ;;  %v5232_v63 = vmul.f32 %v10047_v59, %v17438_v23 }
 0xba5   : > { %v5037_v6 = vmul.f32 1.442695, %v4925_v41  ;;  %v5039_v42 = vmul.f32 1.442695, %v4926_v49 }
 0xba7   : > { %10048 = vpow2.f32 %v5037_v6 }
 0xba8   : > { %10050 = vpow2.f32 %v5039_v42 }
 0xbab   : > { %9201 = vmatmul.msk.f32.gmra.mxu3 %vm1826_vm8, %v4421_v51 }
 0xbac   : > { %5361 = vmatmul.f32.gmra.mxu0 %v5231_v30  ;;  %5474 = vmatmul.f32.gmra.mxu1 %v5232_v63 }
 0xbad   : > { %v14624_v53 = vpop.eup %10048 }
 0xbae   : > { %v14626_v19 = vpop.eup %10050 }
 0xbaf   : > { %v5141_v36 = vadd.f32 %v14626_v19, %v14624_v53 }
 0xbb1   : > { %5142 = vadd.xlane.f32.xlu2 %v5141_v36 }
 0xbbf   : > { %v5341_v7 = vpop.f32.mrf.mxu0  ;;  %v5454_v56 = vpop.f32.mrf.mxu1 }
 0xbc0   : > { %v5455_v10 = vadd.f32 %v5454_v56, %v5341_v7 }
 0xbc2   : > { %v5125_v39 = vpop.xlane.xlu2 %5124  ;;  %9148 = vmatmul.msk.f32.gmra.mxu2 %vm1826_vm8, %v5455_v10 }
 0xbc3   : > { %10052 = vrcp.f32 %v5125_v39 }
 0xbc4   : > { %v5128_v54 = vpop.xlane.xlu1 %5127 }
 0xbc5   : > { %10054 = vrcp.f32 %v5128_v54 }
 0xbc7   : > { %v5344_v55 = vpop.f32.mrf.mxu0  ;;  %v5457_v44 = vpop.f32.mrf.mxu1 }
 0xbc8   : > { %v5458_v37 = vadd.f32 %v5457_v44, %v5344_v55 }
 0xbc9   : > { %v10053_v48 = vpop.eup %10052 }
 0xbca   : > { %v4861_v28 = vpop.xlane.xlu2 %4860  ;;  %9149 = vmatmul.msk.f32.gmra.mxu2 %vm1826_vm8, %v5458_v37  ;;  %v5233_v21 = vmul.f32 %v10053_v48, %v14470_v35  ;;  %v5234_v45 = vmul.f32 %v10053_v48, %v14473_v29 }
 0xbcb   : > { %v4929_v34 = vsub.f32 %v14475_v5, %v4861_v28  ;;  %v4930_v31 = vsub.f32 %v14441_v32, %v4861_v28  ;;  %v10055_v59 = vpop.eup %10054 }
 0xbcc   : > { %v4864_v46 = vpop.xlane.xlu1 %4863  ;;  %5364 = vmatmul.f32.gmra.mxu0 %v5233_v21  ;;  %5477 = vmatmul.f32.gmra.mxu1 %v5234_v45  ;;  %v5235_v35 = vmul.f32 %v10055_v59, %v14477_v50  ;;  %v5236_v32 = vmul.f32 %v10055_v59, %v14481_v26 }
 0xbcd   : > { %v5045_v41 = vmul.f32 1.442695, %v4929_v34  ;;  %v5047_v49 = vmul.f32 1.442695, %v4930_v31  ;;  %v4931_v6 = vsub.f32 %v14490_v40, %v4864_v46  ;;  %v4932_v42 = vsub.f32 %v14446_v47, %v4864_v46 }
 0xbcf   : > { %10056 = vpow2.f32 %v5045_v41  ;;  %v5049_v24 = vmul.f32 1.442695, %v4931_v6  ;;  %v5051_v25 = vmul.f32 1.442695, %v4932_v42 }
 0xbd0   : > { %10058 = vpow2.f32 %v5047_v49 }
 0xbd1   : > { %10060 = vpow2.f32 %v5049_v24 }
 0xbd2   : > { %10062 = vpow2.f32 %v5051_v25 }
 0xbd4   : > { %5367 = vmatmul.f32.gmra.mxu0 %v5235_v35  ;;  %5480 = vmatmul.f32.gmra.mxu1 %v5236_v32 }
 0xbd5   : > { %v14640_v29 = vpop.eup %10056 }
 0xbd6   : > { %v14642_v5 = vpop.eup %10058 }
 0xbd7   : > { %v14644_v40 = vpop.eup %10060  ;;  %v5347_v47 = vpop.f32.mrf.mxu0  ;;  %v5147_v60 = vadd.f32 %v14642_v5, %v14640_v29 }
 0xbd8   : > { %v5460_v51 = vpop.f32.mrf.mxu1  ;;  %v14648_v30 = vpop.eup %10062 }
 0xbd9   : > { %v5461_v23 = vadd.f32 %v5460_v51, %v5347_v47  ;;  %5148 = vadd.xlane.f32.xlu2 %v5147_v60  ;;  %v5150_v50 = vadd.f32 %v14648_v30, %v14644_v40 }
 0xbda   : > { %v5131_v26 = vpop.xlane.xlu0 %5130 }
 0xbdb   : > { %9150 = vmatmul.msk.f32.gmra.mxu2 %vm1826_vm8, %v5461_v23  ;;  %10064 = vrcp.f32 %v5131_v26  ;;  %5151 = vadd.xlane.f32.xlu0 %v5150_v50 }
 0xbdf   : > { %v5350_v63 = vpop.f32.mrf.mxu0 }
 0xbe0   : > { %v5463_v36 = vpop.f32.mrf.mxu1 }
 0xbe1   : > { %v5464_v7 = vadd.f32 %v5463_v36, %v5350_v63  ;;  %v10065_v56 = vpop.eup %10064 }
 0xbe2   : > { %v4867_v10 = vpop.xlane.xlu0 %4866  ;;  %v5134_v39 = vpop.xlane.xlu2 %5133  ;;  %v5237_v54 = vmul.f32 %v10065_v56, %v14513_v15  ;;  %v5238_v55 = vmul.f32 %v10065_v56, %v14516_v2 }
 0xbe3   : > { %9151 = vmatmul.msk.f32.gmra.mxu2 %vm1826_vm8, %v5464_v7  ;;  %v4933_v44 = vsub.f32 %v14523_v17, %v4867_v10  ;;  %v4934_v37 = vsub.f32 %v14452_v20, %v4867_v10  ;;  %10066 = vrcp.f32 %v5134_v39 }
 0xbe4   : > { %5370 = vmatmul.f32.gmra.mxu0 %v5237_v54  ;;  %5483 = vmatmul.f32.gmra.mxu1 %v5238_v55 }
 0xbe5   : > { %v5053_v48 = vmul.f32 1.442695, %v4933_v44  ;;  %v5055_v28 = vmul.f32 1.442695, %v4934_v37  ;;  %v17441_v37 = vld [vmem:[#allocation68_spill] sm:$0xff] }
 0xbe7   : > { %10068 = vpow2.f32 %v5053_v48  ;;  %v5353_v21 = vpop.f32.mrf.mxu0  ;;  %v17442_v48 = vld [vmem:[#allocation69_spill] sm:$0xff] }
 0xbe8   : > { %v5466_v45 = vpop.f32.mrf.mxu1  ;;  %10070 = vpow2.f32 %v5055_v28  ;;  %v17443_v28 = vld [vmem:[#allocation42_spill] sm:$0xff] }
 0xbe9   : > { %v5467_v34 = vadd.f32 %v5466_v45, %v5353_v21  ;;  %v10067_v31 = vpop.eup %10066  ;;  %v17444_v21 = vld [vmem:[#allocation71_spill] sm:$0xff] }
 0xbea   : > { %v5137_v46 = vpop.xlane.xlu1 %5136  ;;  %v4870_v41 = vpop.xlane.xlu2 %4869  ;;  %v5239_v15 = vmul.f32 %v10067_v31, %v14531_v4  ;;  %v5240_v2 = vmul.f32 %v10067_v31, %v14534_v11 }
 0xbeb   : > { %9152 = vmatmul.msk.f32.gmra.mxu2 %vm1826_vm8, %v5467_v34  ;;  %10072 = vrcp.f32 %v5137_v46  ;;  %v4935_v20 = vsub.f32 %v14542_v33, %v4870_v41  ;;  %v4936_v17 = vsub.f32 %v14464_v9, %v4870_v41  ;;  %v17445_v46 = vld [vmem:[#allocation76_spill] sm:$0xff] }
 0xbec   : > { %5373 = vmatmul.f32.gmra.mxu0 %v5239_v15  ;;  %5486 = vmatmul.f32.gmra.mxu1 %v5240_v2  ;;  %v17446_v15 = vld [vmem:[#allocation77_spill] sm:$0xff] }
 0xbed   : > { %v14663_v49 = vpop.eup %10068  ;;  %v5057_v6 = vmul.f32 1.442695, %v4935_v20  ;;  %v5059_v42 = vmul.f32 1.442695, %v4936_v17  ;;  %v17447_v20 = vld [vmem:[#allocation31_spill] sm:$0xff] }
 0xbee   : > { %v14665_v59 = vpop.eup %10070 }
 0xbef   : > { %10074 = vpow2.f32 %v5057_v6  ;;  %v5153_v24 = vadd.f32 %v14665_v59, %v14663_v49  ;;  %v5356_v4 = vpop.f32.mrf.mxu0 }
 0xbf0   : > { %v5469_v25 = vpop.f32.mrf.mxu1  ;;  %10076 = vpow2.f32 %v5059_v42 }
 0xbf1   : > { %v5470_v11 = vadd.f32 %v5469_v25, %v5356_v4  ;;  %v10073_v35 = vpop.eup %10072  ;;  %5154 = vadd.xlane.f32.xlu1 %v5153_v24  ;;  %v17448_v24 = vld [vmem:[#allocation70_spill] sm:$0xff] }
 0xbf2   : > { %v4873_v33 = vpop.xlane.xlu1 %4872  ;;  %v5140_v9 = vpop.xlane.xlu0 %5139  ;;  %v5241_v32 = vmul.f32 %v10073_v35, %v14551_v38  ;;  %v5242_v47 = vmul.f32 %v10073_v35, %v14554_v58  ;;  %v17449_v35 = vld [vmem:[#allocation81_spill] sm:$0xff] }
 0xbf3   : > { %9153 = vmatmul.msk.f32.gmra.mxu2 %vm1826_vm8, %v5470_v11  ;;  %v4937_v51 = vsub.f32 %v14560_v27, %v4873_v33  ;;  %v4938_v60 = vsub.f32 %v14485_v43, %v4873_v33  ;;  %10078 = vrcp.f32 %v5140_v9  ;;  %v17450_v9 = vld [vmem:[#allocation83_spill] sm:$0xff] }
 0xbf4   : > { %5376 = vmatmul.f32.gmra.mxu0 %v5241_v32  ;;  %5489 = vmatmul.f32.gmra.mxu1 %v5242_v47  ;;  %v17451_v32 = vld [vmem:[#allocation80_spill] sm:$0xff] }
 0xbf5   : > { %v14674_v23 = vpop.eup %10074  ;;  %v5061_v50 = vmul.f32 1.442695, %v4937_v51  ;;  %v5063_v26 = vmul.f32 1.442695, %v4938_v60  ;;  %v17454_v60 = vld [vmem:[#allocation50_spill] sm:$0xff] }
 0xbf6   : > { %v14676_v63 = vpop.eup %10076 }
 0xbf7   : > { %10080 = vpow2.f32 %v5061_v50  ;;  %v5156_v36 = vadd.f32 %v14676_v63, %v14674_v23  ;;  %v17455_v50 = vld [vmem:[#allocation34_spill] sm:$0xff] }
 0xbf8   : > { %10082 = vpow2.f32 %v5063_v26  ;;  %v17456_v26 = vld [vmem:[#allocation86_spill] sm:$0xff] }
 0xbf9   : > { %v10079_v38 = vpop.eup %10078  ;;  %5157 = vadd.xlane.f32.xlu2 %v5156_v36  ;;  %v17459_v36 = vld [vmem:[#allocation33_spill] sm:$0xff] }
 0xbfa   : > { %v4876_v58 = vpop.xlane.xlu0 %4875  ;;  %v5243_v27 = vmul.f32 %v10079_v38, %v14567_v14  ;;  %v5244_v43 = vmul.f32 %v10079_v38, %v14570_v61 }
 0xbfb   : > { %v4939_v7 = vsub.f32 %v14578_v8, %v4876_v58  ;;  %v4940_v56 = vsub.f32 %v14503_v1, %v4876_v58  ;;  %v17440_v8 = vld [vmem:[#allocation75_spill] sm:$0xff] }
 0xbfc   : > { %5379 = vmatmul.f32.gmra.mxu0 %v5243_v27  ;;  %5492 = vmatmul.f32.gmra.mxu1 %v5244_v43  ;;  %v17460_v27 = vld [vmem:[#allocation32_spill] sm:$0xff] }
 0xbfd   : > { %v14684_v10 = vpop.eup %10080  ;;  %v5065_v39 = vmul.f32 1.442695, %v4939_v7  ;;  %v5067_v54 = vmul.f32 1.442695, %v4940_v56  ;;  %v17461_v56 = vld [vmem:[#allocation89_spill] sm:$0xff] }
 0xbfe   : > { %v14686_v55 = vpop.eup %10082 }
 0xbff   : > { %10084 = vpow2.f32 %v5065_v39  ;;  %v5159_v44 = vadd.f32 %v14686_v55, %v14684_v10 }
 0xc00   : > { %10086 = vpow2.f32 %v5067_v54  ;;  %v17462_v54 = vld [vmem:[#allocation87_spill] sm:$0xff] }
 0xc01   : > { %5160 = vadd.xlane.f32.xlu0 %v5159_v44 }
 0xc05   : > { %v14690_v14 = vpop.eup %10084 }
 0xc06   : > { %v14692_v61 = vpop.eup %10086 }
 0xc07   : > { %v5162_v1 = vadd.f32 %v14692_v61, %v14690_v14 }
 0xc09   : > { %5163 = vadd.xlane.f32.xlu1 %v5162_v1 }
 0xc0d   : > { %v5146_v2 = vpop.xlane.xlu1 %5145 }
 0xc11   : > { %5943 = vrot.lane.b32.xlu2 %v17440_v8, %s10789_s27 }
 0xc15   : > { %5945 = vrot.lane.b32.xlu0 %v17441_v37, %s10789_s27 }
 0xc19   : > { %5951 = vrot.lane.b32.xlu2 %v17442_v48, %s10789_s27 }
 0xc1d   : > { %5949 = vrot.lane.b32.xlu0 %v17443_v28, %s10789_s27 }
 0xc21   : > { %5957 = vrot.lane.b32.xlu2 %v17444_v21, %s10789_s27  ;;  %v5359_v45 = vpop.f32.mrf.mxu0  ;;  %v5472_v34 = vpop.f32.mrf.mxu1 }
 0xc22   : > { %v5473_v31 = vadd.f32 %v5472_v34, %v5359_v45  ;;  %5947 = vrot.lane.b32.xlu1 %v17445_v46, %s10789_s27  ;;  %v17463_v45 = vld [vmem:[#allocation78_spill] sm:$0xff] }
 0xc24   : > { %v5143_v41 = vpop.xlane.xlu2 %5142  ;;  %9154 = vmatmul.msk.f32.gmra.mxu2 %vm1826_vm8, %v5473_v31 }
 0xc25   : > { %10088 = vrcp.f32 %v5143_v41  ;;  %5955 = vrot.lane.b32.xlu0 %v17446_v15, %s10789_s27 }
 0xc26   : > { %10090 = vrcp.f32 %v5146_v2 }
 0xc29   : > { %5963 = vrot.lane.b32.xlu2 %v17447_v20, %s10789_s27  ;;  %v5362_v17 = vpop.f32.mrf.mxu0  ;;  %v5475_v6 = vpop.f32.mrf.mxu1 }
 0xc2a   : > { %v5476_v42 = vadd.f32 %v5475_v6, %v5362_v17  ;;  %5953 = vrot.lane.b32.xlu1 %v17448_v24, %s10789_s27  ;;  %v17464_v17 = vld [vmem:[#allocation73_spill] sm:$0xff] }
 0xc2b   : > { %v10089_v4 = vpop.eup %10088 }
 0xc2c   : > { %9155 = vmatmul.msk.f32.gmra.mxu2 %vm1826_vm8, %v5476_v42  ;;  %v5245_v25 = vmul.f32 %v10089_v4, %v14624_v53  ;;  %v5246_v11 = vmul.f32 %v10089_v4, %v14626_v19  ;;  %v10091_v33 = vpop.eup %10090  ;;  %v17452_v53 = vld [vmem:[#allocation52_spill] sm:$0xff]  ;;  %v17453_v19 = vld [vmem:[#allocation67_spill] sm:$0xff]  ;;  %v17465_v42 = vld [vmem:[#allocation65_spill] sm:$0xff] }
 0xc2d   : > { %5961 = vrot.lane.b32.xlu0 %v17449_v35, %s10789_s27  ;;  %v5247_v47 = vmul.f32 %v10091_v33, %v14595_v13  ;;  %v5248_v51 = vmul.f32 %v10091_v33, %v14599_v16  ;;  %v17457_v13 = vld [vmem:[#allocation84_spill] sm:$0xff]  ;;  %v17458_v16 = vld [vmem:[#allocation85_spill] sm:$0xff]  ;;  %v17466_v4 = vld [vmem:[#allocation66_spill] sm:$0xff] }
 0xc2e   : > { %5382 = vmatmul.f32.gmra.mxu0 %v5245_v25  ;;  %5495 = vmatmul.f32.gmra.mxu1 %v5246_v11 }
 0xc31   : > { %5969 = vrot.lane.b32.xlu2 %v17450_v9, %s10789_s27 }
 0xc32   : > { %5959 = vrot.lane.b32.xlu1 %v17451_v32, %s10789_s27 }
 0xc35   : > { %5967 = vrot.lane.b32.xlu0 %v17452_v53, %s10789_s27 }
 0xc36   : > { %5385 = vmatmul.f32.gmra.mxu0 %v5247_v47  ;;  %5498 = vmatmul.f32.gmra.mxu1 %v5248_v51  ;;  %v17469_v51 = vld [vmem:[#allocation63_spill] sm:$0xff] }
 0xc39   : > { %5975 = vrot.lane.b32.xlu2 %v17453_v19, %s10789_s27 }
 0xc3a   : > { %5965 = vrot.lane.b32.xlu1 %v17454_v60, %s10789_s27 }
 0xc3d   : > { %5973 = vrot.lane.b32.xlu0 %v17455_v50, %s10789_s27 }
 0xc41   : > { %5981 = vrot.lane.b32.xlu2 %v17456_v26, %s10789_s27 }
 0xc42   : > { %5971 = vrot.lane.b32.xlu1 %v17457_v13, %s10789_s27 }
 0xc45   : > { %5979 = vrot.lane.b32.xlu0 %v17458_v16, %s10789_s27 }
 0xc49   : > { %5985 = vrot.lane.b32.xlu2 %v17459_v36, %s10789_s27  ;;  %v5365_v38 = vpop.f32.mrf.mxu0  ;;  %v5478_v58 = vpop.f32.mrf.mxu1 }
 0xc4a   : > { %5977 = vrot.lane.b32.xlu1 %v17460_v27, %s10789_s27  ;;  %v5479_v43 = vadd.f32 %v5478_v58, %v5365_v38 }
 0xc4c   : > { %v5149_v7 = vpop.xlane.xlu2 %5148  ;;  %9156 = vmatmul.msk.f32.gmra.mxu2 %vm1826_vm8, %v5479_v43 }
 0xc4d   : > { %10092 = vrcp.f32 %v5149_v7  ;;  %5989 = vrot.lane.b32.xlu0 %v17461_v56, %s10789_s27 }
 0xc4e   : > { %v5152_v39 = vpop.xlane.xlu0 %5151 }
 0xc4f   : > { %10094 = vrcp.f32 %v5152_v39  ;;  %v17472_v39 = vld [vmem:[#allocation47_spill] sm:$0xff] }
 0xc51   : > { %5987 = vrot.lane.b32.xlu2 %v17462_v54, %s10789_s27  ;;  %v5368_v44 = vpop.f32.mrf.mxu0  ;;  %v5481_v1 = vpop.f32.mrf.mxu1 }
 0xc52   : > { %5983 = vrot.lane.b32.xlu1 %v17463_v45, %s10789_s27  ;;  %v5482_v34 = vadd.f32 %v5481_v1, %v5368_v44 }
 0xc53   : > { %v10093_v31 = vpop.eup %10092 }
 0xc54   : > { %9157 = vmatmul.msk.f32.gmra.mxu2 %vm1826_vm8, %v5482_v34  ;;  %v5249_v41 = vmul.f32 %v10093_v31, %v14640_v29  ;;  %v5250_v2 = vmul.f32 %v10093_v31, %v14642_v5  ;;  %v17467_v29 = vld [vmem:[#allocation64_spill] sm:$0xff]  ;;  %v17468_v5 = vld [vmem:[#allocation30_spill] sm:$0xff] }
 0xc55   : > { %5991 = vrot.lane.b32.xlu0 %v17464_v17, %s10789_s27  ;;  %v10095_v6 = vpop.eup %10094 }
 0xc56   : > { %5388 = vmatmul.f32.gmra.mxu0 %v5249_v41  ;;  %5501 = vmatmul.f32.gmra.mxu1 %v5250_v2  ;;  %v5251_v25 = vmul.f32 %v10095_v6, %v14644_v40  ;;  %v5252_v11 = vmul.f32 %v10095_v6, %v14648_v30  ;;  %v17470_v40 = vld [vmem:[#allocation62_spill] sm:$0xff]  ;;  %v17473_v2 = vld [vmem:[#allocation95_spill] sm:$0xff] }
 0xc57   : > { %v17471_v30 = vld [vmem:[#allocation54_spill] sm:$0xff] }
 0xc59   : > { %2054 = vrot.lane.b32.xlu2 %v17465_v42, %s10789_s27 }
 0xc5a   : > { %2056 = vrot.lane.b32.xlu1 %v17466_v4, %s10789_s27 }
 0xc5d   : > { %2052 = vrot.lane.b32.xlu0 %v17467_v29, %s10789_s27 }
 0xc5e   : > { %5391 = vmatmul.f32.gmra.mxu0 %v5251_v25  ;;  %5504 = vmatmul.f32.gmra.mxu1 %v5252_v11 }
 0xc61   : > { %2046 = vrot.lane.b32.xlu2 %v17468_v5, %s10789_s27  ;;  %v5371_v33 = vpop.f32.mrf.mxu0  ;;  %v5484_v47 = vpop.f32.mrf.mxu1 }
 0xc62   : > { %2050 = vrot.lane.b32.xlu1 %v17469_v51, %s10789_s27  ;;  %v5485_v38 = vadd.f32 %v5484_v47, %v5371_v33 }
 0xc64   : > { %v5155_v58 = vpop.xlane.xlu1 %5154  ;;  %9158 = vmatmul.msk.f32.gmra.mxu2 %vm1826_vm8, %v5485_v38 }
 0xc65   : > { %10096 = vrcp.f32 %v5155_v58  ;;  %2048 = vrot.lane.b32.xlu0 %v17470_v40, %s10789_s27 }
 0xc69   : > { %2042 = vrot.lane.b32.xlu2 %v17471_v30, %s10789_s27  ;;  %v5374_v43 = vpop.f32.mrf.mxu0  ;;  %v5487_v7 = vpop.f32.mrf.mxu1 }
 0xc6a   : > { %2036 = vrot.lane.b32.xlu1 %v17472_v39, %s10789_s27  ;;  %v5488_v44 = vadd.f32 %v5487_v7, %v5374_v43 }
 0xc6b   : > { %v10097_v1 = vpop.eup %10096 }
 0xc6c   : > { %v5158_v34 = vpop.xlane.xlu2 %5157  ;;  %9159 = vmatmul.msk.f32.gmra.mxu2 %vm1826_vm8, %v5488_v44  ;;  %v5253_v31 = vmul.f32 %v10097_v1, %v14663_v49  ;;  %v5254_v41 = vmul.f32 %v10097_v1, %v14665_v59  ;;  %v17474_v59 = vld [vmem:[#allocation29_spill] sm:$0xff] }
 0xc6d   : > { %10098 = vrcp.f32 %v5158_v34  ;;  %5993 = vrot.lane.b32.xlu0 %v17473_v2, %s10789_s27 }
 0xc6e   : > { %5394 = vmatmul.f32.gmra.mxu0 %v5253_v31  ;;  %5507 = vmatmul.f32.gmra.mxu1 %v5254_v41 }
 0xc71   : > { %v5377_v6 = vpop.f32.mrf.mxu0  ;;  %v5490_v25 = vpop.f32.mrf.mxu1 }
 0xc72   : > { %v5491_v11 = vadd.f32 %v5490_v25, %v5377_v6 }
 0xc73   : > { %v10099_v33 = vpop.eup %10098 }
 0xc74   : > { %v5161_v47 = vpop.xlane.xlu0 %5160  ;;  %v5944_v38 = vpop.permute.xlu2 %5943  ;;  %9160 = vmatmul.msk.f32.gmra.mxu2 %vm1826_vm8, %v5491_v11  ;;  %v5255_v58 = vmul.f32 %v10099_v33, %v14674_v23  ;;  %v5256_v49 = vmul.f32 %v10099_v33, %v14676_v63  ;;  %v17475_v63 = vld [vmem:[#allocation51_spill] sm:$0xff] }
 0xc75   : > { %10100 = vrcp.f32 %v5161_v47  ;;  %2044 = vrot.lane.b32.xlu0 %v17474_v59, %s10789_s27  ;;  %v17476_v47 = vld [vmem:[#allocation105_spill] sm:$0xff] }
 0xc76   : > { %5397 = vmatmul.f32.gmra.mxu0 %v5255_v58  ;;  %5510 = vmatmul.f32.gmra.mxu1 %v5256_v49 }
 0xc79   : > { %v5380_v43 = vpop.f32.mrf.mxu0  ;;  %v5493_v7 = vpop.f32.mrf.mxu1 }
 0xc7a   : > { %v5494_v44 = vadd.f32 %v5493_v7, %v5380_v43 }
 0xc7b   : > { %v10101_v1 = vpop.eup %10100 }
 0xc7c   : > { %v5164_v34 = vpop.xlane.xlu1 %5163  ;;  %v5952_v31 = vpop.permute.xlu2 %5951  ;;  %9161 = vmatmul.msk.f32.gmra.mxu2 %vm1826_vm8, %v5494_v44  ;;  %v5257_v41 = vmul.f32 %v10101_v1, %v14684_v10  ;;  %v5258_v23 = vmul.f32 %v10101_v1, %v14686_v55  ;;  %v17477_v55 = vld [vmem:[#allocation49_spill] sm:$0xff] }
 0xc7d   : > { %10102 = vrcp.f32 %v5164_v34  ;;  %2040 = vrot.lane.b32.xlu0 %v17475_v63, %s10789_s27 }
 0xc7e   : > { %5400 = vmatmul.f32.gmra.mxu0 %v5257_v41  ;;  %5513 = vmatmul.f32.gmra.mxu1 %v5258_v23 }
 0xc83   : > { %v10103_v6 = vpop.eup %10102 }
 0xc84   : > { %v5958_v25 = vpop.permute.xlu2 %5957  ;;  %v5259_v11 = vmul.f32 %v10103_v6, %v14690_v14  ;;  %v5260_v33 = vmul.f32 %v10103_v6, %v14692_v61 }
 0xc85   : > { %5995 = vrot.lane.b32.xlu0 %v17476_v47, %s10789_s27 }
 0xc86   : > { %5403 = vmatmul.f32.gmra.mxu0 %v5259_v11  ;;  %5516 = vmatmul.f32.gmra.mxu1 %v5260_v33 }
 0xc87   : > { %v5946_v10 = vpop.permute.xlu0 %5945 }
 0xc8c   : > { %v14794_v58 = vpop.permute.xlu2 %5963 }
 0xc8d   : > { %2038 = vrot.lane.b32.xlu0 %v17477_v55, %s10789_s27 }
 0xc8e   : > { %9202 = vmatmul.msk.f32.vlgmr.msrb.gmra.mxu0 %vm1826_vm8, %v5944_v38  ;;  %9234 = vmatmul.msk.f32.vlgmr.msrb.gmra.mxu1 %vm1826_vm8, %v5944_v38 }
 0xc8f   : > { %v5950_v49 = vpop.permute.xlu0 %5949 }
 0xc94   : > { %v5948_v43 = vpop.permute.xlu1 %5947  ;;  %v14800_v14 = vpop.permute.xlu2 %5969 }
 0xc96   : > { %9203 = vmatmul.msk.f32.gmra.mxu0 %vm1826_vm8, %v5946_v10  ;;  %9235 = vmatmul.msk.f32.gmra.mxu1 %vm1826_vm8, %v5946_v10 }
 0xc97   : > { %v5956_v61 = vpop.permute.xlu0 %5955 }
 0xc9c   : > { %v5954_v7 = vpop.permute.xlu1 %5953  ;;  %v14804_v44 = vpop.permute.xlu2 %5975 }
 0xc9e   : > { %9204 = vmatmul.msk.f32.gmra.mxu0 %vm1826_vm8, %v5948_v43  ;;  %9236 = vmatmul.msk.f32.gmra.mxu1 %vm1826_vm8, %v5948_v43 }
 0xc9f   : > { %v5962_v1 = vpop.permute.xlu0 %5961 }
 0xca4   : > { %v5960_v34 = vpop.permute.xlu1 %5959  ;;  %v14808_v41 = vpop.permute.xlu2 %5981 }
 0xca6   : > { %9205 = vmatmul.msk.f32.gmra.mxu0 %vm1826_vm8, %v5950_v49  ;;  %9237 = vmatmul.msk.f32.gmra.mxu1 %vm1826_vm8, %v5950_v49 }
 0xca7   : > { %v14812_v38 = vpop.permute.xlu0 %5967 }
 0xcab   : > { %v5383_v23 = vpop.f32.mrf.mxu0  ;;  %v5496_v6 = vpop.f32.mrf.mxu1 }
 0xcac   : > { %v5497_v11 = vadd.f32 %v5496_v6, %v5383_v23  ;;  %v14814_v33 = vpop.permute.xlu1 %5965  ;;  %v14816_v10 = vpop.permute.xlu2 %5985 }
 0xcad   : > { %v14829_v6 = vpop.f32.mrf.mxu2 }
 0xcae   : > { %9162 = vmatmul.msk.f32.gmra.mxu2 %vm1826_vm8, %v5497_v11  ;;  %9206 = vmatmul.msk.f32.gmra.mxu0 %vm1826_vm8, %v5952_v31  ;;  %17479 = vst [vmem:[#allocation72_spill] sm:$0xff] %v14829_v6 }
 0xcaf   : > { %9238 = vmatmul.msk.f32.gmra.mxu1 %vm1826_vm8, %v5952_v31  ;;  %v14823_v43 = vpop.permute.xlu0 %5973 }
 0xcb3   : > { %v5386_v49 = vpop.f32.mrf.mxu0  ;;  %v5499_v18 = vpop.f32.mrf.mxu1 }
 0xcb4   : > { %v5500_v0 = vadd.f32 %v5499_v18, %v5386_v49  ;;  %v14825_v3 = vpop.permute.xlu1 %5971  ;;  %v14827_v23 = vpop.permute.xlu2 %5987 }
 0xcb5   : > { %v14856_v52 = vpop.f32.mrf.mxu2 }
 0xcb6   : > { %9163 = vmatmul.msk.f32.gmra.mxu2 %vm1826_vm8, %v5500_v0  ;;  %9207 = vmatmul.msk.f32.gmra.mxu0 %vm1826_vm8, %v5954_v7  ;;  %17480 = vst [vmem:[#allocation48_spill] sm:$0xff] %v14856_v52 }
 0xcb7   : > { %9239 = vmatmul.msk.f32.gmra.mxu1 %vm1826_vm8, %v5954_v7  ;;  %v14834_v11 = vpop.permute.xlu0 %5979 }
 0xcbc   : > { %v14836_v31 = vpop.permute.xlu1 %5977  ;;  %v2055_v57 = vpop.permute.xlu2 %2054 }
 0xcbd   : > { %2137 = vst.msk [vmem:[#allocation3 + $0x270] sm:$0xff] %vm1826_vm8, %v2055_v57 }
 0xcbe   : > { %9208 = vmatmul.msk.f32.gmra.mxu0 %vm1826_vm8, %v5956_v61 }
 0xcbf   : > { %9240 = vmatmul.msk.f32.gmra.mxu1 %vm1826_vm8, %v5956_v61  ;;  %v14841_v18 = vpop.permute.xlu0 %5989 }
 0xcc4   : > { %v14843_v49 = vpop.permute.xlu1 %5983  ;;  %v2047_v0 = vpop.permute.xlu2 %2046 }
 0xcc5   : > { %2133 = vst.msk [vmem:[#allocation3 + $0x250] sm:$0xff] %vm1826_vm8, %v2047_v0 }
 0xcc6   : > { %9209 = vmatmul.msk.f32.gmra.mxu0 %vm1826_vm8, %v5958_v25 }
 0xcc7   : > { %9241 = vmatmul.msk.f32.gmra.mxu1 %vm1826_vm8, %v5958_v25  ;;  %v14848_v7 = vpop.permute.xlu0 %5991 }
 0xccc   : > { %v2057_v12 = vpop.permute.xlu1 %2056  ;;  %v2043_v22 = vpop.permute.xlu2 %2042 }
 0xccd   : > { %2138 = vst.msk [vmem:[#allocation3 + $0x278] sm:$0xff] %vm1826_vm8, %v2057_v12 }
 0xcce   : > { %2131 = vst.msk [vmem:[#allocation3 + $0x240] sm:$0xff] %vm1826_vm8, %v2043_v22  ;;  %9210 = vmatmul.msk.f32.gmra.mxu0 %vm1826_vm8, %v5960_v34  ;;  %v6792_v22 = vld [vmem:[#allocation3 + $0x270] sm:$0xff] }
 0xccf   : > { %9242 = vmatmul.msk.f32.gmra.mxu1 %vm1826_vm8, %v5960_v34  ;;  %v2053_v57 = vpop.permute.xlu0 %2052 }
 0xcd0   : > { %2136 = vst.msk [vmem:[#allocation3 + $0x268] sm:$0xff] %vm1826_vm8, %v2053_v57 }
 0xcd3   : > { %v5389_v61 = vpop.f32.mrf.mxu0  ;;  %v5502_v0 = vpop.f32.mrf.mxu1 }
 0xcd4   : > { %v5503_v6 = vadd.f32 %v5502_v0, %v5389_v61  ;;  %v2051_v62 = vpop.permute.xlu1 %2050  ;;  %v6793_v25 = vld [vmem:[#allocation3 + $0x278] sm:$0xff] }
 0xcd5   : > { %2135 = vst.msk [vmem:[#allocation3 + $0x260] sm:$0xff] %vm1826_vm8, %v2051_v62  ;;  %6810 = vmatpush.msra.mxu2 %v6793_v25 }
 0xcd6   : > { %9164 = vmatmul.msk.f32.gmra.mxu2 %vm1826_vm8, %v5503_v6  ;;  %9211 = vmatmul.msk.f32.gmra.mxu0 %vm1826_vm8, %v5962_v1  ;;  %v14863_v6 = vpop.f32.mrf.mxu2 }
 0xcd7   : > { %9243 = vmatmul.msk.f32.gmra.mxu1 %vm1826_vm8, %v5962_v1  ;;  %v2049_v12 = vpop.permute.xlu0 %2048  ;;  %6811 = vmatpush.msra.mxu2 %v6792_v22  ;;  %v6791_v34 = vld [vmem:[#allocation3 + $0x268] sm:$0xff]  ;;  %17481 = vst [vmem:[#allocation114_spill] sm:$0xff] %v14863_v6 }
 0xcd8   : > { %2134 = vst.msk [vmem:[#allocation3 + $0x258] sm:$0xff] %vm1826_vm8, %v2049_v12  ;;  %v6788_v12 = vld [vmem:[#allocation3 + $0x250] sm:$0xff] }
 0xcd9   : > { %6812 = vmatpush.msra.mxu2 %v6791_v34 }
 0xcdb   : > { %v5392_v57 = vpop.f32.mrf.mxu0  ;;  %v5505_v61 = vpop.f32.mrf.mxu1 }
 0xcdc   : > { %v5506_v0 = vadd.f32 %v5505_v61, %v5392_v57  ;;  %v2037_v62 = vpop.permute.xlu1 %2036  ;;  %v6790_v25 = vld [vmem:[#allocation3 + $0x260] sm:$0xff] }
 0xcdd   : > { %2128 = vst.msk [vmem:[#allocation3 + $0x228] sm:$0xff] %vm1826_vm8, %v2037_v62  ;;  %6813 = vmatpush.msra.mxu2 %v6790_v25 }
 0xcde   : > { %9165 = vmatmul.msk.f32.gmra.mxu2 %vm1826_vm8, %v5506_v0  ;;  %9212 = vmatmul.msk.f32.gmra.mxu0 %vm1826_vm8, %v14794_v58  ;;  %v14876_v57 = vpop.f32.mrf.mxu2 }
 0xcdf   : > { %9244 = vmatmul.msk.f32.gmra.mxu1 %vm1826_vm8, %v14794_v58  ;;  %v14870_v1 = vpop.permute.xlu0 %5993  ;;  %v6789_v22 = vld [vmem:[#allocation3 + $0x258] sm:$0xff]  ;;  %17482 = vst [vmem:[#allocation35_spill] sm:$0xff] %v14876_v57 }
 0xce0   : > { %6814 = vmatpush.msra.mxu2 %v6789_v22  ;;  %v17491_v57 = vld [vmem:[#allocation44_spill] sm:$0xff] }
 0xce2   : > { %6815 = vmatpush.msra.mxu2 %v6788_v12 }
 0xce6   : > { %9213 = vmatmul.msk.f32.gmra.mxu0 %vm1826_vm8, %v14814_v33  ;;  %v14885_v22 = vpop.f32.mrf.mxu2 }
 0xce7   : > { %9245 = vmatmul.msk.f32.gmra.mxu1 %vm1826_vm8, %v14814_v33  ;;  %v2045_v34 = vpop.permute.xlu0 %2044  ;;  %v6786_v33 = vld [vmem:[#allocation3 + $0x240] sm:$0xff]  ;;  %17483 = vst [vmem:[#allocation41_spill] sm:$0xff] %v14885_v22 }
 0xce8   : > { %2132 = vst.msk [vmem:[#allocation3 + $0x248] sm:$0xff] %vm1826_vm8, %v2045_v34 }
 0xceb   : > { %v5395_v61 = vpop.f32.mrf.mxu0  ;;  %v5508_v0 = vpop.f32.mrf.mxu1 }
 0xcec   : > { %v5509_v58 = vadd.f32 %v5508_v0, %v5395_v61 }
 0xcee   : > { %9166 = vmatmul.msk.f32.gmra.mxu2 %vm1826_vm8, %v5509_v58  ;;  %9214 = vmatmul.msk.f32.gmra.mxu0 %vm1826_vm8, %v14812_v38 }
 0xcef   : > { %9246 = vmatmul.msk.f32.gmra.mxu1 %vm1826_vm8, %v14812_v38  ;;  %v2041_v62 = vpop.permute.xlu0 %2040  ;;  %v6787_v25 = vld [vmem:[#allocation3 + $0x248] sm:$0xff] }
 0xcf0   : > { %2130 = vst.msk [vmem:[#allocation3 + $0x238] sm:$0xff] %vm1826_vm8, %v2041_v62  ;;  %6816 = vmatpush.msra.mxu2 %v6787_v25  ;;  %v14894_v25 = vpop.f32.mrf.mxu2 }
 0xcf1   : > { %17484 = vst [vmem:[#allocation102_spill] sm:$0xff] %v14894_v25 }
 0xcf2   : > { %6817 = vmatpush.msra.mxu2 %v6786_v33 }
 0xcf3   : > { %v5398_v12 = vpop.f32.mrf.mxu0  ;;  %v5511_v34 = vpop.f32.mrf.mxu1 }
 0xcf4   : > { %v5512_v61 = vadd.f32 %v5511_v34, %v5398_v12 }
 0xcf6   : > { %9167 = vmatmul.msk.f32.gmra.mxu2 %vm1826_vm8, %v5512_v61  ;;  %9215 = vmatmul.msk.f32.gmra.mxu0 %vm1826_vm8, %v14800_v14 }
 0xcf7   : > { %9247 = vmatmul.msk.f32.gmra.mxu1 %vm1826_vm8, %v14800_v14  ;;  %v14892_v38 = vpop.permute.xlu0 %5995  ;;  %v6785_v0 = vld [vmem:[#allocation3 + $0x238] sm:$0xff] }
 0xcf8   : > { %6818 = vmatpush.msra.mxu2 %v6785_v0  ;;  %v14902_v0 = vpop.f32.mrf.mxu2 }
 0xcf9   : > { %17485 = vst [vmem:[#allocation98_spill] sm:$0xff] %v14902_v0 }
 0xcfb   : > { %v5401_v58 = vpop.f32.mrf.mxu0  ;;  %v5514_v62 = vpop.f32.mrf.mxu1 }
 0xcfc   : > { %v5515_v33 = vadd.f32 %v5514_v62, %v5401_v58  ;;  %v6783_v62 = vld [vmem:[#allocation3 + $0x228] sm:$0xff] }
 0xcfe   : > { %9168 = vmatmul.msk.f32.gmra.mxu2 %vm1826_vm8, %v5515_v33  ;;  %9216 = vmatmul.msk.f32.gmra.mxu0 %vm1826_vm8, %v14825_v3 }
 0xcff   : > { %9248 = vmatmul.msk.f32.gmra.mxu1 %vm1826_vm8, %v14825_v3  ;;  %v2039_v12 = vpop.permute.xlu0 %2038 }
 0xd00   : > { %2129 = vst.msk [vmem:[#allocation3 + $0x230] sm:$0xff] %vm1826_vm8, %v2039_v12 }
 0xd03   : > { %v5404_v14 = vpop.f32.mrf.mxu0  ;;  %v5517_v34 = vpop.f32.mrf.mxu1 }
 0xd04   : > { %v5518_v61 = vadd.f32 %v5517_v34, %v5404_v14 }
 0xd06   : > { %9169 = vmatmul.msk.f32.gmra.mxu2 %vm1826_vm8, %v5518_v61  ;;  %9217 = vmatmul.msk.f32.gmra.mxu0 %vm1826_vm8, %v14823_v43 }
 0xd07   : > { %9249 = vmatmul.msk.f32.gmra.mxu1 %vm1826_vm8, %v14823_v43  ;;  %v6784_v58 = vld [vmem:[#allocation3 + $0x230] sm:$0xff] }
 0xd08   : > { %6819 = vmatpush.msra.mxu2 %v6784_v58 }
 0xd0a   : > { %6820 = vmatpush.msra.mxu2 %v6783_v62  ;;  %v17486_v62 = vld [vmem:[#allocation39_spill] sm:$0xff] }
 0xd0b   : > { %v14909_v3 = vpop.f32.mrf.mxu0  ;;  %v14911_v33 = vpop.f32.mrf.mxu1 }
 0xd0c   : > { %v6297_v12 = vmax.f32 %v14909_v3, %v14911_v33 }
 0xd0e   : > { %6298 = vmax.xlane.f32.xlu0 %v6297_v12  ;;  %9218 = vmatmul.msk.f32.gmra.mxu0 %vm1826_vm8, %v14804_v44 }
 0xd0f   : > { %9250 = vmatmul.msk.f32.gmra.mxu1 %vm1826_vm8, %v14804_v44 }
 0xd13   : > { %v14919_v14 = vpop.f32.mrf.mxu0  ;;  %v14921_v43 = vpop.f32.mrf.mxu1 }
 0xd14   : > { %v6300_v34 = vmax.f32 %v14919_v14, %v14921_v43 }
 0xd16   : > { %6301 = vmax.xlane.f32.xlu1 %v6300_v34  ;;  %9219 = vmatmul.msk.f32.gmra.mxu0 %vm1826_vm8, %v14836_v31 }
 0xd17   : > { %9251 = vmatmul.msk.f32.gmra.mxu1 %vm1826_vm8, %v14836_v31 }
 0xd1b   : > { %v14929_v61 = vpop.f32.mrf.mxu0  ;;  %v14931_v58 = vpop.f32.mrf.mxu1 }
 0xd1c   : > { %v6303_v44 = vmax.f32 %v14929_v61, %v14931_v58 }
 0xd1e   : > { %6304 = vmax.xlane.f32.xlu2 %v6303_v44  ;;  %9220 = vmatmul.msk.f32.gmra.mxu0 %vm1826_vm8, %v14834_v11  ;;  %v17487_v44 = vld [vmem:[#allocation40_spill] sm:$0xff] }
 0xd1f   : > { %9252 = vmatmul.msk.f32.gmra.mxu1 %vm1826_vm8, %v14834_v11 }
 0xd22   : > { %2034 = vrot.lane.b32.xlu0 %v17486_v62, %s10789_s27 }
 0xd23   : > { %v14941_v12 = vpop.f32.mrf.mxu0  ;;  %v14943_v31 = vpop.f32.mrf.mxu1 }
 0xd24   : > { %v6306_v34 = vmax.f32 %v14941_v12, %v14943_v31 }
 0xd26   : > { %6307 = vmax.xlane.f32.xlu2 %v6306_v34  ;;  %9221 = vmatmul.msk.f32.gmra.mxu0 %vm1826_vm8, %v14808_v41 }
 0xd27   : > { %9253 = vmatmul.msk.f32.gmra.mxu1 %vm1826_vm8, %v14808_v41 }
 0xd2a   : > { %2032 = vrot.lane.b32.xlu0 %v17487_v44, %s10789_s27 }
 0xd2b   : > { %v14953_v11 = vpop.f32.mrf.mxu0 }
 0xd2c   : > { %v14955_v0 = vpop.f32.mrf.mxu1 }
 0xd2d   : > { %v6309_v25 = vmax.f32 %v14953_v11, %v14955_v0 }
 0xd2e   : > { %9222 = vmatmul.msk.f32.gmra.mxu0 %vm1826_vm8, %v14843_v49 }
 0xd2f   : > { %6310 = vmax.xlane.f32.xlu1 %v6309_v25  ;;  %9254 = vmatmul.msk.f32.gmra.mxu1 %vm1826_vm8, %v14843_v49  ;;  %v17488_v49 = vld [vmem:[#allocation38_spill] sm:$0xff]  ;;  %v17489_v25 = vld [vmem:[#allocation107_spill] sm:$0xff] }
 0xd33   : > { %v14963_v34 = vpop.f32.mrf.mxu0 }
 0xd34   : > { %v14965_v41 = vpop.f32.mrf.mxu1 }
 0xd35   : > { %v6312_v22 = vmax.f32 %v14963_v34, %v14965_v41 }
 0xd36   : > { %9223 = vmatmul.msk.f32.gmra.mxu0 %vm1826_vm8, %v14816_v10 }
 0xd37   : > { %6313 = vmax.xlane.f32.xlu2 %v6312_v22  ;;  %9255 = vmatmul.msk.f32.gmra.mxu1 %vm1826_vm8, %v14816_v10 }
 0xd3b   : > { %v14985_v22 = vpop.f32.mrf.mxu0 }
 0xd3c   : > { %v14987_v10 = vpop.f32.mrf.mxu1 }
 0xd3e   : > { %9224 = vmatmul.msk.f32.gmra.mxu0 %vm1826_vm8, %v14827_v23 }
 0xd3f   : > { %9256 = vmatmul.msk.f32.gmra.mxu1 %vm1826_vm8, %v14827_v23  ;;  %v17490_v23 = vld [vmem:[#allocation45_spill] sm:$0xff] }
 0xd43   : > { %v15009_v6 = vpop.f32.mrf.mxu0 }
 0xd46   : > { %9225 = vmatmul.msk.f32.gmra.mxu0 %vm1826_vm8, %v14841_v18 }
 0xd47   : > { %9257 = vmatmul.msk.f32.gmra.mxu1 %vm1826_vm8, %v14841_v18  ;;  %v6315_v18 = vmax.f32 %v14985_v22, %v14987_v10 }
 0xd48   : > { %2030 = vrot.lane.b32.xlu1 %v17488_v49, %s10789_s27 }
 0xd4b   : > { %v15013_v52 = vpop.f32.mrf.mxu0 }
 0xd4e   : > { %9226 = vmatmul.msk.f32.gmra.mxu0 %vm1826_vm8, %v14848_v7 }
 0xd4f   : > { %5997 = vrot.lane.b32.xlu2 %v17489_v25, %s10789_s27  ;;  %9258 = vmatmul.msk.f32.gmra.mxu1 %vm1826_vm8, %v14848_v7  ;;  %v17492_v7 = vld [vmem:[#allocation108_spill] sm:$0xff] }
 0xd50   : > { %2028 = vrot.lane.b32.xlu1 %v17490_v23, %s10789_s27 }
 0xd54   : > { %6316 = vmax.xlane.f32.xlu0 %v6315_v18  ;;  %v15011_v18 = vpop.f32.mrf.mxu1 }
 0xd55   : > { %v6318_v49 = vmax.f32 %v15009_v6, %v15011_v18 }
 0xd56   : > { %9227 = vmatmul.msk.f32.gmra.mxu0 %vm1826_vm8, %v14870_v1 }
 0xd57   : > { %2026 = vrot.lane.b32.xlu2 %v17491_v57, %s10789_s27  ;;  %9259 = vmatmul.msk.f32.gmra.mxu1 %vm1826_vm8, %v14870_v1 }
 0xd5c   : > { %v15015_v23 = vpop.f32.mrf.mxu1 }
 0xd5d   : > { %v6321_v1 = vmax.f32 %v15013_v52, %v15015_v23 }
 0xd5e   : > { %9228 = vmatmul.msk.f32.gmra.mxu0 %vm1826_vm8, %v14892_v38 }
 0xd5f   : > { %9260 = vmatmul.msk.f32.gmra.mxu1 %vm1826_vm8, %v14892_v38  ;;  %v15021_v38 = vpop.f32.mrf.mxu0 }
 0xd64   : > { %v15023_v57 = vpop.f32.mrf.mxu1 }
 0xd65   : > { %v6324_v44 = vmax.f32 %v15021_v38, %v15023_v57 }
 0xd67   : > { %v15029_v63 = vpop.f32.mrf.mxu0 }
 0xd68   : > { %5999 = vrot.lane.b32.xlu0 %v17492_v7, %s10789_s27 }
 0xd6c   : > { %v15031_v30 = vpop.f32.mrf.mxu1 }
 0xd6f   : > { %v15051_v40 = vpop.f32.mrf.mxu0 }
 0xd74   : > { %v15055_v29 = vpop.f32.mrf.mxu1 }
 0xd7a   : > { %6322 = vmax.xlane.f32.xlu1 %v6321_v1 }
 0xd80   : > { %6319 = vmax.xlane.f32.xlu2 %v6318_v49  ;;  %v6327_v49 = vmax.f32 %v15029_v63, %v15031_v30 }
 0xd81   : > { %v6299_v55 = vpop.xlane.xlu0 %6298 }
 0xd82   : > { %v6393_v47 = vsub.f32 %v14909_v3, %v6299_v55 }
 0xd84   : > { %v6457_v2 = vmul.f32 1.442695, %v6393_v47 }
 0xd88   : > { %6325 = vmax.xlane.f32.xlu2 %v6324_v44  ;;  %v17493_v44 = vld [vmem:[#allocation109_spill] sm:$0xff] }
 0xd89   : > { %v6302_v62 = vpop.xlane.xlu1 %6301 }
 0xd8a   : > { %v6395_v7 = vsub.f32 %v14919_v14, %v6302_v62  ;;  %v6396_v39 = vsub.f32 %v14921_v43, %v6302_v62 }
 0xd8c   : > { %v6461_v25 = vmul.f32 1.442695, %v6395_v7  ;;  %v6463_v1 = vmul.f32 1.442695, %v6396_v39 }
 0xd8e   : > { %10104 = vpow2.f32 %v6461_v25 }
 0xd8f   : > { %10106 = vpow2.f32 %v6463_v1  ;;  %v17494_v1 = vld [vmem:[#allocation110_spill] sm:$0xff] }
 0xd90   : > { %10108 = vpow2.f32 %v6457_v2 }
 0xd91   : > { %v6305_v39 = vpop.xlane.xlu2 %6304 }
 0xd92   : > { %6328 = vmax.xlane.f32.xlu0 %v6327_v49  ;;  %v6397_v47 = vsub.f32 %v14929_v61, %v6305_v39  ;;  %v6398_v3 = vsub.f32 %v14931_v58, %v6305_v39  ;;  %v15068_v61 = vpop.f32.mrf.mxu0  ;;  %v15071_v58 = vpop.f32.mrf.mxu1 }
 0xd93   : > { %6001 = vrot.lane.b32.xlu1 %v17493_v44, %s10789_s27 }
 0xd94   : > { %v15037_v59 = vpop.eup %10104  ;;  %v2035_v14 = vpop.permute.xlu0 %2034 }
 0xd95   : > { %v15039_v43 = vpop.eup %10106  ;;  %2127 = vst.msk [vmem:[#allocation3 + $0x220] sm:$0xff] %vm1826_vm8, %v2035_v14  ;;  %v6394_v14 = vsub.f32 %v14911_v33, %v6299_v55 }
 0xd96   : > { %v6588_v62 = vadd.f32 %v15039_v43, %v15037_v59  ;;  %v15061_v2 = vpop.eup %10108 }
 0xd97   : > { %v6459_v56 = vmul.f32 1.442695, %v6394_v14 }
 0xd99   : > { %v6308_v49 = vpop.xlane.xlu2 %6307  ;;  %10110 = vpow2.f32 %v6459_v56  ;;  %v6465_v56 = vmul.f32 1.442695, %v6397_v47 }
 0xd9a   : > { %6589 = vadd.xlane.f32.xlu0 %v6588_v62  ;;  %v17495_v62 = vld [vmem:[#allocation112_spill] sm:$0xff] }
 0xd9c   : > { %v2033_v25 = vpop.permute.xlu0 %2032  ;;  %v6782_v7 = vld [vmem:[#allocation3 + $0x220] sm:$0xff] }
 0xd9d   : > { %2126 = vst.msk [vmem:[#allocation3 + $0x218] sm:$0xff] %vm1826_vm8, %v2033_v25  ;;  %6821 = vmatpush.msra.mxu2 %v6782_v7  ;;  %v6399_v25 = vsub.f32 %v14941_v12, %v6308_v49  ;;  %v6400_v7 = vsub.f32 %v14943_v31, %v6308_v49  ;;  %v6467_v31 = vmul.f32 1.442695, %v6398_v3 }
 0xd9f   : > { %v6469_v55 = vmul.f32 1.442695, %v6399_v25  ;;  %v6471_v33 = vmul.f32 1.442695, %v6400_v7  ;;  %v15063_v12 = vpop.eup %10110 }
 0xda0   : > { %6003 = vrot.lane.b32.xlu2 %v17494_v1, %s10789_s27 }
 0xda1   : > { %10112 = vpow2.f32 %v6469_v55 }
 0xda2   : > { %v6311_v1 = vpop.xlane.xlu1 %6310  ;;  %10114 = vpow2.f32 %v6471_v33 }
 0xda3   : > { %10116 = vpow2.f32 %v6465_v56  ;;  %v6401_v39 = vsub.f32 %v14953_v11, %v6311_v1  ;;  %v6402_v25 = vsub.f32 %v14955_v0, %v6311_v1  ;;  %v15088_v56 = vpop.f32.mrf.mxu0 }
 0xda4   : > { %v6781_v44 = vld [vmem:[#allocation3 + $0x218] sm:$0xff]  ;;  %10118 = vpow2.f32 %v6467_v31 }
 0xda5   : > { %6822 = vmatpush.msra.mxu2 %v6781_v44  ;;  %v6473_v55 = vmul.f32 1.442695, %v6401_v39  ;;  %v6475_v33 = vmul.f32 1.442695, %v6402_v25 }
 0xda7   : > { %v15075_v7 = vpop.eup %10112  ;;  %10120 = vpow2.f32 %v6473_v55  ;;  %v6333_v55 = vmax.f32 %v15068_v61, %v15071_v58 }
 0xda8   : > { %v15077_v47 = vpop.eup %10114  ;;  %10122 = vpow2.f32 %v6475_v33 }
 0xda9   : > { %v15081_v54 = vpop.eup %10116  ;;  %v6594_v0 = vadd.f32 %v15077_v47, %v15075_v7 }
 0xdaa   : > { %v6314_v5 = vpop.xlane.xlu2 %6313  ;;  %v15086_v11 = vpop.eup %10118 }
 0xdab   : > { %v6403_v3 = vsub.f32 %v14963_v34, %v6314_v5  ;;  %v6591_v31 = vadd.f32 %v15086_v11, %v15081_v54 }
 0xdad   : > { %v6477_v1 = vmul.f32 1.442695, %v6403_v3  ;;  %v15096_v25 = vpop.eup %10120 }
 0xdae   : > { %6005 = vrot.lane.b32.xlu0 %v17495_v62, %s10789_s27  ;;  %v15100_v3 = vpop.eup %10122 }
 0xdaf   : > { %10124 = vpow2.f32 %v6477_v1 }
 0xdb2   : > { %v5998_v44 = vpop.permute.xlu2 %5997 }
 0xdb3   : > { %9229 = vmatmul.msk.f32.gmra.mxu0 %vm1826_vm8, %v5998_v44  ;;  %9261 = vmatmul.msk.f32.gmra.mxu1 %vm1826_vm8, %v5998_v44  ;;  %v6585_v44 = vadd.f32 %v15063_v12, %v15061_v2 }
 0xdb5   : > { %v15103_v1 = vpop.eup %10124 }
 0xdba   : > { %v2031_v49 = vpop.permute.xlu1 %2030  ;;  %v2027_v14 = vpop.permute.xlu2 %2026 }
 0xdbb   : > { %2125 = vst.msk [vmem:[#allocation3 + $0x210] sm:$0xff] %vm1826_vm8, %v2031_v49  ;;  %v6404_v49 = vsub.f32 %v14965_v41, %v6314_v5  ;;  %v15090_v5 = vpop.f32.mrf.mxu1 }
 0xdbc   : > { %2123 = vst.msk [vmem:[#allocation3 + $0x200] sm:$0xff] %vm1826_vm8, %v2027_v14 }
 0xdbd   : > { %6586 = vadd.xlane.f32.xlu1 %v6585_v44  ;;  %v6479_v34 = vmul.f32 1.442695, %v6404_v49  ;;  %v17496_v49 = vld [vmem:[#allocation104_spill] sm:$0xff] }
 0xdbf   : > { %10126 = vpow2.f32 %v6479_v34 }
 0xdc2   : > { %v2029_v14 = vpop.permute.xlu1 %2028  ;;  %v6780_v62 = vld [vmem:[#allocation3 + $0x210] sm:$0xff] }
 0xdc3   : > { %2124 = vst.msk [vmem:[#allocation3 + $0x208] sm:$0xff] %vm1826_vm8, %v2029_v14  ;;  %6823 = vmatpush.msra.mxu2 %v6780_v62  ;;  %v6778_v33 = vld [vmem:[#allocation3 + $0x200] sm:$0xff]  ;;  %v9581_v14 = vunpack.i.h.bf16 %v17496_v49 }
 0xdc5   : > { %6595 = vadd.xlane.f32.xlu1 %v6594_v0  ;;  %v15107_v34 = vpop.eup %10126 }
 0xdc7   : > { %v6317_v41 = vpop.xlane.xlu0 %6316 }
 0xdc8   : > { %v6405_v62 = vsub.f32 %v14985_v22, %v6317_v41  ;;  %v6406_v44 = vsub.f32 %v14987_v10, %v6317_v41  ;;  %v6597_v10 = vadd.f32 %v15100_v3, %v15096_v25  ;;  %v15109_v41 = vpop.f32.mrf.mxu0 }
 0xdc9   : > { %6592 = vadd.xlane.f32.xlu2 %v6591_v31  ;;  %v15111_v31 = vpop.f32.mrf.mxu1 }
 0xdca   : > { %v6779_v39 = vld [vmem:[#allocation3 + $0x208] sm:$0xff]  ;;  %v6481_v0 = vmul.f32 1.442695, %v6405_v62  ;;  %v6483_v22 = vmul.f32 1.442695, %v6406_v44  ;;  %v6600_v62 = vadd.f32 %v15107_v34, %v15103_v1  ;;  %v6330_v44 = vmax.f32 %v15051_v40, %v15055_v29 }
 0xdcb   : > { %6824 = vmatpush.msra.mxu2 %v6779_v39 }
 0xdcc   : > { %10128 = vpow2.f32 %v6481_v0 }
 0xdcd   : > { %6334 = vmax.xlane.f32.xlu1 %v6333_v55  ;;  %6825 = vmatpush.msra.mxu2 %v6778_v33  ;;  %10130 = vpow2.f32 %v6483_v22  ;;  %v6336_v55 = vmax.f32 %v15088_v56, %v15090_v5 }
 0xdcf   : > { %7538 = vmatpush.msrb.mxu2 %v9581_v14 }
 0xdd0   : > { %v15123_v14 = vpop.f32.mrf.mxu0 }
 0xdd1   : > { %6598 = vadd.xlane.f32.xlu2 %v6597_v10  ;;  %v15125_v0 = vpop.f32.mrf.mxu1 }
 0xdd2   : > { %v15117_v39 = vpop.eup %10128  ;;  %v6342_v10 = vmax.f32 %v15123_v14, %v15125_v0 }
 0xdd3   : > { %v15121_v33 = vpop.eup %10130 }
 0xdd4   : > { %v6603_v22 = vadd.f32 %v15121_v33, %v15117_v39 }
 0xdd5   : > { %6601 = vadd.xlane.f32.xlu1 %v6600_v62  ;;  %v6339_v62 = vmax.f32 %v15109_v41, %v15111_v31 }
 0xdd8   : > { %6331 = vmax.xlane.f32.xlu0 %v6330_v44 }
 0xdd9   : > { %6337 = vmax.xlane.f32.xlu2 %v6336_v55 }
 0xdda   : > { %v6000_v49 = vpop.permute.xlu0 %5999 }
 0xddb   : > { %9230 = vmatmul.msk.f32.gmra.mxu0 %vm1826_vm8, %v6000_v49  ;;  %9262 = vmatmul.msk.f32.gmra.mxu1 %vm1826_vm8, %v6000_v49  ;;  %v17497_v49 = vld [vmem:[#allocation61_spill] sm:$0xff] }
 0xddd   : > { %6604 = vadd.xlane.f32.xlu1 %v6603_v22 }
 0xde0   : > { %6343 = vmax.xlane.f32.xlu0 %v6342_v10 }
 0xde1   : > { %6340 = vmax.xlane.f32.xlu2 %v6339_v62 }
 0xded   : > { %v6323_v44 = vpop.xlane.xlu1 %6322 }
 0xdee   : > { %v6409_v45 = vsub.f32 %v15013_v52, %v6323_v44  ;;  %v6410_v17 = vsub.f32 %v15015_v23, %v6323_v44 }
 0xdf0   : > { %v6489_v27 = vmul.f32 1.442695, %v6409_v45  ;;  %v6491_v10 = vmul.f32 1.442695, %v6410_v17 }
 0xdf3   : > { %v6320_v55 = vpop.xlane.xlu2 %6319 }
 0xdf4   : > { %v6407_v51 = vsub.f32 %v15009_v6, %v6320_v55  ;;  %v6408_v42 = vsub.f32 %v15011_v18, %v6320_v55  ;;  %2088 = vrot.lane.b32.xlu0 %v17497_v49, %s10789_s27 }
 0xdf6   : > { %v6485_v22 = vmul.f32 1.442695, %v6407_v51  ;;  %v6487_v4 = vmul.f32 1.442695, %v6408_v42 }
 0xdf8   : > { %10132 = vpow2.f32 %v6485_v22 }
 0xdf9   : > { %10134 = vpow2.f32 %v6487_v4 }
 0xdfa   : > { %10136 = vpow2.f32 %v6489_v27 }
 0xdfb   : > { %v6326_v62 = vpop.xlane.xlu2 %6325  ;;  %10138 = vpow2.f32 %v6491_v10 }
 0xdfc   : > { %v6411_v36 = vsub.f32 %v15021_v38, %v6326_v62  ;;  %v6412_v6 = vsub.f32 %v15023_v57, %v6326_v62 }
 0xdfe   : > { %v15143_v26 = vpop.eup %10132  ;;  %v6493_v18 = vmul.f32 1.442695, %v6411_v36  ;;  %v6495_v55 = vmul.f32 1.442695, %v6412_v6 }
 0xdff   : > { %v15145_v49 = vpop.eup %10134 }
 0xe00   : > { %10140 = vpow2.f32 %v6493_v18  ;;  %v6606_v52 = vadd.f32 %v15145_v49, %v15143_v26  ;;  %v15149_v45 = vpop.eup %10136 }
 0xe01   : > { %10142 = vpow2.f32 %v6495_v55  ;;  %v15151_v17 = vpop.eup %10138 }
 0xe02   : > { %6607 = vadd.xlane.f32.xlu1 %v6606_v52  ;;  %v6609_v44 = vadd.f32 %v15151_v17, %v15149_v45 }
 0xe03   : > { %v6004_v10 = vpop.permute.xlu2 %6003 }
 0xe05   : > { %v6002_v42 = vpop.permute.xlu1 %6001  ;;  %v6329_v4 = vpop.xlane.xlu0 %6328 }
 0xe06   : > { %v15153_v51 = vpop.eup %10140  ;;  %v6413_v36 = vsub.f32 %v15029_v63, %v6329_v4  ;;  %v6414_v27 = vsub.f32 %v15031_v30, %v6329_v4  ;;  %9231 = vmatmul.msk.f32.gmra.mxu0 %vm1826_vm8, %v6002_v42  ;;  %9263 = vmatmul.msk.f32.gmra.mxu1 %vm1826_vm8, %v6002_v42  ;;  %v15165_v63 = vpop.f32.mrf.mxu0 }
 0xe07   : > { %v15159_v57 = vpop.eup %10142  ;;  %v15167_v30 = vpop.f32.mrf.mxu1 }
 0xe08   : > { %v6497_v23 = vmul.f32 1.442695, %v6413_v36  ;;  %v6499_v38 = vmul.f32 1.442695, %v6414_v27  ;;  %v6612_v22 = vadd.f32 %v15159_v57, %v15153_v51  ;;  %v6345_v6 = vmax.f32 %v15165_v63, %v15167_v30 }
 0xe0a   : > { %10144 = vpow2.f32 %v6497_v23  ;;  %6610 = vadd.xlane.f32.xlu1 %v6609_v44  ;;  %6613 = vadd.xlane.f32.xlu2 %v6612_v22  ;;  %v17498_v23 = vld [vmem:[#allocation60_spill] sm:$0xff]  ;;  %v15191_v22 = vpop.f32.mrf.mxu2 }
 0xe0b   : > { %10146 = vpow2.f32 %v6499_v38  ;;  %v17499_v38 = vld [vmem:[#allocation59_spill] sm:$0xff]  ;;  %17500 = vst [vmem:[#allocation116_spill] sm:$0xff] %v15191_v22  ;;  %v17505_v22 = vld [vmem:[#allocation56_spill] sm:$0xff] }
 0xe0d   : > { %v6590_v52 = vpop.xlane.xlu0 %6589 }
 0xe0e   : > { %9232 = vmatmul.msk.f32.gmra.mxu0 %vm1826_vm8, %v6004_v10  ;;  %9264 = vmatmul.msk.f32.gmra.mxu1 %vm1826_vm8, %v6004_v10  ;;  %v15179_v42 = vpop.f32.mrf.mxu0  ;;  %v17501_v10 = vld [vmem:[#allocation53_spill] sm:$0xff] }
 0xe0f   : > { %v15181_v4 = vpop.f32.mrf.mxu1 }
 0xe10   : > { %v15171_v62 = vpop.eup %10144  ;;  %v6348_v36 = vmax.f32 %v15179_v42, %v15181_v4 }
 0xe11   : > { %v15175_v18 = vpop.eup %10146 }
 0xe12   : > { %6346 = vmax.xlane.f32.xlu1 %v6345_v6  ;;  %v6615_v55 = vadd.f32 %v15175_v18, %v15171_v62  ;;  %v17502_v6 = vld [vmem:[#allocation58_spill] sm:$0xff] }
 0xe14   : > { %6616 = vadd.xlane.f32.xlu2 %v6615_v55  ;;  %v17503_v55 = vld [vmem:[#allocation57_spill] sm:$0xff] }
 0xe1e   : > { %6349 = vmax.xlane.f32.xlu0 %v6348_v36 }
 0xe20   : > { %v6006_v27 = vpop.permute.xlu0 %6005 }
 0xe21   : > { %9233 = vmatmul.msk.f32.gmra.mxu0 %vm1826_vm8, %v6006_v27  ;;  %9265 = vmatmul.msk.f32.gmra.mxu1 %vm1826_vm8, %v6006_v27 }
 0xe2b   : > { %2086 = vrot.lane.b32.xlu1 %v17498_v23, %s10789_s27 }
 0xe2c   : > { %2084 = vrot.lane.b32.xlu2 %v17499_v38, %s10789_s27 }
 0xe30   : > { %v6587_v44 = vpop.xlane.xlu1 %6586 }
 0xe31   : > { %10148 = vrcp.f32 %v6587_v44  ;;  %v15203_v44 = vpop.f32.mrf.mxu2 }
 0xe32   : > { %2074 = vrot.lane.b32.xlu0 %v17501_v10, %s10789_s27  ;;  %10150 = vrcp.f32 %v6590_v52  ;;  %17504 = vst [vmem:[#allocation117_spill] sm:$0xff] %v15203_v44 }
 0xe33   : > { %2082 = vrot.lane.b32.xlu1 %v17502_v6, %s10789_s27 }
 0xe34   : > { %2080 = vrot.lane.b32.xlu2 %v17503_v55, %s10789_s27 }
 0xe37   : > { %v15199_v36 = vpop.eup %10148 }
 0xe38   : > { %v6713_v27 = vmul.f32 %v15199_v36, %v15061_v2  ;;  %v6596_v38 = vpop.xlane.xlu1 %6595  ;;  %v15207_v23 = vpop.eup %10150  ;;  %v17507_v2 = vld [vmem:[#allocation55_spill] sm:$0xff] }
 0xe39   : > { %v6715_v55 = vmul.f32 %v15207_v23, %v15037_v59  ;;  %v15211_v52 = vpop.f32.mrf.mxu2 }
 0xe3a   : > { %6826 = vmatmul.f32.vlgmr.msra.gmra.mxu2 %v6713_v27  ;;  %17506 = vst [vmem:[#allocation36_spill] sm:$0xff] %v15211_v52 }
 0xe3c   : > { %2078 = vrot.lane.b32.xlu2 %v17505_v22, %s10789_s27  ;;  %v6593_v10 = vpop.xlane.xlu2 %6592 }
 0xe3d   : > { %10152 = vrcp.f32 %v6593_v10 }
 0xe3e   : > { %10154 = vrcp.f32 %v6596_v38 }
 0xe40   : > { %v6335_v6 = vpop.xlane.xlu1 %6334 }
 0xe41   : > { %v6417_v44 = vsub.f32 %v15068_v61, %v6335_v6  ;;  %v6418_v22 = vsub.f32 %v15071_v58, %v6335_v6  ;;  %v15225_v60 = vpop.f32.mrf.mxu2 }
 0xe42   : > { %6829 = vmatmul.f32.gmra.mxu2 %v6715_v55  ;;  %17508 = vst [vmem:[#allocation74_spill] sm:$0xff] %v15225_v60  ;;  %v17516_v60 = vld [vmem:[#allocation96_spill] sm:$0xff] }
 0xe43   : > { %v15215_v27 = vpop.eup %10152  ;;  %v6505_v13 = vmul.f32 1.442695, %v6417_v44  ;;  %v6507_v55 = vmul.f32 1.442695, %v6418_v22 }
 0xe44   : > { %2076 = vrot.lane.b32.xlu2 %v17507_v2, %s10789_s27  ;;  %v6717_v10 = vmul.f32 %v15215_v27, %v15081_v54  ;;  %v6599_v16 = vpop.xlane.xlu2 %6598  ;;  %v15223_v2 = vpop.eup %10154 }
 0xe45   : > { %10156 = vpow2.f32 %v6505_v13  ;;  %v6719_v54 = vmul.f32 %v15223_v2, %v15075_v7 }
 0xe46   : > { %10158 = vrcp.f32 %v6599_v16 }
 0xe47   : > { %10160 = vpow2.f32 %v6507_v55 }
 0xe48   : > { %v6602_v58 = vpop.xlane.xlu1 %6601 }
 0xe49   : > { %v15235_v6 = vpop.f32.mrf.mxu2 }
 0xe4a   : > { %6832 = vmatmul.f32.gmra.mxu2 %v6717_v10  ;;  %17509 = vst [vmem:[#allocation120_spill] sm:$0xff] %v15235_v6 }
 0xe4b   : > { %v6332_v59 = vpop.xlane.xlu0 %6331  ;;  %v15229_v22 = vpop.eup %10156 }
 0xe4c   : > { %v6415_v52 = vsub.f32 %v15051_v40, %v6332_v59  ;;  %v6416_v19 = vsub.f32 %v15055_v29, %v6332_v59  ;;  %v15231_v40 = vpop.eup %10158 }
 0xe4d   : > { %v15233_v29 = vpop.eup %10160  ;;  %v6721_v16 = vmul.f32 %v15231_v40, %v15096_v25 }
 0xe4e   : > { %v6501_v61 = vmul.f32 1.442695, %v6415_v52  ;;  %v6503_v38 = vmul.f32 1.442695, %v6416_v19  ;;  %v6621_v7 = vadd.f32 %v15233_v29, %v15229_v22 }
 0xe50   : > { %10162 = vpow2.f32 %v6501_v61  ;;  %v6605_v52 = vpop.xlane.xlu1 %6604 }
 0xe51   : > { %10164 = vpow2.f32 %v6503_v38  ;;  %v15251_v55 = vpop.f32.mrf.mxu2 }
 0xe52   : > { %6835 = vmatmul.f32.gmra.mxu2 %v6719_v54  ;;  %10166 = vrcp.f32 %v6602_v58  ;;  %17510 = vst [vmem:[#allocation111_spill] sm:$0xff] %v15251_v55  ;;  %v15258_v54 = vpop.f32.mrf.mxu0  ;;  %v15260_v58 = vpop.f32.mrf.mxu1  ;;  %v17513_v55 = vld [vmem:[#allocation103_spill] sm:$0xff] }
 0xe53   : > { %v15249_v59 = vpop.xlane.xlu0 %6343  ;;  %10168 = vrcp.f32 %v6605_v52 }
 0xe56   : > { %v15237_v13 = vpop.eup %10162 }
 0xe57   : > { %v15239_v19 = vpop.eup %10164 }
 0xe58   : > { %v6618_v44 = vadd.f32 %v15239_v19, %v15237_v13  ;;  %v15247_v10 = vpop.eup %10166 }
 0xe59   : > { %v6723_v25 = vmul.f32 %v15247_v10, %v15103_v1  ;;  %v15255_v61 = vpop.eup %10168  ;;  %v15268_v1 = vpop.xlane.xlu2 %6337 }
 0xe5a   : > { %6838 = vmatmul.f32.gmra.mxu2 %v6721_v16  ;;  %v6725_v16 = vmul.f32 %v15255_v61, %v15117_v39 }
 0xe5c   : > { %6622 = vadd.xlane.f32.xlu0 %v6621_v7  ;;  %v15264_v7 = vpop.f32.mrf.mxu2 }
 0xe5d   : > { %6619 = vadd.xlane.f32.xlu1 %v6618_v44  ;;  %17511 = vst [vmem:[#allocation122_spill] sm:$0xff] %v15264_v7  ;;  %v6351_v44 = vmax.f32 %v15258_v54, %v15260_v58 }
 0xe61   : > { %v15274_v39 = vpop.xlane.xlu2 %6340 }
 0xe62   : > { %6841 = vmatmul.f32.gmra.mxu2 %v6723_v25  ;;  %v17512_v25 = vld [vmem:[#allocation90_spill] sm:$0xff] }
 0xe64   : > { %v15280_v6 = vpop.f32.mrf.mxu2 }
 0xe65   : > { %17515 = vst [vmem:[#allocation123_spill] sm:$0xff] %v15280_v6  ;;  %v17519_v6 = vld [vmem:[#allocation99_spill] sm:$0xff] }
 0xe66   : > { %v2089_v38 = vpop.permute.xlu0 %2088 }
 0xe67   : > { %2154 = vst.msk [vmem:[#allocation3 + $0x2f8] sm:$0xff] %vm1826_vm8, %v2089_v38 }
 0xe6a   : > { %6844 = vmatmul.f32.gmra.mxu2 %v6725_v16  ;;  %v17514_v16 = vld [vmem:[#allocation88_spill] sm:$0xff] }
 0xe6d   : > { %6352 = vmax.xlane.f32.xlu2 %v6351_v44 }
 0xe6e   : > { %v6809_v52 = vld [vmem:[#allocation3 + $0x2f8] sm:$0xff] }
 0xe6f   : > { %6923 = vmatpush.msra.mxu3 %v6809_v52 }
 0xe70   : > { %2064 = vrot.lane.b32.xlu0 %v17512_v25, %s10789_s27  ;;  %v17517_v25 = vld [vmem:[#allocation82_spill] sm:$0xff] }
 0xe75   : > { %v6608_v38 = vpop.xlane.xlu1 %6607 }
 0xe76   : > { %10170 = vrcp.f32 %v6608_v38  ;;  %2072 = vrot.lane.b32.xlu1 %v17513_v55, %s10789_s27 }
 0xe78   : > { %2062 = vrot.lane.b32.xlu0 %v17514_v16, %s10789_s27  ;;  %v15290_v16 = vpop.f32.mrf.mxu2 }
 0xe79   : > { %17518 = vst [vmem:[#allocation94_spill] sm:$0xff] %v15290_v16 }
 0xe7c   : > { %v15278_v7 = vpop.eup %10170 }
 0xe7d   : > { %v6611_v44 = vpop.xlane.xlu1 %6610  ;;  %v6727_v52 = vmul.f32 %v15278_v7, %v15143_v26  ;;  %v6614_v38 = vpop.xlane.xlu2 %6613 }
 0xe7e   : > { %10172 = vrcp.f32 %v6611_v44  ;;  %2068 = vrot.lane.b32.xlu1 %v17516_v60, %s10789_s27  ;;  %v17520_v60 = vld [vmem:[#allocation79_spill] sm:$0xff] }
 0xe7f   : > { %6847 = vmatmul.f32.gmra.mxu2 %v6727_v52  ;;  %10174 = vrcp.f32 %v6614_v38 }
 0xe80   : > { %2060 = vrot.lane.b32.xlu0 %v17517_v25, %s10789_s27  ;;  %v17521_v25 = vld [vmem:[#allocation92_spill] sm:$0xff]  ;;  %v15304_v16 = vpop.f32.mrf.mxu2 }
 0xe81   : > { %17522 = vst [vmem:[#allocation97_spill] sm:$0xff] %v15304_v16 }
 0xe84   : > { %v15288_v55 = vpop.eup %10172 }
 0xe85   : > { %2070 = vrot.lane.b32.xlu2 %v17519_v6, %s10789_s27  ;;  %v6729_v26 = vmul.f32 %v15288_v55, %v15149_v45  ;;  %v15298_v52 = vpop.eup %10174  ;;  %v15313_v50 = vpop.xlane.xlu1 %6346 }
 0xe86   : > { %v6731_v38 = vmul.f32 %v15298_v52, %v15153_v51 }
 0xe87   : > { %6850 = vmatmul.f32.gmra.mxu2 %v6729_v26  ;;  %v6617_v44 = vpop.xlane.xlu2 %6616  ;;  %v15309_v26 = vpop.f32.mrf.mxu0 }
 0xe88   : > { %2058 = vrot.lane.b32.xlu0 %v17520_v60, %s10789_s27  ;;  %10176 = vrcp.f32 %v6617_v44  ;;  %v15311_v60 = vpop.f32.mrf.mxu1  ;;  %v15319_v51 = vpop.f32.mrf.mxu2 }
 0xe89   : > { %17524 = vst [vmem:[#allocation37_spill] sm:$0xff] %v15319_v51  ;;  %v6421_v51 = vsub.f32 %v15109_v41, %v15274_v39 }
 0xe8b   : > { %v6513_v35 = vmul.f32 1.442695, %v6421_v51 }
 0xe8d   : > { %2066 = vrot.lane.b32.xlu2 %v17521_v25, %s10789_s27  ;;  %v15317_v25 = vpop.f32.mrf.mxu3 }
 0xe8e   : > { %v15307_v45 = vpop.eup %10176  ;;  %17523 = vst [vmem:[#allocation43_spill] sm:$0xff] %v15317_v25 }
 0xe8f   : > { %6853 = vmatmul.f32.gmra.mxu2 %v6731_v38  ;;  %v2085_v6 = vpop.permute.xlu2 %2084  ;;  %v6733_v44 = vmul.f32 %v15307_v45, %v15171_v62  ;;  %v15324_v9 = vpop.f32.mrf.mxu0 }
 0xe90   : > { %2152 = vst.msk [vmem:[#allocation3 + $0x2e8] sm:$0xff] %vm1826_vm8, %v2085_v6  ;;  %v15327_v32 = vpop.f32.mrf.mxu1  ;;  %v15433_v15 = vpop.f32.mrf.mxu2 }
 0xe91   : > { %v15322_v6 = vpop.xlane.xlu0 %6349  ;;  %v6357_v51 = vmax.f32 %v15324_v9, %v15327_v32  ;;  %17533 = vst [vmem:[#allocation129_spill] sm:$0xff] %v15433_v15 }
 0xe95   : > { %v15330_v62 = vpop.f32.mrf.mxu3 }
 0xe96   : > { %17525 = vst [vmem:[#allocation93_spill] sm:$0xff] %v15330_v62 }
 0xe97   : > { %6856 = vmatmul.f32.gmra.mxu2 %v6733_v44  ;;  %v2081_v38 = vpop.permute.xlu2 %2080  ;;  %v6419_v44 = vsub.f32 %v15088_v56, %v15268_v1  ;;  %v15345_v41 = vpop.f32.mrf.mxu0 }
 0xe98   : > { %2150 = vst.msk [vmem:[#allocation3 + $0x2d8] sm:$0xff] %vm1826_vm8, %v2081_v38  ;;  %v6420_v38 = vsub.f32 %v15090_v5, %v15268_v1  ;;  %v6807_v5 = vld [vmem:[#allocation3 + $0x2e8] sm:$0xff]  ;;  %v15449_v15 = vpop.f32.mrf.mxu2 }
 0xe99   : > { %v6509_v62 = vmul.f32 1.442695, %v6419_v44  ;;  %17535 = vst [vmem:[#allocation131_spill] sm:$0xff] %v15449_v15 }
 0xe9a   : > { %v6511_v56 = vmul.f32 1.442695, %v6420_v38 }
 0xe9b   : > { %10178 = vpow2.f32 %v6509_v62 }
 0xe9c   : > { %10180 = vpow2.f32 %v6511_v56 }
 0xe9d   : > { %v2087_v16 = vpop.permute.xlu1 %2086  ;;  %v15351_v44 = vpop.f32.mrf.mxu3  ;;  %10182 = vpow2.f32 %v6513_v35 }
 0xe9e   : > { %2153 = vst.msk [vmem:[#allocation3 + $0x2f0] sm:$0xff] %vm1826_vm8, %v2087_v16  ;;  %v6422_v16 = vsub.f32 %v15111_v31, %v15274_v39  ;;  %v15347_v31 = vpop.f32.mrf.mxu1  ;;  %v6423_v39 = vsub.f32 %v15123_v14, %v15249_v59 }
 0xe9f   : > { %v2079_v53 = vpop.permute.xlu2 %2078  ;;  %17526 = vst [vmem:[#allocation118_spill] sm:$0xff] %v15351_v44  ;;  %v6360_v14 = vmax.f32 %v15345_v41, %v15347_v31 }
 0xea0   : > { %2149 = vst.msk [vmem:[#allocation3 + $0x2d0] sm:$0xff] %vm1826_vm8, %v2079_v53  ;;  %v6354_v53 = vmax.f32 %v15309_v26, %v15311_v60  ;;  %v6517_v38 = vmul.f32 1.442695, %v6423_v39  ;;  %v6426_v39 = vsub.f32 %v15167_v30, %v15313_v50  ;;  %v6428_v30 = vsub.f32 %v15181_v4, %v15322_v6 }
 0xea1   : > { %v15357_v62 = vpop.eup %10178 }
 0xea2   : > { %v15361_v56 = vpop.eup %10180 }
 0xea3   : > { %v15363_v35 = vpop.eup %10182 }
 0xea4   : > { %v2075_v25 = vpop.permute.xlu0 %2074 }
 0xea5   : > { %v2083_v20 = vpop.permute.xlu1 %2082  ;;  %2147 = vst.msk [vmem:[#allocation3 + $0x2c0] sm:$0xff] %vm1826_vm8, %v2075_v25  ;;  %v6808_v24 = vld [vmem:[#allocation3 + $0x2f0] sm:$0xff]  ;;  %v6515_v25 = vmul.f32 1.442695, %v6422_v16  ;;  %v6805_v16 = vld [vmem:[#allocation3 + $0x2d8] sm:$0xff] }
 0xea6   : > { %2151 = vst.msk [vmem:[#allocation3 + $0x2e0] sm:$0xff] %vm1826_vm8, %v2083_v20  ;;  %6924 = vmatpush.msra.mxu3 %v6808_v24  ;;  %v6424_v20 = vsub.f32 %v15125_v0, %v15249_v59  ;;  %v6425_v59 = vsub.f32 %v15165_v63, %v15313_v50  ;;  %v6427_v50 = vsub.f32 %v15179_v42, %v15322_v6 }
 0xea7   : > { %v2077_v1 = vpop.permute.xlu2 %2076  ;;  %10184 = vpow2.f32 %v6515_v25  ;;  %v6804_v0 = vld [vmem:[#allocation3 + $0x2d0] sm:$0xff]  ;;  %v15371_v25 = vpop.f32.mrf.mxu1 }
 0xea8   : > { %6355 = vmax.xlane.f32.xlu1 %v6354_v53  ;;  %6925 = vmatpush.msra.mxu3 %v6807_v5  ;;  %2148 = vst.msk [vmem:[#allocation3 + $0x2c8] sm:$0xff] %vm1826_vm8, %v2077_v1  ;;  %v6519_v53 = vmul.f32 1.442695, %v6424_v20  ;;  %10186 = vpow2.f32 %v6517_v38  ;;  %v15369_v1 = vpop.f32.mrf.mxu0  ;;  %v6521_v38 = vmul.f32 1.442695, %v6425_v59 }
 0xeaa   : > { %10188 = vpow2.f32 %v6519_v53 }
 0xeab   : > { %10190 = vpow2.f32 %v6521_v38 }
 0xeac   : > { %v6802_v63 = vld [vmem:[#allocation3 + $0x2c0] sm:$0xff] }
 0xead   : > { %v6806_v24 = vld [vmem:[#allocation3 + $0x2e0] sm:$0xff]  ;;  %v15367_v5 = vpop.eup %10184 }
 0xeae   : > { %6926 = vmatpush.msra.mxu3 %v6806_v24  ;;  %v6624_v24 = vadd.f32 %v15361_v56, %v15357_v62 }
 0xeaf   : > { %v6803_v20 = vld [vmem:[#allocation3 + $0x2c8] sm:$0xff] }
 0xeb0   : > { %6358 = vmax.xlane.f32.xlu1 %v6357_v51  ;;  %6927 = vmatpush.msra.mxu3 %v6805_v16  ;;  %v15377_v51 = vpop.f32.mrf.mxu3  ;;  %v6627_v16 = vadd.f32 %v15367_v5, %v15363_v35 }
 0xeb1   : > { %17527 = vst [vmem:[#allocation104_spill] sm:$0xff] %v15377_v51 }
 0xeb2   : > { %6928 = vmatpush.msra.mxu3 %v6804_v0  ;;  %6361 = vmax.xlane.f32.xlu0 %v6360_v14  ;;  %v6523_v14 = vmul.f32 1.442695, %v6426_v39  ;;  %v15381_v0 = vpop.eup %10186  ;;  %v6363_v39 = vmax.f32 %v15369_v1, %v15371_v25 }
 0xeb3   : > { %v15383_v53 = vpop.eup %10188 }
 0xeb4   : > { %6929 = vmatpush.msra.mxu3 %v6803_v20  ;;  %10192 = vpow2.f32 %v6523_v14  ;;  %v6630_v59 = vadd.f32 %v15383_v53, %v15381_v0  ;;  %v15391_v20 = vpop.f32.mrf.mxu0  ;;  %v15399_v42 = vpop.eup %10190 }
 0xeb6   : > { %6930 = vmatpush.msra.mxu3 %v6802_v63  ;;  %6625 = vadd.xlane.f32.xlu2 %v6624_v24  ;;  %v15393_v24 = vpop.f32.mrf.mxu1  ;;  %v6525_v63 = vmul.f32 1.442695, %v6427_v50 }
 0xeb7   : > { %v6366_v6 = vmax.f32 %v15391_v20, %v15393_v24 }
 0xeb8   : > { %6628 = vadd.xlane.f32.xlu1 %v6627_v16  ;;  %v15397_v38 = vpop.f32.mrf.mxu3  ;;  %v6527_v16 = vmul.f32 1.442695, %v6428_v30  ;;  %10194 = vpow2.f32 %v6525_v63 }
 0xeb9   : > { %17528 = vst [vmem:[#allocation124_spill] sm:$0xff] %v15397_v38 }
 0xeba   : > { %v15401_v14 = vpop.eup %10192  ;;  %10196 = vpow2.f32 %v6527_v16 }
 0xebb   : > { %17529 = vst [vmem:[#allocation125_spill] sm:$0xff] %v15401_v14  ;;  %v6633_v4 = vadd.f32 %v15401_v14, %v15399_v42 }
 0xebc   : > { %v15407_v51 = vpop.f32.mrf.mxu0 }
 0xebe   : > { %6631 = vadd.xlane.f32.xlu2 %v6630_v59  ;;  %v15409_v50 = vpop.f32.mrf.mxu1  ;;  %v15411_v59 = vpop.eup %10194 }
 0xebf   : > { %v6369_v16 = vmax.f32 %v15407_v51, %v15409_v50 }
 0xec0   : > { %6364 = vmax.xlane.f32.xlu1 %v6363_v39  ;;  %v15413_v30 = vpop.eup %10196  ;;  %v15415_v39 = vpop.f32.mrf.mxu3 }
 0xec1   : > { %17530 = vst [vmem:[#allocation126_spill] sm:$0xff] %v15413_v30  ;;  %v6636_v63 = vadd.f32 %v15413_v30, %v15411_v59 }
 0xec2   : > { %17531 = vst [vmem:[#allocation127_spill] sm:$0xff] %v15415_v39 }
 0xec6   : > { %6634 = vadd.xlane.f32.xlu2 %v6633_v4  ;;  %v15421_v4 = vpop.f32.mrf.mxu0  ;;  %v15423_v44 = vpop.f32.mrf.mxu1 }
 0xec7   : > { %v6372_v39 = vmax.f32 %v15421_v4, %v15423_v44 }
 0xec8   : > { %6367 = vmax.xlane.f32.xlu1 %v6366_v6  ;;  %v15425_v21 = vpop.f32.mrf.mxu3 }
 0xec9   : > { %17532 = vst [vmem:[#allocation128_spill] sm:$0xff] %v15425_v21 }
 0xece   : > { %6637 = vadd.xlane.f32.xlu2 %v6636_v63  ;;  %v15437_v48 = vpop.f32.mrf.mxu1 }
 0xecf   : > { %v6623_v6 = vpop.xlane.xlu0 %6622 }
 0xed0   : > { %v6620_v38 = vpop.xlane.xlu1 %6619  ;;  %6370 = vmax.xlane.f32.xlu1 %v6369_v16  ;;  %v15435_v16 = vpop.f32.mrf.mxu0 }
 0xed1   : > { %10198 = vrcp.f32 %v6620_v38  ;;  %v15441_v21 = vpop.f32.mrf.mxu3  ;;  %v6375_v28 = vmax.f32 %v15435_v16, %v15437_v48 }
 0xed2   : > { %10200 = vrcp.f32 %v6623_v6  ;;  %17534 = vst [vmem:[#allocation130_spill] sm:$0xff] %v15441_v21 }
 0xed7   : > { %v15429_v46 = vpop.eup %10198 }
 0xed8   : > { %6373 = vmax.xlane.f32.xlu1 %v6372_v39  ;;  %v6735_v63 = vmul.f32 %v15429_v46, %v15237_v13  ;;  %v15439_v38 = vpop.eup %10200 }
 0xed9   : > { %v6737_v39 = vmul.f32 %v15439_v38, %v15229_v22  ;;  %v15452_v21 = vpop.f32.mrf.mxu3 }
 0xeda   : > { %6859 = vmatmul.f32.gmra.mxu2 %v6735_v63 }
 0xee0   : > { %6376 = vmax.xlane.f32.xlu1 %v6375_v28  ;;  %v6353_v6 = vpop.xlane.xlu2 %6352 }
 0xee1   : > { %v6429_v13 = vsub.f32 %v15258_v54, %v6353_v6  ;;  %v6430_v63 = vsub.f32 %v15260_v58, %v6353_v6 }
 0xee2   : > { %6862 = vmatmul.f32.gmra.mxu2 %v6737_v39  ;;  %v2065_v37 = vpop.permute.xlu0 %2064 }
 0xee3   : > { %v6529_v8 = vmul.f32 1.442695, %v6429_v13  ;;  %v6531_v30 = vmul.f32 1.442695, %v6430_v63  ;;  %2142 = vst.msk [vmem:[#allocation3 + $0x298] sm:$0xff] %vm1826_vm8, %v2065_v37  ;;  %v15464_v13 = vpop.f32.mrf.mxu3 }
 0xee4   : > { %17536 = vst [vmem:[#allocation132_spill] sm:$0xff] %v15464_v13 }
 0xee5   : > { %10202 = vpow2.f32 %v6529_v8 }
 0xee6   : > { %10204 = vpow2.f32 %v6531_v30 }
 0xee8   : > { %v2073_v28 = vpop.permute.xlu1 %2072  ;;  %v2071_v14 = vpop.permute.xlu2 %2070 }
 0xee9   : > { %2146 = vst.msk [vmem:[#allocation3 + $0x2b8] sm:$0xff] %vm1826_vm8, %v2073_v28 }
 0xeea   : > { %2145 = vst.msk [vmem:[#allocation3 + $0x2b0] sm:$0xff] %vm1826_vm8, %v2071_v14  ;;  %v2063_v22 = vpop.permute.xlu0 %2062 }
 0xeeb   : > { %v15456_v54 = vpop.eup %10202  ;;  %2141 = vst.msk [vmem:[#allocation3 + $0x290] sm:$0xff] %vm1826_vm8, %v2063_v22 }
 0xeec   : > { %v15459_v58 = vpop.eup %10204 }
 0xeed   : > { %v6639_v37 = vadd.f32 %v15459_v58, %v15456_v54 }
 0xeef   : > { %6640 = vadd.xlane.f32.xlu2 %v6639_v37  ;;  %v15469_v37 = vpop.f32.mrf.mxu3 }
 0xef0   : > { %v2069_v8 = vpop.permute.xlu1 %2068  ;;  %v6801_v30 = vld [vmem:[#allocation3 + $0x2b8] sm:$0xff]  ;;  %v2067_v6 = vpop.permute.xlu2 %2066  ;;  %17537 = vst [vmem:[#allocation133_spill] sm:$0xff] %v15469_v37 }
 0xef1   : > { %2144 = vst.msk [vmem:[#allocation3 + $0x2a8] sm:$0xff] %vm1826_vm8, %v2069_v8  ;;  %6931 = vmatpush.msra.mxu3 %v6801_v30  ;;  %v6800_v39 = vld [vmem:[#allocation3 + $0x2b0] sm:$0xff]  ;;  %v6797_v8 = vld [vmem:[#allocation3 + $0x298] sm:$0xff] }
 0xef2   : > { %2143 = vst.msk [vmem:[#allocation3 + $0x2a0] sm:$0xff] %vm1826_vm8, %v2067_v6  ;;  %v2061_v14 = vpop.permute.xlu0 %2060  ;;  %v6796_v30 = vld [vmem:[#allocation3 + $0x290] sm:$0xff]  ;;  %v6714_v6 = vmul.f32 %v15199_v36, %v15063_v12 }
 0xef3   : > { %6932 = vmatpush.msra.mxu3 %v6800_v39  ;;  %2140 = vst.msk [vmem:[#allocation3 + $0x288] sm:$0xff] %vm1826_vm8, %v2061_v14  ;;  %v15473_v14 = vpop.f32.mrf.mxu2 }
 0xef4   : > { %17538 = vst [vmem:[#allocation134_spill] sm:$0xff] %v15473_v14 }
 0xef8   : > { %v6799_v63 = vld [vmem:[#allocation3 + $0x2a8] sm:$0xff] }
 0xef9   : > { %6933 = vmatpush.msra.mxu3 %v6799_v63  ;;  %v6798_v28 = vld [vmem:[#allocation3 + $0x2a0] sm:$0xff]  ;;  %v15475_v63 = vpop.f32.mrf.mxu3 }
 0xefa   : > { %v2059_v22 = vpop.permute.xlu0 %2058  ;;  %v6795_v15 = vld [vmem:[#allocation3 + $0x288] sm:$0xff]  ;;  %17539 = vst [vmem:[#allocation135_spill] sm:$0xff] %v15475_v63 }
 0xefb   : > { %6934 = vmatpush.msra.mxu3 %v6798_v28  ;;  %2139 = vst.msk [vmem:[#allocation3 + $0x280] sm:$0xff] %vm1826_vm8, %v2059_v22  ;;  %v6716_v28 = vmul.f32 %v15207_v23, %v15039_v43  ;;  %v15479_v22 = vpop.f32.mrf.mxu2 }
 0xefc   : > { %17540 = vst [vmem:[#allocation136_spill] sm:$0xff] %v15479_v22 }
 0xefd   : > { %6935 = vmatpush.msra.mxu3 %v6797_v8 }
 0xeff   : > { %6936 = vmatpush.msra.mxu3 %v6796_v30  ;;  %v6720_v30 = vmul.f32 %v15223_v2, %v15077_v47 }
 0xf01   : > { %6937 = vmatpush.msra.mxu3 %v6795_v15  ;;  %v15481_v8 = vpop.f32.mrf.mxu3  ;;  %v6718_v15 = vmul.f32 %v15215_v27, %v15086_v11  ;;  %v6722_v11 = vmul.f32 %v15231_v40, %v15100_v3  ;;  %v15507_v3 = vpop.f32.mrf.mxu0 }
 0xf02   : > { %v6794_v39 = vld [vmem:[#allocation3 + $0x280] sm:$0xff]  ;;  %17541 = vst [vmem:[#allocation137_spill] sm:$0xff] %v15481_v8  ;;  %v15509_v40 = vpop.f32.mrf.mxu1 }
 0xf03   : > { %6938 = vmatpush.msra.mxu3 %v6794_v39  ;;  %v15485_v12 = vpop.f32.mrf.mxu2 }
 0xf04   : > { %6939 = vmatmul.f32.vlgmr.msra.gmra.mxu3 %v6714_v6  ;;  %17542 = vst [vmem:[#allocation138_spill] sm:$0xff] %v15485_v12 }
 0xf09   : > { %v15487_v36 = vpop.f32.mrf.mxu3 }
 0xf0a   : > { %17543 = vst [vmem:[#allocation139_spill] sm:$0xff] %v15487_v36 }
 0xf0b   : > { %v15493_v22 = vpop.f32.mrf.mxu2 }
 0xf0c   : > { %6942 = vmatmul.f32.gmra.mxu3 %v6716_v28  ;;  %17544 = vst [vmem:[#allocation140_spill] sm:$0xff] %v15493_v22 }
 0xf14   : > { %6945 = vmatmul.f32.gmra.mxu3 %v6718_v15  ;;  %v15497_v15 = vpop.f32.mrf.mxu3 }
 0xf15   : > { %17545 = vst [vmem:[#allocation141_spill] sm:$0xff] %v15497_v15 }
 0xf1b   : > { %v6356_v6 = vpop.xlane.xlu1 %6355 }
 0xf1c   : > { %v6431_v39 = vsub.f32 %v15309_v26, %v6356_v6  ;;  %v6432_v43 = vsub.f32 %v15311_v60, %v6356_v6  ;;  %6948 = vmatmul.f32.gmra.mxu3 %v6720_v30 }
 0xf1e   : > { %v6533_v23 = vmul.f32 1.442695, %v6431_v39  ;;  %v6535_v28 = vmul.f32 1.442695, %v6432_v43 }
 0xf20   : > { %10206 = vpow2.f32 %v6533_v23 }
 0xf21   : > { %10208 = vpow2.f32 %v6535_v28 }
 0xf23   : > { %v6359_v27 = vpop.xlane.xlu1 %6358 }
 0xf24   : > { %v6433_v47 = vsub.f32 %v15324_v9, %v6359_v27  ;;  %v6434_v2 = vsub.f32 %v15327_v32, %v6359_v27  ;;  %6951 = vmatmul.f32.gmra.mxu3 %v6722_v11  ;;  %v15513_v27 = vpop.f32.mrf.mxu2 }
 0xf25   : > { %v6362_v26 = vpop.xlane.xlu0 %6361  ;;  %17546 = vst [vmem:[#allocation142_spill] sm:$0xff] %v15513_v27 }
 0xf26   : > { %v15501_v60 = vpop.eup %10206  ;;  %v6537_v30 = vmul.f32 1.442695, %v6433_v47  ;;  %v6539_v6 = vmul.f32 1.442695, %v6434_v2  ;;  %v6435_v39 = vsub.f32 %v15345_v41, %v6362_v26  ;;  %v6436_v43 = vsub.f32 %v15347_v31, %v6362_v26  ;;  %v15519_v2 = vpop.f32.mrf.mxu3 }
 0xf27   : > { %v15505_v23 = vpop.eup %10208  ;;  %v6724_v41 = vmul.f32 %v15247_v10, %v15107_v34  ;;  %17547 = vst [vmem:[#allocation143_spill] sm:$0xff] %v15519_v2 }
 0xf28   : > { %10210 = vpow2.f32 %v6537_v30  ;;  %v6541_v9 = vmul.f32 1.442695, %v6435_v39  ;;  %v6543_v28 = vmul.f32 1.442695, %v6436_v43  ;;  %v6642_v32 = vadd.f32 %v15505_v23, %v15501_v60  ;;  %v15523_v30 = vpop.f32.mrf.mxu0 }
 0xf29   : > { %10212 = vpow2.f32 %v6539_v6  ;;  %v6626_v11 = vpop.xlane.xlu2 %6625  ;;  %v15525_v6 = vpop.f32.mrf.mxu1  ;;  %v6378_v43 = vmax.f32 %v15507_v3, %v15509_v40 }
 0xf2a   : > { %10214 = vpow2.f32 %v6541_v9  ;;  %6643 = vadd.xlane.f32.xlu2 %v6642_v32 }
 0xf2b   : > { %10216 = vpow2.f32 %v6543_v28  ;;  %v6629_v31 = vpop.xlane.xlu1 %6628 }
 0xf2c   : > { %10218 = vrcp.f32 %v6626_v11  ;;  %6954 = vmatmul.f32.gmra.mxu3 %v6724_v41  ;;  %v15537_v28 = vpop.f32.mrf.mxu2  ;;  %v6726_v11 = vmul.f32 %v15255_v61, %v15121_v33  ;;  %v6381_v61 = vmax.f32 %v15523_v30, %v15525_v6 }
 0xf2d   : > { %17548 = vst [vmem:[#allocation144_spill] sm:$0xff] %v15537_v28  ;;  %10220 = vrcp.f32 %v6629_v31 }
 0xf2e   : > { %v15517_v47 = vpop.eup %10210  ;;  %v15553_v33 = vpop.f32.mrf.mxu3 }
 0xf2f   : > { %v15521_v26 = vpop.eup %10212  ;;  %17549 = vst [vmem:[#allocation145_spill] sm:$0xff] %v15553_v33 }
 0xf30   : > { %v15527_v39 = vpop.eup %10214  ;;  %v6645_v34 = vadd.f32 %v15521_v26, %v15517_v47 }
 0xf31   : > { %v15533_v10 = vpop.eup %10216  ;;  %v6632_v41 = vpop.xlane.xlu2 %6631 }
 0xf32   : > { %v15535_v9 = vpop.eup %10218  ;;  %6646 = vadd.xlane.f32.xlu0 %v6645_v34  ;;  %6379 = vmax.xlane.f32.xlu2 %v6378_v43  ;;  %v6648_v32 = vadd.f32 %v15533_v10, %v15527_v39  ;;  %v15547_v34 = vpop.f32.mrf.mxu0 }
 0xf33   : > { %v6365_v27 = vpop.xlane.xlu1 %6364  ;;  %v6739_v22 = vmul.f32 %v15535_v9, %v15357_v62  ;;  %v15549_v28 = vpop.f32.mrf.mxu1 }
 0xf34   : > { %v6437_v2 = vsub.f32 %v15369_v1, %v6365_v27  ;;  %v6438_v12 = vsub.f32 %v15371_v25, %v6365_v27  ;;  %6649 = vadd.xlane.f32.xlu1 %v6648_v32  ;;  %6957 = vmatmul.f32.gmra.mxu3 %v6726_v11  ;;  %v15551_v15 = vpop.eup %10220  ;;  %v6384_v62 = vmax.f32 %v15547_v34, %v15549_v28 }
 0xf35   : > { %6865 = vmatmul.f32.gmra.mxu2 %v6739_v22  ;;  %v6728_v1 = vmul.f32 %v15278_v7, %v15145_v49  ;;  %v6741_v22 = vmul.f32 %v15551_v15, %v15363_v35 }
 0xf36   : > { %v6545_v31 = vmul.f32 1.442695, %v6437_v2  ;;  %v6547_v43 = vmul.f32 1.442695, %v6438_v12  ;;  %v15563_v12 = vpop.f32.mrf.mxu2  ;;  %v15575_v35 = vpop.f32.mrf.mxu3 }
 0xf37   : > { %17550 = vst [vmem:[#allocation146_spill] sm:$0xff] %v15563_v12 }
 0xf38   : > { %10222 = vpow2.f32 %v6545_v31  ;;  %17551 = vst [vmem:[#allocation147_spill] sm:$0xff] %v15575_v35 }
 0xf39   : > { %10224 = vpow2.f32 %v6547_v43  ;;  %v6635_v32 = vpop.xlane.xlu2 %6634 }
 0xf3a   : > { %10226 = vrcp.f32 %v6632_v41  ;;  %6382 = vmax.xlane.f32.xlu0 %v6381_v61 }
 0xf3b   : > { %v6368_v25 = vpop.xlane.xlu1 %6367 }
 0xf3c   : > { %v6439_v27 = vsub.f32 %v15391_v20, %v6368_v25  ;;  %v6440_v2 = vsub.f32 %v15393_v24, %v6368_v25  ;;  %6385 = vmax.xlane.f32.xlu1 %v6384_v62  ;;  %6960 = vmatmul.f32.gmra.mxu3 %v6728_v1  ;;  %v6730_v20 = vmul.f32 %v15288_v55, %v15151_v17 }
 0xf3d   : > { %6868 = vmatmul.f32.gmra.mxu2 %v6741_v22  ;;  %v15585_v22 = vpop.f32.mrf.mxu0 }
 0xf3e   : > { %v15567_v11 = vpop.eup %10222  ;;  %v6549_v41 = vmul.f32 1.442695, %v6439_v27  ;;  %v6551_v31 = vmul.f32 1.442695, %v6440_v2  ;;  %v15581_v62 = vpop.f32.mrf.mxu2 }
 0xf3f   : > { %v15569_v43 = vpop.eup %10224  ;;  %17552 = vst [vmem:[#allocation148_spill] sm:$0xff] %v15581_v62  ;;  %v15587_v27 = vpop.f32.mrf.mxu1 }
 0xf40   : > { %v15571_v49 = vpop.eup %10226  ;;  %10228 = vpow2.f32 %v6549_v41  ;;  %v6651_v7 = vadd.f32 %v15569_v43, %v15567_v11 }
 0xf41   : > { %10230 = vpow2.f32 %v6551_v31  ;;  %v6743_v61 = vmul.f32 %v15571_v49, %v15381_v0  ;;  %v6638_v41 = vpop.xlane.xlu2 %6637  ;;  %v6732_v31 = vmul.f32 %v15298_v52, %v15159_v57 }
 0xf42   : > { %10232 = vrcp.f32 %v6635_v32  ;;  %6652 = vadd.xlane.f32.xlu2 %v6651_v7 }
 0xf43   : > { %v6371_v24 = vpop.xlane.xlu1 %6370 }
 0xf44   : > { %v6441_v1 = vsub.f32 %v15407_v51, %v6371_v24  ;;  %v6442_v25 = vsub.f32 %v15409_v50, %v6371_v24  ;;  %6963 = vmatmul.f32.gmra.mxu3 %v6730_v20  ;;  %v6387_v51 = vmax.f32 %v15585_v22, %v15587_v27  ;;  %v15603_v24 = vpop.f32.mrf.mxu3 }
 0xf45   : > { %6871 = vmatmul.f32.gmra.mxu2 %v6743_v61  ;;  %17553 = vst [vmem:[#allocation149_spill] sm:$0xff] %v15603_v24 }
 0xf46   : > { %v15589_v2 = vpop.eup %10228  ;;  %v6553_v32 = vmul.f32 1.442695, %v6441_v1  ;;  %v6555_v17 = vmul.f32 1.442695, %v6442_v25  ;;  %v15607_v25 = vpop.f32.mrf.mxu0 }
 0xf47   : > { %v15591_v55 = vpop.eup %10230 }
 0xf48   : > { %v15593_v0 = vpop.eup %10232  ;;  %10234 = vpow2.f32 %v6553_v32  ;;  %v6654_v50 = vadd.f32 %v15591_v55, %v15589_v2  ;;  %v15609_v32 = vpop.f32.mrf.mxu1 }
 0xf49   : > { %10236 = vpow2.f32 %v6555_v17  ;;  %v6745_v20 = vmul.f32 %v15593_v0, %v15399_v42 }
 0xf4a   : > { %10238 = vrcp.f32 %v6638_v41  ;;  %6655 = vadd.xlane.f32.xlu0 %v6654_v50  ;;  %6388 = vmax.xlane.f32.xlu2 %v6387_v51  ;;  %v15613_v41 = vpop.f32.mrf.mxu2  ;;  %v6734_v50 = vmul.f32 %v15307_v45, %v15175_v18 }
 0xf4b   : > { %v6374_v7 = vpop.xlane.xlu1 %6373  ;;  %17554 = vst [vmem:[#allocation150_spill] sm:$0xff] %v15613_v41 }
 0xf4c   : > { %v6443_v61 = vsub.f32 %v15421_v4, %v6374_v7  ;;  %v6444_v1 = vsub.f32 %v15423_v44, %v6374_v7  ;;  %6966 = vmatmul.f32.gmra.mxu3 %v6732_v31  ;;  %v6390_v4 = vmax.f32 %v15607_v25, %v15609_v32 }
 0xf4d   : > { %6874 = vmatmul.f32.gmra.mxu2 %v6745_v20 }
 0xf4e   : > { %v15611_v17 = vpop.eup %10234  ;;  %v6557_v57 = vmul.f32 1.442695, %v6443_v61  ;;  %v6559_v52 = vmul.f32 1.442695, %v6444_v1 }
 0xf4f   : > { %v15615_v51 = vpop.eup %10236 }
 0xf50   : > { %v10239_v42 = vpop.eup %10238  ;;  %10240 = vpow2.f32 %v6557_v57  ;;  %v6657_v44 = vadd.f32 %v15615_v51, %v15611_v17 }
 0xf51   : > { %10242 = vpow2.f32 %v6559_v52  ;;  %v6747_v7 = vmul.f32 %v10239_v42, %v15411_v59  ;;  %v15630_v52 = vpop.f32.mrf.mxu3 }
 0xf52   : > { %6391 = vmax.xlane.f32.xlu0 %v6390_v4  ;;  %6658 = vadd.xlane.f32.xlu1 %v6657_v44  ;;  %17555 = vst [vmem:[#allocation151_spill] sm:$0xff] %v15630_v52  ;;  %v15632_v4 = vpop.f32.mrf.mxu2 }
 0xf53   : > { %v6377_v31 = vpop.xlane.xlu1 %6376  ;;  %17556 = vst [vmem:[#allocation152_spill] sm:$0xff] %v15632_v4 }
 0xf54   : > { %v6445_v20 = vsub.f32 %v15435_v16, %v6377_v31  ;;  %v6446_v61 = vsub.f32 %v15437_v48, %v6377_v31  ;;  %6969 = vmatmul.f32.gmra.mxu3 %v6734_v50  ;;  %v6736_v48 = vmul.f32 %v15429_v46, %v15239_v19  ;;  %v7037_v46 = vld [vmem:[#allocation13 + $0x10] sm:$0xff] }
 0xf55   : > { %6877 = vmatmul.f32.gmra.mxu2 %v6747_v7  ;;  %7149 = vmatpush.msra.mxu0 %v7037_v46 }
 0xf56   : > { %v15626_v1 = vpop.eup %10240  ;;  %v6561_v57 = vmul.f32 1.442695, %v6445_v20  ;;  %v6563_v41 = vmul.f32 1.442695, %v6446_v61  ;;  %v6740_v61 = vmul.f32 %v15535_v9, %v15361_v56 }
 0xf57   : > { %v15628_v62 = vpop.eup %10242 }
 0xf58   : > { %10244 = vpow2.f32 %v6561_v57  ;;  %v6660_v18 = vadd.f32 %v15628_v62, %v15626_v1 }
 0xf59   : > { %10246 = vpow2.f32 %v6563_v41  ;;  %v15644_v44 = vpop.f32.mrf.mxu3  ;;  %v6738_v41 = vmul.f32 %v15439_v38, %v15233_v29  ;;  %v6744_v38 = vmul.f32 %v15571_v49, %v15383_v53 }
 0xf5a   : > { %6661 = vadd.xlane.f32.xlu2 %v6660_v18  ;;  %17557 = vst [vmem:[#allocation153_spill] sm:$0xff] %v15644_v44  ;;  %v15646_v50 = vpop.f32.mrf.mxu2  ;;  %v6742_v18 = vmul.f32 %v15551_v15, %v15367_v5  ;;  %v17563_v5 = vld [vmem:[#allocation126_spill] sm:$0xff] }
 0xf5b   : > { %17558 = vst [vmem:[#allocation154_spill] sm:$0xff] %v15646_v50  ;;  %v6748_v15 = vmul.f32 %v10239_v42, %v17563_v5 }
 0xf5c   : > { %6972 = vmatmul.f32.gmra.mxu3 %v6736_v48 }
 0xf5e   : > { %v15638_v45 = vpop.eup %10244 }
 0xf5f   : > { %v15640_v59 = vpop.eup %10246 }
 0xf60   : > { %v6663_v16 = vadd.f32 %v15640_v59, %v15638_v45 }
 0xf61   : > { %v15653_v57 = vpop.f32.mrf.mxu3 }
 0xf62   : > { %6664 = vadd.xlane.f32.xlu1 %v6663_v16  ;;  %v6641_v31 = vpop.xlane.xlu2 %6640  ;;  %v6827_v7 = vpop.f32.mrf.mxu2  ;;  %17559 = vst [vmem:[#allocation155_spill] sm:$0xff] %v15653_v57 }
 0xf63   : > { %10248 = vrcp.f32 %v6641_v31  ;;  %v17562_v31 = vld [vmem:[#allocation125_spill] sm:$0xff] }
 0xf64   : > { %6975 = vmatmul.f32.gmra.mxu3 %v6738_v41  ;;  %v6746_v56 = vmul.f32 %v15593_v0, %v17562_v31 }
 0xf69   : > { %v10249_v19 = vpop.eup %10248  ;;  %v15657_v29 = vpop.f32.mrf.mxu3 }
 0xf6a   : > { %v6749_v20 = vmul.f32 %v10249_v19, %v15456_v54  ;;  %v6830_v48 = vpop.f32.mrf.mxu2  ;;  %17560 = vst [vmem:[#allocation156_spill] sm:$0xff] %v15657_v29  ;;  %v6750_v53 = vmul.f32 %v10249_v19, %v15459_v58 }
 0xf6c   : > { %6880 = vmatmul.f32.gmra.mxu2 %v6749_v20  ;;  %6978 = vmatmul.f32.gmra.mxu3 %v6740_v61 }
 0xf71   : > { %v15661_v54 = vpop.f32.mrf.mxu3 }
 0xf72   : > { %v6833_v16 = vpop.f32.mrf.mxu2  ;;  %17561 = vst [vmem:[#allocation157_spill] sm:$0xff] %v15661_v54 }
 0xf74   : > { %6981 = vmatmul.f32.gmra.mxu3 %v6742_v18 }
 0xf7a   : > { %v6836_v41 = vpop.f32.mrf.mxu2 }
 0xf7c   : > { %6984 = vmatmul.f32.gmra.mxu3 %v6744_v38 }
 0xf82   : > { %v6839_v18 = vpop.f32.mrf.mxu2 }
 0xf84   : > { %6987 = vmatmul.f32.gmra.mxu3 %v6746_v56 }
 0xf87   : > { %v6940_v9 = vpop.f32.mrf.mxu3 }
 0xf88   : > { %v6941_v46 = vadd.f32 %v6940_v9, %v6827_v7 }
 0xf8a   : > { %9266 = vmatmul.msk.f32.vlgmr.msra.gmra.mxu0 %vm1826_vm8, %v6941_v46  ;;  %v6842_v0 = vpop.f32.mrf.mxu2 }
 0xf8c   : > { %6990 = vmatmul.f32.gmra.mxu3 %v6748_v15 }
 0xf8f   : > { %v6943_v20 = vpop.f32.mrf.mxu3 }
 0xf90   : > { %v6944_v61 = vadd.f32 %v6943_v20, %v6830_v48 }
 0xf92   : > { %9267 = vmatmul.msk.f32.gmra.mxu0 %vm1826_vm8, %v6944_v61  ;;  %v6845_v58 = vpop.f32.mrf.mxu2 }
 0xf94   : > { %6993 = vmatmul.f32.gmra.mxu3 %v6750_v53 }
 0xf97   : > { %v6946_v49 = vpop.f32.mrf.mxu3 }
 0xf98   : > { %v6947_v38 = vadd.f32 %v6946_v49, %v6833_v16 }
 0xf9a   : > { %9268 = vmatmul.msk.f32.gmra.mxu0 %vm1826_vm8, %v6947_v38  ;;  %v6848_v38 = vpop.f32.mrf.mxu2 }
 0xf9d   : > { %v6644_v31 = vpop.xlane.xlu2 %6643 }
 0xf9e   : > { %10250 = vrcp.f32 %v6644_v31 }
 0xf9f   : > { %v6949_v7 = vpop.f32.mrf.mxu3 }
 0xfa0   : > { %v6950_v56 = vadd.f32 %v6949_v7, %v6836_v41 }
 0xfa2   : > { %9269 = vmatmul.msk.f32.gmra.mxu0 %vm1826_vm8, %v6950_v56 }
 0xfa4   : > { %v10251_v42 = vpop.eup %10250 }
 0xfa5   : > { %v6647_v9 = vpop.xlane.xlu0 %6646  ;;  %v6380_v48 = vpop.xlane.xlu2 %6379  ;;  %v6751_v46 = vmul.f32 %v10251_v42, %v15501_v60  ;;  %v6752_v5 = vmul.f32 %v10251_v42, %v15505_v23 }
 0xfa6   : > { %10252 = vrcp.f32 %v6647_v9  ;;  %v6447_v19 = vsub.f32 %v15507_v3, %v6380_v48  ;;  %v6448_v16 = vsub.f32 %v15509_v40, %v6380_v48 }
 0xfa7   : > { %6883 = vmatmul.f32.gmra.mxu2 %v6751_v46  ;;  %6996 = vmatmul.f32.gmra.mxu3 %v6752_v5  ;;  %v6650_v15 = vpop.xlane.xlu1 %6649  ;;  %v6952_v20 = vpop.f32.mrf.mxu3 }
 0xfa8   : > { %v6565_v41 = vmul.f32 1.442695, %v6447_v19  ;;  %v6567_v61 = vmul.f32 1.442695, %v6448_v16  ;;  %v6953_v53 = vadd.f32 %v6952_v20, %v6839_v18 }
 0xfaa   : > { %10254 = vpow2.f32 %v6565_v41  ;;  %9270 = vmatmul.msk.f32.gmra.mxu0 %vm1826_vm8, %v6953_v53 }
 0xfab   : > { %10256 = vpow2.f32 %v6567_v61  ;;  %v6851_v61 = vpop.f32.mrf.mxu2 }
 0xfac   : > { %v10253_v60 = vpop.eup %10252  ;;  %10258 = vrcp.f32 %v6650_v15 }
 0xfad   : > { %v6383_v23 = vpop.xlane.xlu0 %6382  ;;  %v6753_v49 = vmul.f32 %v10253_v60, %v15517_v47  ;;  %v6754_v3 = vmul.f32 %v10253_v60, %v15521_v26 }
 0xfae   : > { %v6449_v40 = vsub.f32 %v15523_v30, %v6383_v23  ;;  %v6450_v31 = vsub.f32 %v15525_v6, %v6383_v23 }
 0xfaf   : > { %6886 = vmatmul.f32.gmra.mxu2 %v6753_v49  ;;  %6999 = vmatmul.f32.gmra.mxu3 %v6754_v3  ;;  %v6386_v7 = vpop.xlane.xlu1 %6385  ;;  %v6955_v18 = vpop.f32.mrf.mxu3 }
 0xfb0   : > { %v15680_v56 = vpop.eup %10254  ;;  %v6569_v42 = vmul.f32 1.442695, %v6449_v40  ;;  %v6571_v9 = vmul.f32 1.442695, %v6450_v31  ;;  %v6451_v48 = vsub.f32 %v15547_v34, %v6386_v7  ;;  %v6452_v46 = vsub.f32 %v15549_v28, %v6386_v7 }
 0xfb1   : > { %v15684_v47 = vpop.eup %10256  ;;  %v6956_v26 = vadd.f32 %v6955_v18, %v6842_v0 }
 0xfb2   : > { %v10259_v5 = vpop.eup %10258  ;;  %10260 = vpow2.f32 %v6569_v42  ;;  %v6573_v30 = vmul.f32 1.442695, %v6451_v48  ;;  %v6575_v19 = vmul.f32 1.442695, %v6452_v46  ;;  %v6666_v6 = vadd.f32 %v15684_v47, %v15680_v56 }
 0xfb3   : > { %10262 = vpow2.f32 %v6571_v9  ;;  %9271 = vmatmul.msk.f32.gmra.mxu0 %vm1826_vm8, %v6956_v26  ;;  %v6755_v34 = vmul.f32 %v10259_v5, %v15527_v39  ;;  %v6756_v28 = vmul.f32 %v10259_v5, %v15533_v10  ;;  %v6854_v46 = vpop.f32.mrf.mxu2 }
 0xfb4   : > { %10264 = vpow2.f32 %v6573_v30  ;;  %6667 = vadd.xlane.f32.xlu0 %v6666_v6 }
 0xfb5   : > { %10266 = vpow2.f32 %v6575_v19  ;;  %v6653_v16 = vpop.xlane.xlu2 %6652 }
 0xfb6   : > { %10268 = vrcp.f32 %v6653_v16 }
 0xfb7   : > { %6889 = vmatmul.f32.gmra.mxu2 %v6755_v34  ;;  %7002 = vmatmul.f32.gmra.mxu3 %v6756_v28  ;;  %v6958_v0 = vpop.f32.mrf.mxu3 }
 0xfb8   : > { %v15691_v15 = vpop.eup %10260  ;;  %v6959_v20 = vadd.f32 %v6958_v0, %v6845_v58 }
 0xfb9   : > { %v15693_v41 = vpop.eup %10262 }
 0xfba   : > { %v15695_v53 = vpop.eup %10264  ;;  %v6669_v60 = vadd.f32 %v15693_v41, %v15691_v15 }
 0xfbb   : > { %v15699_v23 = vpop.eup %10266  ;;  %9272 = vmatmul.msk.f32.gmra.mxu0 %vm1826_vm8, %v6959_v20 }
 0xfbc   : > { %v10269_v39 = vpop.eup %10268  ;;  %6670 = vadd.xlane.f32.xlu2 %v6669_v60  ;;  %v6672_v10 = vadd.f32 %v15699_v23, %v15695_v53 }
 0xfbd   : > { %v6656_v49 = vpop.xlane.xlu0 %6655  ;;  %v6389_v3 = vpop.xlane.xlu2 %6388  ;;  %v6757_v58 = vmul.f32 %v10269_v39, %v15567_v11  ;;  %v6758_v40 = vmul.f32 %v10269_v39, %v15569_v43 }
 0xfbe   : > { %10270 = vrcp.f32 %v6656_v49  ;;  %v6453_v31 = vsub.f32 %v15585_v22, %v6389_v3  ;;  %v6454_v7 = vsub.f32 %v15587_v27, %v6389_v3  ;;  %6673 = vadd.xlane.f32.xlu1 %v6672_v10 }
 0xfbf   : > { %6892 = vmatmul.f32.gmra.mxu2 %v6757_v58  ;;  %7005 = vmatmul.f32.gmra.mxu3 %v6758_v40  ;;  %v6961_v18 = vpop.f32.mrf.mxu3 }
 0xfc0   : > { %v6577_v42 = vmul.f32 1.442695, %v6453_v31  ;;  %v6579_v9 = vmul.f32 1.442695, %v6454_v7  ;;  %v6962_v48 = vadd.f32 %v6961_v18, %v6848_v38  ;;  %v17564_v7 = vld [vmem:[#allocation75_spill] sm:$0xff] }
 0xfc2   : > { %10272 = vpow2.f32 %v6577_v42 }
 0xfc3   : > { %10274 = vpow2.f32 %v6579_v9  ;;  %9273 = vmatmul.msk.f32.gmra.mxu0 %vm1826_vm8, %v6962_v48 }
 0xfc4   : > { %v10271_v11 = vpop.eup %10270 }
 0xfc5   : > { %v6392_v26 = vpop.xlane.xlu0 %6391  ;;  %v6659_v43 = vpop.xlane.xlu1 %6658  ;;  %v6759_v5 = vmul.f32 %v10271_v11, %v15589_v2  ;;  %v6760_v22 = vmul.f32 %v10271_v11, %v15591_v55  ;;  %v17566_v11 = vld [vmem:[#allocation42_spill] sm:$0xff] }
 0xfc6   : > { %v6455_v27 = vsub.f32 %v15607_v25, %v6392_v26  ;;  %v6456_v30 = vsub.f32 %v15609_v32, %v6392_v26  ;;  %10276 = vrcp.f32 %v6659_v43  ;;  %v6857_v25 = vpop.f32.mrf.mxu2 }
 0xfc7   : > { %6895 = vmatmul.f32.gmra.mxu2 %v6759_v5  ;;  %7008 = vmatmul.f32.gmra.mxu3 %v6760_v22  ;;  %v6964_v38 = vpop.f32.mrf.mxu3  ;;  %v17567_v22 = vld [vmem:[#allocation69_spill] sm:$0xff] }
 0xfc8   : > { %v15713_v19 = vpop.eup %10272  ;;  %v6581_v6 = vmul.f32 1.442695, %v6455_v27  ;;  %v6583_v16 = vmul.f32 1.442695, %v6456_v30  ;;  %v6965_v34 = vadd.f32 %v6964_v38, %v6851_v61  ;;  %v17569_v27 = vld [vmem:[#allocation76_spill] sm:$0xff]  ;;  %v17570_v38 = vld [vmem:[#allocation71_spill] sm:$0xff] }
 0xfc9   : > { %v15715_v28 = vpop.eup %10274 }
 0xfca   : > { %10278 = vpow2.f32 %v6581_v6  ;;  %v6675_v2 = vadd.f32 %v15715_v28, %v15713_v19  ;;  %v17571_v6 = vld [vmem:[#allocation81_spill] sm:$0xff] }
 0xfcb   : > { %10280 = vpow2.f32 %v6583_v16  ;;  %9274 = vmatmul.msk.f32.gmra.mxu0 %vm1826_vm8, %v6965_v34 }
 0xfcc   : > { %v10277_v55 = vpop.eup %10276  ;;  %6676 = vadd.xlane.f32.xlu0 %v6675_v2  ;;  %v17572_v2 = vld [vmem:[#allocation70_spill] sm:$0xff] }
 0xfcd   : > { %v6662_v32 = vpop.xlane.xlu2 %6661  ;;  %v6761_v0 = vmul.f32 %v10277_v55, %v15611_v17  ;;  %v6762_v20 = vmul.f32 %v10277_v55, %v15615_v51 }
 0xfce   : > { %10282 = vrcp.f32 %v6662_v32  ;;  %v6860_v58 = vpop.f32.mrf.mxu2  ;;  %v17574_v32 = vld [vmem:[#allocation52_spill] sm:$0xff] }
 0xfcf   : > { %6898 = vmatmul.f32.gmra.mxu2 %v6761_v0  ;;  %7011 = vmatmul.f32.gmra.mxu3 %v6762_v20  ;;  %v6967_v61 = vpop.f32.mrf.mxu3 }
 0xfd0   : > { %v15722_v60 = vpop.eup %10278  ;;  %v6968_v39 = vadd.f32 %v6967_v61, %v6854_v46  ;;  %v17575_v61 = vld [vmem:[#allocation80_spill] sm:$0xff] }
 0xfd1   : > { %v15724_v10 = vpop.eup %10280 }
 0xfd2   : > { %v6678_v49 = vadd.f32 %v15724_v10, %v15722_v60 }
 0xfd3   : > { %9275 = vmatmul.msk.f32.gmra.mxu0 %vm1826_vm8, %v6968_v39 }
 0xfd4   : > { %v10283_v3 = vpop.eup %10282  ;;  %6679 = vadd.xlane.f32.xlu2 %v6678_v49  ;;  %v17576_v49 = vld [vmem:[#allocation83_spill] sm:$0xff] }
 0xfd5   : > { %v6665_v17 = vpop.xlane.xlu1 %6664  ;;  %v6763_v51 = vmul.f32 %v10283_v3, %v15626_v1  ;;  %v6764_v40 = vmul.f32 %v10283_v3, %v15628_v62  ;;  %v17565_v1 = vld [vmem:[#allocation68_spill] sm:$0xff]  ;;  %v17577_v3 = vld [vmem:[#allocation34_spill] sm:$0xff] }
 0xfd6   : > { %10284 = vrcp.f32 %v6665_v17  ;;  %v6863_v46 = vpop.f32.mrf.mxu2  ;;  %v17578_v17 = vld [vmem:[#allocation50_spill] sm:$0xff] }
 0xfd7   : > { %6901 = vmatmul.f32.gmra.mxu2 %v6763_v51  ;;  %7014 = vmatmul.f32.gmra.mxu3 %v6764_v40  ;;  %v6970_v31 = vpop.f32.mrf.mxu3 }
 0xfd8   : > { %7282 = vrot.lane.b32.xlu1 %v17564_v7, %s10790_s24  ;;  %v6971_v18 = vadd.f32 %v6970_v31, %v6857_v25  ;;  %v17573_v25 = vld [vmem:[#allocation31_spill] sm:$0xff]  ;;  %v17580_v7 = vld [vmem:[#allocation85_spill] sm:$0xff] }
 0xfd9   : > { %v17579_v31 = vld [vmem:[#allocation67_spill] sm:$0xff] }
 0xfdb   : > { %9276 = vmatmul.msk.f32.gmra.mxu0 %vm1826_vm8, %v6971_v18 }
 0xfdc   : > { %v10285_v42 = vpop.eup %10284 }
 0xfdd   : > { %v6765_v9 = vmul.f32 %v10285_v42, %v15638_v45  ;;  %v6766_v48 = vmul.f32 %v10285_v42, %v15640_v59  ;;  %v17568_v45 = vld [vmem:[#allocation77_spill] sm:$0xff]  ;;  %v17581_v42 = vld [vmem:[#allocation84_spill] sm:$0xff] }
 0xfde   : > { %v6866_v43 = vpop.f32.mrf.mxu2 }
 0xfdf   : > { %6904 = vmatmul.f32.gmra.mxu2 %v6765_v9  ;;  %7017 = vmatmul.f32.gmra.mxu3 %v6766_v48  ;;  %v6973_v62 = vpop.f32.mrf.mxu3 }
 0xfe0   : > { %7284 = vrot.lane.b32.xlu0 %v17565_v1, %s10790_s24  ;;  %7288 = vrot.lane.b32.xlu1 %v17566_v11, %s10790_s24  ;;  %v6974_v26 = vadd.f32 %v6973_v62, %v6860_v58  ;;  %v17583_v62 = vld [vmem:[#allocation33_spill] sm:$0xff]  ;;  %v17584_v11 = vld [vmem:[#allocation32_spill] sm:$0xff] }
 0xfe3   : > { %9277 = vmatmul.msk.f32.gmra.mxu0 %vm1826_vm8, %v6974_v26 }
 0xfe6   : > { %v6869_v34 = vpop.f32.mrf.mxu2 }
 0xfe7   : > { %v6976_v5 = vpop.f32.mrf.mxu3 }
 0xfe8   : > { %7290 = vrot.lane.b32.xlu0 %v17567_v22, %s10790_s24  ;;  %7294 = vrot.lane.b32.xlu1 %v17568_v45, %s10790_s24  ;;  %v6977_v59 = vadd.f32 %v6976_v5, %v6863_v46  ;;  %v17582_v46 = vld [vmem:[#allocation86_spill] sm:$0xff]  ;;  %v17585_v5 = vld [vmem:[#allocation73_spill] sm:$0xff] }
 0xfe9   : > { %v17586_v22 = vld [vmem:[#allocation66_spill] sm:$0xff] }
 0xfeb   : > { %9278 = vmatmul.msk.f32.gmra.mxu0 %vm1826_vm8, %v6977_v59  ;;  %v17587_v59 = vld [vmem:[#allocation78_spill] sm:$0xff] }
 0xfec   : > { %7286 = vrot.lane.b32.xlu2 %v17569_v27, %s10790_s24  ;;  %v17588_v27 = vld [vmem:[#allocation65_spill] sm:$0xff] }
 0xfee   : > { %v6872_v20 = vpop.f32.mrf.mxu2 }
 0xfef   : > { %v6979_v30 = vpop.f32.mrf.mxu3 }
 0xff0   : > { %7296 = vrot.lane.b32.xlu0 %v17570_v38, %s10790_s24  ;;  %7300 = vrot.lane.b32.xlu1 %v17571_v6, %s10790_s24  ;;  %v6980_v16 = vadd.f32 %v6979_v30, %v6866_v43  ;;  %v17589_v30 = vld [vmem:[#allocation63_spill] sm:$0xff] }
 0xff1   : > { %v17590_v38 = vld [vmem:[#allocation87_spill] sm:$0xff] }
 0xff3   : > { %9279 = vmatmul.msk.f32.gmra.mxu0 %vm1826_vm8, %v6980_v16  ;;  %v17591_v16 = vld [vmem:[#allocation64_spill] sm:$0xff] }
 0xff4   : > { %7292 = vrot.lane.b32.xlu2 %v17572_v2, %s10790_s24 }
 0xff6   : > { %v6875_v51 = vpop.f32.mrf.mxu2 }
 0xff7   : > { %v6982_v55 = vpop.f32.mrf.mxu3 }
 0xff8   : > { %7302 = vrot.lane.b32.xlu0 %v17573_v25, %s10790_s24  ;;  %7306 = vrot.lane.b32.xlu1 %v17574_v32, %s10790_s24  ;;  %v6983_v0 = vadd.f32 %v6982_v55, %v6869_v34  ;;  %v17592_v34 = vld [vmem:[#allocation62_spill] sm:$0xff]  ;;  %v17593_v32 = vld [vmem:[#allocation89_spill] sm:$0xff] }
 0xffb   : > { %9280 = vmatmul.msk.f32.gmra.mxu0 %vm1826_vm8, %v6983_v0 }
 0xffc   : > { %7298 = vrot.lane.b32.xlu2 %v17575_v61, %s10790_s24 }
 0xffe   : > { %v6878_v9 = vpop.f32.mrf.mxu2 }
 0xfff   : > { %v6985_v39 = vpop.f32.mrf.mxu3 }
0x1000   : > { %7308 = vrot.lane.b32.xlu0 %v17576_v49, %s10790_s24  ;;  %7312 = vrot.lane.b32.xlu1 %v17577_v3, %s10790_s24  ;;  %v6986_v58 = vadd.f32 %v6985_v39, %v6872_v20  ;;  %v17594_v49 = vld [vmem:[#allocation61_spill] sm:$0xff] }
0x1003   : > { %9281 = vmatmul.msk.f32.gmra.mxu0 %vm1826_vm8, %v6986_v58 }
0x1004   : > { %7304 = vrot.lane.b32.xlu2 %v17578_v17, %s10790_s24 }
0x1006   : > { %v6881_v26 = vpop.f32.mrf.mxu2 }
0x1007   : > { %v6988_v40 = vpop.f32.mrf.mxu3 }
0x1008   : > { %7314 = vrot.lane.b32.xlu0 %v17579_v31, %s10790_s24  ;;  %7318 = vrot.lane.b32.xlu1 %v17580_v7, %s10790_s24  ;;  %v6989_v18 = vadd.f32 %v6988_v40, %v6875_v51  ;;  %v17595_v40 = vld [vmem:[#allocation95_spill] sm:$0xff]  ;;  %v17596_v7 = vld [vmem:[#allocation60_spill] sm:$0xff] }
0x100b   : > { %9282 = vmatmul.msk.f32.gmra.mxu0 %vm1826_vm8, %v6989_v18 }
0x100c   : > { %7310 = vrot.lane.b32.xlu2 %v17581_v42, %s10790_s24 }
0x100f   : > { %v6991_v48 = vpop.f32.mrf.mxu3 }
0x1010   : > { %7320 = vrot.lane.b32.xlu0 %v17582_v46, %s10790_s24  ;;  %7324 = vrot.lane.b32.xlu1 %v17583_v62, %s10790_s24  ;;  %v6992_v1 = vadd.f32 %v6991_v48, %v6878_v9  ;;  %v17597_v46 = vld [vmem:[#allocation30_spill] sm:$0xff] }
0x1013   : > { %9283 = vmatmul.msk.f32.gmra.mxu0 %vm1826_vm8, %v6992_v1 }
0x1014   : > { %7316 = vrot.lane.b32.xlu2 %v17584_v11, %s10790_s24 }
0x1017   : > { %v6994_v43 = vpop.f32.mrf.mxu3 }
0x1018   : > { %7330 = vrot.lane.b32.xlu0 %v17585_v5, %s10790_s24  ;;  %2188 = vrot.lane.b32.xlu1 %v17586_v22, %s10790_s24  ;;  %v6995_v45 = vadd.f32 %v6994_v43, %v6881_v26  ;;  %v17599_v5 = vld [vmem:[#allocation105_spill] sm:$0xff] }
0x101b   : > { %9284 = vmatmul.msk.f32.gmra.mxu0 %vm1826_vm8, %v6995_v45 }
0x101c   : > { %7322 = vrot.lane.b32.xlu2 %v17587_v59, %s10790_s24  ;;  %v17600_v59 = vld [vmem:[#allocation29_spill] sm:$0xff] }
0x1020   : > { %2186 = vrot.lane.b32.xlu0 %v17588_v27, %s10790_s24  ;;  %2182 = vrot.lane.b32.xlu1 %v17589_v30, %s10790_s24 }
0x1024   : > { %7326 = vrot.lane.b32.xlu2 %v17590_v38, %s10790_s24 }
0x1027   : > { %v6668_v6 = vpop.xlane.xlu0 %6667 }
0x1028   : > { %10286 = vrcp.f32 %v6668_v6  ;;  %2184 = vrot.lane.b32.xlu0 %v17591_v16, %s10790_s24  ;;  %2180 = vrot.lane.b32.xlu1 %v17592_v34, %s10790_s24  ;;  %v17601_v16 = vld [vmem:[#allocation58_spill] sm:$0xff] }
0x102a   : > { %v6884_v2 = vpop.f32.mrf.mxu2  ;;  %v6997_v55 = vpop.f32.mrf.mxu3 }
0x102b   : > { %v6998_v25 = vadd.f32 %v6997_v55, %v6884_v2  ;;  %v17602_v55 = vld [vmem:[#allocation54_spill] sm:$0xff] }
0x102c   : > { %7328 = vrot.lane.b32.xlu2 %v17593_v32, %s10790_s24 }
0x102d   : > { %9285 = vmatmul.msk.f32.gmra.mxu0 %vm1826_vm8, %v6998_v25  ;;  %v15836_v25 = vpop.f32.mrf.mxu0 }
0x102e   : > { %v10287_v0 = vpop.eup %10286 }
0x102f   : > { %v6671_v20 = vpop.xlane.xlu2 %6670  ;;  %v6767_v61 = vmul.f32 %v10287_v0, %v15680_v56  ;;  %v6768_v39 = vmul.f32 %v10287_v0, %v15684_v47 }
0x1030   : > { %10288 = vrcp.f32 %v6671_v20  ;;  %2220 = vrot.lane.b32.xlu0 %v17594_v49, %s10790_s24  ;;  %v17603_v49 = vld [vmem:[#allocation57_spill] sm:$0xff] }
0x1031   : > { %6907 = vmatmul.f32.gmra.mxu2 %v6767_v61  ;;  %7020 = vmatmul.f32.gmra.mxu3 %v6768_v39  ;;  %v6674_v17 = vpop.xlane.xlu1 %6673 }
0x1032   : > { %v6887_v3 = vpop.f32.mrf.mxu2  ;;  %v7000_v58 = vpop.f32.mrf.mxu3  ;;  %10290 = vrcp.f32 %v6674_v17 }
0x1033   : > { %v7001_v51 = vadd.f32 %v7000_v58, %v6887_v3 }
0x1034   : > { %7332 = vrot.lane.b32.xlu2 %v17595_v40, %s10790_s24 }
0x1035   : > { %9286 = vmatmul.msk.f32.gmra.mxu0 %vm1826_vm8, %v7001_v51  ;;  %v15846_v40 = vpop.f32.mrf.mxu0 }
0x1036   : > { %v10289_v31 = vpop.eup %10288 }
0x1037   : > { %v6769_v56 = vmul.f32 %v10289_v31, %v15691_v15  ;;  %v6770_v47 = vmul.f32 %v10289_v31, %v15693_v41  ;;  %v17598_v41 = vld [vmem:[#allocation59_spill] sm:$0xff] }
0x1038   : > { %2218 = vrot.lane.b32.xlu0 %v17596_v7, %s10790_s24  ;;  %v10291_v48 = vpop.eup %10290 }
0x1039   : > { %6910 = vmatmul.f32.gmra.mxu2 %v6769_v56  ;;  %7023 = vmatmul.f32.gmra.mxu3 %v6770_v47  ;;  %v6771_v1 = vmul.f32 %v10291_v48, %v15695_v53  ;;  %v6772_v15 = vmul.f32 %v10291_v48, %v15699_v23  ;;  %v17605_v56 = vld [vmem:[#allocation56_spill] sm:$0xff] }
0x103a   : > { %v6890_v18 = vpop.f32.mrf.mxu2  ;;  %v7003_v42 = vpop.f32.mrf.mxu3 }
0x103b   : > { %v7004_v9 = vadd.f32 %v7003_v42, %v6890_v18 }
0x103c   : > { %2178 = vrot.lane.b32.xlu2 %v17597_v46, %s10790_s24 }
0x103d   : > { %9287 = vmatmul.msk.f32.gmra.mxu0 %vm1826_vm8, %v7004_v9  ;;  %v15853_v46 = vpop.f32.mrf.mxu0 }
0x103f   : > { %v6677_v62 = vpop.xlane.xlu0 %6676 }
0x1040   : > { %10292 = vrcp.f32 %v6677_v62  ;;  %2216 = vrot.lane.b32.xlu0 %v17598_v41, %s10790_s24 }
0x1041   : > { %6913 = vmatmul.f32.gmra.mxu2 %v6771_v1  ;;  %7026 = vmatmul.f32.gmra.mxu3 %v6772_v15 }
0x1042   : > { %v6893_v11 = vpop.f32.mrf.mxu2  ;;  %v7006_v26 = vpop.f32.mrf.mxu3 }
0x1043   : > { %v7007_v43 = vadd.f32 %v7006_v26, %v6893_v11 }
0x1044   : > { %7334 = vrot.lane.b32.xlu2 %v17599_v5, %s10790_s24 }
0x1045   : > { %9288 = vmatmul.msk.f32.gmra.mxu0 %vm1826_vm8, %v7007_v43 }
0x1046   : > { %v10293_v22 = vpop.eup %10292 }
0x1047   : > { %v6680_v45 = vpop.xlane.xlu2 %6679  ;;  %v6773_v53 = vmul.f32 %v10293_v22, %v15713_v19  ;;  %v6774_v23 = vmul.f32 %v10293_v22, %v15715_v28 }
0x1048   : > { %10294 = vrcp.f32 %v6680_v45  ;;  %2176 = vrot.lane.b32.xlu0 %v17600_v59, %s10790_s24 }
0x1049   : > { %6916 = vmatmul.f32.gmra.mxu2 %v6773_v53  ;;  %7029 = vmatmul.f32.gmra.mxu3 %v6774_v23 }
0x104a   : > { %v7283_v27 = vpop.permute.xlu1 %7282  ;;  %v6896_v30 = vpop.f32.mrf.mxu2 }
0x104b   : > { %v7009_v38 = vpop.f32.mrf.mxu3  ;;  %9298 = vmatmul.msk.f32.vlgmr.msra.gmra.mxu1 %vm1826_vm8, %v7283_v27 }
0x104c   : > { %v7010_v6 = vadd.f32 %v7009_v38, %v6896_v30  ;;  %2214 = vrot.lane.b32.xlu2 %v17601_v16, %s10790_s24 }
0x104e   : > { %v10295_v34 = vpop.eup %10294  ;;  %9289 = vmatmul.msk.f32.gmra.mxu0 %vm1826_vm8, %v7010_v6 }
0x104f   : > { %v7287_v19 = vpop.permute.xlu2 %7286  ;;  %v6775_v28 = vmul.f32 %v10295_v34, %v15722_v60  ;;  %v6776_v2 = vmul.f32 %v10295_v34, %v15724_v10  ;;  %v17604_v10 = vld [vmem:[#allocation51_spill] sm:$0xff] }
0x1050   : > { %2174 = vrot.lane.b32.xlu0 %v17602_v55, %s10790_s24 }
0x1051   : > { %6919 = vmatmul.f32.gmra.mxu2 %v6775_v28  ;;  %7032 = vmatmul.f32.gmra.mxu3 %v6776_v2 }
0x1052   : > { %v7285_v32 = vpop.permute.xlu0 %7284  ;;  %v7289_v0 = vpop.permute.xlu1 %7288 }
0x1053   : > { %v6899_v20 = vpop.f32.mrf.mxu2  ;;  %v7012_v61 = vpop.f32.mrf.mxu3  ;;  %9299 = vmatmul.msk.f32.gmra.mxu1 %vm1826_vm8, %v7285_v32 }
0x1054   : > { %v7013_v39 = vadd.f32 %v7012_v61, %v6899_v20  ;;  %2212 = vrot.lane.b32.xlu2 %v17603_v49, %s10790_s24 }
0x1056   : > { %9290 = vmatmul.msk.f32.gmra.mxu0 %vm1826_vm8, %v7013_v39 }
0x1057   : > { %v7293_v60 = vpop.permute.xlu2 %7292 }
0x1058   : > { %2172 = vrot.lane.b32.xlu0 %v17604_v10, %s10790_s24 }
0x1059   : > { %9330 = vmatmul.msk.f32.vlgmr.msrb.gmra.mxu2 %vm1826_vm8, %v7283_v27 }
0x105a   : > { %v7291_v3 = vpop.permute.xlu0 %7290  ;;  %v7295_v58 = vpop.permute.xlu1 %7294 }
0x105b   : > { %v6902_v17 = vpop.f32.mrf.mxu2  ;;  %v7015_v51 = vpop.f32.mrf.mxu3  ;;  %9300 = vmatmul.msk.f32.gmra.mxu1 %vm1826_vm8, %v7287_v19 }
0x105c   : > { %v7016_v31 = vadd.f32 %v7015_v51, %v6902_v17  ;;  %2210 = vrot.lane.b32.xlu2 %v17605_v56, %s10790_s24 }
0x105e   : > { %9291 = vmatmul.msk.f32.gmra.mxu0 %vm1826_vm8, %v7016_v31 }
0x105f   : > { %v7299_v47 = vpop.permute.xlu2 %7298 }
0x1061   : > { %9331 = vmatmul.msk.f32.gmra.mxu2 %vm1826_vm8, %v7285_v32 }
0x1062   : > { %v7297_v7 = vpop.permute.xlu0 %7296  ;;  %v7301_v18 = vpop.permute.xlu1 %7300 }
0x1063   : > { %v6905_v42 = vpop.f32.mrf.mxu2  ;;  %v7018_v9 = vpop.f32.mrf.mxu3  ;;  %9301 = vmatmul.msk.f32.gmra.mxu1 %vm1826_vm8, %v7289_v0 }
0x1064   : > { %v7019_v48 = vadd.f32 %v7018_v9, %v6905_v42 }
0x1066   : > { %9292 = vmatmul.msk.f32.gmra.mxu0 %vm1826_vm8, %v7019_v48 }
0x1067   : > { %v15856_v62 = vpop.permute.xlu2 %7304 }
0x1069   : > { %9332 = vmatmul.msk.f32.gmra.mxu2 %vm1826_vm8, %v7287_v19 }
0x106a   : > { %v7303_v1 = vpop.permute.xlu0 %7302  ;;  %v15859_v15 = vpop.permute.xlu1 %7306 }
0x106b   : > { %9302 = vmatmul.msk.f32.gmra.mxu1 %vm1826_vm8, %v7291_v3 }
0x106f   : > { %v15862_v41 = vpop.permute.xlu2 %7310 }
0x1071   : > { %9333 = vmatmul.msk.f32.gmra.mxu2 %vm1826_vm8, %v7289_v0 }
0x1072   : > { %v15865_v11 = vpop.permute.xlu0 %7308  ;;  %v15867_v26 = vpop.permute.xlu1 %7312 }
0x1073   : > { %9303 = vmatmul.msk.f32.gmra.mxu1 %vm1826_vm8, %v7293_v60 }
0x1077   : > { %v15870_v43 = vpop.permute.xlu2 %7316 }
0x1079   : > { %9334 = vmatmul.msk.f32.gmra.mxu2 %vm1826_vm8, %v7291_v3 }
0x107a   : > { %v15873_v5 = vpop.permute.xlu0 %7314  ;;  %v15875_v22 = vpop.permute.xlu1 %7318 }
0x107b   : > { %9304 = vmatmul.msk.f32.gmra.mxu1 %vm1826_vm8, %v7295_v58 }
0x107f   : > { %v15878_v45 = vpop.permute.xlu2 %7322 }
0x1081   : > { %9335 = vmatmul.msk.f32.gmra.mxu2 %vm1826_vm8, %v7293_v60 }
0x1082   : > { %v15881_v53 = vpop.permute.xlu0 %7320  ;;  %v15883_v23 = vpop.permute.xlu1 %7324 }
0x1083   : > { %9305 = vmatmul.msk.f32.gmra.mxu1 %vm1826_vm8, %v7297_v7 }
0x1087   : > { %v15886_v59 = vpop.permute.xlu2 %7326 }
0x1089   : > { %9336 = vmatmul.msk.f32.gmra.mxu2 %vm1826_vm8, %v7295_v58  ;;  %v15916_v58 = vpop.f32.mrf.mxu0 }
0x108a   : > { %v15889_v27 = vpop.permute.xlu0 %7330  ;;  %v2189_v30 = vpop.permute.xlu1 %2188 }
0x108b   : > { %2270 = vst.msk [vmem:[#allocation3 + $0x378] sm:$0xff] %vm1826_vm8, %v2189_v30  ;;  %9306 = vmatmul.msk.f32.gmra.mxu1 %vm1826_vm8, %v7299_v47 }
0x108f   : > { %v15893_v38 = vpop.permute.xlu2 %7328 }
0x1091   : > { %9337 = vmatmul.msk.f32.gmra.mxu2 %vm1826_vm8, %v7297_v7  ;;  %v15926_v42 = vpop.f32.mrf.mxu0 }
0x1092   : > { %v2187_v6 = vpop.permute.xlu0 %2186  ;;  %v2183_v16 = vpop.permute.xlu1 %2182  ;;  %v8132_v34 = vld [vmem:[#allocation3 + $0x378] sm:$0xff] }
0x1093   : > { %2269 = vst.msk [vmem:[#allocation3 + $0x370] sm:$0xff] %vm1826_vm8, %v2187_v6  ;;  %9307 = vmatmul.msk.f32.gmra.mxu1 %vm1826_vm8, %v7301_v18  ;;  %8149 = vmatpush.msrb.mxu3 %v8132_v34 }
0x1094   : > { %2267 = vst.msk [vmem:[#allocation3 + $0x360] sm:$0xff] %vm1826_vm8, %v2183_v16 }
0x1097   : > { %v15899_v19 = vpop.permute.xlu2 %7332 }
0x1099   : > { %9338 = vmatmul.msk.f32.gmra.mxu2 %vm1826_vm8, %v7299_v47 }
0x109a   : > { %v2185_v28 = vpop.permute.xlu0 %2184  ;;  %v2181_v2 = vpop.permute.xlu1 %2180  ;;  %v8131_v55 = vld [vmem:[#allocation3 + $0x370] sm:$0xff] }
0x109b   : > { %2268 = vst.msk [vmem:[#allocation3 + $0x368] sm:$0xff] %vm1826_vm8, %v2185_v28  ;;  %8150 = vmatpush.msrb.mxu3 %v8131_v55  ;;  %9308 = vmatmul.msk.f32.gmra.mxu1 %vm1826_vm8, %v7303_v1  ;;  %v8129_v61 = vld [vmem:[#allocation3 + $0x360] sm:$0xff] }
0x109c   : > { %2266 = vst.msk [vmem:[#allocation3 + $0x358] sm:$0xff] %vm1826_vm8, %v2181_v2  ;;  %v15937_v2 = vpop.f32.mrf.mxu0 }
0x109f   : > { %v2179_v32 = vpop.permute.xlu2 %2178 }
0x10a0   : > { %2265 = vst.msk [vmem:[#allocation3 + $0x350] sm:$0xff] %vm1826_vm8, %v2179_v32 }
0x10a1   : > { %9339 = vmatmul.msk.f32.gmra.mxu2 %vm1826_vm8, %v7301_v18 }
0x10a2   : > { %v2221_v0 = vpop.permute.xlu0 %2220  ;;  %v8130_v20 = vld [vmem:[#allocation3 + $0x368] sm:$0xff] }
0x10a3   : > { %2286 = vst.msk [vmem:[#allocation3 + $0x3f8] sm:$0xff] %vm1826_vm8, %v2221_v0  ;;  %8151 = vmatpush.msrb.mxu3 %v8130_v20  ;;  %9309 = vmatmul.msk.f32.gmra.mxu1 %vm1826_vm8, %v15856_v62  ;;  %v8128_v39 = vld [vmem:[#allocation3 + $0x358] sm:$0xff] }
0x10a5   : > { %8152 = vmatpush.msrb.mxu3 %v8129_v61 }
0x10a7   : > { %8153 = vmatpush.msrb.mxu3 %v8128_v39  ;;  %v15910_v49 = vpop.permute.xlu2 %7334  ;;  %v8127_v60 = vld [vmem:[#allocation3 + $0x350] sm:$0xff] }
0x10a9   : > { %9340 = vmatmul.msk.f32.gmra.mxu2 %vm1826_vm8, %v7303_v1  ;;  %8154 = vmatpush.msrb.mxu3 %v8127_v60 }
0x10aa   : > { %v2219_v10 = vpop.permute.xlu0 %2218  ;;  %v8148_v3 = vld [vmem:[#allocation3 + $0x3f8] sm:$0xff] }
0x10ab   : > { %2285 = vst.msk [vmem:[#allocation3 + $0x3f0] sm:$0xff] %vm1826_vm8, %v2219_v10  ;;  %8262 = vmatpush.msrb.mxu0 %v8148_v3  ;;  %9310 = vmatmul.msk.f32.gmra.mxu1 %vm1826_vm8, %v15859_v15  ;;  %v15948_v10 = vpop.f32.mrf.mxu0 }
0x10af   : > { %v2215_v17 = vpop.permute.xlu2 %2214 }
0x10b0   : > { %2283 = vst.msk [vmem:[#allocation3 + $0x3e0] sm:$0xff] %vm1826_vm8, %v2215_v17 }
0x10b1   : > { %9341 = vmatmul.msk.f32.gmra.mxu2 %vm1826_vm8, %v15856_v62 }
0x10b2   : > { %v2217_v51 = vpop.permute.xlu0 %2216  ;;  %v8147_v31 = vld [vmem:[#allocation3 + $0x3f0] sm:$0xff] }
0x10b3   : > { %2284 = vst.msk [vmem:[#allocation3 + $0x3e8] sm:$0xff] %vm1826_vm8, %v2217_v51  ;;  %8263 = vmatpush.msrb.mxu0 %v8147_v31  ;;  %9311 = vmatmul.msk.f32.gmra.mxu1 %vm1826_vm8, %v15865_v11 }
0x10b4   : > { %v6908_v56 = vpop.f32.mrf.mxu2  ;;  %v7021_v47 = vpop.f32.mrf.mxu3 }
0x10b5   : > { %v7022_v7 = vadd.f32 %v7021_v47, %v6908_v56  ;;  %v15957_v47 = vpop.f32.mrf.mxu0 }
0x10b7   : > { %9293 = vmatmul.msk.f32.gmra.mxu0 %vm1826_vm8, %v7022_v7  ;;  %v2213_v18 = vpop.permute.xlu2 %2212  ;;  %v8145_v30 = vld [vmem:[#allocation3 + $0x3e0] sm:$0xff] }
0x10b8   : > { %2282 = vst.msk [vmem:[#allocation3 + $0x3d8] sm:$0xff] %vm1826_vm8, %v2213_v18 }
0x10b9   : > { %9342 = vmatmul.msk.f32.gmra.mxu2 %vm1826_vm8, %v15859_v15 }
0x10ba   : > { %v2177_v9 = vpop.permute.xlu0 %2176  ;;  %v8146_v48 = vld [vmem:[#allocation3 + $0x3e8] sm:$0xff] }
0x10bb   : > { %2264 = vst.msk [vmem:[#allocation3 + $0x348] sm:$0xff] %vm1826_vm8, %v2177_v9  ;;  %8264 = vmatpush.msrb.mxu0 %v8146_v48  ;;  %9312 = vmatmul.msk.f32.gmra.mxu1 %vm1826_vm8, %v15862_v41 }
0x10bc   : > { %v6911_v62 = vpop.f32.mrf.mxu2  ;;  %v7024_v1 = vpop.f32.mrf.mxu3 }
0x10bd   : > { %v7025_v6 = vadd.f32 %v7024_v1, %v6911_v62  ;;  %8265 = vmatpush.msrb.mxu0 %v8145_v30 }
0x10bf   : > { %9294 = vmatmul.msk.f32.gmra.mxu0 %vm1826_vm8, %v7025_v6  ;;  %v2211_v16 = vpop.permute.xlu2 %2210  ;;  %v8144_v34 = vld [vmem:[#allocation3 + $0x3d8] sm:$0xff] }
0x10c0   : > { %2281 = vst.msk [vmem:[#allocation3 + $0x3d0] sm:$0xff] %vm1826_vm8, %v2211_v16  ;;  %8266 = vmatpush.msrb.mxu0 %v8144_v34 }
0x10c1   : > { %9343 = vmatmul.msk.f32.gmra.mxu2 %vm1826_vm8, %v15865_v11 }
0x10c2   : > { %v2175_v15 = vpop.permute.xlu0 %2174  ;;  %v8126_v28 = vld [vmem:[#allocation3 + $0x348] sm:$0xff] }
0x10c3   : > { %2263 = vst.msk [vmem:[#allocation3 + $0x340] sm:$0xff] %vm1826_vm8, %v2175_v15  ;;  %8155 = vmatpush.msrb.mxu3 %v8126_v28  ;;  %9313 = vmatmul.msk.f32.gmra.mxu1 %vm1826_vm8, %v15867_v26  ;;  %v17606_v28 = vld [vmem:[#allocation55_spill] sm:$0xff] }
0x10c4   : > { %v6914_v55 = vpop.f32.mrf.mxu2  ;;  %v7027_v32 = vpop.f32.mrf.mxu3 }
0x10c5   : > { %v7028_v0 = vadd.f32 %v7027_v32, %v6914_v55  ;;  %v17608_v55 = vld [vmem:[#allocation49_spill] sm:$0xff] }
0x10c6   : > { %v17611_v32 = vld [vmem:[#allocation53_spill] sm:$0xff] }
0x10c7   : > { %9295 = vmatmul.msk.f32.gmra.mxu0 %vm1826_vm8, %v7028_v0  ;;  %v8143_v20 = vld [vmem:[#allocation3 + $0x3d0] sm:$0xff]  ;;  %v17612_v0 = vld [vmem:[#allocation108_spill] sm:$0xff] }
0x10c8   : > { %8267 = vmatpush.msrb.mxu0 %v8143_v20  ;;  %v15953_v17 = vpop.f32.mrf.mxu1  ;;  %v17614_v20 = vld [vmem:[#allocation103_spill] sm:$0xff] }
0x10c9   : > { %9344 = vmatmul.msk.f32.gmra.mxu2 %vm1826_vm8, %v15862_v41 }
0x10ca   : > { %v2173_v11 = vpop.permute.xlu0 %2172  ;;  %v8125_v61 = vld [vmem:[#allocation3 + $0x340] sm:$0xff] }
0x10cb   : > { %2262 = vst.msk [vmem:[#allocation3 + $0x338] sm:$0xff] %vm1826_vm8, %v2173_v11  ;;  %8156 = vmatpush.msrb.mxu3 %v8125_v61  ;;  %9314 = vmatmul.msk.f32.gmra.mxu1 %vm1826_vm8, %v15873_v5  ;;  %v17615_v11 = vld [vmem:[#allocation92_spill] sm:$0xff] }
0x10cc   : > { %v6917_v39 = vpop.f32.mrf.mxu2  ;;  %v7030_v60 = vpop.f32.mrf.mxu3  ;;  %v17616_v61 = vld [vmem:[#allocation40_spill] sm:$0xff] }
0x10cd   : > { %v7031_v3 = vadd.f32 %v7030_v60, %v6917_v39  ;;  %v17618_v39 = vld [vmem:[#allocation38_spill] sm:$0xff] }
0x10ce   : > { %v17619_v60 = vld [vmem:[#allocation90_spill] sm:$0xff] }
0x10cf   : > { %9296 = vmatmul.msk.f32.gmra.mxu0 %vm1826_vm8, %v7031_v3  ;;  %v17620_v3 = vld [vmem:[#allocation96_spill] sm:$0xff] }
0x10d1   : > { %9345 = vmatmul.msk.f32.gmra.mxu2 %vm1826_vm8, %v15867_v26  ;;  %v15964_v26 = vpop.f32.mrf.mxu1 }
0x10d2   : > { %v8124_v41 = vld [vmem:[#allocation3 + $0x338] sm:$0xff] }
0x10d3   : > { %8157 = vmatpush.msrb.mxu3 %v8124_v41  ;;  %9315 = vmatmul.msk.f32.gmra.mxu1 %vm1826_vm8, %v15870_v43 }
0x10d4   : > { %v6920_v51 = vpop.f32.mrf.mxu2  ;;  %v7033_v31 = vpop.f32.mrf.mxu3 }
0x10d5   : > { %v7034_v56 = vadd.f32 %v7033_v31, %v6920_v51 }
0x10d7   : > { %9297 = vmatmul.msk.f32.gmra.mxu0 %vm1826_vm8, %v7034_v56 }
0x10d9   : > { %9346 = vmatmul.msk.f32.gmra.mxu2 %vm1826_vm8, %v15873_v5  ;;  %v15978_v48 = vpop.f32.mrf.mxu1 }
0x10db   : > { %9316 = vmatmul.msk.f32.gmra.mxu1 %vm1826_vm8, %v15875_v22 }
0x10dc   : > { %v15966_v7 = vpop.f32.mrf.mxu2 }
0x10dd   : > { %v7636_v18 = vmax.f32 %v15953_v17, %v15966_v7 }
0x10df   : > { %7637 = vmax.xlane.f32.xlu0 %v7636_v18 }
0x10e1   : > { %9347 = vmatmul.msk.f32.gmra.mxu2 %vm1826_vm8, %v15870_v43  ;;  %v15988_v1 = vpop.f32.mrf.mxu1 }
0x10e3   : > { %9317 = vmatmul.msk.f32.gmra.mxu1 %vm1826_vm8, %v15881_v53 }
0x10e4   : > { %v15974_v9 = vpop.f32.mrf.mxu2 }
0x10e5   : > { %v7639_v5 = vmax.f32 %v15964_v26, %v15974_v9 }
0x10e7   : > { %7640 = vmax.xlane.f32.xlu1 %v7639_v5 }
0x10e9   : > { %9348 = vmatmul.msk.f32.gmra.mxu2 %vm1826_vm8, %v15875_v22  ;;  %v16000_v6 = vpop.f32.mrf.mxu1 }
0x10eb   : > { %9318 = vmatmul.msk.f32.gmra.mxu1 %vm1826_vm8, %v15878_v45 }
0x10ec   : > { %v15984_v62 = vpop.f32.mrf.mxu2 }
0x10ed   : > { %v7642_v43 = vmax.f32 %v15978_v48, %v15984_v62 }
0x10ef   : > { %7643 = vmax.xlane.f32.xlu2 %v7642_v43 }
0x10f1   : > { %9349 = vmatmul.msk.f32.gmra.mxu2 %vm1826_vm8, %v15881_v53  ;;  %v16012_v34 = vpop.f32.mrf.mxu1 }
0x10f3   : > { %9319 = vmatmul.msk.f32.gmra.mxu1 %vm1826_vm8, %v15883_v23 }
0x10f4   : > { %v15994_v30 = vpop.f32.mrf.mxu2 }
0x10f5   : > { %v7645_v22 = vmax.f32 %v15988_v1, %v15994_v30 }
0x10f7   : > { %7646 = vmax.xlane.f32.xlu2 %v7645_v22 }
0x10f9   : > { %9350 = vmatmul.msk.f32.gmra.mxu2 %vm1826_vm8, %v15878_v45  ;;  %v16068_v51 = vpop.f32.mrf.mxu1 }
0x10fb   : > { %9320 = vmatmul.msk.f32.gmra.mxu1 %vm1826_vm8, %v15886_v59 }
0x10fc   : > { %v16004_v16 = vpop.f32.mrf.mxu2 }
0x10fd   : > { %v7648_v53 = vmax.f32 %v16000_v6, %v16004_v16 }
0x10ff   : > { %7649 = vmax.xlane.f32.xlu1 %v7648_v53 }
0x1101   : > { %9351 = vmatmul.msk.f32.gmra.mxu2 %vm1826_vm8, %v15883_v23  ;;  %v17607_v23 = vld [vmem:[#allocation107_spill] sm:$0xff]  ;;  %v16076_v22 = vpop.f32.mrf.mxu1 }
0x1103   : > { %9321 = vmatmul.msk.f32.gmra.mxu1 %vm1826_vm8, %v15893_v38 }
0x1104   : > { %v16014_v45 = vpop.f32.mrf.mxu2 }
0x1105   : > { %v7651_v15 = vmax.f32 %v16012_v34, %v16014_v45 }
0x1107   : > { %7652 = vmax.xlane.f32.xlu0 %v7651_v15 }
0x1109   : > { %9352 = vmatmul.msk.f32.gmra.mxu2 %vm1826_vm8, %v15886_v59  ;;  %v17609_v59 = vld [vmem:[#allocation99_spill] sm:$0xff] }
0x110b   : > { %9322 = vmatmul.msk.f32.gmra.mxu1 %vm1826_vm8, %v15889_v27 }
0x110c   : > { %v16066_v41 = vpop.f32.mrf.mxu2 }
0x110d   : > { %v7654_v31 = vmax.f32 %v16068_v51, %v16066_v41 }
0x110f   : > { %2208 = vrot.lane.b32.xlu2 %v17606_v28, %s10790_s24 }
0x1111   : > { %9353 = vmatmul.msk.f32.gmra.mxu2 %vm1826_vm8, %v15893_v38  ;;  %v17610_v38 = vld [vmem:[#allocation47_spill] sm:$0xff] }
0x1113   : > { %9323 = vmatmul.msk.f32.gmra.mxu1 %vm1826_vm8, %v15899_v19 }
0x1114   : > { %v16074_v43 = vpop.f32.mrf.mxu2 }
0x1117   : > { %7336 = vrot.lane.b32.xlu2 %v17607_v23, %s10790_s24  ;;  %v7657_v23 = vmax.f32 %v16076_v22, %v16074_v43 }
0x1118   : > { %2170 = vrot.lane.b32.xlu1 %v17608_v55, %s10790_s24 }
0x1119   : > { %9354 = vmatmul.msk.f32.gmra.mxu2 %vm1826_vm8, %v15889_v27  ;;  %v17613_v27 = vld [vmem:[#allocation39_spill] sm:$0xff] }
0x111b   : > { %2202 = vrot.lane.b32.xlu0 %v17609_v59, %s10790_s24  ;;  %9324 = vmatmul.msk.f32.gmra.mxu1 %vm1826_vm8, %v15910_v49 }
0x111f   : > { %2168 = vrot.lane.b32.xlu2 %v17610_v38, %s10790_s24 }
0x1120   : > { %2206 = vrot.lane.b32.xlu1 %v17611_v32, %s10790_s24 }
0x1121   : > { %9355 = vmatmul.msk.f32.gmra.mxu2 %vm1826_vm8, %v15899_v19  ;;  %v17617_v19 = vld [vmem:[#allocation44_spill] sm:$0xff] }
0x1123   : > { %7338 = vrot.lane.b32.xlu0 %v17612_v0, %s10790_s24  ;;  %v16086_v0 = vpop.f32.mrf.mxu1 }
0x1127   : > { %2166 = vrot.lane.b32.xlu2 %v17613_v27, %s10790_s24 }
0x1128   : > { %2204 = vrot.lane.b32.xlu1 %v17614_v20, %s10790_s24 }
0x1129   : > { %9356 = vmatmul.msk.f32.gmra.mxu2 %vm1826_vm8, %v15910_v49  ;;  %v17621_v49 = vld [vmem:[#allocation45_spill] sm:$0xff] }
0x112b   : > { %2198 = vrot.lane.b32.xlu0 %v17615_v11, %s10790_s24 }
0x112f   : > { %2164 = vrot.lane.b32.xlu2 %v17616_v61, %s10790_s24 }
0x1133   : > { %2158 = vrot.lane.b32.xlu0 %v17617_v19, %s10790_s24 }
0x1137   : > { %2162 = vrot.lane.b32.xlu2 %v17618_v39, %s10790_s24 }
0x113b   : > { %2196 = vrot.lane.b32.xlu0 %v17619_v60, %s10790_s24  ;;  %v17623_v60 = vld [vmem:[#allocation109_spill] sm:$0xff] }
0x113f   : > { %2200 = vrot.lane.b32.xlu2 %v17620_v3, %s10790_s24 }
0x1147   : > { %2160 = vrot.lane.b32.xlu2 %v17621_v49, %s10790_s24 }
0x1152   : > { %7655 = vmax.xlane.f32.xlu1 %v7654_v31  ;;  %v7638_v56 = vpop.xlane.xlu0 %7637 }
0x1153   : > { %v7732_v18 = vsub.f32 %v15953_v17, %v7638_v56  ;;  %v7733_v5 = vsub.f32 %v15966_v7, %v7638_v56  ;;  %v16082_v7 = vpop.f32.mrf.mxu2 }
0x1155   : > { %v7796_v53 = vmul.f32 1.442695, %v7732_v18  ;;  %v7798_v15 = vmul.f32 1.442695, %v7733_v5  ;;  %v16109_v5 = vpop.f32.mrf.mxu1 }
0x1157   : > { %10296 = vpow2.f32 %v7796_v53  ;;  %v17624_v53 = vld [vmem:[#allocation79_spill] sm:$0xff] }
0x1158   : > { %10298 = vpow2.f32 %v7798_v15 }
0x115a   : > { %v7641_v31 = vpop.xlane.xlu1 %7640 }
0x115b   : > { %v16107_v49 = vpop.f32.mrf.mxu2 }
0x115d   : > { %v16084_v32 = vpop.eup %10296 }
0x115e   : > { %v16090_v20 = vpop.eup %10298 }
0x115f   : > { %v7924_v11 = vadd.f32 %v16090_v20, %v16084_v32 }
0x1162   : > { %v7644_v28 = vpop.xlane.xlu2 %7643 }
0x1163   : > { %v7736_v55 = vsub.f32 %v15978_v48, %v7644_v28  ;;  %v7737_v59 = vsub.f32 %v15984_v62, %v7644_v28  ;;  %v7660_v48 = vmax.f32 %v16086_v0, %v16082_v7  ;;  %v17622_v62 = vld [vmem:[#allocation88_spill] sm:$0xff] }
0x1165   : > { %v7804_v38 = vmul.f32 1.442695, %v7736_v55  ;;  %7658 = vmax.xlane.f32.xlu0 %v7657_v23  ;;  %v7806_v17 = vmul.f32 1.442695, %v7737_v59  ;;  %v16118_v23 = vpop.f32.mrf.mxu2  ;;  %v16120_v55 = vpop.f32.mrf.mxu1 }
0x1167   : > { %10300 = vpow2.f32 %v7804_v38  ;;  %v17625_v38 = vld [vmem:[#allocation82_spill] sm:$0xff] }
0x1168   : > { %10302 = vpow2.f32 %v7806_v17  ;;  %v17626_v17 = vld [vmem:[#allocation112_spill] sm:$0xff] }
0x116a   : > { %v16088_v27 = vpop.xlane.xlu2 %7646 }
0x116b   : > { %2194 = vrot.lane.b32.xlu1 %v17622_v62, %s10790_s24 }
0x116d   : > { %7661 = vmax.xlane.f32.xlu0 %v7660_v48  ;;  %v16098_v61 = vpop.eup %10300 }
0x116e   : > { %v16100_v19 = vpop.eup %10302 }
0x116f   : > { %v7930_v3 = vadd.f32 %v16100_v19, %v16098_v61 }
0x1170   : > { %7925 = vadd.xlane.f32.xlu2 %v7924_v11  ;;  %v16128_v11 = vpop.f32.mrf.mxu0 }
0x1172   : > { %v2209_v39 = vpop.permute.xlu2 %2208  ;;  %v16115_v15 = vpop.xlane.xlu1 %7649 }
0x1173   : > { %2280 = vst.msk [vmem:[#allocation3 + $0x3c8] sm:$0xff] %vm1826_vm8, %v2209_v39  ;;  %7340 = vrot.lane.b32.xlu1 %v17623_v60, %s10790_s24  ;;  %v16132_v60 = vpop.f32.mrf.mxu2 }
0x1175   : > { %7931 = vadd.xlane.f32.xlu0 %v7930_v3  ;;  %v16135_v3 = vpop.f32.mrf.mxu1 }
0x117a   : > { %v7337_v56 = vpop.permute.xlu2 %7336  ;;  %v8142_v18 = vld [vmem:[#allocation3 + $0x3c8] sm:$0xff]  ;;  %v16122_v59 = vpop.xlane.xlu0 %7652 }
0x117b   : > { %2190 = vrot.lane.b32.xlu1 %v17624_v53, %s10790_s24  ;;  %9325 = vmatmul.msk.f32.gmra.mxu1 %vm1826_vm8, %v7337_v56  ;;  %v7735_v53 = vsub.f32 %v15974_v9, %v7641_v31  ;;  %v16147_v9 = vpop.f32.mrf.mxu2 }
0x117c   : > { %9357 = vmatmul.msk.f32.gmra.mxu2 %vm1826_vm8, %v7337_v56  ;;  %8268 = vmatpush.msrb.mxu0 %v8142_v18  ;;  %v17627_v56 = vld [vmem:[#allocation110_spill] sm:$0xff]  ;;  %v7734_v18 = vsub.f32 %v15964_v26, %v7641_v31 }
0x117d   : > { %v7802_v50 = vmul.f32 1.442695, %v7735_v53  ;;  %v16149_v31 = vpop.f32.mrf.mxu1 }
0x1182   : > { %v2169_v28 = vpop.permute.xlu2 %2168 }
0x1183   : > { %2260 = vst.msk [vmem:[#allocation3 + $0x328] sm:$0xff] %vm1826_vm8, %v2169_v28 }
0x1185   : > { %v16173_v4 = vpop.f32.mrf.mxu1 }
0x1188   : > { %2192 = vrot.lane.b32.xlu2 %v17625_v38, %s10790_s24 }
0x1189   : > { %7344 = vrot.lane.b32.xlu0 %v17626_v17, %s10790_s24 }
0x118a   : > { %v2171_v48 = vpop.permute.xlu1 %2170  ;;  %v2167_v62 = vpop.permute.xlu2 %2166 }
0x118b   : > { %2261 = vst.msk [vmem:[#allocation3 + $0x330] sm:$0xff] %vm1826_vm8, %v2171_v48  ;;  %v8122_v48 = vld [vmem:[#allocation3 + $0x328] sm:$0xff] }
0x118c   : > { %2259 = vst.msk [vmem:[#allocation3 + $0x320] sm:$0xff] %vm1826_vm8, %v2167_v62  ;;  %v16143_v62 = vpop.f32.mrf.mxu0 }
0x118d   : > { %v2203_v39 = vpop.permute.xlu0 %2202 }
0x118e   : > { %2277 = vst.msk [vmem:[#allocation3 + $0x3b0] sm:$0xff] %vm1826_vm8, %v2203_v39  ;;  %v7800_v39 = vmul.f32 1.442695, %v7734_v18 }
0x1190   : > { %7342 = vrot.lane.b32.xlu2 %v17627_v56, %s10790_s24  ;;  %10304 = vpow2.f32 %v7800_v39  ;;  %v7739_v39 = vsub.f32 %v15994_v30, %v16088_v27 }
0x1191   : > { %10306 = vpow2.f32 %v7802_v50  ;;  %v7738_v50 = vsub.f32 %v15988_v1, %v16088_v27 }
0x1192   : > { %v2207_v28 = vpop.permute.xlu1 %2206  ;;  %v2165_v38 = vpop.permute.xlu2 %2164  ;;  %v8123_v17 = vld [vmem:[#allocation3 + $0x330] sm:$0xff]  ;;  %v7810_v30 = vmul.f32 1.442695, %v7739_v39 }
0x1193   : > { %2279 = vst.msk [vmem:[#allocation3 + $0x3c0] sm:$0xff] %vm1826_vm8, %v2207_v28  ;;  %8158 = vmatpush.msrb.mxu3 %v8123_v17  ;;  %v8121_v26 = vld [vmem:[#allocation3 + $0x320] sm:$0xff] }
0x1194   : > { %2258 = vst.msk [vmem:[#allocation3 + $0x318] sm:$0xff] %vm1826_vm8, %v2165_v38  ;;  %v16156_v17 = vpop.f32.mrf.mxu0 }
0x1195   : > { %v7339_v54 = vpop.permute.xlu0 %7338  ;;  %8159 = vmatpush.msrb.mxu3 %v8122_v48 }
0x1196   : > { %9326 = vmatmul.msk.f32.gmra.mxu1 %vm1826_vm8, %v7339_v54  ;;  %9358 = vmatmul.msk.f32.gmra.mxu2 %vm1826_vm8, %v7339_v54  ;;  %v16154_v54 = vpop.eup %10304 }
0x1197   : > { %8160 = vmatpush.msrb.mxu3 %v8121_v26  ;;  %v16160_v48 = vpop.eup %10306  ;;  %v7740_v26 = vsub.f32 %v16000_v6, %v16115_v15  ;;  %v8139_v6 = vld [vmem:[#allocation3 + $0x3b0] sm:$0xff] }
0x1198   : > { %v7927_v1 = vadd.f32 %v16160_v48, %v16154_v54 }
0x1199   : > { %v7812_v27 = vmul.f32 1.442695, %v7740_v26 }
0x119a   : > { %v2205_v56 = vpop.permute.xlu1 %2204  ;;  %v2163_v28 = vpop.permute.xlu2 %2162  ;;  %v8141_v38 = vld [vmem:[#allocation3 + $0x3c0] sm:$0xff] }
0x119b   : > { %2278 = vst.msk [vmem:[#allocation3 + $0x3b8] sm:$0xff] %vm1826_vm8, %v2205_v56  ;;  %v8120_v18 = vld [vmem:[#allocation3 + $0x318] sm:$0xff]  ;;  %8269 = vmatpush.msrb.mxu0 %v8141_v38  ;;  %v16166_v56 = vpop.f32.mrf.mxu2 }
0x119c   : > { %2257 = vst.msk [vmem:[#allocation3 + $0x310] sm:$0xff] %vm1826_vm8, %v2163_v28  ;;  %8161 = vmatpush.msrb.mxu3 %v8120_v18  ;;  %v7741_v28 = vsub.f32 %v16004_v16, %v16115_v15  ;;  %v16176_v15 = vpop.f32.mrf.mxu0 }
0x119d   : > { %v2199_v53 = vpop.permute.xlu0 %2198 }
0x119e   : > { %2275 = vst.msk [vmem:[#allocation3 + $0x3a0] sm:$0xff] %vm1826_vm8, %v2199_v53  ;;  %v7808_v53 = vmul.f32 1.442695, %v7738_v50  ;;  %v7814_v16 = vmul.f32 1.442695, %v7741_v28  ;;  %v7742_v50 = vsub.f32 %v16012_v34, %v16122_v59 }
0x11a0   : > { %10308 = vpow2.f32 %v7808_v53  ;;  %v7816_v53 = vmul.f32 1.442695, %v7742_v50 }
0x11a1   : > { %10310 = vpow2.f32 %v7810_v30 }
0x11a2   : > { %v2201_v38 = vpop.permute.xlu2 %2200  ;;  %v8140_v18 = vld [vmem:[#allocation3 + $0x3b8] sm:$0xff]  ;;  %10312 = vpow2.f32 %v7812_v27 }
0x11a3   : > { %2276 = vst.msk [vmem:[#allocation3 + $0x3a8] sm:$0xff] %vm1826_vm8, %v2201_v38  ;;  %v8119_v29 = vld [vmem:[#allocation3 + $0x310] sm:$0xff]  ;;  %8270 = vmatpush.msrb.mxu0 %v8140_v18  ;;  %10314 = vpow2.f32 %v7814_v16  ;;  %v7666_v38 = vmax.f32 %v16120_v55, %v16118_v23 }
0x11a4   : > { %8162 = vmatpush.msrb.mxu3 %v8119_v29  ;;  %v7743_v29 = vsub.f32 %v16014_v45, %v16122_v59  ;;  %v16191_v45 = vpop.f32.mrf.mxu1  ;;  %10316 = vpow2.f32 %v7816_v53  ;;  %v16200_v50 = vpop.f32.mrf.mxu0  ;;  %v7663_v53 = vmax.f32 %v16109_v5, %v16107_v49 }
0x11a5   : > { %v2159_v57 = vpop.permute.xlu0 %2158  ;;  %7928 = vadd.xlane.f32.xlu1 %v7927_v1  ;;  %8271 = vmatpush.msrb.mxu0 %v8139_v6  ;;  %v8137_v28 = vld [vmem:[#allocation3 + $0x3a0] sm:$0xff] }
0x11a6   : > { %2255 = vst.msk [vmem:[#allocation3 + $0x300] sm:$0xff] %vm1826_vm8, %v2159_v57  ;;  %v16185_v57 = vpop.f32.mrf.mxu2  ;;  %v16187_v18 = vpop.eup %10308  ;;  %v7818_v59 = vmul.f32 1.442695, %v7743_v29 }
0x11a7   : > { %v16189_v34 = vpop.eup %10310 }
0x11a8   : > { %v16194_v30 = vpop.eup %10312  ;;  %v7933_v27 = vadd.f32 %v16189_v34, %v16187_v18  ;;  %10318 = vpow2.f32 %v7818_v59 }
0x11a9   : > { %v16196_v6 = vpop.eup %10314 }
0x11aa   : > { %v2161_v39 = vpop.permute.xlu2 %2160  ;;  %v8138_v26 = vld [vmem:[#allocation3 + $0x3a8] sm:$0xff] }
0x11ab   : > { %2256 = vst.msk [vmem:[#allocation3 + $0x308] sm:$0xff] %vm1826_vm8, %v2161_v39  ;;  %8272 = vmatpush.msrb.mxu0 %v8138_v26  ;;  %v7936_v39 = vadd.f32 %v16196_v6, %v16194_v30 }
0x11ac   : > { %v16212_v59 = vpop.f32.mrf.mxu1 }
0x11ad   : > { %v2197_v1 = vpop.permute.xlu0 %2196  ;;  %7667 = vmax.xlane.f32.xlu1 %v7666_v38  ;;  %8273 = vmatpush.msrb.mxu0 %v8137_v28  ;;  %v8117_v29 = vld [vmem:[#allocation3 + $0x300] sm:$0xff]  ;;  %v16206_v28 = vpop.eup %10316 }
0x11ae   : > { %2274 = vst.msk [vmem:[#allocation3 + $0x398] sm:$0xff] %vm1826_vm8, %v2197_v1  ;;  %v16204_v38 = vpop.f32.mrf.mxu2  ;;  %v16210_v1 = vpop.eup %10318 }
0x11b2   : > { %v8118_v16 = vld [vmem:[#allocation3 + $0x308] sm:$0xff] }
0x11b3   : > { %7934 = vadd.xlane.f32.xlu0 %v7933_v27  ;;  %8163 = vmatpush.msrb.mxu3 %v8118_v16  ;;  %v7681_v27 = vmax.f32 %v16212_v59, %v16204_v38  ;;  %v7939_v16 = vadd.f32 %v16210_v1, %v16206_v28 }
0x11b5   : > { %7937 = vadd.xlane.f32.xlu1 %v7936_v39  ;;  %8164 = vmatpush.msrb.mxu3 %v8117_v29  ;;  %v8136_v26 = vld [vmem:[#allocation3 + $0x398] sm:$0xff]  ;;  %v16218_v39 = vpop.f32.mrf.mxu0  ;;  %v7669_v29 = vmax.f32 %v16135_v3, %v16132_v60 }
0x11b6   : > { %8274 = vmatpush.msrb.mxu0 %v8136_v26 }
0x11b9   : > { %7664 = vmax.xlane.f32.xlu2 %v7663_v53  ;;  %v7672_v53 = vmax.f32 %v16149_v31, %v16147_v9 }
0x11bb   : > { %7682 = vmax.xlane.f32.xlu0 %v7681_v27 }
0x11bd   : > { %7940 = vadd.xlane.f32.xlu1 %v7939_v16  ;;  %v16224_v12 = vpop.f32.mrf.mxu0  ;;  %v7675_v16 = vmax.f32 %v16173_v4, %v16166_v56 }
0x11be   : > { %17628 = vst [vmem:[#allocation125_spill] sm:$0xff] %v16224_v12 }
0x11c1   : > { %7670 = vmax.xlane.f32.xlu2 %v7669_v29 }
0x11c5   : > { %v7656_v26 = vpop.xlane.xlu1 %7655 }
0x11c6   : > { %v7744_v44 = vsub.f32 %v16068_v51, %v7656_v26  ;;  %v7745_v52 = vsub.f32 %v16066_v41, %v7656_v26  ;;  %v16234_v51 = vpop.f32.mrf.mxu0 }
0x11c7   : > { %17629 = vst [vmem:[#allocation126_spill] sm:$0xff] %v16234_v51 }
0x11c8   : > { %v7820_v27 = vmul.f32 1.442695, %v7744_v44  ;;  %v7822_v24 = vmul.f32 1.442695, %v7745_v52  ;;  %v7678_v52 = vmax.f32 %v16191_v45, %v16185_v57 }
0x11c9   : > { %7673 = vmax.xlane.f32.xlu2 %v7672_v53 }
0x11ca   : > { %10320 = vpow2.f32 %v7820_v27 }
0x11cb   : > { %10322 = vpow2.f32 %v7822_v24 }
0x11ce   : > { %v16242_v53 = vpop.f32.mrf.mxu0 }
0x11cf   : > { %17630 = vst [vmem:[#allocation75_spill] sm:$0xff] %v16242_v53 }
0x11d0   : > { %v16230_v35 = vpop.eup %10320 }
0x11d1   : > { %v16232_v29 = vpop.eup %10322  ;;  %7676 = vmax.xlane.f32.xlu2 %v7675_v16 }
0x11d2   : > { %v7942_v41 = vadd.f32 %v16232_v29, %v16230_v35 }
0x11d4   : > { %7943 = vadd.xlane.f32.xlu1 %v7942_v41 }
0x11d8   : > { %v7659_v44 = vpop.xlane.xlu0 %7658 }
0x11d9   : > { %v7746_v24 = vsub.f32 %v16076_v22, %v7659_v44  ;;  %v7747_v26 = vsub.f32 %v16074_v43, %v7659_v44  ;;  %7679 = vmax.xlane.f32.xlu2 %v7678_v52  ;;  %v16251_v44 = vpop.f32.mrf.mxu0 }
0x11da   : > { %17631 = vst [vmem:[#allocation68_spill] sm:$0xff] %v16251_v44 }
0x11db   : > { %v7824_v27 = vmul.f32 1.442695, %v7746_v24  ;;  %v7826_v33 = vmul.f32 1.442695, %v7747_v26 }
0x11dd   : > { %10324 = vpow2.f32 %v7824_v27  ;;  %v2195_v36 = vpop.permute.xlu1 %2194 }
0x11de   : > { %10326 = vpow2.f32 %v7826_v33  ;;  %2273 = vst.msk [vmem:[#allocation3 + $0x390] sm:$0xff] %vm1826_vm8, %v2195_v36 }
0x11e0   : > { %v7662_v16 = vpop.xlane.xlu0 %7661 }
0x11e1   : > { %v7748_v41 = vsub.f32 %v16086_v0, %v7662_v16  ;;  %v7749_v14 = vsub.f32 %v16082_v7, %v7662_v16 }
0x11e3   : > { %v16247_v8 = vpop.eup %10324  ;;  %v7828_v22 = vmul.f32 1.442695, %v7748_v41  ;;  %v7830_v63 = vmul.f32 1.442695, %v7749_v14  ;;  %v7926_v43 = vpop.xlane.xlu2 %7925 }
0x11e4   : > { %v16249_v52 = vpop.eup %10326  ;;  %10328 = vrcp.f32 %v7926_v43  ;;  %v16266_v41 = vpop.f32.mrf.mxu0 }
0x11e5   : > { %10330 = vpow2.f32 %v7828_v22  ;;  %v7341_v24 = vpop.permute.xlu1 %7340  ;;  %v7945_v36 = vadd.f32 %v16249_v52, %v16247_v8  ;;  %v8135_v33 = vld [vmem:[#allocation3 + $0x390] sm:$0xff]  ;;  %17632 = vst [vmem:[#allocation42_spill] sm:$0xff] %v16266_v41  ;;  %v16268_v22 = vpop.f32.mrf.mxu2 }
0x11e6   : > { %10332 = vpow2.f32 %v7830_v63  ;;  %9327 = vmatmul.msk.f32.gmra.mxu1 %vm1826_vm8, %v7341_v24  ;;  %9359 = vmatmul.msk.f32.gmra.mxu2 %vm1826_vm8, %v7341_v24 }
0x11e7   : > { %7946 = vadd.xlane.f32.xlu1 %v7945_v36  ;;  %8275 = vmatpush.msrb.mxu0 %v8135_v33  ;;  %v16270_v36 = vpop.f32.mrf.mxu1 }
0x11e8   : > { %v7932_v43 = vpop.xlane.xlu0 %7931  ;;  %v7684_v33 = vmax.f32 %v16270_v36, %v16268_v22 }
0x11ea   : > { %v10329_v14 = vpop.eup %10328 }
0x11eb   : > { %v16257_v7 = vpop.eup %10330  ;;  %v8052_v0 = vmul.f32 %v10329_v14, %v16084_v32  ;;  %v2193_v26 = vpop.permute.xlu2 %2192 }
0x11ec   : > { %v16260_v27 = vpop.eup %10332  ;;  %2272 = vst.msk [vmem:[#allocation3 + $0x388] sm:$0xff] %vm1826_vm8, %v2193_v26  ;;  %v8053_v26 = vmul.f32 %v10329_v14, %v16090_v20 }
0x11ed   : > { %v2191_v16 = vpop.permute.xlu1 %2190  ;;  %8165 = vmatmul.f32.vlgmr.msrb.gmra.mxu3 %v8052_v0  ;;  %v7948_v63 = vadd.f32 %v16260_v27, %v16257_v7 }
0x11ee   : > { %2271 = vst.msk [vmem:[#allocation3 + $0x380] sm:$0xff] %vm1826_vm8, %v2191_v16  ;;  %v16277_v16 = vpop.f32.mrf.mxu0 }
0x11ef   : > { %7949 = vadd.xlane.f32.xlu1 %v7948_v63  ;;  %17633 = vst [vmem:[#allocation69_spill] sm:$0xff] %v16277_v16 }
0x11f3   : > { %v7343_v24 = vpop.permute.xlu2 %7342  ;;  %v8134_v32 = vld [vmem:[#allocation3 + $0x388] sm:$0xff] }
0x11f4   : > { %9328 = vmatmul.msk.f32.gmra.mxu1 %vm1826_vm8, %v7343_v24  ;;  %9360 = vmatmul.msk.f32.gmra.mxu2 %vm1826_vm8, %v7343_v24 }
0x11f5   : > { %8276 = vmatpush.msrb.mxu0 %v8134_v32  ;;  %v8133_v0 = vld [vmem:[#allocation3 + $0x380] sm:$0xff] }
0x11f6   : > { %v16281_v41 = vpop.f32.mrf.mxu0 }
0x11f7   : > { %7685 = vmax.xlane.f32.xlu1 %v7684_v33  ;;  %8277 = vmatpush.msrb.mxu0 %v8133_v0  ;;  %17634 = vst [vmem:[#allocation77_spill] sm:$0xff] %v16281_v41  ;;  %v16293_v41 = vpop.f32.mrf.mxu2 }
0x11f8   : > { %8278 = vmatmul.f32.vlgmr.msrb.gmra.mxu0 %v8053_v26 }
0x11fb   : > { %v7345_v63 = vpop.permute.xlu0 %7344 }
0x11fc   : > { %9329 = vmatmul.msk.f32.gmra.mxu1 %vm1826_vm8, %v7345_v63  ;;  %9361 = vmatmul.msk.f32.gmra.mxu2 %vm1826_vm8, %v7345_v63 }
0x11fe   : > { %v16283_v24 = vpop.f32.mrf.mxu0 }
0x11ff   : > { %17635 = vst [vmem:[#allocation76_spill] sm:$0xff] %v16283_v24 }
0x1206   : > { %v16285_v37 = vpop.f32.mrf.mxu0 }
0x1207   : > { %17636 = vst [vmem:[#allocation71_spill] sm:$0xff] %v16285_v37 }
0x120e   : > { %v16287_v20 = vpop.f32.mrf.mxu0 }
0x120f   : > { %17637 = vst [vmem:[#allocation81_spill] sm:$0xff] %v16287_v20 }
0x1218   : > { %v7929_v32 = vpop.xlane.xlu1 %7928 }
0x1219   : > { %10334 = vrcp.f32 %v7929_v32  ;;  %v16295_v32 = vpop.f32.mrf.mxu1 }
0x121a   : > { %10336 = vrcp.f32 %v7932_v43 }
0x121f   : > { %v10335_v44 = vpop.eup %10334 }
0x1220   : > { %v7668_v14 = vpop.xlane.xlu1 %7667  ;;  %v8054_v33 = vmul.f32 %v10335_v44, %v16154_v54  ;;  %v8055_v0 = vmul.f32 %v10335_v44, %v16160_v48  ;;  %v10337_v16 = vpop.eup %10336 }
0x1221   : > { %v7752_v26 = vsub.f32 %v16120_v55, %v7668_v14  ;;  %v7753_v63 = vsub.f32 %v16118_v23, %v7668_v14  ;;  %v8056_v54 = vmul.f32 %v10337_v16, %v16098_v61  ;;  %v8057_v48 = vmul.f32 %v10337_v16, %v16100_v19  ;;  %v16299_v55 = vpop.f32.mrf.mxu0  ;;  %v16311_v19 = vpop.f32.mrf.mxu1 }
0x1222   : > { %8168 = vmatmul.f32.gmra.mxu3 %v8054_v33  ;;  %8281 = vmatmul.f32.gmra.mxu0 %v8055_v0  ;;  %17638 = vst [vmem:[#allocation70_spill] sm:$0xff] %v16299_v55  ;;  %v16305_v33 = vpop.f32.mrf.mxu2 }
0x1223   : > { %v7836_v37 = vmul.f32 1.442695, %v7752_v26  ;;  %v7838_v24 = vmul.f32 1.442695, %v7753_v63  ;;  %v7690_v55 = vmax.f32 %v16311_v19, %v16305_v33 }
0x1225   : > { %10338 = vpow2.f32 %v7836_v37 }
0x1226   : > { %10340 = vpow2.f32 %v7838_v24  ;;  %v7935_v43 = vpop.xlane.xlu0 %7934 }
0x1227   : > { %10342 = vrcp.f32 %v7935_v43 }
0x1228   : > { %v7938_v23 = vpop.xlane.xlu1 %7937 }
0x1229   : > { %10344 = vrcp.f32 %v7938_v23 }
0x122a   : > { %8171 = vmatmul.f32.gmra.mxu3 %v8056_v54  ;;  %8284 = vmatmul.f32.gmra.mxu0 %v8057_v48 }
0x122b   : > { %v16301_v44 = vpop.eup %10338 }
0x122c   : > { %v16303_v14 = vpop.eup %10340  ;;  %v7665_v0 = vpop.xlane.xlu2 %7664 }
0x122d   : > { %v10343_v37 = vpop.eup %10342  ;;  %v7750_v24 = vsub.f32 %v16109_v5, %v7665_v0  ;;  %v7751_v26 = vsub.f32 %v16107_v49, %v7665_v0  ;;  %v7954_v61 = vadd.f32 %v16303_v14, %v16301_v44  ;;  %v16315_v5 = vpop.f32.mrf.mxu0 }
0x122e   : > { %v8058_v43 = vmul.f32 %v10343_v37, %v16187_v18  ;;  %v8059_v54 = vmul.f32 %v10343_v37, %v16189_v34  ;;  %17639 = vst [vmem:[#allocation31_spill] sm:$0xff] %v16315_v5 }
0x122f   : > { %v7832_v16 = vmul.f32 1.442695, %v7750_v24  ;;  %v7834_v63 = vmul.f32 1.442695, %v7751_v26  ;;  %7955 = vadd.xlane.f32.xlu0 %v7954_v61  ;;  %v10345_v0 = vpop.eup %10344  ;;  %v16321_v26 = vpop.f32.mrf.mxu2 }
0x1230   : > { %v7941_v49 = vpop.xlane.xlu1 %7940 }
0x1231   : > { %10346 = vpow2.f32 %v7832_v16  ;;  %v16327_v16 = vpop.f32.mrf.mxu1 }
0x1232   : > { %10348 = vpow2.f32 %v7834_v63  ;;  %8174 = vmatmul.f32.gmra.mxu3 %v8058_v43  ;;  %8287 = vmatmul.f32.gmra.mxu0 %v8059_v54  ;;  %v8060_v63 = vmul.f32 %v10345_v0, %v16194_v30  ;;  %v8061_v43 = vmul.f32 %v10345_v0, %v16196_v6 }
0x1233   : > { %10350 = vrcp.f32 %v7941_v49 }
0x1234   : > { %v7671_v48 = vpop.xlane.xlu2 %7670 }
0x1235   : > { %v7754_v23 = vsub.f32 %v16135_v3, %v7671_v48  ;;  %v7755_v24 = vsub.f32 %v16132_v60, %v7671_v48  ;;  %v16333_v49 = vpop.f32.mrf.mxu0 }
0x1236   : > { %17640 = vst [vmem:[#allocation52_spill] sm:$0xff] %v16333_v49 }
0x1237   : > { %v16323_v18 = vpop.eup %10346  ;;  %v7840_v34 = vmul.f32 1.442695, %v7754_v23  ;;  %v7842_v37 = vmul.f32 1.442695, %v7755_v24  ;;  %7691 = vmax.xlane.f32.xlu0 %v7690_v55  ;;  %v16341_v24 = vpop.f32.mrf.mxu2 }
0x1238   : > { %v16325_v61 = vpop.eup %10348 }
0x1239   : > { %10352 = vpow2.f32 %v7840_v34  ;;  %v7951_v60 = vadd.f32 %v16325_v61, %v16323_v18  ;;  %v10351_v54 = vpop.eup %10350 }
0x123a   : > { %10354 = vpow2.f32 %v7842_v37  ;;  %8177 = vmatmul.f32.gmra.mxu3 %v8060_v63  ;;  %8290 = vmatmul.f32.gmra.mxu0 %v8061_v43  ;;  %v8062_v34 = vmul.f32 %v10351_v54, %v16206_v28  ;;  %v8063_v37 = vmul.f32 %v10351_v54, %v16210_v1  ;;  %v7687_v63 = vmax.f32 %v16295_v32, %v16293_v41  ;;  %v7683_v43 = vpop.xlane.xlu0 %7682 }
0x123b   : > { %7952 = vadd.xlane.f32.xlu2 %v7951_v60  ;;  %v7762_v54 = vsub.f32 %v16212_v59, %v7683_v43 }
0x123c   : > { %v7674_v3 = vpop.xlane.xlu2 %7673 }
0x123d   : > { %v7756_v55 = vsub.f32 %v16149_v31, %v7674_v3  ;;  %v7757_v48 = vsub.f32 %v16147_v9, %v7674_v3  ;;  %v16349_v9 = vpop.f32.mrf.mxu1  ;;  %v16351_v3 = vpop.f32.mrf.mxu0  ;;  %v7856_v59 = vmul.f32 1.442695, %v7762_v54 }
0x123e   : > { %17641 = vst [vmem:[#allocation80_spill] sm:$0xff] %v16351_v3 }
0x123f   : > { %v16337_v23 = vpop.eup %10352  ;;  %v7844_v30 = vmul.f32 1.442695, %v7756_v55  ;;  %v7846_v6 = vmul.f32 1.442695, %v7757_v48 }
0x1240   : > { %v16339_v0 = vpop.eup %10354 }
0x1241   : > { %10356 = vpow2.f32 %v7844_v30  ;;  %v7957_v31 = vadd.f32 %v16339_v0, %v16337_v23 }
0x1242   : > { %10358 = vpow2.f32 %v7846_v6  ;;  %8180 = vmatmul.f32.gmra.mxu3 %v8062_v34  ;;  %8293 = vmatmul.f32.gmra.mxu0 %v8063_v37  ;;  %v7763_v34 = vsub.f32 %v16204_v38, %v7683_v43  ;;  %v7693_v37 = vmax.f32 %v16327_v16, %v16321_v26 }
0x1243   : > { %7688 = vmax.xlane.f32.xlu2 %v7687_v63  ;;  %7958 = vadd.xlane.f32.xlu1 %v7957_v31 }
0x1244   : > { %v7677_v60 = vpop.xlane.xlu2 %7676  ;;  %v7858_v31 = vmul.f32 1.442695, %v7763_v34 }
0x1245   : > { %v7758_v28 = vsub.f32 %v16173_v4, %v7677_v60  ;;  %v7759_v1 = vsub.f32 %v16166_v56, %v7677_v60  ;;  %v16365_v56 = vpop.f32.mrf.mxu2  ;;  %v16367_v63 = vpop.f32.mrf.mxu1 }
0x1247   : > { %v16356_v55 = vpop.eup %10356  ;;  %v7848_v48 = vmul.f32 1.442695, %v7758_v28  ;;  %v7850_v30 = vmul.f32 1.442695, %v7759_v1  ;;  %v7944_v49 = vpop.xlane.xlu1 %7943 }
0x1248   : > { %v16358_v6 = vpop.eup %10358  ;;  %10360 = vrcp.f32 %v7944_v49  ;;  %v16373_v1 = vpop.f32.mrf.mxu0 }
0x1249   : > { %10362 = vpow2.f32 %v7848_v48  ;;  %v7960_v4 = vadd.f32 %v16358_v6, %v16356_v55  ;;  %17642 = vst [vmem:[#allocation83_spill] sm:$0xff] %v16373_v1 }
0x124a   : > { %10364 = vpow2.f32 %v7850_v30 }
0x124b   : > { %7694 = vmax.xlane.f32.xlu1 %v7693_v37  ;;  %7961 = vadd.xlane.f32.xlu2 %v7960_v4  ;;  %10366 = vpow2.f32 %v7856_v59  ;;  %v8376_v59 = vld [vmem:[#allocation13 + $0x18] sm:$0xff] }
0x124c   : > { %v7680_v60 = vpop.xlane.xlu2 %7679  ;;  %10368 = vpow2.f32 %v7858_v31  ;;  %8488 = vmatpush.msrb.mxu1 %v8376_v59 }
0x124d   : > { %v7760_v38 = vsub.f32 %v16191_v45, %v7680_v60  ;;  %v7761_v49 = vsub.f32 %v16185_v57, %v7680_v60  ;;  %v7696_v45 = vmax.f32 %v16349_v9, %v16341_v24  ;;  %v16389_v4 = vpop.f32.mrf.mxu1 }
0x124e   : > { %v10361_v43 = vpop.eup %10360 }
0x124f   : > { %v16371_v28 = vpop.eup %10362  ;;  %v7852_v48 = vmul.f32 1.442695, %v7760_v38  ;;  %v7854_v3 = vmul.f32 1.442695, %v7761_v49  ;;  %v8064_v54 = vmul.f32 %v10361_v43, %v16230_v35  ;;  %v8065_v30 = vmul.f32 %v10361_v43, %v16232_v29  ;;  %v16385_v35 = vpop.f32.mrf.mxu2 }
0x1250   : > { %v16377_v37 = vpop.eup %10364  ;;  %v16395_v38 = vpop.f32.mrf.mxu0  ;;  %v7702_v59 = vmax.f32 %v16389_v4, %v16385_v35 }
0x1251   : > { %10370 = vpow2.f32 %v7852_v48  ;;  %8183 = vmatmul.f32.gmra.mxu3 %v8064_v54  ;;  %8296 = vmatmul.f32.gmra.mxu0 %v8065_v30  ;;  %v7963_v57 = vadd.f32 %v16377_v37, %v16371_v28  ;;  %v16383_v34 = vpop.eup %10366  ;;  %17643 = vst [vmem:[#allocation34_spill] sm:$0xff] %v16395_v38 }
0x1252   : > { %10372 = vpow2.f32 %v7854_v3  ;;  %v16387_v29 = vpop.eup %10368  ;;  %v7699_v3 = vmax.f32 %v16367_v63, %v16365_v56 }
0x1253   : > { %7697 = vmax.xlane.f32.xlu2 %v7696_v45  ;;  %7964 = vadd.xlane.f32.xlu0 %v7963_v57  ;;  %v7969_v49 = vadd.f32 %v16387_v29, %v16383_v34 }
0x1255   : > { %v16405_v30 = vpop.f32.mrf.mxu1 }
0x1257   : > { %v16391_v31 = vpop.eup %10370  ;;  %v16403_v54 = vpop.f32.mrf.mxu2 }
0x1258   : > { %v16393_v60 = vpop.eup %10372  ;;  %v7705_v57 = vmax.f32 %v16405_v30, %v16403_v54 }
0x1259   : > { %v7966_v43 = vadd.f32 %v16393_v60, %v16391_v31 }
0x125a   : > { %v7947_v48 = vpop.xlane.xlu1 %7946 }
0x125b   : > { %10374 = vrcp.f32 %v7947_v48  ;;  %7970 = vadd.xlane.f32.xlu2 %v7969_v49  ;;  %7700 = vmax.xlane.f32.xlu0 %v7699_v3  ;;  %v16413_v48 = vpop.f32.mrf.mxu0 }
0x125c   : > { %7967 = vadd.xlane.f32.xlu1 %v7966_v43  ;;  %17644 = vst [vmem:[#allocation50_spill] sm:$0xff] %v16413_v48 }
0x1261   : > { %v10375_v45 = vpop.eup %10374 }
0x1262   : > { %v7950_v38 = vpop.xlane.xlu1 %7949  ;;  %v8066_v1 = vmul.f32 %v10375_v45, %v16247_v8  ;;  %v8067_v5 = vmul.f32 %v10375_v45, %v16249_v52 }
0x1263   : > { %10376 = vrcp.f32 %v7950_v38  ;;  %7706 = vmax.xlane.f32.xlu2 %v7705_v57  ;;  %v16419_v8 = vpop.f32.mrf.mxu0 }
0x1264   : > { %7703 = vmax.xlane.f32.xlu1 %v7702_v59  ;;  %8186 = vmatmul.f32.gmra.mxu3 %v8066_v1  ;;  %17645 = vst [vmem:[#allocation67_spill] sm:$0xff] %v16419_v8 }
0x1265   : > { %8299 = vmatmul.f32.gmra.mxu0 %v8067_v5 }
0x1269   : > { %v10377_v3 = vpop.eup %10376 }
0x126a   : > { %v7686_v49 = vpop.xlane.xlu1 %7685  ;;  %v8068_v43 = vmul.f32 %v10377_v3, %v16257_v7  ;;  %v8069_v20 = vmul.f32 %v10377_v3, %v16260_v27 }
0x126b   : > { %v7764_v13 = vsub.f32 %v16270_v36, %v7686_v49  ;;  %v7765_v51 = vsub.f32 %v16268_v22, %v7686_v49  ;;  %v16428_v22 = vpop.f32.mrf.mxu2 }
0x126c   : > { %8189 = vmatmul.f32.gmra.mxu3 %v8068_v43 }
0x126d   : > { %v7860_v52 = vmul.f32 1.442695, %v7764_v13  ;;  %v7862_v45 = vmul.f32 1.442695, %v7765_v51  ;;  %8302 = vmatmul.f32.gmra.mxu0 %v8069_v20  ;;  %v16430_v13 = vpop.f32.mrf.mxu1 }
0x126e   : > { %v7708_v51 = vmax.f32 %v16430_v13, %v16428_v22 }
0x126f   : > { %10378 = vpow2.f32 %v7860_v52 }
0x1270   : > { %10380 = vpow2.f32 %v7862_v45  ;;  %v8166_v5 = vpop.f32.mrf.mxu3 }
0x1275   : > { %v16421_v1 = vpop.eup %10378  ;;  %v8279_v38 = vpop.f32.mrf.mxu0 }
0x1276   : > { %v16423_v57 = vpop.eup %10380  ;;  %v8280_v7 = vadd.f32 %v8279_v38, %v8166_v5 }
0x1277   : > { %v7972_v27 = vadd.f32 %v16423_v57, %v16421_v1 }
0x1278   : > { %9362 = vmatmul.msk.f32.vlgmr.msrb.gmra.mxu1 %vm1826_vm8, %v8280_v7 }
0x1279   : > { %7973 = vadd.xlane.f32.xlu0 %v7972_v27 }
0x1281   : > { %7709 = vmax.xlane.f32.xlu0 %v7708_v51 }
0x129f   : > { %v8282_v36 = vpop.f32.mrf.mxu0 }
0x12a2   : > { %v7956_v20 = vpop.xlane.xlu0 %7955 }
0x12a5   : > { %v8169_v59 = vpop.f32.mrf.mxu3 }
0x12a6   : > { %v8283_v3 = vadd.f32 %v8282_v36, %v8169_v59  ;;  %v16438_v36 = vpop.f32.mrf.mxu2  ;;  %v16440_v59 = vpop.f32.mrf.mxu1 }
0x12a7   : > { %v8285_v49 = vpop.f32.mrf.mxu0 }
0x12a8   : > { %9363 = vmatmul.msk.f32.gmra.mxu1 %vm1826_vm8, %v8283_v3 }
0x12aa   : > { %v7692_v43 = vpop.xlane.xlu0 %7691 }
0x12ab   : > { %v7768_v52 = vsub.f32 %v16311_v19, %v7692_v43  ;;  %v7769_v45 = vsub.f32 %v16305_v33, %v7692_v43 }
0x12ad   : > { %v7868_v5 = vmul.f32 1.442695, %v7768_v52  ;;  %v7870_v38 = vmul.f32 1.442695, %v7769_v45  ;;  %v8172_v7 = vpop.f32.mrf.mxu3 }
0x12ae   : > { %v8286_v27 = vadd.f32 %v8285_v49, %v8172_v7  ;;  %v7953_v8 = vpop.xlane.xlu2 %7952 }
0x12af   : > { %10382 = vpow2.f32 %v7868_v5  ;;  %v8288_v51 = vpop.f32.mrf.mxu0 }
0x12b0   : > { %10384 = vpow2.f32 %v7870_v38  ;;  %9364 = vmatmul.msk.f32.gmra.mxu1 %vm1826_vm8, %v8286_v27 }
0x12b1   : > { %10386 = vrcp.f32 %v7953_v8 }
0x12b2   : > { %10388 = vrcp.f32 %v7956_v20 }
0x12b5   : > { %v16442_v3 = vpop.eup %10382  ;;  %v8175_v19 = vpop.f32.mrf.mxu3 }
0x12b6   : > { %v16444_v48 = vpop.eup %10384  ;;  %v8289_v33 = vadd.f32 %v8288_v51, %v8175_v19  ;;  %v7959_v43 = vpop.xlane.xlu1 %7958 }
0x12b7   : > { %v7689_v52 = vpop.xlane.xlu2 %7688  ;;  %v10387_v49 = vpop.eup %10386  ;;  %v7978_v8 = vadd.f32 %v16444_v48, %v16442_v3 }
0x12b8   : > { %v7766_v45 = vsub.f32 %v16295_v32, %v7689_v52  ;;  %v7767_v5 = vsub.f32 %v16293_v41, %v7689_v52  ;;  %v8070_v38 = vmul.f32 %v10387_v49, %v16323_v18  ;;  %v8071_v7 = vmul.f32 %v10387_v49, %v16325_v61  ;;  %9365 = vmatmul.msk.f32.gmra.mxu1 %vm1826_vm8, %v8289_v33  ;;  %v8291_v20 = vpop.f32.mrf.mxu0  ;;  %v16453_v51 = vpop.f32.mrf.mxu2 }
0x12b9   : > { %7979 = vadd.xlane.f32.xlu2 %v7978_v8  ;;  %v10389_v41 = vpop.eup %10388  ;;  %v16455_v32 = vpop.f32.mrf.mxu1 }
0x12ba   : > { %v7864_v27 = vmul.f32 1.442695, %v7766_v45  ;;  %v7866_v53 = vmul.f32 1.442695, %v7767_v5  ;;  %8192 = vmatmul.f32.gmra.mxu3 %v8070_v38  ;;  %8305 = vmatmul.f32.gmra.mxu0 %v8071_v7  ;;  %v7714_v61 = vmax.f32 %v16455_v32, %v16453_v51  ;;  %v8072_v45 = vmul.f32 %v10389_v41, %v16301_v44 }
0x12bb   : > { %v8073_v5 = vmul.f32 %v10389_v41, %v16303_v14 }
0x12bc   : > { %10390 = vpow2.f32 %v7864_v27 }
0x12bd   : > { %10392 = vpow2.f32 %v7866_v53  ;;  %v8178_v19 = vpop.f32.mrf.mxu3 }
0x12be   : > { %v8292_v52 = vadd.f32 %v8291_v20, %v8178_v19  ;;  %v7695_v18 = vpop.xlane.xlu1 %7694  ;;  %10394 = vrcp.f32 %v7959_v43 }
0x12bf   : > { %v7962_v12 = vpop.xlane.xlu2 %7961  ;;  %v7770_v33 = vsub.f32 %v16327_v16, %v7695_v18  ;;  %v7771_v49 = vsub.f32 %v16321_v26, %v7695_v18 }
0x12c0   : > { %9366 = vmatmul.msk.f32.gmra.mxu1 %vm1826_vm8, %v8292_v52  ;;  %v8294_v44 = vpop.f32.mrf.mxu0 }
0x12c1   : > { %v7872_v8 = vmul.f32 1.442695, %v7770_v33  ;;  %v7874_v38 = vmul.f32 1.442695, %v7771_v49  ;;  %7715 = vmax.xlane.f32.xlu2 %v7714_v61  ;;  %v16477_v33 = vpop.f32.mrf.mxu2 }
0x12c2   : > { %v16464_v53 = vpop.eup %10390  ;;  %8195 = vmatmul.f32.gmra.mxu3 %v8072_v45  ;;  %8308 = vmatmul.f32.gmra.mxu0 %v8073_v5 }
0x12c3   : > { %v16466_v7 = vpop.eup %10392  ;;  %10396 = vpow2.f32 %v7872_v8 }
0x12c4   : > { %v7975_v16 = vadd.f32 %v16466_v7, %v16464_v53  ;;  %10398 = vpow2.f32 %v7874_v38  ;;  %v10395_v26 = vpop.eup %10394 }
0x12c5   : > { %v8181_v14 = vpop.f32.mrf.mxu3  ;;  %10400 = vrcp.f32 %v7962_v12  ;;  %v8074_v52 = vmul.f32 %v10395_v26, %v16337_v23  ;;  %v8075_v18 = vmul.f32 %v10395_v26, %v16339_v0  ;;  %v7711_v12 = vmax.f32 %v16440_v59, %v16438_v36 }
0x12c6   : > { %7976 = vadd.xlane.f32.xlu1 %v7975_v16  ;;  %v8295_v43 = vadd.f32 %v8294_v44, %v8181_v14  ;;  %v7965_v27 = vpop.xlane.xlu0 %7964 }
0x12c7   : > { %v7698_v20 = vpop.xlane.xlu2 %7697 }
0x12c8   : > { %v7772_v41 = vsub.f32 %v16349_v9, %v7698_v20  ;;  %v7773_v19 = vsub.f32 %v16341_v24, %v7698_v20  ;;  %9367 = vmatmul.msk.f32.gmra.mxu1 %vm1826_vm8, %v8295_v43  ;;  %v16483_v24 = vpop.f32.mrf.mxu1 }
0x12c9   : > { %v16475_v61 = vpop.eup %10396  ;;  %v16493_v20 = vpop.f32.mrf.mxu2 }
0x12ca   : > { %v7876_v49 = vmul.f32 1.442695, %v7772_v41  ;;  %v7878_v45 = vmul.f32 1.442695, %v7773_v19  ;;  %v16479_v5 = vpop.eup %10398  ;;  %8198 = vmatmul.f32.gmra.mxu3 %v8074_v52  ;;  %8311 = vmatmul.f32.gmra.mxu0 %v8075_v18 }
0x12cb   : > { %v7981_v23 = vadd.f32 %v16479_v5, %v16475_v61  ;;  %v10401_v0 = vpop.eup %10400 }
0x12cc   : > { %10402 = vpow2.f32 %v7876_v49  ;;  %v8076_v44 = vmul.f32 %v10401_v0, %v16356_v55  ;;  %v8077_v14 = vmul.f32 %v10401_v0, %v16358_v6 }
0x12cd   : > { %10404 = vpow2.f32 %v7878_v45  ;;  %7982 = vadd.xlane.f32.xlu0 %v7981_v23 }
0x12ce   : > { %7712 = vmax.xlane.f32.xlu1 %v7711_v12  ;;  %10406 = vrcp.f32 %v7965_v27  ;;  %v7701_v9 = vpop.xlane.xlu0 %7700  ;;  %v8297_v27 = vpop.f32.mrf.mxu0 }
0x12cf   : > { %v7774_v8 = vsub.f32 %v16367_v63, %v7701_v9  ;;  %v7775_v38 = vsub.f32 %v16365_v56, %v7701_v9  ;;  %v7968_v16 = vpop.xlane.xlu1 %7967  ;;  %v7971_v26 = vpop.xlane.xlu2 %7970  ;;  %v7717_v63 = vmax.f32 %v16483_v24, %v16477_v33 }
0x12d0   : > { %v16499_v56 = vpop.f32.mrf.mxu1 }
0x12d1   : > { %v7880_v41 = vmul.f32 1.442695, %v7774_v8  ;;  %v7882_v19 = vmul.f32 1.442695, %v7775_v38 }
0x12d2   : > { %v16491_v43 = vpop.eup %10402  ;;  %8201 = vmatmul.f32.gmra.mxu3 %v8076_v44  ;;  %8314 = vmatmul.f32.gmra.mxu0 %v8077_v14 }
0x12d3   : > { %v16495_v52 = vpop.eup %10404  ;;  %10408 = vpow2.f32 %v7880_v41  ;;  %v16512_v41 = vpop.f32.mrf.mxu2 }
0x12d4   : > { %v7984_v55 = vadd.f32 %v16495_v52, %v16491_v43  ;;  %v10407_v6 = vpop.eup %10406  ;;  %10410 = vpow2.f32 %v7882_v19  ;;  %v8184_v18 = vpop.f32.mrf.mxu3 }
0x12d5   : > { %v8298_v49 = vadd.f32 %v8297_v27, %v8184_v18  ;;  %7718 = vmax.xlane.f32.xlu0 %v7717_v63  ;;  %10412 = vrcp.f32 %v7968_v16  ;;  %v8078_v23 = vmul.f32 %v10407_v6, %v16371_v28  ;;  %v8079_v0 = vmul.f32 %v10407_v6, %v16377_v37 }
0x12d6   : > { %7985 = vadd.xlane.f32.xlu1 %v7984_v55  ;;  %v7720_v28 = vmax.f32 %v16499_v56, %v16493_v20  ;;  %10414 = vrcp.f32 %v7971_v26 }
0x12d7   : > { %v7704_v45 = vpop.xlane.xlu1 %7703  ;;  %v7707_v12 = vpop.xlane.xlu2 %7706  ;;  %9368 = vmatmul.msk.f32.gmra.mxu1 %vm1826_vm8, %v8298_v49 }
0x12d8   : > { %v7776_v9 = vsub.f32 %v16389_v4, %v7704_v45  ;;  %v7777_v8 = vsub.f32 %v16385_v35, %v7704_v45  ;;  %v7778_v38 = vsub.f32 %v16405_v30, %v7707_v12  ;;  %v7779_v44 = vsub.f32 %v16403_v54, %v7707_v12  ;;  %v16518_v37 = vpop.f32.mrf.mxu1 }
0x12d9   : > { %v16510_v14 = vpop.eup %10408  ;;  %v7723_v45 = vmax.f32 %v16518_v37, %v16512_v41 }
0x12da   : > { %v16514_v16 = vpop.eup %10410  ;;  %v7884_v19 = vmul.f32 1.442695, %v7776_v9  ;;  %v7886_v63 = vmul.f32 1.442695, %v7777_v8  ;;  %v7888_v55 = vmul.f32 1.442695, %v7778_v38  ;;  %8204 = vmatmul.f32.gmra.mxu3 %v8078_v23  ;;  %8317 = vmatmul.f32.gmra.mxu0 %v8079_v0 }
0x12db   : > { %v7890_v35 = vmul.f32 1.442695, %v7779_v44  ;;  %v7987_v4 = vadd.f32 %v16514_v16, %v16510_v14  ;;  %v10413_v54 = vpop.eup %10412  ;;  %v16524_v18 = vpop.f32.mrf.mxu2 }
0x12dc   : > { %10416 = vpow2.f32 %v7884_v19  ;;  %v8080_v30 = vmul.f32 %v10413_v54, %v16391_v31  ;;  %v8081_v6 = vmul.f32 %v10413_v54, %v16393_v60  ;;  %v10415_v27 = vpop.eup %10414 }
0x12dd   : > { %10418 = vpow2.f32 %v7886_v63  ;;  %7988 = vadd.xlane.f32.xlu2 %v7987_v4  ;;  %v8082_v44 = vmul.f32 %v10415_v27, %v16383_v34  ;;  %v8083_v19 = vmul.f32 %v10415_v27, %v16387_v29 }
0x12de   : > { %7721 = vmax.xlane.f32.xlu1 %v7720_v28  ;;  %10420 = vpow2.f32 %v7888_v55 }
0x12df   : > { %10422 = vpow2.f32 %v7890_v35 }
0x12e0   : > { %v16532_v12 = vpop.f32.mrf.mxu1 }
0x12e1   : > { %v7726_v55 = vmax.f32 %v16532_v12, %v16524_v18 }
0x12e2   : > { %v16526_v49 = vpop.eup %10416  ;;  %8207 = vmatmul.f32.gmra.mxu3 %v8080_v30  ;;  %8320 = vmatmul.f32.gmra.mxu0 %v8081_v6  ;;  %v8300_v0 = vpop.f32.mrf.mxu0 }
0x12e3   : > { %v16528_v26 = vpop.eup %10418  ;;  %v16544_v63 = vpop.f32.mrf.mxu2 }
0x12e4   : > { %v16534_v23 = vpop.eup %10420  ;;  %v7990_v31 = vadd.f32 %v16528_v26, %v16526_v49 }
0x12e5   : > { %v16538_v60 = vpop.eup %10422  ;;  %7724 = vmax.xlane.f32.xlu2 %v7723_v45 }
0x12e6   : > { %7991 = vadd.xlane.f32.xlu0 %v7990_v31  ;;  %v7993_v9 = vadd.f32 %v16538_v60, %v16534_v23 }
0x12e7   : > { %v8187_v8 = vpop.f32.mrf.mxu3 }
0x12e8   : > { %7994 = vadd.xlane.f32.xlu1 %v7993_v9  ;;  %v8301_v38 = vadd.f32 %v8300_v0, %v8187_v8  ;;  %v16549_v35 = vpop.f32.mrf.mxu1 }
0x12e9   : > { %v7729_v4 = vmax.f32 %v16549_v35, %v16544_v63 }
0x12ea   : > { %8210 = vmatmul.f32.gmra.mxu3 %v8082_v44  ;;  %8323 = vmatmul.f32.gmra.mxu0 %v8083_v19  ;;  %v8303_v34 = vpop.f32.mrf.mxu0 }
0x12eb   : > { %9369 = vmatmul.msk.f32.gmra.mxu1 %vm1826_vm8, %v8301_v38 }
0x12ec   : > { %v7974_v28 = vpop.xlane.xlu0 %7973 }
0x12ed   : > { %10424 = vrcp.f32 %v7974_v28 }
0x12ee   : > { %7727 = vmax.xlane.f32.xlu0 %v7726_v55 }
0x12ef   : > { %v8190_v54 = vpop.f32.mrf.mxu3 }
0x12f0   : > { %7730 = vmax.xlane.f32.xlu1 %v7729_v4  ;;  %v8304_v29 = vadd.f32 %v8303_v34, %v8190_v54 }
0x12f3   : > { %v10425_v30 = vpop.eup %10424  ;;  %9370 = vmatmul.msk.f32.gmra.mxu1 %vm1826_vm8, %v8304_v29 }
0x12f4   : > { %v7710_v6 = vpop.xlane.xlu0 %7709  ;;  %v8084_v27 = vmul.f32 %v10425_v30, %v16421_v1  ;;  %v8085_v45 = vmul.f32 %v10425_v30, %v16423_v57 }
0x12f5   : > { %v7780_v31 = vsub.f32 %v16430_v13, %v7710_v6  ;;  %v7781_v0 = vsub.f32 %v16428_v22, %v7710_v6 }
0x12f6   : > { %8213 = vmatmul.f32.gmra.mxu3 %v8084_v27  ;;  %8326 = vmatmul.f32.gmra.mxu0 %v8085_v45 }
0x12f7   : > { %v7892_v9 = vmul.f32 1.442695, %v7780_v31  ;;  %v7894_v8 = vmul.f32 1.442695, %v7781_v0 }
0x12f9   : > { %10426 = vpow2.f32 %v7892_v9 }
0x12fa   : > { %10428 = vpow2.f32 %v7894_v8 }
0x12ff   : > { %v16558_v38 = vpop.eup %10426 }
0x1300   : > { %v16560_v44 = vpop.eup %10428 }
0x1301   : > { %v7996_v19 = vadd.f32 %v16560_v44, %v16558_v38 }
0x1303   : > { %7997 = vadd.xlane.f32.xlu2 %v7996_v19 }
0x132c   : > { %v7980_v1 = vpop.xlane.xlu2 %7979 }
0x1334   : > { %v7716_v57 = vpop.xlane.xlu2 %7715 }
0x1335   : > { %v7784_v13 = vsub.f32 %v16455_v32, %v7716_v57  ;;  %v7785_v22 = vsub.f32 %v16453_v51, %v7716_v57 }
0x1337   : > { %v7900_v55 = vmul.f32 1.442695, %v7784_v13  ;;  %v7902_v28 = vmul.f32 1.442695, %v7785_v22  ;;  %v8306_v4 = vpop.f32.mrf.mxu0 }
0x1339   : > { %v7977_v34 = vpop.xlane.xlu1 %7976  ;;  %10430 = vpow2.f32 %v7900_v55 }
0x133a   : > { %10432 = vpow2.f32 %v7902_v28 }
0x133b   : > { %10434 = vrcp.f32 %v7977_v34 }
0x133c   : > { %10436 = vrcp.f32 %v7980_v1 }
0x133d   : > { %v8193_v54 = vpop.f32.mrf.mxu3 }
0x133e   : > { %v8307_v29 = vadd.f32 %v8306_v4, %v8193_v54 }
0x133f   : > { %v16566_v30 = vpop.eup %10430  ;;  %v8309_v6 = vpop.f32.mrf.mxu0 }
0x1340   : > { %v16568_v27 = vpop.eup %10432  ;;  %9371 = vmatmul.msk.f32.gmra.mxu1 %vm1826_vm8, %v8307_v29  ;;  %v7983_v45 = vpop.xlane.xlu0 %7982 }
0x1341   : > { %v7713_v32 = vpop.xlane.xlu1 %7712  ;;  %v10435_v31 = vpop.eup %10434  ;;  %v8002_v9 = vadd.f32 %v16568_v27, %v16566_v30 }
0x1342   : > { %v7782_v51 = vsub.f32 %v16440_v59, %v7713_v32  ;;  %v7783_v0 = vsub.f32 %v16438_v36, %v7713_v32  ;;  %v8086_v8 = vmul.f32 %v10435_v31, %v16464_v53  ;;  %v8087_v19 = vmul.f32 %v10435_v31, %v16466_v7  ;;  %v10437_v55 = vpop.eup %10436 }
0x1343   : > { %8003 = vadd.xlane.f32.xlu2 %v8002_v9  ;;  %v8088_v4 = vmul.f32 %v10437_v55, %v16442_v3  ;;  %v8089_v34 = vmul.f32 %v10437_v55, %v16444_v48 }
0x1344   : > { %v7896_v57 = vmul.f32 1.442695, %v7782_v51  ;;  %v7898_v13 = vmul.f32 1.442695, %v7783_v0  ;;  %8216 = vmatmul.f32.gmra.mxu3 %v8086_v8  ;;  %8329 = vmatmul.f32.gmra.mxu0 %v8087_v19 }
0x1345   : > { %v8196_v22 = vpop.f32.mrf.mxu3 }
0x1346   : > { %10438 = vpow2.f32 %v7896_v57  ;;  %v8310_v1 = vadd.f32 %v8309_v6, %v8196_v22 }
0x1347   : > { %10440 = vpow2.f32 %v7898_v13  ;;  %v8312_v59 = vpop.f32.mrf.mxu0 }
0x1348   : > { %9372 = vmatmul.msk.f32.gmra.mxu1 %vm1826_vm8, %v8310_v1  ;;  %v7719_v36 = vpop.xlane.xlu0 %7718  ;;  %10442 = vrcp.f32 %v7983_v45 }
0x1349   : > { %v7986_v28 = vpop.xlane.xlu1 %7985  ;;  %v7786_v53 = vsub.f32 %v16483_v24, %v7719_v36  ;;  %v7787_v7 = vsub.f32 %v16477_v33, %v7719_v36 }
0x134b   : > { %v7904_v29 = vmul.f32 1.442695, %v7786_v53  ;;  %v7906_v32 = vmul.f32 1.442695, %v7787_v7 }
0x134c   : > { %v16582_v54 = vpop.eup %10438  ;;  %8219 = vmatmul.f32.gmra.mxu3 %v8088_v4  ;;  %8332 = vmatmul.f32.gmra.mxu0 %v8089_v34 }
0x134d   : > { %v16584_v6 = vpop.eup %10440  ;;  %10444 = vpow2.f32 %v7904_v29  ;;  %v8199_v31 = vpop.f32.mrf.mxu3 }
0x134e   : > { %v7999_v45 = vadd.f32 %v16584_v6, %v16582_v54  ;;  %10446 = vpow2.f32 %v7906_v32  ;;  %v8313_v24 = vadd.f32 %v8312_v59, %v8199_v31  ;;  %v10443_v33 = vpop.eup %10442 }
0x134f   : > { %v8315_v3 = vpop.f32.mrf.mxu0  ;;  %10448 = vrcp.f32 %v7986_v28  ;;  %v8090_v8 = vmul.f32 %v10443_v33, %v16475_v61  ;;  %v8091_v19 = vmul.f32 %v10443_v33, %v16479_v5 }
0x1350   : > { %8000 = vadd.xlane.f32.xlu0 %v7999_v45  ;;  %9373 = vmatmul.msk.f32.gmra.mxu1 %vm1826_vm8, %v8313_v24  ;;  %v7989_v51 = vpop.xlane.xlu2 %7988 }
0x1351   : > { %v7722_v48 = vpop.xlane.xlu1 %7721 }
0x1352   : > { %v7788_v0 = vsub.f32 %v16499_v56, %v7722_v48  ;;  %v7789_v9 = vsub.f32 %v16493_v20, %v7722_v48 }
0x1353   : > { %v16593_v57 = vpop.eup %10444 }
0x1354   : > { %v7908_v13 = vmul.f32 1.442695, %v7788_v0  ;;  %v7910_v22 = vmul.f32 1.442695, %v7789_v9  ;;  %v16595_v1 = vpop.eup %10446  ;;  %8222 = vmatmul.f32.gmra.mxu3 %v8090_v8  ;;  %8335 = vmatmul.f32.gmra.mxu0 %v8091_v19 }
0x1355   : > { %v8202_v55 = vpop.f32.mrf.mxu3  ;;  %v8005_v59 = vadd.f32 %v16595_v1, %v16593_v57  ;;  %v10449_v20 = vpop.eup %10448 }
0x1356   : > { %10450 = vpow2.f32 %v7908_v13  ;;  %v8316_v56 = vadd.f32 %v8315_v3, %v8202_v55  ;;  %v8092_v7 = vmul.f32 %v10449_v20, %v16491_v43  ;;  %v8093_v4 = vmul.f32 %v10449_v20, %v16495_v52 }
0x1357   : > { %10452 = vpow2.f32 %v7910_v22  ;;  %8006 = vadd.xlane.f32.xlu1 %v8005_v59  ;;  %v8318_v5 = vpop.f32.mrf.mxu0 }
0x1358   : > { %9374 = vmatmul.msk.f32.gmra.mxu1 %vm1826_vm8, %v8316_v56  ;;  %v7725_v61 = vpop.xlane.xlu2 %7724  ;;  %10454 = vrcp.f32 %v7989_v51 }
0x1359   : > { %v7992_v36 = vpop.xlane.xlu0 %7991  ;;  %v7790_v28 = vsub.f32 %v16518_v37, %v7725_v61  ;;  %v7791_v53 = vsub.f32 %v16512_v41, %v7725_v61 }
0x135b   : > { %v7995_v29 = vpop.xlane.xlu1 %7994  ;;  %v7912_v32 = vmul.f32 1.442695, %v7790_v28  ;;  %v7914_v31 = vmul.f32 1.442695, %v7791_v53 }
0x135c   : > { %v16604_v34 = vpop.eup %10450  ;;  %8225 = vmatmul.f32.gmra.mxu3 %v8092_v7  ;;  %8338 = vmatmul.f32.gmra.mxu0 %v8093_v4 }
0x135d   : > { %v16606_v45 = vpop.eup %10452  ;;  %10456 = vpow2.f32 %v7912_v32  ;;  %v8205_v24 = vpop.f32.mrf.mxu3 }
0x135e   : > { %v8008_v37 = vadd.f32 %v16606_v45, %v16604_v34  ;;  %10458 = vpow2.f32 %v7914_v31  ;;  %v8319_v41 = vadd.f32 %v8318_v5, %v8205_v24  ;;  %v10455_v33 = vpop.eup %10454  ;;  %v8490_v5 = vpop.f32.mrf.mxu1 }
0x135f   : > { %10460 = vrcp.f32 %v7992_v36  ;;  %v8094_v48 = vmul.f32 %v10455_v33, %v16510_v14  ;;  %v8095_v51 = vmul.f32 %v10455_v33, %v16514_v16  ;;  %v8321_v9 = vpop.f32.mrf.mxu0 }
0x1360   : > { %8009 = vadd.xlane.f32.xlu0 %v8008_v37  ;;  %9375 = vmatmul.msk.f32.gmra.mxu1 %vm1826_vm8, %v8319_v41  ;;  %10462 = vrcp.f32 %v7995_v29 }
0x1361   : > { %v7728_v43 = vpop.xlane.xlu0 %7727 }
0x1362   : > { %v7792_v52 = vsub.f32 %v16532_v12, %v7728_v43  ;;  %v7793_v3 = vsub.f32 %v16524_v18, %v7728_v43 }
0x1363   : > { %v16615_v0 = vpop.eup %10456  ;;  %v7731_v8 = vpop.xlane.xlu1 %7730 }
0x1364   : > { %v16617_v19 = vpop.eup %10458  ;;  %v7916_v13 = vmul.f32 1.442695, %v7792_v52  ;;  %v7918_v22 = vmul.f32 1.442695, %v7793_v3  ;;  %v7794_v55 = vsub.f32 %v16549_v35, %v7731_v8  ;;  %v7795_v59 = vsub.f32 %v16544_v63, %v7731_v8  ;;  %8228 = vmatmul.f32.gmra.mxu3 %v8094_v48  ;;  %8341 = vmatmul.f32.gmra.mxu0 %v8095_v51 }
0x1365   : > { %v8208_v18 = vpop.f32.mrf.mxu3  ;;  %v8011_v14 = vadd.f32 %v16617_v19, %v16615_v0  ;;  %v10461_v20 = vpop.eup %10460 }
0x1366   : > { %10464 = vpow2.f32 %v7916_v13  ;;  %v7920_v16 = vmul.f32 1.442695, %v7794_v55  ;;  %v7922_v12 = vmul.f32 1.442695, %v7795_v59  ;;  %v8322_v56 = vadd.f32 %v8321_v9, %v8208_v18  ;;  %v10463_v61 = vpop.eup %10462  ;;  %v8493_v37 = vpop.f32.mrf.mxu1  ;;  %v16650_v59 = vld [vmem:[%s16856_s11] ss:$0 sm:$0xff] }
0x1367   : > { %10466 = vpow2.f32 %v7918_v22  ;;  %8012 = vadd.xlane.f32.xlu2 %v8011_v14  ;;  %v8096_v63 = vmul.f32 %v10461_v20, %v16526_v49  ;;  %v8097_v35 = vmul.f32 %v10461_v20, %v16528_v26  ;;  %v8324_v53 = vpop.f32.mrf.mxu0  ;;  %v8098_v26 = vmul.f32 %v10463_v61, %v16534_v23  ;;  %v17646_v23 = vld [vmem:[#allocation91_spill] sm:$0xff]  ;;  %v17648_v18 = vld [vmem:[#allocation72_spill] sm:$0xff]  ;;  %v17649_v14 = vld [vmem:[#allocation46_spill] sm:$0xff] }
0x1368   : > { %10468 = vpow2.f32 %v7920_v16  ;;  %9376 = vmatmul.msk.f32.gmra.mxu1 %vm1826_vm8, %v8322_v56  ;;  %v8099_v24 = vmul.f32 %v10463_v61, %v16538_v60  ;;  %v17647_v60 = vld [vmem:[#allocation119_spill] sm:$0xff]  ;;  %v5848_v16 = vadd.f32 %v17649_v14, %v17648_v18  ;;  %v17650_v20 = vld [vmem:[#allocation48_spill] sm:$0xff] }
0x1369   : > { %10470 = vpow2.f32 %v7922_v12  ;;  %v5845_v8 = vadd.f32 %v17647_v60, %v17646_v23 }
0x136b   : > { %v7247_v22 = vadd.f32 %v15836_v25, %v5845_v8 }
0x136c   : > { %v16626_v36 = vpop.eup %10464  ;;  %8231 = vmatmul.f32.gmra.mxu3 %v8096_v63  ;;  %8344 = vmatmul.f32.gmra.mxu0 %v8097_v35  ;;  %v17651_v63 = vld [vmem:[#allocation115_spill] sm:$0xff] }
0x136d   : > { %v16628_v28 = vpop.eup %10466  ;;  %v8211_v7 = vpop.f32.mrf.mxu3  ;;  %v8586_v55 = vadd.f32 %v8490_v5, %v7247_v22  ;;  %v5851_v35 = vadd.f32 %v17651_v63, %v17650_v20  ;;  %v17659_v22 = vld [vmem:[#allocation121_spill] sm:$0xff] }
0x136e   : > { %v16630_v4 = vpop.eup %10468  ;;  %v8325_v29 = vadd.f32 %v8324_v53, %v8211_v7  ;;  %v8014_v32 = vadd.f32 %v16628_v28, %v16626_v36  ;;  %v8496_v48 = vpop.f32.mrf.mxu1  ;;  %v17652_v7 = vld [vmem:[#allocation114_spill] sm:$0xff] }
0x136f   : > { %v16634_v31 = vpop.eup %10470  ;;  %v7249_v61 = vadd.f32 %v15853_v46, %v5851_v35 }
0x1370   : > { %8015 = vadd.xlane.f32.xlu1 %v8014_v32  ;;  %v8017_v49 = vadd.f32 %v16634_v31, %v16630_v4  ;;  %9377 = vmatmul.msk.f32.gmra.mxu1 %vm1826_vm8, %v8325_v29  ;;  %v17653_v29 = vld [vmem:[#allocation106_spill] sm:$0xff] }
0x1371   : > { %v8588_v5 = vadd.f32 %v8496_v48, %v7249_v61  ;;  %v5854_v32 = vadd.f32 %v17653_v29, %v17652_v7  ;;  %v17656_v48 = vld [vmem:[#allocation41_spill] sm:$0xff]  ;;  %v17662_v61 = vld [vmem:[#allocation116_spill] sm:$0xff] }
0x1372   : > { %8018 = vadd.xlane.f32.xlu0 %v8017_v49 }
0x1373   : > { %v8327_v33 = vpop.f32.mrf.mxu0  ;;  %v8624_v49 = vadd.f32 %v16650_v59, %v8588_v5  ;;  %v17663_v5 = vld [vmem:[#allocation43_spill] sm:$0xff] }
0x1374   : > { %8234 = vmatmul.f32.gmra.mxu3 %v8098_v26  ;;  %8347 = vmatmul.f32.gmra.mxu0 %v8099_v24 }
0x1376   : > { %v7998_v41 = vpop.xlane.xlu2 %7997  ;;  %v8499_v13 = vpop.f32.mrf.mxu1 }
0x1377   : > { %10472 = vrcp.f32 %v7998_v41  ;;  %v17655_v41 = vld [vmem:[#allocation113_spill] sm:$0xff] }
0x1379   : > { %v8214_v43 = vpop.f32.mrf.mxu3 }
0x137a   : > { %v8328_v52 = vadd.f32 %v8327_v33, %v8214_v43 }
0x137c   : > { %9378 = vmatmul.msk.f32.gmra.mxu1 %vm1826_vm8, %v8328_v52 }
0x137d   : > { %v10473_v3 = vpop.eup %10472 }
0x137e   : > { %v8100_v51 = vmul.f32 %v10473_v3, %v16558_v38  ;;  %v8101_v9 = vmul.f32 %v10473_v3, %v16560_v44  ;;  %v8622_v38 = vadd.f32 %v16650_v59, %v8586_v55  ;;  %v7248_v44 = vadd.f32 %v15846_v40, %v5848_v16  ;;  %v8502_v12 = vpop.f32.mrf.mxu1 }
0x137f   : > { %v7250_v40 = vadd.f32 %v15916_v58, %v5854_v32 }
0x1380   : > { %8237 = vmatmul.f32.gmra.mxu3 %v8100_v51  ;;  %8350 = vmatmul.f32.gmra.mxu0 %v8101_v9  ;;  %v8587_v56 = vadd.f32 %v8493_v37, %v7248_v44  ;;  %v17654_v37 = vld [vmem:[#allocation35_spill] sm:$0xff]  ;;  %v17657_v51 = vld [vmem:[#allocation100_spill] sm:$0xff]  ;;  %v17661_v44 = vld [vmem:[#allocation101_spill] sm:$0xff] }
0x1381   : > { %v8589_v26 = vadd.f32 %v8499_v13, %v7250_v40  ;;  %v5857_v33 = vadd.f32 %v17655_v41, %v17654_v37  ;;  %v5860_v9 = vadd.f32 %v17657_v51, %v17656_v48  ;;  %v17658_v13 = vld [vmem:[#allocation102_spill] sm:$0xff] }
0x1382   : > { %v8623_v25 = vadd.f32 %v16650_v59, %v8587_v56  ;;  %v5863_v55 = vadd.f32 %v17659_v22, %v17658_v13  ;;  %v17667_v13 = vld [vmem:[#allocation118_spill] sm:$0xff] }
0x1383   : > { %v8625_v43 = vadd.f32 %v16650_v59, %v8589_v26  ;;  %v7251_v46 = vadd.f32 %v15926_v42, %v5857_v33  ;;  %v7252_v58 = vadd.f32 %v15937_v2, %v5860_v9  ;;  %v17664_v33 = vld [vmem:[#allocation117_spill] sm:$0xff] }
0x1384   : > { %v7253_v42 = vadd.f32 %v15948_v10, %v5863_v55 }
0x1385   : > { %v8590_v52 = vadd.f32 %v8502_v12, %v7251_v46 }
0x1386   : > { %v8505_v53 = vpop.f32.mrf.mxu1 }
0x1387   : > { %v8626_v23 = vadd.f32 %v16650_v59, %v8590_v52  ;;  %v8591_v60 = vadd.f32 %v8505_v53, %v7252_v58  ;;  %v5869_v53 = vadd.f32 %v17663_v5, %v17662_v61 }
0x1389   : > { %v8627_v18 = vadd.f32 %v16650_v59, %v8591_v60  ;;  %v7255_v32 = vadd.f32 %v16128_v11, %v5869_v53 }
0x138e   : > { %v8508_v24 = vpop.f32.mrf.mxu1 }
0x138f   : > { %v8592_v14 = vadd.f32 %v8508_v24, %v7253_v42 }
0x1390   : > { %8654 = vxpose.xlu2.b32.start [1/16] (narrow) %v8622_v38, 32  ;;  %v17660_v38 = vld [vmem:[#allocation98_spill] sm:$0xff] }
0x1391   : > { %v5866_v12 = vadd.f32 %v17661_v44, %v17660_v38  ;;  %v8628_v56 = vadd.f32 %v16650_v59, %v8592_v14 }
0x1393   : > { %v7254_v2 = vadd.f32 %v15957_v47, %v5866_v12 }
0x1396   : > { %v8511_v3 = vpop.f32.mrf.mxu1 }
0x1397   : > { %v8593_v63 = vadd.f32 %v8511_v3, %v7254_v2  ;;  %v17669_v2 = vld [vmem:[#allocation104_spill] sm:$0xff] }
0x1398   : > { %8655 = vxpose.xlu2.b32.cont [2/16] (narrow) %v8623_v25, 32 }
0x1399   : > { %v8629_v10 = vadd.f32 %v16650_v59, %v8593_v63 }
0x139e   : > { %v8514_v8 = vpop.f32.mrf.mxu1 }
0x139f   : > { %v8594_v26 = vadd.f32 %v8514_v8, %v7255_v32  ;;  %v17666_v8 = vld [vmem:[#allocation36_spill] sm:$0xff] }
0x13a0   : > { %8656 = vxpose.xlu2.b32.cont [3/16] (narrow) %v8624_v49, 32  ;;  %v5875_v22 = vadd.f32 %v17667_v13, %v17666_v8  ;;  %v17676_v8 = vld [vmem:[#allocation94_spill] sm:$0xff] }
0x13a1   : > { %v8630_v11 = vadd.f32 %v16650_v59, %v8594_v26  ;;  %v5893_v13 = vadd.f32 %v15452_v21, %v17676_v8 }
0x13a2   : > { %v7257_v14 = vadd.f32 %v16156_v17, %v5875_v22 }
0x13a8   : > { %8657 = vxpose.xlu2.b32.cont [4/16] (narrow) %v8625_v43, 32  ;;  %v17665_v43 = vld [vmem:[#allocation93_spill] sm:$0xff] }
0x13a9   : > { %v5872_v46 = vadd.f32 %v17665_v43, %v17664_v33  ;;  %v17672_v43 = vld [vmem:[#allocation111_spill] sm:$0xff] }
0x13ab   : > { %v7256_v51 = vadd.f32 %v16143_v62, %v5872_v46  ;;  %v17673_v46 = vld [vmem:[#allocation127_spill] sm:$0xff] }
0x13b0   : > { %8658 = vxpose.xlu2.b32.cont [5/16] (narrow) %v8626_v23, 32 }
0x13b6   : > { %v8004_v7 = vpop.xlane.xlu2 %8003 }
0x13b8   : > { %8659 = vxpose.xlu2.b32.cont [6/16] (narrow) %v8627_v18, 32 }
0x13bd   : > { %v8517_v16 = vpop.f32.mrf.mxu1 }
0x13c0   : > { %8660 = vxpose.xlu2.b32.cont [7/16] (narrow) %v8628_v56, 32  ;;  %v17668_v56 = vld [vmem:[#allocation74_spill] sm:$0xff] }
0x13c1   : > { %v8330_v20 = vpop.f32.mrf.mxu0 }
0x13c3   : > { %v8001_v35 = vpop.xlane.xlu0 %8000 }
0x13c4   : > { %10474 = vrcp.f32 %v8001_v35 }
0x13c5   : > { %v8520_v25 = vpop.f32.mrf.mxu1  ;;  %10476 = vrcp.f32 %v8004_v7  ;;  %v17670_v7 = vld [vmem:[#allocation120_spill] sm:$0xff] }
0x13c7   : > { %v8217_v29 = vpop.f32.mrf.mxu3 }
0x13c8   : > { %v8331_v49 = vadd.f32 %v8330_v20, %v8217_v29  ;;  %8661 = vxpose.xlu2.b32.cont [8/16] (narrow) %v8629_v10, 32  ;;  %v5878_v20 = vadd.f32 %v17669_v2, %v17668_v56  ;;  %v17671_v29 = vld [vmem:[#allocation124_spill] sm:$0xff]  ;;  %v17680_v56 = vld [vmem:[#allocation130_spill] sm:$0xff] }
0x13c9   : > { %v8333_v47 = vpop.f32.mrf.mxu0  ;;  %v5881_v32 = vadd.f32 %v17671_v29, %v17670_v7 }
0x13ca   : > { %v10475_v40 = vpop.eup %10474  ;;  %9379 = vmatmul.msk.f32.gmra.mxu1 %vm1826_vm8, %v8331_v49  ;;  %v8007_v52 = vpop.xlane.xlu1 %8006  ;;  %v7258_v5 = vadd.f32 %v16176_v15, %v5878_v20 }
0x13cb   : > { %v8102_v24 = vmul.f32 %v10475_v40, %v16582_v54  ;;  %v8103_v37 = vmul.f32 %v10475_v40, %v16584_v6  ;;  %v10477_v3 = vpop.eup %10476  ;;  %10478 = vrcp.f32 %v8007_v52  ;;  %v8595_v54 = vadd.f32 %v8517_v16, %v7256_v51 }
0x13cc   : > { %v8104_v6 = vmul.f32 %v10477_v3, %v16566_v30  ;;  %v8105_v58 = vmul.f32 %v10477_v3, %v16568_v27  ;;  %v8596_v30 = vadd.f32 %v8520_v25, %v7257_v14  ;;  %v17678_v14 = vld [vmem:[#allocation75_spill] sm:$0xff] }
0x13cd   : > { %8240 = vmatmul.f32.gmra.mxu3 %v8102_v24  ;;  %8353 = vmatmul.f32.gmra.mxu0 %v8103_v37  ;;  %v8523_v41 = vpop.f32.mrf.mxu1  ;;  %v8631_v55 = vadd.f32 %v16650_v59, %v8595_v54  ;;  %v7259_v24 = vadd.f32 %v16200_v50, %v5881_v32 }
0x13ce   : > { %v8632_v63 = vadd.f32 %v16650_v59, %v8596_v30  ;;  %v8597_v53 = vadd.f32 %v8523_v41, %v7258_v5 }
0x13cf   : > { %v8220_v48 = vpop.f32.mrf.mxu3 }
0x13d0   : > { %v8334_v9 = vadd.f32 %v8333_v47, %v8220_v48  ;;  %8662 = vxpose.xlu2.b32.cont [9/16] (narrow) %v8630_v11, 32  ;;  %v8633_v49 = vadd.f32 %v16650_v59, %v8597_v53  ;;  %v5884_v11 = vadd.f32 %v17673_v46, %v17672_v43  ;;  %v17683_v53 = vld [vmem:[#allocation132_spill] sm:$0xff]  ;;  %v17688_v46 = vld [vmem:[#allocation129_spill] sm:$0xff] }
0x13d1   : > { %v8336_v23 = vpop.f32.mrf.mxu0  ;;  %v10479_v18 = vpop.eup %10478 }
0x13d2   : > { %9380 = vmatmul.msk.f32.gmra.mxu1 %vm1826_vm8, %v8334_v9  ;;  %v8106_v27 = vmul.f32 %v10479_v18, %v16593_v57  ;;  %v8107_v44 = vmul.f32 %v10479_v18, %v16595_v1  ;;  %v7260_v51 = vadd.f32 %v16218_v39, %v5884_v11  ;;  %v17677_v18 = vld [vmem:[#allocation125_spill] sm:$0xff]  ;;  %v17689_v11 = vld [vmem:[#allocation135_spill] sm:$0xff] }
0x13d3   : > { %v8010_v62 = vpop.xlane.xlu0 %8009 }
0x13d4   : > { %10480 = vrcp.f32 %v8010_v62 }
0x13d5   : > { %8243 = vmatmul.f32.gmra.mxu3 %v8104_v6  ;;  %8356 = vmatmul.f32.gmra.mxu0 %v8105_v58  ;;  %v8526_v60 = vpop.f32.mrf.mxu1  ;;  %v17674_v6 = vld [vmem:[#allocation122_spill] sm:$0xff]  ;;  %v17675_v58 = vld [vmem:[#allocation128_spill] sm:$0xff] }
0x13d7   : > { %v8223_v42 = vpop.f32.mrf.mxu3 }
0x13d8   : > { %v8337_v16 = vadd.f32 %v8336_v23, %v8223_v42  ;;  %8663 = vxpose.xlu2.b32.cont [10/16] (narrow) %v8631_v55, 32 }
0x13d9   : > { %v8339_v38 = vpop.f32.mrf.mxu0 }
0x13da   : > { %9381 = vmatmul.msk.f32.gmra.mxu1 %vm1826_vm8, %v8337_v16  ;;  %v8013_v17 = vpop.xlane.xlu2 %8012  ;;  %v10481_v35 = vpop.eup %10480  ;;  %v7263_v16 = vadd.f32 %v17678_v14, %v5893_v13  ;;  %v17695_v14 = vld [vmem:[#allocation139_spill] sm:$0xff] }
0x13db   : > { %10482 = vrcp.f32 %v8013_v17  ;;  %v8108_v57 = vmul.f32 %v10481_v35, %v16604_v34  ;;  %v8109_v1 = vmul.f32 %v10481_v35, %v16606_v45  ;;  %v8598_v34 = vadd.f32 %v8526_v60, %v7259_v24 }
0x13dc   : > { %v5887_v60 = vadd.f32 %v17675_v58, %v17674_v6  ;;  %v17692_v6 = vld [vmem:[#allocation137_spill] sm:$0xff] }
0x13dd   : > { %8246 = vmatmul.f32.gmra.mxu3 %v8106_v27  ;;  %8359 = vmatmul.f32.gmra.mxu0 %v8107_v44  ;;  %v8529_v12 = vpop.f32.mrf.mxu1  ;;  %v8634_v52 = vadd.f32 %v16650_v59, %v8598_v34 }
0x13de   : > { %v7261_v42 = vadd.f32 %v17677_v18, %v5887_v60  ;;  %v17693_v60 = vld [vmem:[#allocation77_spill] sm:$0xff] }
0x13df   : > { %v8226_v61 = vpop.f32.mrf.mxu3 }
0x13e0   : > { %v8340_v25 = vadd.f32 %v8339_v38, %v8226_v61  ;;  %8664 = vxpose.xlu2.b32.cont [11/16] (narrow) %v8632_v63, 32  ;;  %v17681_v63 = vld [vmem:[#allocation126_spill] sm:$0xff] }
0x13e1   : > { %v8342_v10 = vpop.f32.mrf.mxu0  ;;  %v10483_v15 = vpop.eup %10482 }
0x13e2   : > { %9382 = vmatmul.msk.f32.gmra.mxu1 %vm1826_vm8, %v8340_v25  ;;  %v8110_v45 = vmul.f32 %v10483_v15, %v16615_v0  ;;  %v8111_v41 = vmul.f32 %v10483_v15, %v16617_v19  ;;  %v8599_v0 = vadd.f32 %v8529_v12, %v7260_v51  ;;  %v17679_v12 = vld [vmem:[#allocation123_spill] sm:$0xff]  ;;  %v17686_v15 = vld [vmem:[#allocation133_spill] sm:$0xff] }
0x13e3   : > { %v8016_v40 = vpop.xlane.xlu1 %8015  ;;  %v5890_v2 = vadd.f32 %v17680_v56, %v17679_v12  ;;  %v17697_v56 = vld [vmem:[#allocation136_spill] sm:$0xff] }
0x13e4   : > { %10484 = vrcp.f32 %v8016_v40  ;;  %v8635_v39 = vadd.f32 %v16650_v59, %v8599_v0  ;;  %v17685_v40 = vld [vmem:[#allocation37_spill] sm:$0xff] }
0x13e5   : > { %8249 = vmatmul.f32.gmra.mxu3 %v8108_v57  ;;  %8362 = vmatmul.f32.gmra.mxu0 %v8109_v1  ;;  %v8532_v47 = vpop.f32.mrf.mxu1  ;;  %v8019_v3 = vpop.xlane.xlu0 %8018  ;;  %v7262_v17 = vadd.f32 %v17681_v63, %v5890_v2  ;;  %v17684_v1 = vld [vmem:[#allocation68_spill] sm:$0xff]  ;;  %v17698_v2 = vld [vmem:[#allocation141_spill] sm:$0xff]  ;;  %v17699_v63 = vld [vmem:[#allocation71_spill] sm:$0xff] }
0x13e6   : > { %10486 = vrcp.f32 %v8019_v3  ;;  %v8600_v38 = vadd.f32 %v8532_v47, %v7261_v42  ;;  %v5899_v47 = vadd.f32 %v17686_v15, %v17685_v40  ;;  %v17690_v3 = vld [vmem:[#allocation69_spill] sm:$0xff]  ;;  %v17694_v42 = vld [vmem:[#allocation134_spill] sm:$0xff] }
0x13e7   : > { %v8229_v26 = vpop.f32.mrf.mxu3 }
0x13e8   : > { %v8343_v37 = vadd.f32 %v8342_v10, %v8229_v26  ;;  %8665 = vxpose.xlu2.b32.cont [12/16] (narrow) %v8633_v49, 32  ;;  %v8636_v20 = vadd.f32 %v16650_v59, %v8600_v38  ;;  %v17687_v26 = vld [vmem:[#allocation42_spill] sm:$0xff] }
0x13e9   : > { %v8345_v33 = vpop.f32.mrf.mxu0  ;;  %v7265_v24 = vadd.f32 %v17687_v26, %v5899_v47 }
0x13ea   : > { %9383 = vmatmul.msk.f32.gmra.mxu1 %vm1826_vm8, %v8343_v37  ;;  %v10485_v50 = vpop.eup %10484 }
0x13eb   : > { %v8112_v19 = vmul.f32 %v10485_v50, %v16626_v36  ;;  %v8113_v54 = vmul.f32 %v10485_v50, %v16628_v28 }
0x13ec   : > { %v10487_v22 = vpop.eup %10486 }
0x13ed   : > { %8252 = vmatmul.f32.gmra.mxu3 %v8110_v45  ;;  %8365 = vmatmul.f32.gmra.mxu0 %v8111_v41  ;;  %v8535_v23 = vpop.f32.mrf.mxu1  ;;  %v8114_v27 = vmul.f32 %v10487_v22, %v16630_v4  ;;  %v8115_v21 = vmul.f32 %v10487_v22, %v16634_v31  ;;  %v17682_v31 = vld [vmem:[#allocation97_spill] sm:$0xff] }
0x13ee   : > { %v8601_v35 = vadd.f32 %v8535_v23, %v7262_v17  ;;  %v5896_v57 = vadd.f32 %v17683_v53, %v17682_v31  ;;  %v17700_v31 = vld [vmem:[#allocation138_spill] sm:$0xff]  ;;  %v17701_v53 = vld [vmem:[#allocation143_spill] sm:$0xff] }
0x13ef   : > { %v8232_v48 = vpop.f32.mrf.mxu3 }
0x13f0   : > { %v8346_v9 = vadd.f32 %v8345_v33, %v8232_v48  ;;  %8666 = vxpose.xlu2.b32.cont [13/16] (narrow) %v8634_v52, 32  ;;  %v8637_v4 = vadd.f32 %v16650_v59, %v8601_v35  ;;  %v7264_v10 = vadd.f32 %v17684_v1, %v5896_v57  ;;  %v5902_v52 = vadd.f32 %v17689_v11, %v17688_v46 }
0x13f1   : > { %v8348_v55 = vpop.f32.mrf.mxu0  ;;  %v5914_v57 = vadd.f32 %v17701_v53, %v17700_v31  ;;  %v17722_v31 = vld [vmem:[#allocation156_spill] sm:$0xff] }
0x13f2   : > { %9384 = vmatmul.msk.f32.gmra.mxu1 %vm1826_vm8, %v8346_v9  ;;  %v7266_v50 = vadd.f32 %v17690_v3, %v5902_v52  ;;  %v17706_v52 = vld [vmem:[#allocation142_spill] sm:$0xff]  ;;  %v17707_v3 = vld [vmem:[#allocation147_spill] sm:$0xff] }
0x13f5   : > { %8255 = vmatmul.f32.gmra.mxu3 %v8112_v19  ;;  %8368 = vmatmul.f32.gmra.mxu0 %v8113_v54  ;;  %v17691_v54 = vld [vmem:[#allocation131_spill] sm:$0xff] }
0x13f6   : > { %v5905_v58 = vadd.f32 %v17692_v6, %v17691_v54  ;;  %v17710_v54 = vld [vmem:[#allocation149_spill] sm:$0xff] }
0x13f7   : > { %v8235_v62 = vpop.f32.mrf.mxu3 }
0x13f8   : > { %v8349_v36 = vadd.f32 %v8348_v55, %v8235_v62  ;;  %8667 = vxpose.xlu2.b32.cont [14/16] (narrow) %v8635_v39, 32  ;;  %v7267_v8 = vadd.f32 %v17693_v60, %v5905_v58  ;;  %v17711_v58 = vld [vmem:[#allocation52_spill] sm:$0xff] }
0x13f9   : > { %v8538_v28 = vpop.f32.mrf.mxu1 }
0x13fa   : > { %9385 = vmatmul.msk.f32.gmra.mxu1 %vm1826_vm8, %v8349_v36  ;;  %v8602_v30 = vadd.f32 %v8538_v28, %v7263_v16  ;;  %v5908_v16 = vadd.f32 %v17695_v14, %v17694_v42  ;;  %v17696_v36 = vld [vmem:[#allocation76_spill] sm:$0xff] }
0x13fc   : > { %v8638_v44 = vadd.f32 %v16650_v59, %v8602_v30  ;;  %v7268_v28 = vadd.f32 %v17696_v36, %v5908_v16 }
0x13fd   : > { %8258 = vmatmul.f32.gmra.mxu3 %v8114_v27  ;;  %8371 = vmatmul.f32.gmra.mxu0 %v8115_v21  ;;  %v8351_v61 = vpop.f32.mrf.mxu0 }
0x13fe   : > { %8686 = vxpose.xlu1.b32.start [1/16] (narrow) %v8638_v44, 32 }
0x1400   : > { %8668 = vxpose.xlu2.b32.cont [15/16] (narrow) %v8636_v20, 32  ;;  %v5911_v20 = vadd.f32 %v17698_v2, %v17697_v56  ;;  %v17718_v2 = vld [vmem:[#allocation150_spill] sm:$0xff] }
0x1402   : > { %v7269_v17 = vadd.f32 %v17699_v63, %v5911_v20  ;;  %v17719_v20 = vld [vmem:[#allocation155_spill] sm:$0xff] }
0x1403   : > { %v8238_v5 = vpop.f32.mrf.mxu3  ;;  %v5932_v63 = vadd.f32 %v17719_v20, %v17718_v2 }
0x1404   : > { %v8352_v25 = vadd.f32 %v8351_v61, %v8238_v5 }
0x1406   : > { %9386 = vmatmul.msk.f32.gmra.mxu1 %vm1826_vm8, %v8352_v25 }
0x1408   : > { %8669 = vxpose.xlu2.b32.end [16/16] (narrow) %v8637_v4, 32 }
0x1447   : > { %v8541_v7 = vpop.f32.mrf.mxu1 }
0x1448   : > { %v8603_v29 = vadd.f32 %v8541_v7, %v7264_v10  ;;  %v17702_v10 = vld [vmem:[#allocation81_spill] sm:$0xff] }
0x1449   : > { %v7270_v7 = vadd.f32 %v17702_v10, %v5914_v57  ;;  %v17723_v57 = vld [vmem:[#allocation50_spill] sm:$0xff] }
0x144a   : > { %v8354_v32 = vpop.f32.mrf.mxu0  ;;  %v8639_v49 = vadd.f32 %v16650_v59, %v8603_v29 }
0x144c   : > { %8687 = vxpose.xlu1.b32.cont [2/16] (narrow) %v8639_v49, 32 }
0x144f   : > { %v8544_v37 = vpop.f32.mrf.mxu1 }
0x1450   : > { %v8241_v34 = vpop.f32.mrf.mxu3  ;;  %v8604_v45 = vadd.f32 %v8544_v37, %v7265_v24  ;;  %v17703_v24 = vld [vmem:[#allocation140_spill] sm:$0xff]  ;;  %v17704_v37 = vld [vmem:[#allocation145_spill] sm:$0xff] }
0x1451   : > { %v8355_v41 = vadd.f32 %v8354_v32, %v8241_v34  ;;  %v5917_v34 = vadd.f32 %v17704_v37, %v17703_v24 }
0x1452   : > { %v8357_v33 = vpop.f32.mrf.mxu0  ;;  %v8640_v43 = vadd.f32 %v16650_v59, %v8604_v45 }
0x1453   : > { %9387 = vmatmul.msk.f32.gmra.mxu1 %vm1826_vm8, %v8355_v41  ;;  %v17705_v41 = vld [vmem:[#allocation70_spill] sm:$0xff] }
0x1454   : > { %8688 = vxpose.xlu1.b32.cont [3/16] (narrow) %v8640_v43, 32 }
0x1457   : > { %v8547_v48 = vpop.f32.mrf.mxu1 }
0x1458   : > { %v8244_v51 = vpop.f32.mrf.mxu3  ;;  %v8605_v9 = vadd.f32 %v8547_v48, %v7266_v50  ;;  %v5920_v50 = vadd.f32 %v17707_v3, %v17706_v52  ;;  %v17708_v48 = vld [vmem:[#allocation31_spill] sm:$0xff] }
0x1459   : > { %v8358_v23 = vadd.f32 %v8357_v33, %v8244_v51  ;;  %v7271_v33 = vadd.f32 %v17705_v41, %v5917_v34  ;;  %v8670_v34 = vpop.trf.xlu2 }
0x145a   : > { %v8360_v0 = vpop.f32.mrf.mxu0  ;;  %v8641_v19 = vadd.f32 %v16650_v59, %v8605_v9  ;;  %v7272_v51 = vadd.f32 %v17708_v48, %v5920_v50  ;;  %8718 = vst [vmem:[%s559_s12] sm:$0xff] %v8670_v34 }
0x145b   : > { %9388 = vmatmul.msk.f32.gmra.mxu1 %vm1826_vm8, %v8358_v23 }
0x145c   : > { %8689 = vxpose.xlu1.b32.cont [4/16] (narrow) %v8641_v19, 32  ;;  %v17709_v19 = vld [vmem:[#allocation144_spill] sm:$0xff] }
0x145d   : > { %v5923_v6 = vadd.f32 %v17710_v54, %v17709_v19 }
0x145f   : > { %v8550_v13 = vpop.f32.mrf.mxu1  ;;  %v7273_v60 = vadd.f32 %v17711_v58, %v5923_v6 }
0x1460   : > { %v8247_v39 = vpop.f32.mrf.mxu3  ;;  %v8606_v22 = vadd.f32 %v8550_v13, %v7267_v8 }
0x1461   : > { %v8361_v55 = vadd.f32 %v8360_v0, %v8247_v39 }
0x1462   : > { %v8363_v62 = vpop.f32.mrf.mxu0  ;;  %v8642_v18 = vadd.f32 %v16650_v59, %v8606_v22  ;;  %v17712_v22 = vld [vmem:[#allocation146_spill] sm:$0xff] }
0x1463   : > { %9389 = vmatmul.msk.f32.gmra.mxu1 %vm1826_vm8, %v8361_v55  ;;  %v17713_v55 = vld [vmem:[#allocation151_spill] sm:$0xff] }
0x1464   : > { %8690 = vxpose.xlu1.b32.cont [5/16] (narrow) %v8642_v18, 32  ;;  %v17714_v18 = vld [vmem:[#allocation80_spill] sm:$0xff] }
0x1467   : > { %v8553_v38 = vpop.f32.mrf.mxu1 }
0x1468   : > { %v8250_v30 = vpop.f32.mrf.mxu3  ;;  %v8607_v27 = vadd.f32 %v8553_v38, %v7268_v28  ;;  %v17715_v28 = vld [vmem:[#allocation148_spill] sm:$0xff]  ;;  %v17716_v38 = vld [vmem:[#allocation153_spill] sm:$0xff] }
0x1469   : > { %v8364_v21 = vadd.f32 %v8363_v62, %v8250_v30  ;;  %v5926_v62 = vadd.f32 %v17713_v55, %v17712_v22  ;;  %v5929_v30 = vadd.f32 %v17716_v38, %v17715_v28 }
0x146a   : > { %v8643_v44 = vadd.f32 %v16650_v59, %v8607_v27  ;;  %v8366_v12 = vpop.f32.mrf.mxu0  ;;  %v17717_v27 = vld [vmem:[#allocation83_spill] sm:$0xff] }
0x146b   : > { %9390 = vmatmul.msk.f32.gmra.mxu1 %vm1826_vm8, %v8364_v21  ;;  %v7274_v42 = vadd.f32 %v17714_v18, %v5926_v62  ;;  %v7275_v21 = vadd.f32 %v17717_v27, %v5929_v30 }
0x146c   : > { %8691 = vxpose.xlu1.b32.cont [6/16] (narrow) %v8643_v44, 32 }
0x146f   : > { %v8556_v35 = vpop.f32.mrf.mxu1 }
0x1470   : > { %v8253_v61 = vpop.f32.mrf.mxu3  ;;  %v8608_v5 = vadd.f32 %v8556_v35, %v7269_v17  ;;  %v17720_v17 = vld [vmem:[#allocation34_spill] sm:$0xff] }
0x1471   : > { %v8367_v25 = vadd.f32 %v8366_v12, %v8253_v61  ;;  %v7276_v35 = vadd.f32 %v17720_v17, %v5932_v63 }
0x1472   : > { %v8644_v4 = vadd.f32 %v16650_v59, %v8608_v5  ;;  %v8369_v1 = vpop.f32.mrf.mxu0 }
0x1473   : > { %9391 = vmatmul.msk.f32.gmra.mxu1 %vm1826_vm8, %v8367_v25 }
0x1474   : > { %8692 = vxpose.xlu1.b32.cont [7/16] (narrow) %v8644_v4, 32  ;;  %v17721_v4 = vld [vmem:[#allocation152_spill] sm:$0xff] }
0x1475   : > { %v5935_v53 = vadd.f32 %v17722_v31, %v17721_v4 }
0x1477   : > { %v8559_v29 = vpop.f32.mrf.mxu1 }
0x1478   : > { %v8256_v32 = vpop.f32.mrf.mxu3  ;;  %v8609_v49 = vadd.f32 %v8559_v29, %v7270_v7 }
0x1479   : > { %v8370_v40 = vadd.f32 %v8369_v1, %v8256_v32  ;;  %v7277_v1 = vadd.f32 %v17723_v57, %v5935_v53  ;;  %v17724_v32 = vld [vmem:[#allocation154_spill] sm:$0xff] }
0x147a   : > { %v8645_v15 = vadd.f32 %v16650_v59, %v8609_v49  ;;  %v8372_v47 = vpop.f32.mrf.mxu0  ;;  %v17725_v49 = vld [vmem:[#allocation157_spill] sm:$0xff] }
0x147b   : > { %9392 = vmatmul.msk.f32.gmra.mxu1 %vm1826_vm8, %v8370_v40  ;;  %v5938_v40 = vadd.f32 %v17725_v49, %v17724_v32 }
0x147c   : > { %8693 = vxpose.xlu1.b32.cont [8/16] (narrow) %v8645_v15, 32  ;;  %v17726_v15 = vld [vmem:[#allocation67_spill] sm:$0xff] }
0x1480   : > { %v8259_v26 = vpop.f32.mrf.mxu3 }
0x1481   : > { %v8373_v45 = vadd.f32 %v8372_v47, %v8259_v26  ;;  %v7278_v47 = vadd.f32 %v17726_v15, %v5938_v40 }
0x1483   : > { %9393 = vmatmul.msk.f32.gmra.mxu1 %vm1826_vm8, %v8373_v45  ;;  %v8562_v43 = vpop.f32.mrf.mxu1  ;;  %v8671_v45 = vpop.trf.xlu2 }
0x1484   : > { %v8610_v46 = vadd.f32 %v8562_v43, %v7271_v33  ;;  %8720 = vst [vmem:[%s559_s12 + $0x10] sm:$0xff] %v8671_v45 }
0x1486   : > { %v8646_v11 = vadd.f32 %v16650_v59, %v8610_v46 }
0x1488   : > { %8694 = vxpose.xlu1.b32.cont [9/16] (narrow) %v8646_v11, 32 }
0x148b   : > { %v8672_v41 = vpop.trf.xlu2 }
0x148c   : > { %8722 = vst [vmem:[%s559_s12 + $0x20] sm:$0xff] %v8672_v41 }
0x1493   : > { %v8673_v33 = vpop.trf.xlu2 }
0x1494   : > { %8724 = vst [vmem:[%s559_s12 + $0x30] sm:$0xff] %v8673_v33 }
0x14d0   : > { %v8565_v9 = vpop.f32.mrf.mxu1 }
0x14d1   : > { %v8611_v23 = vadd.f32 %v8565_v9, %v7272_v51 }
0x14d3   : > { %v8647_v0 = vadd.f32 %v16650_v59, %v8611_v23 }
0x14d5   : > { %8695 = vxpose.xlu1.b32.cont [10/16] (narrow) %v8647_v0, 32 }
0x14d8   : > { %v8568_v8 = vpop.f32.mrf.mxu1 }
0x14d9   : > { %v8612_v13 = vadd.f32 %v8568_v8, %v7273_v60 }
0x14db   : > { %v8648_v39 = vadd.f32 %v16650_v59, %v8612_v13 }
0x14dd   : > { %8696 = vxpose.xlu1.b32.cont [11/16] (narrow) %v8648_v39, 32 }
0x14e0   : > { %v8571_v14 = vpop.f32.mrf.mxu1 }
0x14e1   : > { %v8613_v16 = vadd.f32 %v8571_v14, %v7274_v42 }
0x14e3   : > { %v8649_v36 = vadd.f32 %v16650_v59, %v8613_v16 }
0x14e5   : > { %8697 = vxpose.xlu1.b32.cont [12/16] (narrow) %v8649_v36, 32 }
0x14e8   : > { %v8574_v44 = vpop.f32.mrf.mxu1 }
0x14e9   : > { %v8614_v12 = vadd.f32 %v8574_v44, %v7275_v21 }
0x14eb   : > { %v8650_v56 = vadd.f32 %v16650_v59, %v8614_v12 }
0x14ed   : > { %8698 = vxpose.xlu1.b32.cont [13/16] (narrow) %v8650_v56, 32 }
0x14f0   : > { %v8577_v61 = vpop.f32.mrf.mxu1 }
0x14f1   : > { %v8615_v5 = vadd.f32 %v8577_v61, %v7276_v35 }
0x14f3   : > { %v8651_v25 = vadd.f32 %v16650_v59, %v8615_v5 }
0x14f5   : > { %8699 = vxpose.xlu1.b32.cont [14/16] (narrow) %v8651_v25, 32 }
0x14f8   : > { %v8580_v10 = vpop.f32.mrf.mxu1 }
0x14f9   : > { %v8616_v7 = vadd.f32 %v8580_v10, %v7277_v1 }
0x14fb   : > { %v8652_v29 = vadd.f32 %v16650_v59, %v8616_v7 }
0x14fd   : > { %8700 = vxpose.xlu1.b32.cont [15/16] (narrow) %v8652_v29, 32 }
0x1500   : > { %v8583_v26 = vpop.f32.mrf.mxu1 }
0x1501   : > { %v8617_v24 = vadd.f32 %v8583_v26, %v7278_v47 }
0x1503   : > { %v8653_v37 = vadd.f32 %v16650_v59, %v8617_v24 }
0x1505   : > { %8701 = vxpose.xlu1.b32.end [16/16] (narrow) %v8653_v37, 32 }
0x1531   : > { %v8702_v43 = vpop.trf.xlu1 }
0x1532   : > { %8719 = vst [vmem:[%s559_s12 + $0x8] sm:$0xff] %v8702_v43 }
0x1539   : > { %v8703_v46 = vpop.trf.xlu1 }
0x153a   : > { %8721 = vst [vmem:[%s559_s12 + $0x18] sm:$0xff] %v8703_v46 }
0x1541   : > { %v8704_v11 = vpop.trf.xlu1 }
0x1542   : > { %8723 = vst [vmem:[%s559_s12 + $0x28] sm:$0xff] %v8704_v11 }
0x1549   : > { %v8705_v59 = vpop.trf.xlu1 }
0x154a   : > { %8725 = vst [vmem:[%s559_s12 + $0x38] sm:$0xff] %v8705_v59 }
0x154b   : > { %10706 = shalt.err (!%p10703_p0)
}
0x154c   : > { %s10791_s17 = smov 256   ;;  %s10792_s19 = smov 16  }
0x154d   : > { %9431 = dma.vmem_to_hbm [thread:$0]  (%p10955_p7), %s8742_s18, 1024, %s8744_s21, %s8727_s8, %s10791_s17, %s10791_s17, %s10792_s19  }
0x154e PF: > { %s17729_s14 = sld [smem:[#allocation22_spill]]  ;;  %p9454_p3 = pnand %p8899_p11, %p10903_p6 }
0x1550   : > { %p9455_p5 = pneg %p9454_p3 }
0x1554   : > { %s8758_s12 = sand.u32 1, %s17729_s14  }
0x1555   : > { %s8759_s4 = scalar_lea.sflag [#allocation6], %s8758_s12 }
0x1556   : > { %10752 = dma.done.wait (%p9455_p5), %s8759_s4, 1024  }
0x1557   : > { %10754 = vsyncadd (%p9455_p5), %s8759_s4, 4294966272  ;;  %s33_s26 = sadd.s32 1, %s10777_s26   ;;  %s17731_s13 = sld [smem:[#allocation23_spill]] }
0x1558   : > { %p30_p9 = scmp.ge.s32.totalorder %s33_s26, 4   ;;  %s17732_s23 = sld [smem:[#allocation28_spill]] }
0x1559   : > { %s17733_s24 = sld [smem:[#allocation25_spill]]  ;;  %s17735_s21 = smov %s10761_s22 }
0x155a   : > { %s17734_s25 = sld [smem:[#allocation27_spill]]  ;;  %32 = sbr.rel (!%p30_p9) target bundleno = 16 (0x10), region = 161 }
0x155d   : > { %s17736_s22 = smov %s17731_s13 }
0x155f   :  { %8765 = vsyncpa [#allocation5], 1 }
0x1560   :  { %8767 = vsyncpa [#allocation5 + $0x1], 1 }
0x1561   :  { %8768 = vsyncpa [#allocation8], 1 }
0x1562   :  { %8770 = vsyncpa [#allocation8 + $0x1], 1 }
0x1563   :  { %8771 = vsyncpa [#allocation11], 1 }
0x1564   :  { %8772 = vsyncpa [#allocation14], 1 }
0x1565   :  { %8773 = vsyncpa [#allocation6], 1 }
0x1566   :  { %8775 = vsyncpa [#allocation6 + $0x1], 1 }

</bundles_post_ra>
